<compile_context>
chip_gen: v7x
topology: tpu7x:2x2x1
jax: 0.10.0
libtpu: 0.0.40
codegen_flags: <defaults>
</compile_context>

<pallas_src>
import functools

import numpy as np
import jax
import jax.numpy as jnp
from jax.experimental import pallas as pl
from jax.experimental.pallas import tpu as pltpu

_SELU_ALPHA = 1.6732632423543772
_SELU_SCALE = 1.0507009873554805
_NEG_INF = -1e30


def _ru(x, m):
    return (x + m - 1) // m * m


def _selu(x):
    return _SELU_SCALE * jnp.where(
        x > 0, x, _SELU_ALPHA * (jnp.exp(jnp.minimum(x, 0.0)) - 1.0))


# --------------------------- fused per-batch kernel ---------------------------

def _fused_kernel(x1_ref, x2_ref, m_ref,
                  w1_ref, b1_ref, w2_ref, b2_ref,
                  wp_ref, bp_ref, wpM_ref, bpM_ref,
                  wa_ref, wb_ref, wm_ref,
                  t1_ref, t2_ref, nmask_ref, kmask_ref,
                  wn_ref, bnode_ref, wmst_ref, bmst_ref,
                  y_ref, mo_ref, *, use_mean_master, inv_nodes):
    f32 = jnp.float32
    bf16 = jnp.bfloat16

    # ---- prologue: per-type node projections; x lives in VMEM only ----------
    x1 = jnp.dot(x1_ref[0].astype(bf16), w1_ref[...],
                 preferred_element_type=f32) + b1_ref[...]
    x2 = jnp.dot(x2_ref[0].astype(bf16), w2_ref[...],
                 preferred_element_type=f32) + b2_ref[...]
    x = jnp.concatenate([x1, x2], axis=0)                    # (Np, Dip)
    valid = t1_ref[...] + t2_ref[...]                        # (Np, 1)
    x = x * valid                                            # zero padded rows
    n, d = x.shape
    xb = x.astype(bf16)

    if use_mean_master:
        m_row = jnp.sum(x, axis=0, keepdims=True) * inv_nodes   # (1, Dip)
    else:
        m_row = m_ref[0, 0:1, :]                                 # (1, Dip)

    # ---- heterogeneous pairwise attention -----------------------------------
    pair = (x[:, None, :] * x[None, :, :]).reshape(n * n, d).astype(bf16)
    h = jnp.tanh(jnp.dot(pair, wp_ref[...], preferred_element_type=f32)
                 + bp_ref[...]).reshape(n, n, -1)            # (Np, Np, Dop)
    # per-pair score weights (quadrant w11/w22/w12, 1/temp folded in), rebuilt
    # in VMEM from two (Np, Dop) tables:  weff[i,j] = t1_i*A[j] + t2_i*B[j]
    weff = (t1_ref[...][:, :, None] * wa_ref[...][None, :, :]
            + t2_ref[...][:, :, None] * wb_ref[...][None, :, :])
    score = jnp.sum(h * weff, axis=-1) + kmask_ref[...]      # (Np, Np)
    # softmax over the key axis (== torch softmax(dim=-2) before the squeeze)
    score = score - jnp.max(score, axis=-1, keepdims=True)
    e = jnp.exp(score)
    p = e / jnp.sum(e, axis=-1, keepdims=True)
    agg = jnp.dot(p.astype(bf16), xb, preferred_element_type=f32)   # (Np, Dip)

    # ---- master attention ----------------------------------------------------
    hM = jnp.tanh(jnp.dot((x * m_row).astype(bf16), wpM_ref[...],
                          preferred_element_type=f32) + bpM_ref[...])
    sM = jnp.sum(hM * wm_ref[...], axis=-1, keepdims=True) + nmask_ref[...]
    sM = sM - jnp.max(sM, axis=0, keepdims=True)
    eM = jnp.exp(sM)
    pM = eM / jnp.sum(eM, axis=0, keepdims=True)             # (Np, 1)
    aggM = jnp.sum(x * pM, axis=0, keepdims=True)            # (1, Dip)

    # ---- node projection epilogue: SELU(BN(agg@Wwa + x@Wwo + b)), BN folded --
    cat = jnp.concatenate([agg.astype(bf16), xb], axis=-1)   # (Np, 2*Dip)
    y = jnp.dot(cat, wn_ref[...], preferred_element_type=f32) + bnode_ref[...]
    y_ref[0] = _selu(y)

    # ---- master projection epilogue ------------------------------------------
    catM = jnp.concatenate([aggM, m_row], axis=-1).astype(bf16)   # (1, 2*Dip)
    mo = jnp.dot(catM, wmst_ref[...], preferred_element_type=f32) + bmst_ref[...]
    mo_ref[0] = jnp.broadcast_to(mo, mo_ref.shape[1:])


# ------------------------------ layer forward ---------------------------------

def htrg_forward(prep, x1, x2, master=None):
    cfg = prep["cfg"]
    num1, num2 = cfg["num1"], cfg["num2"]
    N1p, N2p, Np = cfg["N1p"], cfg["N2p"], cfg["Np"]
    Dip, Dop = cfg["Dip"], cfg["Dop"]
    in_dim, out_dim = cfg["in_dim"], cfg["out_dim"]
    B = x1.shape[0]

    x1p = jnp.pad(x1.astype(jnp.float32),
                  ((0, 0), (0, N1p - num1), (0, Dip - in_dim)))
    x2p = jnp.pad(x2.astype(jnp.float32),
                  ((0, 0), (0, N2p - num2), (0, Dip - in_dim)))
    if master is None:
        use_mean = True
        m_in = jnp.zeros((B, 8, Dip), jnp.float32)
    else:
        use_mean = False
        m = jnp.broadcast_to(master, (B, 1, in_dim)).astype(jnp.float32)
        m_in = jnp.pad(m, ((0, 0), (0, 7), (0, Dip - in_dim)))

    consts = prep["consts"]

    def batch_spec(shape):
        return pl.BlockSpec(shape, lambda b: (b, 0, 0))

    def const_spec(arr):
        nd = arr.ndim
        return pl.BlockSpec(arr.shape, lambda b, _nd=nd: (0,) * _nd)

    # NOTE: for B == 1 on v7x one could additionally split query rows across a
    # second "parallel" grid axis to keep both TensorCores busy; at B >= 2 the
    # batch axis already feeds both cores.
    y_p, m_p = pl.pallas_call(
        functools.partial(_fused_kernel, use_mean_master=use_mean,
                          inv_nodes=1.0 / float(num1 + num2)),
        out_shape=(jax.ShapeDtypeStruct((B, Np, Dop), jnp.float32),
                   jax.ShapeDtypeStruct((B, 8, Dop), jnp.float32)),
        grid=(B,),
        in_specs=[batch_spec((1, N1p, Dip)),
                  batch_spec((1, N2p, Dip)),
                  batch_spec((1, 8, Dip))] + [const_spec(c) for c in consts],
        out_specs=(batch_spec((1, Np, Dop)), batch_spec((1, 8, Dop))),
        compiler_params=pltpu.CompilerParams(
            dimension_semantics=("parallel",)),
    )(x1p, x2p, m_in, *consts)

    y1 = y_p[:, :num1, :out_dim]
    y2 = y_p[:, N1p:N1p + num2, :out_dim]
    new_master = m_p[:, 0:1, :out_dim]
    return y1, y2, new_master


# --------------------------- parameter preparation -----------------------------

def prepare_params(raw, num1, num2, temp):
    """Pad / fold / pre-cast all weights once (no per-call work around the kernel)."""
    in_dim = raw["proj_type1"]["w"].shape[0]
    out_dim = raw["proj_with_att"]["w"].shape[1]
    eps = 1e-5
    N1p, N2p = _ru(num1, 8), _ru(num2, 8)
    Np = N1p + N2p
    Dip, Dop = _ru(in_dim, 128), _ru(out_dim, 128)

    def pad2(w, rows, cols):
        return jnp.zeros((rows, cols), jnp.float32).at[:w.shape[0], :w.shape[1]].set(w)

    def pad_bias(b, cols):
        return jnp.zeros((1, cols), jnp.float32).at[0, :b.shape[0]].set(b)

    def pad_lane(v, cols):
        return jnp.zeros((cols,), jnp.float32).at[:v.shape[0]].set(v)

    w1 = pad2(raw["proj_type1"]["w"], Dip, Dip).astype(jnp.bfloat16)
    b1 = pad_bias(raw["proj_type1"]["b"], Dip)
    w2 = pad2(raw["proj_type2"]["w"], Dip, Dip).astype(jnp.bfloat16)
    b2 = pad_bias(raw["proj_type2"]["b"], Dip)
    wp = pad2(raw["att_proj"]["w"], Dip, Dop).astype(jnp.bfloat16)
    bp = pad_bias(raw["att_proj"]["b"], Dop)
    wpM = pad2(raw["att_projM"]["w"], Dip, Dop).astype(jnp.bfloat16)
    bpM = pad_bias(raw["att_projM"]["b"], Dop)

    # node-type layout: type1 rows [0, num1), type2 rows [N1p, N1p+num2)
    idx = np.arange(Np)
    t1 = (idx < num1).astype(np.float32)
    t2 = ((idx >= N1p) & (idx < N1p + num2)).astype(np.float32)
    valid = t1 + t2
    mask = np.where(valid > 0, 0.0, _NEG_INF).astype(np.float32)
    t1c = jnp.asarray(t1)[:, None]                   # (Np, 1)
    t2c = jnp.asarray(t2)[:, None]
    nmask = jnp.asarray(mask)[:, None]               # (Np, 1)  master softmax
    kmask = jnp.asarray(mask)[None, :]               # (1, Np)  key softmax

    # per-key score-weight tables with 1/temp folded in:
    #   weff(i,j) = t1_i*A[j] + t2_i*B[j]   reproduces the w11/w22/w12 quadrants
    w11 = pad_lane(raw["att_weight11"][:, 0], Dop)
    w22 = pad_lane(raw["att_weight22"][:, 0], Dop)
    w12 = pad_lane(raw["att_weight12"][:, 0], Dop)
    a_tab = (t1c * w11[None, :] + t2c * w12[None, :]) / temp      # (Np, Dop)
    b_tab = (t1c * w12[None, :] + t2c * w22[None, :]) / temp
    wm = (pad_lane(raw["att_weightM"][:, 0], Dop) / temp)[None, :]

    # proj_with_att + proj_without_att fused over concat([agg, x]);
    # eval-mode BatchNorm folded in: y = selu(z*scale + shift)
    bn = raw["bn"]
    scale = bn["gamma"] / jnp.sqrt(bn["var"] + eps)
    shift = bn["beta"] - bn["mean"] * scale
    wn = jnp.zeros((2 * Dip, Dop), jnp.float32)
    wn = wn.at[:in_dim, :out_dim].set(raw["proj_with_att"]["w"] * scale[None, :])
    wn = wn.at[Dip:Dip + in_dim, :out_dim].set(
        raw["proj_without_att"]["w"] * scale[None, :])
    bnode = pad_bias((raw["proj_with_att"]["b"] + raw["proj_without_att"]["b"])
                     * scale + shift, Dop)
    wn = wn.astype(jnp.bfloat16)

    wmst = jnp.zeros((2 * Dip, Dop), jnp.float32)
    wmst = wmst.at[:in_dim, :out_dim].set(raw["proj_with_attM"]["w"])
    wmst = wmst.at[Dip:Dip + in_dim, :out_dim].set(raw["proj_without_attM"]["w"])
    bmst = pad_bias(raw["proj_with_attM"]["b"] + raw["proj_without_attM"]["b"], Dop)
    wmst = wmst.astype(jnp.bfloat16)

    consts = [w1, b1, w2, b2, wp, bp, wpM, bpM, a_tab, b_tab, wm,
              t1c, t2c, nmask, kmask, wn, bnode, wmst, bmst]
    cfg = dict(num1=num1, num2=num2, N1p=N1p, N2p=N2p, Np=Np,
               Dip=Dip, Dop=Dop, in_dim=in_dim, out_dim=out_dim)
    return {"consts": consts, "cfg": cfg}


def init_raw_params(key, in_dim, out_dim):
    ks = jax.random.split(key, 14)

    def dense(k, din, dout):
        kw, kb = jax.random.split(k)
        s = 1.0 / np.sqrt(din)
        return {"w": s * jax.random.normal(kw, (din, dout), jnp.float32),
                "b": s * jax.random.normal(kb, (dout,), jnp.float32)}

    def attw(k, dout):
        return (1.0 / np.sqrt(dout)) * jax.random.normal(k, (dout, 1), jnp.float32)

    kb = jax.random.split(ks[13], 4)
    return {
        "proj_type1": dense(ks[0], in_dim, in_dim),
        "proj_type2": dense(ks[1], in_dim, in_dim),
        "att_proj": dense(ks[2], in_dim, out_dim),
        "att_projM": dense(ks[3], in_dim, out_dim),
        "att_weight11": attw(ks[4], out_dim),
        "att_weight22": attw(ks[5], out_dim),
        "att_weight12": attw(ks[6], out_dim),
        "att_weightM": attw(ks[7], out_dim),
        "proj_with_att": dense(ks[8], in_dim, out_dim),
        "proj_without_att": dense(ks[9], in_dim, out_dim),
        "proj_with_attM": dense(ks[10], in_dim, out_dim),
        "proj_without_attM": dense(ks[11], in_dim, out_dim),
        "bn": {"gamma": 1.0 + 0.1 * jax.random.normal(kb[0], (out_dim,), jnp.float32),
               "beta": 0.1 * jax.random.normal(kb[1], (out_dim,), jnp.float32),
               "mean": 0.1 * jax.random.normal(kb[2], (out_dim,), jnp.float32),
               "var": 1.0 + 0.2 * jax.random.uniform(kb[3], (out_dim,), jnp.float32)},
    }


# ----------------------------- pure-JAX reference ------------------------------

def reference_forward(raw, x1, x2, master, num1, num2, temp):
    lin = lambda x, p: x @ p["w"] + p["b"]
    x1p, x2p = lin(x1, raw["proj_type1"]), lin(x2, raw["proj_type2"])
    x = jnp.concatenate([x1p, x2p], axis=1)
    if master is None:
        master = jnp.mean(x, axis=1, keepdims=True)
    master = jnp.broadcast_to(master, (x.shape[0],) + master.shape[1:])
    pair = x[:, :, None, :] * x[:, None, :, :]
    h = jnp.tanh(lin(pair, raw["att_proj"]))
    s11 = h[:, :num1, :num1] @ raw["att_weight11"]
    s22 = h[:, num1:, num1:] @ raw["att_weight22"]
    s12 = h[:, :num1, num1:] @ raw["att_weight12"]
    s21 = h[:, num1:, :num1] @ raw["att_weight12"]
    score = jnp.concatenate(
        [jnp.concatenate([s11, s12], axis=2),
         jnp.concatenate([s21, s22], axis=2)], axis=1)[..., 0] / temp
    att = jax.nn.softmax(score, axis=-1)   # == torch softmax(dim=-2) pre-squeeze
    hM = jnp.tanh(lin(x * master, raw["att_projM"]))
    sM = (hM @ raw["att_weightM"])[..., 0] / temp
    attM = jax.nn.softmax(sM, axis=-1)
    aggM = jnp.einsum("bn,bnd->bd", attM, x)
    new_master = (lin(aggM, raw["proj_with_attM"])[:, None, :]
                  + lin(master, raw["proj_without_attM"]))
    agg = jnp.einsum("bij,bjd->bid", att, x)
    z = lin(agg, raw["proj_with_att"]) + lin(x, raw["proj_without_att"])
    bn = raw["bn"]
    z = (z - bn["mean"]) / jnp.sqrt(bn["var"] + 1e-5) * bn["gamma"] + bn["beta"]
    z = _selu(z)
    return z[:, :num1], z[:, num1:num1 + num2], new_master


# ------------------------------------ main --------------------------------------

if __name__ == "__main__":
    B, N1, N2, IN_DIM, OUT_DIM = 2, 12, 9, 64, 32
    TEMP = 100.0

    key = jax.random.PRNGKey(0)
    ks = jax.random.split(key, 4)
    raw = init_raw_params(ks[0], IN_DIM, OUT_DIM)
    x1 = jax.random.normal(ks[1], (B, N1, IN_DIM), jnp.float32)
    x2 = jax.random.normal(ks[2], (B, N2, IN_DIM), jnp.float32)
    master = 0.5 * jax.random.normal(ks[3], (B, 1, IN_DIM), jnp.float32)

    prep = prepare_params(raw, N1, N2, TEMP)
    fwd = jax.jit(functools.partial(htrg_forward, prep))

    # explicit-master path
    y1, y2, new_master = jax.block_until_ready(fwd(x1, x2, master))
    assert y1.shape == (B, N1, OUT_DIM) and y1.dtype == jnp.float32
    assert y2.shape == (B, N2, OUT_DIM) and y2.dtype == jnp.float32
    assert new_master.shape == (B, 1, OUT_DIM)

    r1, r2, rm = reference_forward(raw, x1, x2, master, N1, N2, TEMP)
    np.testing.assert_allclose(np.asarray(y1), np.asarray(r1), rtol=5e-2, atol=3e-2)
    np.testing.assert_allclose(np.asarray(y2), np.asarray(r2), rtol=5e-2, atol=3e-2)
    np.testing.assert_allclose(np.asarray(new_master), np.asarray(rm),
                               rtol=5e-2, atol=3e-2)

    # master=None path (mean over nodes computed inside the kernel)
    y1n, y2n, mn = jax.block_until_ready(fwd(x1, x2, None))
    r1n, r2n, rmn = reference_forward(raw, x1, x2, None, N1, N2, TEMP)
    np.testing.assert_allclose(np.asarray(y1n), np.asarray(r1n), rtol=5e-2, atol=3e-2)
    np.testing.assert_allclose(np.asarray(y2n), np.asarray(r2n), rtol=5e-2, atol=3e-2)
    np.testing.assert_allclose(np.asarray(mn), np.asarray(rmn), rtol=5e-2, atol=3e-2)

    print("KERNEL_OK")
</pallas_src>

<mosaic_0001>
module attributes {stable_mosaic.version = 11 : i64} {
  func.func @_fused_kernel(%arg0: i32, %arg1: memref<1x16x128xf32, #tpu.memory_space<vmem>>, %arg2: memref<1x16x128xf32, #tpu.memory_space<vmem>>, %arg3: memref<1x8x128xf32, #tpu.memory_space<vmem>>, %arg4: memref<128x128xbf16, #tpu.memory_space<vmem>>, %arg5: memref<1x128xf32, #tpu.memory_space<vmem>>, %arg6: memref<128x128xbf16, #tpu.memory_space<vmem>>, %arg7: memref<1x128xf32, #tpu.memory_space<vmem>>, %arg8: memref<128x128xbf16, #tpu.memory_space<vmem>>, %arg9: memref<1x128xf32, #tpu.memory_space<vmem>>, %arg10: memref<128x128xbf16, #tpu.memory_space<vmem>>, %arg11: memref<1x128xf32, #tpu.memory_space<vmem>>, %arg12: memref<32x128xf32, #tpu.memory_space<vmem>>, %arg13: memref<32x128xf32, #tpu.memory_space<vmem>>, %arg14: memref<1x128xf32, #tpu.memory_space<vmem>>, %arg15: memref<32x1xf32, #tpu.memory_space<vmem>>, %arg16: memref<32x1xf32, #tpu.memory_space<vmem>>, %arg17: memref<32x1xf32, #tpu.memory_space<vmem>>, %arg18: memref<1x32xf32, #tpu.memory_space<vmem>>, %arg19: memref<256x128xbf16, #tpu.memory_space<vmem>>, %arg20: memref<1x128xf32, #tpu.memory_space<vmem>>, %arg21: memref<256x128xbf16, #tpu.memory_space<vmem>>, %arg22: memref<1x128xf32, #tpu.memory_space<vmem>>, %arg23: memref<1x32x128xf32, #tpu.memory_space<vmem>>, %arg24: memref<1x8x128xf32, #tpu.memory_space<vmem>>) attributes {dimension_semantics = [#tpu.dimension_semantics<parallel>], iteration_bounds = array<i64: 2>, scalar_prefetch = 0 : i64, scratch_operands = 0 : i64, tpu.core_type = #tpu.core_type<tc>, window_params = [{transform_indices = @transform_0, window_bounds = array<i64: 1, 16, 128>}, {transform_indices = @transform_1, window_bounds = array<i64: 1, 16, 128>}, {transform_indices = @transform_2, window_bounds = array<i64: 1, 8, 128>}, {pipeline_mode = #tpu.pipeline_mode<synchronous>, transform_indices = @transform_3, window_bounds = array<i64: 128, 128>}, {pipeline_mode = #tpu.pipeline_mode<synchronous>, transform_indices = @transform_4, window_bounds = array<i64: 1, 128>}, {pipeline_mode = #tpu.pipeline_mode<synchronous>, transform_indices = @transform_5, window_bounds = array<i64: 128, 128>}, {pipeline_mode = #tpu.pipeline_mode<synchronous>, transform_indices = @transform_6, window_bounds = array<i64: 1, 128>}, {pipeline_mode = #tpu.pipeline_mode<synchronous>, transform_indices = @transform_7, window_bounds = array<i64: 128, 128>}, {pipeline_mode = #tpu.pipeline_mode<synchronous>, transform_indices = @transform_8, window_bounds = array<i64: 1, 128>}, {pipeline_mode = #tpu.pipeline_mode<synchronous>, transform_indices = @transform_9, window_bounds = array<i64: 128, 128>}, {pipeline_mode = #tpu.pipeline_mode<synchronous>, transform_indices = @transform_10, window_bounds = array<i64: 1, 128>}, {pipeline_mode = #tpu.pipeline_mode<synchronous>, transform_indices = @transform_11, window_bounds = array<i64: 32, 128>}, {pipeline_mode = #tpu.pipeline_mode<synchronous>, transform_indices = @transform_12, window_bounds = array<i64: 32, 128>}, {pipeline_mode = #tpu.pipeline_mode<synchronous>, transform_indices = @transform_13, window_bounds = array<i64: 1, 128>}, {pipeline_mode = #tpu.pipeline_mode<synchronous>, transform_indices = @transform_14, window_bounds = array<i64: 32, 1>}, {pipeline_mode = #tpu.pipeline_mode<synchronous>, transform_indices = @transform_15, window_bounds = array<i64: 32, 1>}, {pipeline_mode = #tpu.pipeline_mode<synchronous>, transform_indices = @transform_16, window_bounds = array<i64: 32, 1>}, {pipeline_mode = #tpu.pipeline_mode<synchronous>, transform_indices = @transform_17, window_bounds = array<i64: 1, 32>}, {pipeline_mode = #tpu.pipeline_mode<synchronous>, transform_indices = @transform_18, window_bounds = array<i64: 256, 128>}, {pipeline_mode = #tpu.pipeline_mode<synchronous>, transform_indices = @transform_19, window_bounds = array<i64: 1, 128>}, {pipeline_mode = #tpu.pipeline_mode<synchronous>, transform_indices = @transform_20, window_bounds = array<i64: 256, 128>}, {pipeline_mode = #tpu.pipeline_mode<synchronous>, transform_indices = @transform_21, window_bounds = array<i64: 1, 128>}, {transform_indices = @transform_22, window_bounds = array<i64: 1, 32, 128>}, {transform_indices = @transform_23, window_bounds = array<i64: 1, 8, 128>}]} {
    %c0 = arith.constant 0 : index
    %c0_0 = arith.constant 0 : index
    %c0_1 = arith.constant 0 : index
    %0 = vector.load %arg1[%c0, %c0_0, %c0_1] : memref<1x16x128xf32, #tpu.memory_space<vmem>>, vector<1x16x128xf32>
    %1 = vector.shape_cast %0 : vector<1x16x128xf32> to vector<16x128xf32>
    %2 = arith.truncf %1 : vector<16x128xf32> to vector<16x128xbf16>
    %c0_2 = arith.constant 0 : index
    %c0_3 = arith.constant 0 : index
    %3 = vector.load %arg4[%c0_2, %c0_3] : memref<128x128xbf16, #tpu.memory_space<vmem>>, vector<128x128xbf16>
    %cst = arith.constant dense<0.000000e+00> : vector<16x128xf32>
    %4 = tpu.matmul %2, %3, %cst {dimension_numbers = #tpu.dot_dimension_numbers<[1], [0], [0], [1], [0, 0, 1, 1], [], []>} : vector<16x128xbf16>, vector<128x128xbf16>, vector<16x128xf32> -> vector<16x128xf32>
    %c0_4 = arith.constant 0 : index
    %c0_5 = arith.constant 0 : index
    %5 = vector.load %arg5[%c0_4, %c0_5] : memref<1x128xf32, #tpu.memory_space<vmem>>, vector<1x128xf32>
    %6 = vector.broadcast %5 : vector<1x128xf32> to vector<16x128xf32>
    %7 = arith.addf %4, %6 : vector<16x128xf32>
    %c0_6 = arith.constant 0 : index
    %c0_7 = arith.constant 0 : index
    %c0_8 = arith.constant 0 : index
    %8 = vector.load %arg2[%c0_6, %c0_7, %c0_8] : memref<1x16x128xf32, #tpu.memory_space<vmem>>, vector<1x16x128xf32>
    %9 = vector.shape_cast %8 : vector<1x16x128xf32> to vector<16x128xf32>
    %10 = arith.truncf %9 : vector<16x128xf32> to vector<16x128xbf16>
    %c0_9 = arith.constant 0 : index
    %c0_10 = arith.constant 0 : index
    %11 = vector.load %arg6[%c0_9, %c0_10] : memref<128x128xbf16, #tpu.memory_space<vmem>>, vector<128x128xbf16>
    %cst_11 = arith.constant dense<0.000000e+00> : vector<16x128xf32>
    %12 = tpu.matmul %10, %11, %cst_11 {dimension_numbers = #tpu.dot_dimension_numbers<[1], [0], [0], [1], [0, 0, 1, 1], [], []>} : vector<16x128xbf16>, vector<128x128xbf16>, vector<16x128xf32> -> vector<16x128xf32>
    %c0_12 = arith.constant 0 : index
    %c0_13 = arith.constant 0 : index
    %13 = vector.load %arg7[%c0_12, %c0_13] : memref<1x128xf32, #tpu.memory_space<vmem>>, vector<1x128xf32>
    %14 = vector.broadcast %13 : vector<1x128xf32> to vector<16x128xf32>
    %15 = arith.addf %12, %14 : vector<16x128xf32>
    %16 = tpu.concatenate %7, %15 in 0 : vector<16x128xf32>, vector<16x128xf32> -> vector<32x128xf32>
    %c0_14 = arith.constant 0 : index
    %c0_15 = arith.constant 0 : index
    %17 = vector.load %arg15[%c0_14, %c0_15] : memref<32x1xf32, #tpu.memory_space<vmem>>, vector<32x1xf32>
    %c0_16 = arith.constant 0 : index
    %c0_17 = arith.constant 0 : index
    %18 = vector.load %arg16[%c0_16, %c0_17] : memref<32x1xf32, #tpu.memory_space<vmem>>, vector<32x1xf32>
    %19 = arith.addf %17, %18 : vector<32x1xf32>
    %20 = vector.broadcast %19 : vector<32x1xf32> to vector<32x128xf32>
    %21 = arith.mulf %16, %20 : vector<32x128xf32>
    %22 = arith.truncf %21 : vector<32x128xf32> to vector<32x128xbf16>
    %c0_18 = arith.constant 0 : index
    %c0_19 = arith.constant 0 : index
    %c0_20 = arith.constant 0 : index
    %23 = vector.load %arg3[%c0_18, %c0_19, %c0_20] : memref<1x8x128xf32, #tpu.memory_space<vmem>>, vector<1x1x128xf32>
    %24 = vector.shape_cast %23 : vector<1x1x128xf32> to vector<1x128xf32>
    %25 = vector.shape_cast %21 : vector<32x128xf32> to vector<32x1x128xf32>
    %26 = vector.shape_cast %21 : vector<32x128xf32> to vector<1x32x128xf32>
    %27 = vector.broadcast %25 : vector<32x1x128xf32> to vector<32x32x128xf32>
    %28 = vector.broadcast %26 : vector<1x32x128xf32> to vector<32x32x128xf32>
    %29 = arith.mulf %27, %28 : vector<32x32x128xf32>
    %30 = vector.shape_cast %29 : vector<32x32x128xf32> to vector<1024x128xf32>
    %31 = arith.truncf %30 : vector<1024x128xf32> to vector<1024x128xbf16>
    %c0_21 = arith.constant 0 : index
    %c0_22 = arith.constant 0 : index
    %32 = vector.load %arg8[%c0_21, %c0_22] : memref<128x128xbf16, #tpu.memory_space<vmem>>, vector<128x128xbf16>
    %cst_23 = arith.constant dense<0.000000e+00> : vector<1024x128xf32>
    %33 = tpu.matmul %31, %32, %cst_23 {dimension_numbers = #tpu.dot_dimension_numbers<[1], [0], [0], [1], [0, 0, 1, 1], [], []>} : vector<1024x128xbf16>, vector<128x128xbf16>, vector<1024x128xf32> -> vector<1024x128xf32>
    %c0_24 = arith.constant 0 : index
    %c0_25 = arith.constant 0 : index
    %34 = vector.load %arg9[%c0_24, %c0_25] : memref<1x128xf32, #tpu.memory_space<vmem>>, vector<1x128xf32>
    %35 = vector.broadcast %34 : vector<1x128xf32> to vector<1024x128xf32>
    %36 = arith.addf %33, %35 : vector<1024x128xf32>
    %37 = math.tanh %36 : vector<1024x128xf32>
    %38 = vector.shape_cast %37 : vector<1024x128xf32> to vector<32x32x128xf32>
    %c0_26 = arith.constant 0 : index
    %c0_27 = arith.constant 0 : index
    %39 = vector.load %arg15[%c0_26, %c0_27] : memref<32x1xf32, #tpu.memory_space<vmem>>, vector<32x1xf32>
    %40 = vector.shape_cast %39 : vector<32x1xf32> to vector<32x1x1xf32>
    %c0_28 = arith.constant 0 : index
    %c0_29 = arith.constant 0 : index
    %41 = vector.load %arg12[%c0_28, %c0_29] : memref<32x128xf32, #tpu.memory_space<vmem>>, vector<32x128xf32>
    %42 = vector.shape_cast %41 : vector<32x128xf32> to vector<1x32x128xf32>
    %43 = vector.broadcast %40 : vector<32x1x1xf32> to vector<32x32x128xf32>
    %44 = vector.broadcast %42 : vector<1x32x128xf32> to vector<32x32x128xf32>
    %45 = arith.mulf %43, %44 : vector<32x32x128xf32>
    %c0_30 = arith.constant 0 : index
    %c0_31 = arith.constant 0 : index
    %46 = vector.load %arg16[%c0_30, %c0_31] : memref<32x1xf32, #tpu.memory_space<vmem>>, vector<32x1xf32>
    %47 = vector.shape_cast %46 : vector<32x1xf32> to vector<32x1x1xf32>
    %c0_32 = arith.constant 0 : index
    %c0_33 = arith.constant 0 : index
    %48 = vector.load %arg13[%c0_32, %c0_33] : memref<32x128xf32, #tpu.memory_space<vmem>>, vector<32x128xf32>
    %49 = vector.shape_cast %48 : vector<32x128xf32> to vector<1x32x128xf32>
    %50 = vector.broadcast %47 : vector<32x1x1xf32> to vector<32x32x128xf32>
    %51 = vector.broadcast %49 : vector<1x32x128xf32> to vector<32x32x128xf32>
    %52 = arith.mulf %50, %51 : vector<32x32x128xf32>
    %53 = arith.addf %45, %52 : vector<32x32x128xf32>
    %54 = arith.mulf %38, %53 : vector<32x32x128xf32>
    %cst_34 = arith.constant dense<0.000000e+00> : vector<32x32xf32>
    %55 = vector.multi_reduction <add>, %54, %cst_34 [2] : vector<32x32x128xf32> to vector<32x32xf32>
    %c0_35 = arith.constant 0 : index
    %c0_36 = arith.constant 0 : index
    %56 = vector.load %arg18[%c0_35, %c0_36] : memref<1x32xf32, #tpu.memory_space<vmem>>, vector<1x32xf32>
    %57 = vector.broadcast %56 : vector<1x32xf32> to vector<32x32xf32>
    %58 = arith.addf %55, %57 : vector<32x32xf32>
    %cst_37 = arith.constant dense<0xFF800000> : vector<32xf32>
    %59 = vector.multi_reduction <maximumf>, %58, %cst_37 [1] : vector<32x32xf32> to vector<32xf32>
    %60 = vector.shape_cast %59 : vector<32xf32> to vector<32x1xf32>
    %61 = vector.broadcast %60 : vector<32x1xf32> to vector<32x32xf32>
    %62 = arith.subf %58, %61 : vector<32x32xf32>
    %63 = math.exp %62 : vector<32x32xf32>
    %cst_38 = arith.constant dense<0.000000e+00> : vector<32xf32>
    %64 = vector.multi_reduction <add>, %63, %cst_38 [1] : vector<32x32xf32> to vector<32xf32>
    %65 = vector.shape_cast %64 : vector<32xf32> to vector<32x1xf32>
    %66 = vector.broadcast %65 : vector<32x1xf32> to vector<32x32xf32>
    %67 = arith.divf %63, %66 : vector<32x32xf32>
    %68 = arith.truncf %67 : vector<32x32xf32> to vector<32x32xbf16>
    %cst_39 = arith.constant dense<0.000000e+00> : vector<32x128xf32>
    %69 = tpu.matmul %68, %22, %cst_39 {dimension_numbers = #tpu.dot_dimension_numbers<[1], [0], [0], [1], [0, 0, 1, 1], [], []>} : vector<32x32xbf16>, vector<32x128xbf16>, vector<32x128xf32> -> vector<32x128xf32>
    %70 = vector.broadcast %24 : vector<1x128xf32> to vector<32x128xf32>
    %71 = arith.mulf %21, %70 : vector<32x128xf32>
    %72 = arith.truncf %71 : vector<32x128xf32> to vector<32x128xbf16>
    %c0_40 = arith.constant 0 : index
    %c0_41 = arith.constant 0 : index
    %73 = vector.load %arg10[%c0_40, %c0_41] : memref<128x128xbf16, #tpu.memory_space<vmem>>, vector<128x128xbf16>
    %cst_42 = arith.constant dense<0.000000e+00> : vector<32x128xf32>
    %74 = tpu.matmul %72, %73, %cst_42 {dimension_numbers = #tpu.dot_dimension_numbers<[1], [0], [0], [1], [0, 0, 1, 1], [], []>} : vector<32x128xbf16>, vector<128x128xbf16>, vector<32x128xf32> -> vector<32x128xf32>
    %c0_43 = arith.constant 0 : index
    %c0_44 = arith.constant 0 : index
    %75 = vector.load %arg11[%c0_43, %c0_44] : memref<1x128xf32, #tpu.memory_space<vmem>>, vector<1x128xf32>
    %76 = vector.broadcast %75 : vector<1x128xf32> to vector<32x128xf32>
    %77 = arith.addf %74, %76 : vector<32x128xf32>
    %78 = math.tanh %77 : vector<32x128xf32>
    %c0_45 = arith.constant 0 : index
    %c0_46 = arith.constant 0 : index
    %79 = vector.load %arg14[%c0_45, %c0_46] : memref<1x128xf32, #tpu.memory_space<vmem>>, vector<1x128xf32>
    %80 = vector.broadcast %79 : vector<1x128xf32> to vector<32x128xf32>
    %81 = arith.mulf %78, %80 : vector<32x128xf32>
    %cst_47 = arith.constant dense<0.000000e+00> : vector<32xf32>
    %82 = vector.multi_reduction <add>, %81, %cst_47 [1] : vector<32x128xf32> to vector<32xf32>
    %83 = vector.shape_cast %82 : vector<32xf32> to vector<32x1xf32>
    %c0_48 = arith.constant 0 : index
    %c0_49 = arith.constant 0 : index
    %84 = vector.load %arg17[%c0_48, %c0_49] : memref<32x1xf32, #tpu.memory_space<vmem>>, vector<32x1xf32>
    %85 = arith.addf %83, %84 : vector<32x1xf32>
    %cst_50 = arith.constant dense<0xFF800000> : vector<1xf32>
    %86 = vector.multi_reduction <maximumf>, %85, %cst_50 [0] : vector<32x1xf32> to vector<1xf32>
    %87 = vector.shape_cast %86 : vector<1xf32> to vector<1x1xf32>
    %88 = vector.broadcast %87 : vector<1x1xf32> to vector<32x1xf32>
    %89 = arith.subf %85, %88 : vector<32x1xf32>
    %90 = math.exp %89 : vector<32x1xf32>
    %cst_51 = arith.constant dense<0.000000e+00> : vector<1xf32>
    %91 = vector.multi_reduction <add>, %90, %cst_51 [0] : vector<32x1xf32> to vector<1xf32>
    %92 = vector.shape_cast %91 : vector<1xf32> to vector<1x1xf32>
    %93 = vector.broadcast %92 : vector<1x1xf32> to vector<32x1xf32>
    %94 = arith.divf %90, %93 : vector<32x1xf32>
    %95 = vector.broadcast %94 : vector<32x1xf32> to vector<32x128xf32>
    %96 = arith.mulf %21, %95 : vector<32x128xf32>
    %cst_52 = arith.constant dense<0.000000e+00> : vector<128xf32>
    %97 = vector.multi_reduction <add>, %96, %cst_52 [0] : vector<32x128xf32> to vector<128xf32>
    %98 = vector.shape_cast %97 : vector<128xf32> to vector<1x128xf32>
    %99 = arith.truncf %69 : vector<32x128xf32> to vector<32x128xbf16>
    %100 = tpu.concatenate %99, %22 in 1 : vector<32x128xbf16>, vector<32x128xbf16> -> vector<32x256xbf16>
    %c0_53 = arith.constant 0 : index
    %c0_54 = arith.constant 0 : index
    %101 = vector.load %arg19[%c0_53, %c0_54] : memref<256x128xbf16, #tpu.memory_space<vmem>>, vector<256x128xbf16>
    %cst_55 = arith.constant dense<0.000000e+00> : vector<32x128xf32>
    %102 = tpu.matmul %100, %101, %cst_55 {dimension_numbers = #tpu.dot_dimension_numbers<[1], [0], [0], [1], [0, 0, 1, 1], [], []>} : vector<32x256xbf16>, vector<256x128xbf16>, vector<32x128xf32> -> vector<32x128xf32>
    %c0_56 = arith.constant 0 : index
    %c0_57 = arith.constant 0 : index
    %103 = vector.load %arg20[%c0_56, %c0_57] : memref<1x128xf32, #tpu.memory_space<vmem>>, vector<1x128xf32>
    %104 = vector.broadcast %103 : vector<1x128xf32> to vector<32x128xf32>
    %105 = arith.addf %102, %104 : vector<32x128xf32>
    %cst_58 = arith.constant 0.000000e+00 : f32
    %106 = vector.broadcast %cst_58 : f32 to vector<32x128xf32>
    %107 = arith.cmpf ogt, %105, %106 : vector<32x128xf32>
    %cst_59 = arith.constant 0.000000e+00 : f32
    %108 = vector.broadcast %cst_59 : f32 to vector<32x128xf32>
    %109 = arith.minimumf %105, %108 : vector<32x128xf32>
    %110 = math.exp %109 : vector<32x128xf32>
    %cst_60 = arith.constant 1.000000e+00 : f32
    %111 = vector.broadcast %cst_60 : f32 to vector<32x128xf32>
    %112 = arith.subf %110, %111 : vector<32x128xf32>
    %cst_61 = arith.constant 1.67326319 : f32
    %113 = vector.broadcast %cst_61 : f32 to vector<32x128xf32>
    %114 = arith.mulf %113, %112 : vector<32x128xf32>
    %115 = arith.select %107, %105, %114 : vector<32x128xi1>, vector<32x128xf32>
    %cst_62 = arith.constant 1.05070102 : f32
    %116 = vector.broadcast %cst_62 : f32 to vector<32x128xf32>
    %117 = arith.mulf %116, %115 : vector<32x128xf32>
    %c0_63 = arith.constant 0 : index
    %c0_64 = arith.constant 0 : index
    %c0_65 = arith.constant 0 : index
    %118 = vector.load %arg23[%c0_63, %c0_64, %c0_65] : memref<1x32x128xf32, #tpu.memory_space<vmem>>, vector<1x32x128xf32>
    %119 = vector.shape_cast %118 : vector<1x32x128xf32> to vector<32x128xf32>
    %120 = vector.shape_cast %117 : vector<32x128xf32> to vector<1x32x128xf32>
    tpu.vector_store %arg23[%c0_63, %c0_64, %c0_65], %120 {strides = array<i32>} : memref<1x32x128xf32, #tpu.memory_space<vmem>>, vector<1x32x128xf32>,
    %121 = tpu.concatenate %98, %24 in 1 : vector<1x128xf32>, vector<1x128xf32> -> vector<1x256xf32>
    %122 = arith.truncf %121 : vector<1x256xf32> to vector<1x256xbf16>
    %c0_66 = arith.constant 0 : index
    %c0_67 = arith.constant 0 : index
    %123 = vector.load %arg21[%c0_66, %c0_67] : memref<256x128xbf16, #tpu.memory_space<vmem>>, vector<256x128xbf16>
    %cst_68 = arith.constant dense<0.000000e+00> : vector<1x128xf32>
    %124 = tpu.matmul %122, %123, %cst_68 {dimension_numbers = #tpu.dot_dimension_numbers<[1], [0], [0], [1], [0, 0, 1, 1], [], []>} : vector<1x256xbf16>, vector<256x128xbf16>, vector<1x128xf32> -> vector<1x128xf32>
    %c0_69 = arith.constant 0 : index
    %c0_70 = arith.constant 0 : index
    %125 = vector.load %arg22[%c0_69, %c0_70] : memref<1x128xf32, #tpu.memory_space<vmem>>, vector<1x128xf32>
    %126 = arith.addf %124, %125 : vector<1x128xf32>
    %127 = vector.shape_cast %126 : vector<1x128xf32> to vector<1x128xf32>
    %128 = vector.broadcast %127 : vector<1x128xf32> to vector<8x128xf32>
    %c0_71 = arith.constant 0 : index
    %c0_72 = arith.constant 0 : index
    %c0_73 = arith.constant 0 : index
    %129 = vector.load %arg24[%c0_71, %c0_72, %c0_73] : memref<1x8x128xf32, #tpu.memory_space<vmem>>, vector<1x8x128xf32>
    %130 = vector.shape_cast %129 : vector<1x8x128xf32> to vector<8x128xf32>
    %131 = vector.shape_cast %128 : vector<8x128xf32> to vector<1x8x128xf32>
    tpu.vector_store %arg24[%c0_71, %c0_72, %c0_73], %131 {strides = array<i32>} : memref<1x8x128xf32, #tpu.memory_space<vmem>>, vector<1x8x128xf32>,
    return
  }
  func.func @transform_0(%arg0: i32) -> (i32, i32, i32) {
    %c0_i32 = arith.constant 0 : i32
    %c0_i32_0 = arith.constant 0 : i32
    %c0_i32_1 = arith.constant 0 : i32
    return %arg0, %c0_i32, %c0_i32_0 : i32, i32, i32
  }
  func.func @transform_1(%arg0: i32) -> (i32, i32, i32) {
    %c0_i32 = arith.constant 0 : i32
    %c0_i32_0 = arith.constant 0 : i32
    %c0_i32_1 = arith.constant 0 : i32
    return %arg0, %c0_i32, %c0_i32_0 : i32, i32, i32
  }
  func.func @transform_2(%arg0: i32) -> (i32, i32, i32) {
    %c0_i32 = arith.constant 0 : i32
    %c0_i32_0 = arith.constant 0 : i32
    %c0_i32_1 = arith.constant 0 : i32
    return %arg0, %c0_i32, %c0_i32_0 : i32, i32, i32
  }
  func.func @transform_3(%arg0: i32) -> (i32, i32) {
    %c0_i32 = arith.constant 0 : i32
    %c0_i32_0 = arith.constant 0 : i32
    %c0_i32_1 = arith.constant 0 : i32
    return %c0_i32, %c0_i32_0 : i32, i32
  }
  func.func @transform_4(%arg0: i32) -> (i32, i32) {
    %c0_i32 = arith.constant 0 : i32
    %c0_i32_0 = arith.constant 0 : i32
    %c0_i32_1 = arith.constant 0 : i32
    return %c0_i32, %c0_i32_0 : i32, i32
  }
  func.func @transform_5(%arg0: i32) -> (i32, i32) {
    %c0_i32 = arith.constant 0 : i32
    %c0_i32_0 = arith.constant 0 : i32
    %c0_i32_1 = arith.constant 0 : i32
    return %c0_i32, %c0_i32_0 : i32, i32
  }
  func.func @transform_6(%arg0: i32) -> (i32, i32) {
    %c0_i32 = arith.constant 0 : i32
    %c0_i32_0 = arith.constant 0 : i32
    %c0_i32_1 = arith.constant 0 : i32
    return %c0_i32, %c0_i32_0 : i32, i32
  }
  func.func @transform_7(%arg0: i32) -> (i32, i32) {
    %c0_i32 = arith.constant 0 : i32
    %c0_i32_0 = arith.constant 0 : i32
    %c0_i32_1 = arith.constant 0 : i32
    return %c0_i32, %c0_i32_0 : i32, i32
  }
  func.func @transform_8(%arg0: i32) -> (i32, i32) {
    %c0_i32 = arith.constant 0 : i32
    %c0_i32_0 = arith.constant 0 : i32
    %c0_i32_1 = arith.constant 0 : i32
    return %c0_i32, %c0_i32_0 : i32, i32
  }
  func.func @transform_9(%arg0: i32) -> (i32, i32) {
    %c0_i32 = arith.constant 0 : i32
    %c0_i32_0 = arith.constant 0 : i32
    %c0_i32_1 = arith.constant 0 : i32
    return %c0_i32, %c0_i32_0 : i32, i32
  }
  func.func @transform_10(%arg0: i32) -> (i32, i32) {
    %c0_i32 = arith.constant 0 : i32
    %c0_i32_0 = arith.constant 0 : i32
    %c0_i32_1 = arith.constant 0 : i32
    return %c0_i32, %c0_i32_0 : i32, i32
  }
  func.func @transform_11(%arg0: i32) -> (i32, i32) {
    %c0_i32 = arith.constant 0 : i32
    %c0_i32_0 = arith.constant 0 : i32
    %c0_i32_1 = arith.constant 0 : i32
    return %c0_i32, %c0_i32_0 : i32, i32
  }
  func.func @transform_12(%arg0: i32) -> (i32, i32) {
    %c0_i32 = arith.constant 0 : i32
    %c0_i32_0 = arith.constant 0 : i32
    %c0_i32_1 = arith.constant 0 : i32
    return %c0_i32, %c0_i32_0 : i32, i32
  }
  func.func @transform_13(%arg0: i32) -> (i32, i32) {
    %c0_i32 = arith.constant 0 : i32
    %c0_i32_0 = arith.constant 0 : i32
    %c0_i32_1 = arith.constant 0 : i32
    return %c0_i32, %c0_i32_0 : i32, i32
  }
  func.func @transform_14(%arg0: i32) -> (i32, i32) {
    %c0_i32 = arith.constant 0 : i32
    %c0_i32_0 = arith.constant 0 : i32
    %c0_i32_1 = arith.constant 0 : i32
    return %c0_i32, %c0_i32_0 : i32, i32
  }
  func.func @transform_15(%arg0: i32) -> (i32, i32) {
    %c0_i32 = arith.constant 0 : i32
    %c0_i32_0 = arith.constant 0 : i32
    %c0_i32_1 = arith.constant 0 : i32
    return %c0_i32, %c0_i32_0 : i32, i32
  }
  func.func @transform_16(%arg0: i32) -> (i32, i32) {
    %c0_i32 = arith.constant 0 : i32
    %c0_i32_0 = arith.constant 0 : i32
    %c0_i32_1 = arith.constant 0 : i32
    return %c0_i32, %c0_i32_0 : i32, i32
  }
  func.func @transform_17(%arg0: i32) -> (i32, i32) {
    %c0_i32 = arith.constant 0 : i32
    %c0_i32_0 = arith.constant 0 : i32
    %c0_i32_1 = arith.constant 0 : i32
    return %c0_i32, %c0_i32_0 : i32, i32
  }
  func.func @transform_18(%arg0: i32) -> (i32, i32) {
    %c0_i32 = arith.constant 0 : i32
    %c0_i32_0 = arith.constant 0 : i32
    %c0_i32_1 = arith.constant 0 : i32
    return %c0_i32, %c0_i32_0 : i32, i32
  }
  func.func @transform_19(%arg0: i32) -> (i32, i32) {
    %c0_i32 = arith.constant 0 : i32
    %c0_i32_0 = arith.constant 0 : i32
    %c0_i32_1 = arith.constant 0 : i32
    return %c0_i32, %c0_i32_0 : i32, i32
  }
  func.func @transform_20(%arg0: i32) -> (i32, i32) {
    %c0_i32 = arith.constant 0 : i32
    %c0_i32_0 = arith.constant 0 : i32
    %c0_i32_1 = arith.constant 0 : i32
    return %c0_i32, %c0_i32_0 : i32, i32
  }
  func.func @transform_21(%arg0: i32) -> (i32, i32) {
    %c0_i32 = arith.constant 0 : i32
    %c0_i32_0 = arith.constant 0 : i32
    %c0_i32_1 = arith.constant 0 : i32
    return %c0_i32, %c0_i32_0 : i32, i32
  }
  func.func @transform_22(%arg0: i32) -> (i32, i32, i32) {
    %c0_i32 = arith.constant 0 : i32
    %c0_i32_0 = arith.constant 0 : i32
    %c0_i32_1 = arith.constant 0 : i32
    return %arg0, %c0_i32, %c0_i32_0 : i32, i32, i32
  }
  func.func @transform_23(%arg0: i32) -> (i32, i32, i32) {
    %c0_i32 = arith.constant 0 : i32
    %c0_i32_0 = arith.constant 0 : i32
    %c0_i32_1 = arith.constant 0 : i32
    return %arg0, %c0_i32, %c0_i32_0 : i32, i32, i32
  }
}

</mosaic_0001>

<bundles_post_ra>
// kernel: htrg_forward.1
= control target key start
LH: loop header
LB: loop body
LE: loop exit
PB: predicated region body
PF: predicated region fallthrough
CT: control target
= control target key end

     0   :  { %s16992_s0 = inlined_call_operand.vmem [shape: f32[2,16,128], index: 0, kind: input, shape index: {}]   ;;  %s16993_s1 = inlined_call_operand.vmem [shape: f32[2,16,128], index: 1, kind: input, shape index: {}]   ;;  %s16994_s2 = inlined_call_operand.vmem [shape: f32[2,8,128], index: 2, kind: input, shape index: {}]   ;;  %s16995_s3 = inlined_call_operand.hbm [shape: bf16[128,128], index: 3, kind: input, shape index: {}]   ;;  %s16996_s4 = inlined_call_operand.hbm [shape: f32[1,128], index: 4, kind: input, shape index: {}]   ;;  %s16997_s5 = inlined_call_operand.hbm [shape: bf16[128,128], index: 5, kind: input, shape index: {}]   ;;  %s16998_s6 = inlined_call_operand.hbm [shape: f32[1,128], index: 6, kind: input, shape index: {}]   ;;  %s16999_s7 = inlined_call_operand.hbm [shape: bf16[128,128], index: 7, kind: input, shape index: {}]   ;;  %s17000_s8 = inlined_call_operand.hbm [shape: f32[1,128], index: 8, kind: input, shape index: {}]   ;;  %s17001_s9 = inlined_call_operand.vmem [shape: bf16[128,128], index: 9, kind: input, shape index: {}]   ;;  %s17002_s10 = inlined_call_operand.hbm [shape: f32[1,128], index: 10, kind: input, shape index: {}]   ;;  %s17003_s11 = inlined_call_operand.hbm [shape: f32[32,128], index: 11, kind: input, shape index: {}]   ;;  %s17004_s12 = inlined_call_operand.hbm [shape: f32[32,128], index: 12, kind: input, shape index: {}]   ;;  %s17005_s13 = inlined_call_operand.hbm [shape: f32[1,128], index: 13, kind: input, shape index: {}]   ;;  %s17006_s14 = inlined_call_operand.hbm [shape: f32[32,1], index: 14, kind: input, shape index: {}]   ;;  %s17007_s15 = inlined_call_operand.hbm [shape: f32[32,1], index: 15, kind: input, shape index: {}]   ;;  %s17008_s16 = inlined_call_operand.hbm [shape: f32[32,1], index: 16, kind: input, shape index: {}]   ;;  %s17009_s17 = inlined_call_operand.vmem [shape: f32[1,32], index: 17, kind: input, shape index: {}]   ;;  %s17010_s18 = inlined_call_operand.vmem [shape: bf16[256,128], index: 18, kind: input, shape index: {}]   ;;  %s17011_s19 = inlined_call_operand.vmem [shape: f32[1,128], index: 19, kind: input, shape index: {}]   ;;  %s17012_s20 = inlined_call_operand.vmem [shape: bf16[256,128], index: 20, kind: input, shape index: {}]   ;;  %s17013_s21 = inlined_call_operand.vmem [shape: f32[1,128], index: 21, kind: input, shape index: {}]   ;;  %s17014_s22 = inlined_call_operand.vmem [shape: f32[2,32,128], index: 22, kind: output, shape index: {0}]   ;;  %s17015_s23 = inlined_call_operand.vmem [shape: f32[2,8,128], index: 23, kind: output, shape index: {1}]  }
   0x1   :  { %17345 = sst [smem:[#allocation181_spill]] %s16992_s0 }
   0x2   :  { %17346 = sst [smem:[#allocation182_spill]] %s16993_s1 }
   0x3   :  { %17347 = sst [smem:[#allocation183_spill]] %s16994_s2 }
   0x4   :  { %17348 = sst [smem:[#allocation184_spill]] %s16995_s3 }
   0x5   :  { %17349 = sst [smem:[#allocation185_spill]] %s16996_s4 }
   0x6   :  { %17350 = sst [smem:[#allocation186_spill]] %s16997_s5 }
   0x7   :  { %17351 = sst [smem:[#allocation187_spill]] %s16998_s6 }
   0x8   :  { %17352 = sst [smem:[#allocation188_spill]] %s16999_s7 }
   0x9   :  { %17353 = sst [smem:[#allocation189_spill]] %s17000_s8 }
   0xa   :  { %17354 = sst [smem:[#allocation190_spill]] %s17011_s19 }
   0xb   :  { %17355 = sst [smem:[#allocation191_spill]] %s17013_s21 }
   0xc   :  { %17356 = sst [smem:[#allocation192_spill]] %s17014_s22 }
   0xd   :  { %17357 = sst [smem:[#allocation193_spill]] %s17015_s23 }
   0xe   :  { %29 = vsyncpa [#allocation3], 0 }
   0xf   :  { %30 = vsyncpa [#allocation5], 0 }
  0x10   :  { %31 = vsyncpa [#allocation8], 0 }
  0x11   :  { %32 = vsyncpa [#allocation11], 0 }
  0x12   :  { %33 = vsyncpa [#allocation14], 0 }
  0x13   :  { %34 = vsyncpa [#allocation17], 0 }
  0x14   :  { %35 = vsyncpa [#allocation20], 0  ;;  %s11651_s4 = smov 0  }
  0x15 LB: > { %17358 = sst [smem:[#allocation29_spill]] %s11508_s4  ;;  %s11510_s30 = smov [#allocation4]   ;;  %s11508_s4 = sphi %s11651_s4, %s41_s4  }
  0x16   : > { %s601_s24 = sshll.u32 %s11510_s30, 4  ;;  %s11657_s25 = sadd.s32 4294967295, %s11508_s4   ;;  %s11662_s24 = int_to_ptr.vmem [resolvable:$true] %s601_s24 }
  0x17   : > { %p9768_p0 = scmp.ge.s32.totalorder %s11508_s4, 1  ;;  %p575_p1 = scmp.lt.s32.totalorder %s11508_s4, 3 }
  0x18   : > { %p17024_p2 = scmp.eq.s32.totalorder %s11657_s25, 0  ;;  %s11511_s1 = smov [#allocation7]  }
  0x19   : > { %p11664_p3 = pnand %p9768_p0, %p575_p1  ;;  %s625_s26 = sshll.u32 %s11511_s1, 4  ;;  %s11670_s26 = int_to_ptr.vmem [resolvable:$true] %s625_s26 }
  0x1a   : > { %s11512_s2 = smov [#allocation10]   ;;  %s11513_s7 = smov [#allocation13]  }
  0x1b   : > { %s17359_s5 = scalar_select %p11664_p3, 1, 0 }
  0x1c   : > { %p10321_p4 = pneg %p11664_p3  ;;  %s649_s6 = sshll.u32 %s11512_s2, 4  ;;  %s11678_s6 = int_to_ptr.vmem [resolvable:$true] %s649_s6 }
  0x1d   : > { %s673_s28 = sshll.u32 %s11513_s7, 4  ;;  %s17361_s0 = sld [smem:[#allocation185_spill]]  ;;  %s11680_s28 = int_to_ptr.vmem [resolvable:$true] %s673_s28 }
  0x1e   : > { %p11674_p5 = pnand %p17024_p2, %p10321_p4 }
  0x20   : > { %p11690_p7 = pneg %p11674_p5 }
  0x23   : > { %s11110_s30 = scalar_lea.hbm %s17361_s0, 16 }
  0x24   : > { %p11111_p6 = scmp.ne.s32.totalorder %s17361_s0, %s11110_s30  ;;  %p11117_p10 = scmp.lt.u32.totalorder %s11110_s30, %s17361_s0 }
  0x26   : > { %p11113_p8 = pnand %p11690_p7, %p11111_p6 }
  0x28   : > { %p11114_p9 = pneg %p11113_p8 }
  0x2a   : > { %p11119_p11 = pnand %p11117_p10, %p11114_p9 }
  0x2c   : > { %11122 = shalt.err (!%p11119_p11)
}
  0x2d   : > { %s11123_s4 = scalar_lea.vmem %s11662_s24, 16  ;;  %s11130_s29 = scalar_lea.vmem %s11662_s24, 32 }
  0x2e   : > { %p11124_p12 = scmp.ne.s32.totalorder %s11662_s24, %s11123_s4  ;;  %p11131_p1 = scmp.lt.s32.totalorder %s11662_s24, %s11662_s24 }
  0x2f   : > { %p11132_p4 = scmp.lt.s32.totalorder %s11130_s29, %s11123_s4 }
  0x30   : > { %p11126_p13 = pnand %p11124_p12, %p11690_p7 }
  0x31   : > { %p11133_p6 = por %p11132_p4, %p11131_p1 }
  0x32   : > { %p11127_p0 = pneg %p11126_p13 }
  0x34   : > { %p11134_p8 = pnand %p11133_p6, %p11127_p0 }
  0x36   : > { %11137 = shalt.err (!%p11134_p8)
}
  0x37   : > { %10327 = dma.hbm_to_vmem [thread:$0]  (!%p11674_p5), %s17361_s0, 16, %s11662_s24, [#allocation5]  }
  0x38   : > { %s17363_s7 = sld [smem:[#allocation187_spill]] }
  0x3e   : > { %s11138_s21 = scalar_lea.hbm %s17363_s7, 16 }
  0x3f   : > { %p11139_p9 = scmp.ne.s32.totalorder %s17363_s7, %s11138_s21  ;;  %p11145_p12 = scmp.lt.u32.totalorder %s11138_s21, %s17363_s7 }
  0x41   : > { %p11141_p10 = pnand %p11139_p9, %p11690_p7 }
  0x43   : > { %p11142_p11 = pneg %p11141_p10 }
  0x45   : > { %p11147_p13 = pnand %p11145_p12, %p11142_p11 }
  0x47   : > { %11150 = shalt.err (!%p11147_p13)
}
  0x48   : > { %s11151_s24 = scalar_lea.vmem %s11670_s26, 16  ;;  %s11158_s19 = scalar_lea.vmem %s11670_s26, 32 }
  0x49   : > { %p11152_p0 = scmp.ne.s32.totalorder %s11670_s26, %s11151_s24  ;;  %p11159_p6 = scmp.lt.s32.totalorder %s11670_s26, %s11670_s26 }
  0x4a   : > { %p11160_p8 = scmp.lt.s32.totalorder %s11158_s19, %s11151_s24 }
  0x4b   : > { %p11154_p1 = pnand %p11152_p0, %p11690_p7 }
  0x4c   : > { %p11161_p9 = por %p11160_p8, %p11159_p6 }
  0x4d   : > { %p11155_p4 = pneg %p11154_p1 }
  0x4f   : > { %p11162_p10 = pnand %p11161_p9, %p11155_p4 }
  0x51   : > { %11165 = shalt.err (!%p11162_p10)
}
  0x52   : > { %10333 = dma.hbm_to_vmem [thread:$0]  (!%p11674_p5), %s17363_s7, 16, %s11670_s26, [#allocation8]  }
  0x53   : > { %s17364_s8 = sld [smem:[#allocation189_spill]] }
  0x59   : > { %s11166_s30 = scalar_lea.hbm %s17364_s8, 16 }
  0x5a   : > { %p11167_p11 = scmp.ne.s32.totalorder %s17364_s8, %s11166_s30  ;;  %p11173_p0 = scmp.lt.u32.totalorder %s11166_s30, %s17364_s8 }
  0x5c   : > { %p11169_p12 = pnand %p11167_p11, %p11690_p7 }
  0x5e   : > { %p11170_p13 = pneg %p11169_p12 }
  0x60   : > { %p11175_p1 = pnand %p11173_p0, %p11170_p13 }
  0x62   : > { %11178 = shalt.err (!%p11175_p1)
}
  0x63   : > { %s11179_s26 = scalar_lea.vmem %s11678_s6, 16  ;;  %s11186_s19 = scalar_lea.vmem %s11678_s6, 32 }
  0x64   : > { %p11180_p4 = scmp.ne.s32.totalorder %s11678_s6, %s11179_s26  ;;  %p11187_p9 = scmp.lt.s32.totalorder %s11678_s6, %s11678_s6 }
  0x65   : > { %p11188_p10 = scmp.lt.s32.totalorder %s11186_s19, %s11179_s26 }
  0x66   : > { %p11182_p6 = pnand %p11180_p4, %p11690_p7 }
  0x67   : > { %p11189_p11 = por %p11188_p10, %p11187_p9 }
  0x68   : > { %p11183_p8 = pneg %p11182_p6 }
  0x6a   : > { %p11190_p12 = pnand %p11189_p11, %p11183_p8 }
  0x6c   : > { %11193 = shalt.err (!%p11190_p12)
}
  0x6d   : > { %10339 = dma.hbm_to_vmem [thread:$0]  (!%p11674_p5), %s17364_s8, 16, %s11678_s6, [#allocation11]  }
  0x6e   : > { %s11194_s30 = scalar_lea.hbm %s17003_s11, 512 }
  0x6f   : > { %p11195_p13 = scmp.ne.s32.totalorder %s17003_s11, %s11194_s30  ;;  %p11201_p4 = scmp.lt.u32.totalorder %s11194_s30, %s17003_s11 }
  0x71   : > { %p11197_p0 = pnand %p11195_p13, %p11690_p7 }
  0x73   : > { %p11198_p1 = pneg %p11197_p0 }
  0x75   : > { %p11203_p6 = pnand %p11201_p4, %p11198_p1 }
  0x77   : > { %11206 = shalt.err (!%p11203_p6)
}
  0x78   : > { %s11207_s6 = scalar_lea.vmem %s11680_s28, 512  ;;  %p11215_p11 = scmp.lt.s32.totalorder %s11680_s28, %s11680_s28 }
  0x79   : > { %p11208_p8 = scmp.ne.s32.totalorder %s11680_s28, %s11207_s6  ;;  %p11216_p12 = scmp.lt.s32.totalorder %s11207_s6, %s11207_s6 }
  0x7b   : > { %p11210_p9 = pnand %p11208_p8, %p11690_p7  ;;  %p11217_p13 = por %p11216_p12, %p11215_p11 }
  0x7d   : > { %p11211_p10 = pneg %p11210_p9 }
  0x7f   : > { %p11218_p0 = pnand %p11217_p13, %p11211_p10 }
  0x81   : > { %11221 = shalt.err (!%p11218_p0)
}
  0x82   : > { %s17026_s26 = smov 128   ;;  %s17028_s19 = smov 8  }
  0x83   : > { %10345 = dma.hbm_to_vmem [thread:$0]  (!%p11674_p5), %s17003_s11, 512, %s11680_s28, [#allocation14], %s17026_s26, %s17026_s26, %s17028_s19  }
  0x84   : > { %s11516_s23 = smov [#allocation16]   ;;  %s11517_s30 = smov [#allocation19]  }
  0x85   : > { %s700_s3 = sshll.u32 %s11516_s23, 4  ;;  %s723_s1 = sshll.u32 %s11517_s30, 4  ;;  %s701_s3 = int_to_ptr.vmem [resolvable:$true] %s700_s3  ;;  %s724_s1 = int_to_ptr.vmem [resolvable:$true] %s723_s1 }
  0x86   : > { %s11222_s24 = scalar_lea.hbm %s17005_s13, 16 }
  0x87   : > { %p11223_p1 = scmp.ne.s32.totalorder %s17005_s13, %s11222_s24  ;;  %p11229_p8 = scmp.lt.u32.totalorder %s11222_s24, %s17005_s13 }
  0x89   : > { %p11225_p4 = pnand %p11223_p1, %p11690_p7 }
  0x8b   : > { %p11226_p6 = pneg %p11225_p4 }
  0x8d   : > { %p11231_p9 = pnand %p11229_p8, %p11226_p6 }
  0x8f   : > { %11234 = shalt.err (!%p11231_p9)
}
  0x90   : > { %s11235_s28 = scalar_lea.vmem %s701_s3, 16  ;;  %s11242_s21 = scalar_lea.vmem %s701_s3, 32 }
  0x91   : > { %p11236_p10 = scmp.ne.s32.totalorder %s701_s3, %s11235_s28  ;;  %p11243_p13 = scmp.lt.s32.totalorder %s701_s3, %s701_s3 }
  0x92   : > { %p11244_p0 = scmp.lt.s32.totalorder %s11242_s21, %s11235_s28 }
  0x93   : > { %p11238_p11 = pnand %p11236_p10, %p11690_p7 }
  0x94   : > { %p11245_p2 = por %p11244_p0, %p11243_p13 }
  0x95   : > { %p11239_p12 = pneg %p11238_p11 }
  0x97   : > { %p11246_p3 = pnand %p11245_p2, %p11239_p12 }
  0x99   : > { %11249 = shalt.err (!%p11246_p3)
}
  0x9a   : > { %10351 = dma.hbm_to_vmem [thread:$0]  (!%p11674_p5), %s17005_s13, 16, %s701_s3, [#allocation17]  }
  0x9b   : > { %s11250_s23 = scalar_lea.hbm %s17007_s15, 512 }
  0x9c   : > { %p11251_p1 = scmp.ne.s32.totalorder %s17007_s15, %s11250_s23  ;;  %p11257_p3 = scmp.lt.u32.totalorder %s11250_s23, %s17007_s15 }
  0x9e   : > { %p11253_p4 = pnand %p11251_p1, %p11690_p7 }
  0xa0   : > { %p11254_p2 = pneg %p11253_p4 }
  0xa2   : > { %p11259_p6 = pnand %p11257_p3, %p11254_p2 }
  0xa4   : > { %11262 = shalt.err (!%p11259_p6)
}
  0xa5   : > { %s11263_s6 = scalar_lea.vmem %s724_s1, 512  ;;  %p11271_p11 = scmp.lt.s32.totalorder %s724_s1, %s724_s1 }
  0xa6   : > { %p11264_p8 = scmp.ne.s32.totalorder %s724_s1, %s11263_s6  ;;  %p11272_p12 = scmp.lt.s32.totalorder %s11263_s6, %s11263_s6 }
  0xa8   : > { %p11266_p9 = pnand %p11264_p8, %p11690_p7  ;;  %p11273_p13 = por %p11272_p12, %p11271_p11 }
  0xaa   : > { %p11267_p10 = pneg %p11266_p9 }
  0xac   : > { %p11274_p0 = pnand %p11273_p13, %p11267_p10 }
  0xae   : > { %11277 = shalt.err (!%p11274_p0)
}
  0xaf   : > { %10357 = dma.hbm_to_vmem [thread:$0]  (!%p11674_p5), %s17007_s15, 512, %s724_s1, [#allocation20], %s17026_s26, %s17026_s26, %s17028_s19  }
  0xb0   : > { %s11518_s21 = smov [#allocation2]   ;;  %s17365_s7 = sld [smem:[#allocation184_spill]] }
  0xb1   : > { %s587_s0 = sshll.u32 %s11518_s21, 4  ;;  %s588_s0 = int_to_ptr.vmem [resolvable:$true] %s587_s0 }
  0xb6   : > { %s11278_s23 = scalar_lea.hbm %s17365_s7, 1024 }
  0xb7   : > { %p11279_p1 = scmp.ne.s32.totalorder %s17365_s7, %s11278_s23  ;;  %p11285_p3 = scmp.lt.u32.totalorder %s11278_s23, %s17365_s7 }
  0xb9   : > { %p11281_p4 = pnand %p11279_p1, %p11690_p7 }
  0xbb   : > { %p11282_p2 = pneg %p11281_p4 }
  0xbd   : > { %p11287_p6 = pnand %p11285_p3, %p11282_p2 }
  0xbf   : > { %11290 = shalt.err (!%p11287_p6)
}
  0xc0   : > { %s11291_s1 = scalar_lea.vmem %s588_s0, 1024  ;;  %p11299_p11 = scmp.lt.s32.totalorder %s588_s0, %s588_s0 }
  0xc1   : > { %p11292_p8 = scmp.ne.s32.totalorder %s588_s0, %s11291_s1  ;;  %p11300_p12 = scmp.lt.s32.totalorder %s11291_s1, %s11291_s1 }
  0xc3   : > { %p11294_p9 = pnand %p11292_p8, %p11690_p7  ;;  %p11301_p13 = por %p11300_p12, %p11299_p11 }
  0xc5   : > { %p11295_p10 = pneg %p11294_p9 }
  0xc7   : > { %p11302_p0 = pnand %p11301_p13, %p11295_p10 }
  0xc9   : > { %11305 = shalt.err (!%p11302_p0)
}
  0xca   : > { %s11519_s6 = smov 64   ;;  %s11520_s3 = smov 4  }
  0xcb   : > { %10324 = dma.hbm_to_vmem [thread:$0]  (!%p11674_p5), %s17365_s7, 1024, %s588_s0, [#allocation3], %s11519_s6, %s11519_s6, %s11520_s3  }
  0xcc   : > { %s11521_s22 = smov [#allocation6]   ;;  %s11522_s23 = smov [#allocation9]  }
  0xcd   : > { %s611_s8 = sshll.u32 %s11521_s22, 4  ;;  %s635_s30 = sshll.u32 %s11522_s23, 4  ;;  %s612_s8 = int_to_ptr.vmem [resolvable:$true] %s611_s8  ;;  %s11846_s30 = int_to_ptr.vmem [resolvable:$true] %s635_s30 }
  0xce   : > { %s17366_s24 = sld [smem:[#allocation186_spill]] }
  0xd4   : > { %s11306_s1 = scalar_lea.hbm %s17366_s24, 1024 }
  0xd5   : > { %p11307_p1 = scmp.ne.s32.totalorder %s17366_s24, %s11306_s1  ;;  %p11313_p3 = scmp.lt.u32.totalorder %s11306_s1, %s17366_s24 }
  0xd7   : > { %p11309_p4 = pnand %p11307_p1, %p11690_p7 }
  0xd9   : > { %p11310_p2 = pneg %p11309_p4 }
  0xdb   : > { %p11315_p6 = pnand %p11313_p3, %p11310_p2 }
  0xdd   : > { %11318 = shalt.err (!%p11315_p6)
}
  0xde   : > { %s11319_s21 = scalar_lea.vmem %s612_s8, 1024  ;;  %p11327_p11 = scmp.lt.s32.totalorder %s612_s8, %s612_s8 }
  0xdf   : > { %p11320_p8 = scmp.ne.s32.totalorder %s612_s8, %s11319_s21  ;;  %p11328_p12 = scmp.lt.s32.totalorder %s11319_s21, %s11319_s21 }
  0xe1   : > { %p11322_p9 = pnand %p11320_p8, %p11690_p7  ;;  %p11329_p13 = por %p11328_p12, %p11327_p11 }
  0xe3   : > { %p11323_p10 = pneg %p11322_p9 }
  0xe5   : > { %p11330_p0 = pnand %p11329_p13, %p11323_p10 }
  0xe7   : > { %11333 = shalt.err (!%p11330_p0)
}
  0xe8   : > { %10330 = dma.hbm_to_vmem [thread:$0]  (!%p11674_p5), %s17366_s24, 1024, %s612_s8, [#allocation5], %s11519_s6, %s11519_s6, %s11520_s3  }
  0xe9   : > { %s17367_s4 = sld [smem:[#allocation188_spill]] }
  0xef   : > { %s17368_s29 = smov %s17367_s4  ;;  %s11334_s1 = scalar_lea.hbm %s17367_s4, 1024 }
  0xf0   : > { %p11335_p1 = scmp.ne.s32.totalorder %s17368_s29, %s11334_s1  ;;  %p11341_p3 = scmp.lt.u32.totalorder %s11334_s1, %s17368_s29 }
  0xf2   : > { %p11337_p4 = pnand %p11335_p1, %p11690_p7 }
  0xf4   : > { %p11338_p2 = pneg %p11337_p4 }
  0xf6   : > { %p11343_p6 = pnand %p11341_p3, %p11338_p2 }
  0xf8   : > { %11346 = shalt.err (!%p11343_p6)
}
  0xf9   : > { %s11347_s8 = scalar_lea.vmem %s11846_s30, 1024  ;;  %p11355_p11 = scmp.lt.s32.totalorder %s11846_s30, %s11846_s30 }
  0xfa   : > { %p11348_p8 = scmp.ne.s32.totalorder %s11846_s30, %s11347_s8  ;;  %p11356_p12 = scmp.lt.s32.totalorder %s11347_s8, %s11347_s8 }
  0xfc   : > { %p11350_p9 = pnand %p11348_p8, %p11690_p7  ;;  %p11357_p13 = por %p11356_p12, %p11355_p11 }
  0xfe   : > { %p11351_p10 = pneg %p11350_p9 }
 0x100   : > { %p11358_p0 = pnand %p11357_p13, %p11351_p10 }
 0x102   : > { %11361 = shalt.err (!%p11358_p0)
}
 0x103   : > { %10336 = dma.hbm_to_vmem [thread:$0]  (!%p11674_p5), %s17368_s29, 1024, %s11846_s30, [#allocation8], %s11519_s6, %s11519_s6, %s11520_s3  }
 0x104   : > { %s11523_s19 = smov [#allocation12]   ;;  %s11524_s23 = smov [#allocation15]  }
 0x105   : > { %s663_s22 = sshll.u32 %s11523_s19, 4  ;;  %s686_s4 = sshll.u32 %s11524_s23, 4  ;;  %s664_s22 = int_to_ptr.vmem [resolvable:$true] %s663_s22  ;;  %s11895_s4 = int_to_ptr.vmem [resolvable:$true] %s686_s4 }
 0x106   : > { %s11362_s0 = scalar_lea.hbm %s17002_s10, 16 }
 0x107   : > { %p11363_p1 = scmp.ne.s32.totalorder %s17002_s10, %s11362_s0  ;;  %p11369_p3 = scmp.lt.u32.totalorder %s11362_s0, %s17002_s10 }
 0x109   : > { %p11365_p4 = pnand %p11363_p1, %p11690_p7 }
 0x10b   : > { %p11366_p2 = pneg %p11365_p4 }
 0x10d   : > { %p11371_p6 = pnand %p11369_p3, %p11366_p2 }
 0x10f   : > { %11374 = shalt.err (!%p11371_p6)
}
 0x110   : > { %s11375_s3 = scalar_lea.vmem %s664_s22, 16  ;;  %s11382_s30 = scalar_lea.vmem %s664_s22, 32 }
 0x111   : > { %p11376_p8 = scmp.ne.s32.totalorder %s664_s22, %s11375_s3  ;;  %p11383_p11 = scmp.lt.s32.totalorder %s664_s22, %s664_s22 }
 0x112   : > { %p11384_p12 = scmp.lt.s32.totalorder %s11382_s30, %s11375_s3 }
 0x113   : > { %p11378_p9 = pnand %p11376_p8, %p11690_p7 }
 0x114   : > { %p11385_p13 = por %p11384_p12, %p11383_p11 }
 0x115   : > { %p11379_p10 = pneg %p11378_p9 }
 0x117   : > { %p11386_p0 = pnand %p11385_p13, %p11379_p10 }
 0x119   : > { %11389 = shalt.err (!%p11386_p0)
}
 0x11a   : > { %10342 = dma.hbm_to_vmem [thread:$0]  (!%p11674_p5), %s17002_s10, 16, %s664_s22, [#allocation11]  }
 0x11b   : > { %s11390_s28 = scalar_lea.hbm %s17004_s12, 512 }
 0x11c   : > { %p11391_p1 = scmp.ne.s32.totalorder %s17004_s12, %s11390_s28  ;;  %p11397_p3 = scmp.lt.u32.totalorder %s11390_s28, %s17004_s12 }
 0x11e   : > { %p11393_p4 = pnand %p11391_p1, %p11690_p7 }
 0x120   : > { %p11394_p2 = pneg %p11393_p4 }
 0x122   : > { %p11399_p6 = pnand %p11397_p3, %p11394_p2 }
 0x124   : > { %11402 = shalt.err (!%p11399_p6)
}
 0x125   : > { %s11403_s22 = scalar_lea.vmem %s11895_s4, 512  ;;  %p11411_p11 = scmp.lt.s32.totalorder %s11895_s4, %s11895_s4 }
 0x126   : > { %p11404_p8 = scmp.ne.s32.totalorder %s11895_s4, %s11403_s22  ;;  %p11412_p12 = scmp.lt.s32.totalorder %s11403_s22, %s11403_s22 }
 0x128   : > { %p11406_p9 = pnand %p11404_p8, %p11690_p7  ;;  %p11413_p13 = por %p11412_p12, %p11411_p11 }
 0x12a   : > { %p11407_p10 = pneg %p11406_p9 }
 0x12c   : > { %p11414_p0 = pnand %p11413_p13, %p11407_p10 }
 0x12e   : > { %11417 = shalt.err (!%p11414_p0)
}
 0x12f   : > { %s17369_s6 = smov 8   ;;  %s17370_s3 = smov 128  }
 0x130   : > { %10348 = dma.hbm_to_vmem [thread:$0]  (!%p11674_p5), %s17004_s12, 512, %s11895_s4, [#allocation14], %s17370_s3, %s17370_s3, %s17369_s6  }
 0x131   : > { %s11525_s19 = smov [#allocation18]   ;;  %s11526_s1 = smov [#allocation21]  }
 0x132   : > { %s710_s23 = sshll.u32 %s11525_s19, 4  ;;  %s736_s28 = sshll.u32 %s11526_s1, 4  ;;  %s711_s23 = int_to_ptr.vmem [resolvable:$true] %s710_s23  ;;  %s11941_s28 = int_to_ptr.vmem [resolvable:$true] %s736_s28 }
 0x133   : > { %s11418_s8 = scalar_lea.hbm %s17006_s14, 512 }
 0x134   : > { %p11419_p1 = scmp.ne.s32.totalorder %s17006_s14, %s11418_s8  ;;  %p11425_p3 = scmp.lt.u32.totalorder %s11418_s8, %s17006_s14 }
 0x136   : > { %p11421_p4 = pnand %p11419_p1, %p11690_p7 }
 0x138   : > { %p11422_p2 = pneg %p11421_p4 }
 0x13a   : > { %p11427_p6 = pnand %p11425_p3, %p11422_p2 }
 0x13c   : > { %11430 = shalt.err (!%p11427_p6)
}
 0x13d   : > { %s11431_s26 = scalar_lea.vmem %s711_s23, 512  ;;  %p11439_p11 = scmp.lt.s32.totalorder %s711_s23, %s711_s23 }
 0x13e   : > { %p11432_p8 = scmp.ne.s32.totalorder %s711_s23, %s11431_s26  ;;  %p11440_p12 = scmp.lt.s32.totalorder %s11431_s26, %s11431_s26 }
 0x140   : > { %p11434_p9 = pnand %p11432_p8, %p11690_p7  ;;  %p11441_p13 = por %p11440_p12, %p11439_p11 }
 0x142   : > { %p11435_p10 = pneg %p11434_p9 }
 0x144   : > { %p11442_p0 = pnand %p11441_p13, %p11435_p10 }
 0x146   : > { %11445 = shalt.err (!%p11442_p0)
}
 0x147   : > { %10354 = dma.hbm_to_vmem [thread:$0]  (!%p11674_p5), %s17006_s14, 512, %s711_s23, [#allocation17], %s17370_s3, %s17370_s3, %s17369_s6  }
 0x148   : > { %s11446_s8 = scalar_lea.hbm %s17008_s16, 512 }
 0x149   : > { %p11447_p1 = scmp.ne.s32.totalorder %s17008_s16, %s11446_s8  ;;  %p11453_p3 = scmp.lt.u32.totalorder %s11446_s8, %s17008_s16 }
 0x14b   : > { %p11449_p4 = pnand %p11447_p1, %p11690_p7 }
 0x14d   : > { %p11450_p2 = pneg %p11449_p4 }
 0x14f   : > { %p11455_p6 = pnand %p11453_p3, %p11450_p2 }
 0x151   : > { %11458 = shalt.err (!%p11455_p6)
}
 0x152   : > { %s11459_s23 = scalar_lea.vmem %s11941_s28, 512  ;;  %p11467_p11 = scmp.lt.s32.totalorder %s11941_s28, %s11941_s28 }
 0x153   : > { %p11460_p8 = scmp.ne.s32.totalorder %s11941_s28, %s11459_s23  ;;  %p11468_p12 = scmp.lt.s32.totalorder %s11459_s23, %s11459_s23 }
 0x155   : > { %p11462_p9 = pnand %p11460_p8, %p11690_p7  ;;  %p11469_p13 = por %p11468_p12, %p11467_p11 }
 0x157   : > { %p11463_p10 = pneg %p11462_p9 }
 0x159   : > { %p11470_p0 = pnand %p11469_p13, %p11463_p10 }
 0x15b   : > { %11473 = shalt.err (!%p11470_p0)
}
 0x15c   : > { %10360 = dma.hbm_to_vmem [thread:$0]  (!%p11674_p5), %s17008_s16, 512, %s11941_s28, [#allocation20], %s17370_s3, %s17370_s3, %s17369_s6  }
 0x15d   : > { %p17371_p1 = scmp.ne.s32.totalorder %s17359_s5, 0 }
 0x15f   : > { %790 = sbr.rel (%p17371_p1) target bundleno = 3591 (0xe07), region = 108 }
 0x166   : > { %p17372_p7 = scmp.eq.s32.totalorder %s11657_s25, 0 }
 0x168   : > { %11479 = dma.done.wait (%p17372_p7), [#allocation3], 1024   ;;  %p17373_p4 = pmov %p17372_p7 }
 0x16a   : > { %11481 = vsyncadd (%p17373_p4), [#allocation3], 4294966272  ;;  %p17374_p2 = pmov %p17373_p4 }
 0x16c   : > { %11483 = dma.done.wait (%p17374_p2), [#allocation5], 1040   ;;  %p17375_p3 = pmov %p17374_p2 }
 0x16d   : > { %p17376_p6 = pmov %p17374_p2 }
 0x16e   : > { %11485 = vsyncadd (%p17375_p3), [#allocation5], 4294966256 }
 0x16f   : > { %11487 = dma.done.wait (%p17376_p6), [#allocation8], 1040   ;;  %p17377_p5 = pmov %p17374_p2 }
 0x170   : > { %p17378_p8 = pmov %p17374_p2 }
 0x171   : > { %11489 = vsyncadd (%p17377_p5), [#allocation8], 4294966256 }
 0x172   : > { %11491 = dma.done.wait (%p17378_p8), [#allocation11], 32   ;;  %p17379_p9 = pmov %p17374_p2 }
 0x173   : > { %p17380_p10 = pmov %p17374_p2 }
 0x174   : > { %11493 = vsyncadd (%p17379_p9), [#allocation11], 4294967264 }
 0x175   : > { %11495 = dma.done.wait (%p17380_p10), [#allocation14], 1024   ;;  %p17381_p11 = pmov %p17374_p2 }
 0x176   : > { %p17382_p12 = pmov %p17374_p2 }
 0x177   : > { %11497 = vsyncadd (%p17381_p11), [#allocation14], 4294966272 }
 0x178   : > { %11499 = dma.done.wait (%p17382_p12), [#allocation17], 528   ;;  %p17383_p13 = pmov %p17374_p2 }
 0x179   : > { %p17384_p0 = pmov %p17374_p2 }
 0x17a   : > { %11501 = vsyncadd (%p17383_p13), [#allocation17], 4294966768 }
 0x17b   : > { %11503 = dma.done.wait (%p17384_p0), [#allocation20], 1024   ;;  %p17385_p1 = pmov %p17384_p0 }
 0x17c   : > { %v17031_v0 = vlaneseq  ;;  %v11527_v1 = vmov 0   ;;  %v11528_v2 = vmov 1966171168   ;;  %v11529_v4 = vmov 0.0   ;;  %v12030_v8 = vld [vmem:[#allocation18 + $0x10] sm:$0xff]  ;;  %v1169_v10 = vld [vmem:[#allocation18] sm:$0xff] }
 0x17d   : > { %11505 = vsyncadd (%p17385_p1), [#allocation20], 4294966272  ;;  %10417 = vset.pattern.permute.xlu1 %v11527_v1  ;;  %10416 = vset.pattern.permute.xlu0 %v11527_v1  ;;  %v1214_v3 = vunpack.c.l.s4 %v11528_v2  ;;  %vm11530_vm0 = vmmov 0   ;;  %v12032_v9 = vld [vmem:[#allocation19 + $0x10] sm:$0xff]  ;;  %v12036_v12 = vld [vmem:[#allocation19] sm:$0xff]  ;;  %v2508_v14 = vcombine.high %v1169_v10, %v1169_v10  ;;  %p915_p7 = scmp.lt.s32.totalorder %s11657_s25, 1 }
 0x17e   : > { %10041 = vmatprep.subr.bf16.mxu0 %v11529_v4  ;;  %10061 = vmatprep.subr.bf16.mxu1 %v11529_v4  ;;  %v12023_v5 = vshrl.u32 %v17031_v0, 7  ;;  %v1179_v11 = vadd.f32 %v12032_v9, %v12030_v8  ;;  %v1177_v13 = vadd.f32 %v12036_v12, %v1169_v10  ;;  %v10422_v15 = vld [vmem:[#allocation2] sm:$0xff]   ;;  %v12047_v22 = vld [vmem:[#allocation18 + $0x8] sm:$0xff]  ;;  %v10428_v24 = vld [vmem:[#allocation2 + $0x8] sm:$0xff]   ;;  %s17388_s6 = sld [smem:[#allocation181_spill]]  ;;  %s17389_s0 = sld [smem:[#allocation182_spill]] }
 0x17f   : > { %v1215_v6 = vunpack.c.0.s8 %v1214_v3  ;;  %10057 = vmatprep.mubr.msk.bf16.mxu0 %vm11530_vm0, %v11529_v4  ;;  %10077 = vmatprep.mubr.msk.bf16.mxu1 %vm11530_vm0, %v11529_v4  ;;  %v10423_v17 = vld [vmem:[#allocation6] sm:$0xff]   ;;  %v12049_v23 = vld [vmem:[#allocation19 + $0x8] sm:$0xff]  ;;  %v10429_v27 = vld [vmem:[#allocation6 + $0x8] sm:$0xff]   ;;  %s18151_s25 = smov (!%p915_p7, %s11657_s25), 1  ;;  %v2557_v45 = vcombine.high %v12047_v22, %v12047_v22  ;;  %vm4868_vm1 = vcmask 130112   ;;  %vm4875_vm2 = vcmask 195712  }
 0x180   : > { %17386 = vst [vmem:[#allocation30_spill] sm:$0xff] %v12023_v5  ;;  %1193 = vperm.xlu1 %10417, %v1179_v11   ;;  %v12040_v18 = vld [vmem:[#allocation18 + $0x18] sm:$0xff]  ;;  %1183 = vperm.xlu0 %10416, %v1177_v13   ;;  %v12053_v25 = vsub.s32 0, %v12023_v5  ;;  %v1178_v26 = vadd.f32 %v12049_v23, %v12047_v22  ;;  %v10430_v30 = vld [vmem:[#allocation2 + $0x10] sm:$0xff]   ;;  %v10432_v39 = vld [vmem:[#allocation2 + $0x18] sm:$0xff]   ;;  %s9884_s5 = sshll.u32 %s18151_s25, 4 }
 0x181   : > { %v12028_v7 = vsub.s32 %v1215_v6, %v12023_v5  ;;  %v12042_v19 = vld [vmem:[#allocation19 + $0x18] sm:$0xff]  ;;  %10042 = vmatpush3.bf16.msra.mxu0 %v10422_v15  ;;  %10062 = vmatpush3.bf16.msra.mxu1 %v10423_v17  ;;  %v10431_v34 = vld [vmem:[#allocation6 + $0x10] sm:$0xff]   ;;  %v10433_v43 = vld [vmem:[#allocation6 + $0x18] sm:$0xff]   ;;  %vm4882_vm3 = vcmask 261312   ;;  %vm5473_vm4 = vcmask 1041409   ;;  %vm5475_vm5 = vcmask 1042434  }
 0x182   : > { %v1180_v21 = vadd.f32 %v12042_v19, %v12040_v18  ;;  %10043 = vmatprep.subr.bf16.mxu0 %v11529_v4  ;;  %17387 = vst [vmem:[#allocation31_spill] sm:$0xff] %v12053_v25  ;;  %10063 = vmatprep.subr.bf16.mxu1 %v11529_v4  ;;  %v10434_v47 = vld [vmem:[#allocation2 + $0x20] sm:$0xff]   ;;  %v10436_v53 = vld [vmem:[#allocation2 + $0x28] sm:$0xff]   ;;  %v10438_v60 = vld [vmem:[#allocation2 + $0x30] sm:$0xff]   ;;  %vm5477_vm6 = vcmask 1043459   ;;  %vm5479_vm7 = vcmask 1044484  }
 0x183   : > { %v2515_v16 = vrot.slane %v1169_v10, %v12028_v7  ;;  %v2522_v20 = vrot.slane %v2508_v14, %v12028_v7  ;;  %v2564_v41 = vrot.slane %v12047_v22, %v12028_v7  ;;  %v10435_v50 = vld [vmem:[#allocation6 + $0x20] sm:$0xff]   ;;  %v10437_v54 = vld [vmem:[#allocation6 + $0x28] sm:$0xff]   ;;  %v2571_v59 = vrot.slane %v2557_v45, %v12028_v7  ;;  %v10439_v61 = vld [vmem:[#allocation6 + $0x30] sm:$0xff]   ;;  %s9801_s4 = sshll.u32 %s18151_s25, 3  ;;  %s18137_s19 = sld [smem:[#allocation183_spill]] }
 0x184   : > { %1198 = vperm.xlu1 %10417, %v1180_v21   ;;  %1188 = vperm.xlu0 %10416, %v1178_v26   ;;  %s919_s3 = scalar_lea.vmem %s17388_s6, %s9884_s5  ;;  %s924_s21 = scalar_lea.vmem %s17389_s0, %s9884_s5  ;;  %v10440_v6 = vld [vmem:[#allocation2 + $0x38] sm:$0xff]   ;;  %vm5481_vm8 = vcmask 1045509   ;;  %vm5483_vm9 = vcmask 1046534   ;;  %vm5485_vm10 = vcmask 1047559   ;;  %vm5512_vm11 = vcmask 261120  }
 0x185   : > { %v2523_v28 = vcombine.high %v2515_v16, %v2515_v16  ;;  %v2531_v29 = vrot.slane %v2515_v16, %v12028_v7  ;;  %10044 = vmatpush3.bf16.msra.mxu0 %v10428_v24  ;;  %v2524_v31 = vcombine.high %v2522_v20, %v2522_v20  ;;  %10064 = vmatpush3.bf16.msra.mxu1 %v10429_v27  ;;  %v939_v10 = vld [vmem:[%s919_s3] sm:$0xff]  ;;  %v940_v11 = vld [vmem:[%s919_s3 + $0x8] sm:$0xff]  ;;  %vm9055_vm12 = vcmask 7168   ;;  %s18145_s8 = sld [smem:[#allocation190_spill]]  ;;  %s9886_s7 = sshll.u32 %s18151_s25, 5 }
 0x186   : > { %10045 = vmatprep.subr.bf16.mxu0 %v11529_v4  ;;  %10065 = vmatprep.subr.bf16.mxu1 %v11529_v4  ;;  %v2538_v40 = vrot.slane %v2522_v20, %v12028_v7  ;;  %v2572_v52 = vcombine.high %v2564_v41, %v2564_v41  ;;  %v2580_v56 = vrot.slane %v2564_v41, %v12028_v7  ;;  %v10441_v13 = vld [vmem:[#allocation6 + $0x38] sm:$0xff]   ;;  %v1055_v15 = vld [vmem:[%s924_s21 + $0x8] sm:$0xff]  ;;  %s18146_s23 = sld [smem:[#allocation192_spill]]  ;;  %s18148_s30 = sld [smem:[#allocation193_spill]] }
 0x187   : > { %v2545_v32 = vrot.slane %v2523_v28, %v12028_v7  ;;  %v2711_v33 = vrot.slane %v2531_v29, %v12053_v25  ;;  %v2553_v35 = vcombine.high %v2531_v29, %v2531_v29  ;;  %v2552_v44 = vrot.slane %v2524_v31, %v12028_v7  ;;  %v1054_v14 = vld [vmem:[%s924_s21] sm:$0xff] }
 0x188   : > { %v2727_v46 = vrot.slane %v2538_v40, %v12053_v25  ;;  %v2554_v48 = vcombine.high %v2538_v40, %v2538_v40  ;;  %v2594_v58 = vrot.slane %v2572_v52, %v12028_v7  ;;  %v2743_v62 = vrot.slane %v2580_v56, %v12053_v25 }
 0x189   : > { %v2715_v36 = vrot.slane %v2545_v32, %v12053_v25  ;;  %v2555_v37 = vcombine.high %v2545_v32, %v2545_v32  ;;  %2837 = vperm.xlu0 %10416, %v2711_v33   ;;  %10046 = vmatpush3.bf16.msra.mxu0 %v10430_v30  ;;  %v2719_v38 = vrot.slane %v2553_v35, %v12053_v25  ;;  %s928_s5 = scalar_lea.vmem %s18137_s19, %s9801_s4 }
 0x18a   : > { %10066 = vmatpush3.bf16.msra.mxu1 %v10431_v34  ;;  %10047 = vmatprep.subr.bf16.mxu0 %v11529_v4  ;;  %v2731_v49 = vrot.slane %v2552_v44, %v12053_v25  ;;  %v2556_v51 = vcombine.high %v2552_v44, %v2552_v44  ;;  %v2735_v55 = vrot.slane %v2554_v48, %v12053_v25 }
 0x18b   : > { %2841 = vperm.xlu1 %10417, %v2715_v36   ;;  %v2723_v42 = vrot.slane %v2555_v37, %v12053_v25  ;;  %10067 = vmatprep.subr.bf16.mxu1 %v11529_v4  ;;  %v2602_v63 = vcombine.high %v2580_v56, %v2580_v56  ;;  %v2747_v1 = vrot.slane %v2594_v58, %v12053_v25 }
 0x18c   : > { %v2739_v57 = vrot.slane %v2556_v51, %v12053_v25  ;;  %v2604_v2 = vcombine.high %v2594_v58, %v2594_v58  ;;  %v2573_v3 = vcombine.high %v2571_v59, %v2571_v59  ;;  %v2587_v17 = vrot.slane %v2571_v59, %v12028_v7  ;;  %s933_s26 = scalar_lea.vmem %s18146_s23, %s9886_s7  ;;  %s937_s23 = scalar_lea.vmem %s18148_s30, %s9801_s4 }
 0x18d   : > { %2845 = vperm.xlu0 %10416, %v2719_v38   ;;  %10048 = vmatpush3.bf16.msra.mxu0 %v10432_v39  ;;  %v2751_v16 = vrot.slane %v2602_v63, %v12053_v25  ;;  %v2613_v20 = vrot.slane %v12030_v8, %v12028_v7  ;;  %v2606_v24 = vcombine.high %v12030_v8, %v12030_v8 }
 0x18e   : > { %10068 = vmatpush3.bf16.msra.mxu1 %v10433_v43  ;;  %10049 = vmatprep.subr.bf16.mxu0 %v11529_v4  ;;  %v2755_v21 = vrot.slane %v2604_v2, %v12053_v25  ;;  %v2601_v22 = vrot.slane %v2573_v3, %v12028_v7  ;;  %v941_v26 = vpack.c.bf16 %v940_v11, %v939_v10 }
 0x18f   : > { %2849 = vperm.xlu1 %10417, %v2723_v42   ;;  %10069 = vmatprep.subr.bf16.mxu1 %v11529_v4  ;;  %v1056_v27 = vpack.c.bf16 %v1055_v15, %v1054_v14  ;;  %v2759_v28 = vrot.slane %v2587_v17, %v12053_v25  ;;  %v2603_v29 = vcombine.high %v2587_v17, %v2587_v17 }
 0x190   : > { %v2763_v30 = vrot.slane %v2601_v22, %v12053_v25  ;;  %v2605_v31 = vcombine.high %v2601_v22, %v2601_v22  ;;  %v2621_v32 = vcombine.high %v2613_v20, %v2613_v20  ;;  %v2629_v8 = vrot.slane %v2613_v20, %v12028_v7 }
 0x191   : > { %2853 = vperm.xlu0 %10416, %v2727_v46   ;;  %10050 = vmatpush3.bf16.msra.mxu0 %v10434_v47  ;;  %v2620_v33 = vrot.slane %v2606_v24, %v12028_v7  ;;  %v2662_v43 = vrot.slane %v12040_v18, %v12028_v7  ;;  %v2655_v48 = vcombine.high %v12040_v18, %v12040_v18 }
 0x192   : > { %10070 = vmatpush3.bf16.msra.mxu1 %v10435_v50  ;;  %10051 = vmatprep.subr.bf16.mxu0 %v11529_v4  ;;  %v2771_v34 = vrot.slane %v2605_v31, %v12053_v25  ;;  %v2643_v35 = vrot.slane %v2621_v32, %v12028_v7  ;;  %v2775_v36 = vrot.slane %v2629_v8, %v12053_v25 }
 0x193   : > { %2857 = vperm.xlu1 %10417, %v2731_v49   ;;  %10071 = vmatprep.subr.bf16.mxu1 %v11529_v4  ;;  %v2651_v37 = vcombine.high %v2629_v8, %v2629_v8  ;;  %v2622_v40 = vcombine.high %v2620_v33, %v2620_v33  ;;  %v2636_v42 = vrot.slane %v2620_v33, %v12028_v7 }
 0x194   : > { %v2779_v38 = vrot.slane %v2643_v35, %v12053_v25  ;;  %v2653_v39 = vcombine.high %v2643_v35, %v2643_v35  ;;  %v2670_v51 = vcombine.high %v2662_v43, %v2662_v43  ;;  %v2669_v56 = vrot.slane %v2655_v48, %v12028_v7 }
 0x195   : > { %2861 = vperm.xlu0 %10416, %v2735_v55   ;;  %10052 = vmatpush3.bf16.msra.mxu0 %v10436_v53  ;;  %v2783_v41 = vrot.slane %v2651_v37, %v12053_v25  ;;  %v2650_v45 = vrot.slane %v2622_v40, %v12028_v7  ;;  %v2791_v46 = vrot.slane %v2636_v42, %v12053_v25 }
 0x196   : > { %10072 = vmatpush3.bf16.msra.mxu1 %v10437_v54  ;;  %10053 = vmatprep.subr.bf16.mxu0 %v11529_v4  ;;  %v2787_v44 = vrot.slane %v2653_v39, %v12053_v25  ;;  %v2652_v47 = vcombine.high %v2636_v42, %v2636_v42  ;;  %v2678_v53 = vrot.slane %v2662_v43, %v12028_v7 }
 0x197   : > { %2865 = vperm.xlu1 %10417, %v2739_v57   ;;  %10073 = vmatprep.subr.bf16.mxu1 %v11529_v4  ;;  %v2795_v49 = vrot.slane %v2650_v45, %v12053_v25  ;;  %v2654_v50 = vcombine.high %v2650_v45, %v2650_v45  ;;  %v2692_v55 = vrot.slane %v2670_v51, %v12028_v7 }
 0x198   : > { %v2799_v52 = vrot.slane %v2652_v47, %v12053_v25  ;;  %v2807_v18 = vrot.slane %v2678_v53, %v12053_v25  ;;  %v2700_v57 = vcombine.high %v2678_v53, %v2678_v53  ;;  %v3103_v63 = vrot.slane %v12036_v12, %v12028_v7  ;;  %v10442_v53 = vld [vmem:[#allocation9] sm:$0xff]  }
 0x199   : > { %2869 = vperm.xlu0 %10416, %v2743_v62   ;;  %10054 = vmatpush3.bf16.msra.mxu0 %v10438_v60  ;;  %v2803_v54 = vrot.slane %v2654_v50, %v12053_v25  ;;  %v2811_v58 = vrot.slane %v2692_v55, %v12053_v25  ;;  %v2702_v59 = vcombine.high %v2692_v55, %v2692_v55 }
 0x19a   : > { %10074 = vmatpush3.bf16.msra.mxu1 %v10439_v61  ;;  %10055 = vmatprep.subr.bf16.mxu0 %v11529_v4  ;;  %v2671_v60 = vcombine.high %v2669_v56, %v2669_v56  ;;  %v2815_v61 = vrot.slane %v2700_v57, %v12053_v25  ;;  %v2685_v62 = vrot.slane %v2669_v56, %v12028_v7 }
 0x19b   : > { %2873 = vperm.xlu1 %10417, %v2747_v1   ;;  %10075 = vmatprep.subr.bf16.mxu1 %v11529_v4  ;;  %v2767_v4 = vrot.slane %v2603_v29, %v12053_v25  ;;  %v2819_v1 = vrot.slane %v2702_v59, %v12053_v25  ;;  %v3096_v10 = vcombine.high %v12036_v12, %v12036_v12  ;;  %v10443_v59 = vld [vmem:[#allocation9 + $0x8] sm:$0xff]  }
 0x19c   : > { %v2699_v2 = vrot.slane %v2671_v60, %v12028_v7  ;;  %v2823_v3 = vrot.slane %v2685_v62, %v12053_v25  ;;  %v3111_v14 = vcombine.high %v3103_v63, %v3103_v63  ;;  %v3145_v33 = vcombine.high %v12049_v23, %v12049_v23 }
 0x19d   : > { %2877 = vperm.xlu0 %10416, %v2751_v16   ;;  %10056 = vmatpush3.bf16.msra.mxu0 %v10440_v6  ;;  %v2701_v6 = vcombine.high %v2685_v62, %v2685_v62  ;;  %v3119_v16 = vrot.slane %v3103_v63, %v12028_v7  ;;  %v3110_v17 = vrot.slane %v3096_v10, %v12028_v7 }
 0x19e   : > { %10076 = vmatpush3.bf16.msra.mxu1 %v10441_v13  ;;  %v2827_v11 = vrot.slane %v2699_v2, %v12053_v25  ;;  %v2703_v13 = vcombine.high %v2699_v2, %v2699_v2  ;;  %v3201_v48 = vrot.slane %v12032_v9, %v12028_v7  ;;  %10081 = vmatprep.subr.bf16.mxu0 %v10442_v53 }
 0x19f   : > { %2881 = vperm.xlu1 %10417, %v2755_v21   ;;  %v2831_v15 = vrot.slane %v2701_v6, %v12053_v25  ;;  %v3133_v21 = vrot.slane %v3111_v14, %v12028_v7  ;;  %v3299_v12 = vrot.slane %v3119_v16, %v12053_v25  ;;  %v3141_v22 = vcombine.high %v3119_v16, %v3119_v16 }
 0x1a0   : > { %10058 = vmatmul.mubr.bf16.vlgmr.msra.gmra.mrb[0].mxu0 %v941_v26  ;;  %v2835_v20 = vrot.slane %v2703_v13, %v12053_v25  ;;  %v3126_v29 = vrot.slane %v3110_v17, %v12028_v7  ;;  %10253 = vmatprep.subr.bf16.mxu1 %v10442_v53  ;;  %v10445_v13 = vld [vmem:[#allocation9 + $0x18] sm:$0xff]   ;;  %v3250_v14 = vrot.slane %v12042_v19, %v12028_v7 }
 0x1a1   : > { %10078 = vmatmul.mubr.bf16.vlgmr.msra.gmra.mrb[0].mxu1 %v1056_v27  ;;  %2885 = vperm.xlu0 %10416, %v2759_v28   ;;  %v3303_v24 = vrot.slane %v3133_v21, %v12053_v25  ;;  %v3143_v26 = vcombine.high %v3133_v21, %v3133_v21  ;;  %v3112_v27 = vcombine.high %v3110_v17, %v3110_v17  ;;  %v10446_v21 = vld [vmem:[#allocation9 + $0x20] sm:$0xff]  }
 0x1a2   : > { %v3307_v28 = vrot.slane %v3141_v22, %v12053_v25  ;;  %v3142_v8 = vcombine.high %v3126_v29, %v3126_v29  ;;  %10261 = vmatpush3.bf16.msra.mxu1 %v10442_v53  ;;  %10082 = vmatpush3.bf16.msra.mxu0 %v10442_v53 }
 0x1a3   : > { %2889 = vperm.xlu1 %10417, %v2763_v30   ;;  %v3152_v30 = vrot.slane %v12049_v23, %v12028_v7  ;;  %v3311_v31 = vrot.slane %v3143_v26, %v12053_v25  ;;  %v3140_v32 = vrot.slane %v3112_v27, %v12028_v7  ;;  %10254 = vmatprep.subr.bf16.mxu1 %v10443_v59 }
 0x1a4   : > { %v3323_v37 = vrot.slane %v3142_v8, %v12053_v25  ;;  %10083 = vmatprep.subr.bf16.mxu0 %v10443_v59  ;;  %v3258_v26 = vcombine.high %v3250_v14, %v3250_v14 }
 0x1a5   : > { %2893 = vperm.xlu0 %10416, %v2767_v4   ;;  %v3315_v4 = vrot.slane %v3126_v29, %v12053_v25  ;;  %v3144_v35 = vcombine.high %v3140_v32, %v3140_v32  ;;  %v10447_v29 = vld [vmem:[#allocation9 + $0x28] sm:$0xff]  }
 0x1a6   : > { %10262 = vmatpush3.bf16.msra.mxu1 %v10443_v59  ;;  %10084 = vmatpush3.bf16.msra.mxu0 %v10443_v59 }
 0x1a7   : > { %2897 = vperm.xlu1 %10417, %v2771_v34   ;;  %v3319_v34 = vrot.slane %v3140_v32, %v12053_v25  ;;  %v3327_v39 = vrot.slane %v3144_v35, %v12053_v25  ;;  %v10448_v35 = vld [vmem:[#allocation9 + $0x30] sm:$0xff]  }
 0x1a9   : > { %2901 = vperm.xlu0 %10416, %v2775_v36   ;;  %v3160_v36 = vcombine.high %v3152_v30, %v3152_v30 }
 0x1ab   : > { %2905 = vperm.xlu1 %10417, %v2779_v38   ;;  %v3168_v38 = vrot.slane %v3152_v30, %v12028_v7  ;;  %v3182_v40 = vrot.slane %v3160_v36, %v12028_v7 }
 0x1ad   : > { %2909 = vperm.xlu0 %10416, %v2783_v41   ;;  %v3159_v41 = vrot.slane %v3145_v33, %v12028_v7  ;;  %v3331_v23 = vrot.slane %v3168_v38, %v12053_v25  ;;  %v3190_v42 = vcombine.high %v3168_v38, %v3168_v38  ;;  %v3335_v43 = vrot.slane %v3182_v40, %v12053_v25 }
 0x1af   : > { %2913 = vperm.xlu1 %10417, %v2787_v44   ;;  %v3192_v44 = vcombine.high %v3182_v40, %v3182_v40  ;;  %v3161_v45 = vcombine.high %v3159_v41, %v3159_v41  ;;  %v3175_v47 = vrot.slane %v3159_v41, %v12028_v7  ;;  %v10449_v40 = vld [vmem:[#allocation9 + $0x38] sm:$0xff]  }
 0x1b1   : > { %2917 = vperm.xlu0 %10416, %v2791_v46   ;;  %v3339_v46 = vrot.slane %v3190_v42, %v12053_v25  ;;  %v3189_v50 = vrot.slane %v3161_v45, %v12028_v7  ;;  %v3347_v51 = vrot.slane %v3175_v47, %v12053_v25 }
 0x1b3   : > { %2921 = vperm.xlu1 %10417, %v2795_v49   ;;  %v3343_v49 = vrot.slane %v3192_v44, %v12053_v25  ;;  %v3351_v55 = vrot.slane %v3189_v50, %v12053_v25  ;;  %v3193_v56 = vcombine.high %v3189_v50, %v3189_v50 }
 0x1b5   : > { %2925 = vperm.xlu0 %10416, %v2799_v52   ;;  %v3191_v52 = vcombine.high %v3175_v47, %v3175_v47 }
 0x1b7   : > { %2929 = vperm.xlu1 %10417, %v2803_v54   ;;  %v3194_v54 = vcombine.high %v12032_v9, %v12032_v9  ;;  %v3355_v57 = vrot.slane %v3191_v52, %v12053_v25  ;;  %v3359_v9 = vrot.slane %v3193_v56, %v12053_v25 }
 0x1b9   : > { %2933 = vperm.xlu0 %10416, %v2807_v18   ;;  %v3209_v18 = vcombine.high %v3201_v48, %v3201_v48  ;;  %v3208_v60 = vrot.slane %v3194_v54, %v12028_v7 }
 0x1bb   : > { %2937 = vperm.xlu1 %10417, %v2811_v58   ;;  %v3217_v58 = vrot.slane %v3201_v48, %v12028_v7  ;;  %v3210_v6 = vcombine.high %v3208_v60, %v3208_v60  ;;  %v9814_v48 = vld [vmem:[#allocation7] ss:$0 sm:$0xff] }
 0x1bd   : > { %2941 = vperm.xlu0 %10416, %v2815_v61   ;;  %v3231_v61 = vrot.slane %v3209_v18, %v12028_v7  ;;  %v3363_v62 = vrot.slane %v3217_v58, %v12053_v25  ;;  %v3239_v63 = vcombine.high %v3217_v58, %v3217_v58  ;;  %v3238_v16 = vrot.slane %v3210_v6, %v12028_v7 }
 0x1bf   : > { %2945 = vperm.xlu1 %10417, %v2819_v1   ;;  %v10444_v1 = vld [vmem:[#allocation9 + $0x10] sm:$0xff]   ;;  %v3367_v2 = vrot.slane %v3231_v61, %v12053_v25  ;;  %v3371_v10 = vrot.slane %v3239_v63, %v12053_v25  ;;  %v3383_v22 = vrot.slane %v3238_v16, %v12053_v25 }
 0x1c0   : > { %10255 = vmatprep.subr.bf16.mxu1 %v10444_v1  ;;  %10085 = vmatprep.subr.bf16.mxu0 %v10444_v1 }
 0x1c1   : > { %2949 = vperm.xlu0 %10416, %v2823_v3   ;;  %v3241_v3 = vcombine.high %v3231_v61, %v3231_v61  ;;  %10263 = vmatpush3.bf16.msra.mxu1 %v10444_v1 }
 0x1c2   : > { %10086 = vmatpush3.bf16.msra.mxu0 %v10444_v1  ;;  %10256 = vmatprep.subr.bf16.mxu1 %v10445_v13 }
 0x1c3   : > { %2953 = vperm.xlu1 %10417, %v2827_v11   ;;  %v3224_v11 = vrot.slane %v3208_v60, %v12028_v7  ;;  %10087 = vmatprep.subr.bf16.mxu0 %v10445_v13 }
 0x1c5   : > { %2957 = vperm.xlu0 %10416, %v2831_v15   ;;  %v3375_v15 = vrot.slane %v3241_v3, %v12053_v25  ;;  %10264 = vmatpush3.bf16.msra.mxu1 %v10445_v13  ;;  %v3379_v17 = vrot.slane %v3224_v11, %v12053_v25 }
 0x1c6   : > { %10088 = vmatpush3.bf16.msra.mxu0 %v10445_v13  ;;  %10257 = vmatprep.subr.bf16.mxu1 %v10446_v21 }
 0x1c7   : > { %2961 = vperm.xlu1 %10417, %v2835_v20   ;;  %v3240_v20 = vcombine.high %v3224_v11, %v3224_v11  ;;  %10089 = vmatprep.subr.bf16.mxu0 %v10446_v21 }
 0x1c9   : > { %3425 = vperm.xlu0 %10416, %v3299_v12   ;;  %v3243_v12 = vcombine.high %v12042_v19, %v12042_v19  ;;  %10265 = vmatpush3.bf16.msra.mxu1 %v10446_v21  ;;  %v3387_v27 = vrot.slane %v3240_v20, %v12053_v25  ;;  %v3280_v19 = vrot.slane %v3258_v26, %v12028_v7 }
 0x1ca   : > { %10090 = vmatpush3.bf16.msra.mxu0 %v10446_v21  ;;  %10258 = vmatprep.subr.bf16.mxu1 %v10447_v29 }
 0x1cb   : > { %3429 = vperm.xlu1 %10417, %v3303_v24   ;;  %v3242_v24 = vcombine.high %v3238_v16, %v3238_v16  ;;  %10091 = vmatprep.subr.bf16.mxu0 %v10447_v29  ;;  %v3399_v8 = vrot.slane %v3280_v19, %v12053_v25  ;;  %v3290_v33 = vcombine.high %v3280_v19, %v3280_v19 }
 0x1cd   : > { %3433 = vperm.xlu0 %10416, %v3307_v28   ;;  %v3266_v28 = vrot.slane %v3250_v14, %v12028_v7  ;;  %v3391_v30 = vrot.slane %v3242_v24, %v12053_v25  ;;  %10266 = vmatpush3.bf16.msra.mxu1 %v10447_v29  ;;  %v3407_v38 = vrot.slane %v3290_v33, %v12053_v25 }
 0x1ce   : > { %10092 = vmatpush3.bf16.msra.mxu0 %v10447_v29  ;;  %10259 = vmatprep.subr.bf16.mxu1 %v10448_v35 }
 0x1cf   : > { %3437 = vperm.xlu1 %10417, %v3311_v31   ;;  %v3257_v31 = vrot.slane %v3243_v12, %v12028_v7  ;;  %v3395_v32 = vrot.slane %v3266_v28, %v12053_v25  ;;  %10093 = vmatprep.subr.bf16.mxu0 %v10448_v35 }
 0x1d1   : > { %3441 = vperm.xlu0 %10416, %v3315_v4   ;;  %v3288_v4 = vcombine.high %v3266_v28, %v3266_v28  ;;  %10267 = vmatpush3.bf16.msra.mxu1 %v10448_v35 }
 0x1d2   : > { %10094 = vmatpush3.bf16.msra.mxu0 %v10448_v35  ;;  %10260 = vmatprep.subr.bf16.mxu1 %v10449_v40 }
 0x1d3   : > { %3445 = vperm.xlu1 %10417, %v3319_v34   ;;  %v3259_v34 = vcombine.high %v3257_v31, %v3257_v31  ;;  %v3403_v36 = vrot.slane %v3288_v4, %v12053_v25  ;;  %10095 = vmatprep.subr.bf16.mxu0 %v10449_v40 }
 0x1d5   : > { %3449 = vperm.xlu0 %10416, %v3323_v37   ;;  %v3273_v37 = vrot.slane %v3257_v31, %v12028_v7  ;;  %10268 = vmatpush3.bf16.msra.mxu1 %v10449_v40 }
 0x1d6   : > { %10096 = vmatpush3.bf16.msra.mxu0 %v10449_v40 }
 0x1d7   : > { %3453 = vperm.xlu1 %10417, %v3327_v39   ;;  %v3287_v39 = vrot.slane %v3259_v34, %v12028_v7  ;;  %v3411_v41 = vrot.slane %v3273_v37, %v12053_v25 }
 0x1d9   : > { %3457 = vperm.xlu0 %10416, %v3331_v23   ;;  %v3289_v23 = vcombine.high %v3273_v37, %v3273_v37  ;;  %v3415_v42 = vrot.slane %v3287_v39, %v12053_v25 }
 0x1db   : > { %3461 = vperm.xlu1 %10417, %v3335_v43   ;;  %v3291_v43 = vcombine.high %v3287_v39, %v3287_v39  ;;  %v3419_v44 = vrot.slane %v3289_v23, %v12053_v25 }
 0x1dd   : > { %3465 = vperm.xlu0 %10416, %v3339_v46   ;;  %v3423_v45 = vrot.slane %v3291_v43, %v12053_v25  ;;  %v9805_v46 = vld [vmem:[#allocation4] ss:$0 sm:$0xff] }
 0x1df   : > { %3469 = vperm.xlu1 %10417, %v3343_v49  }
 0x1e1   : > { %3473 = vperm.xlu0 %10416, %v3347_v51  }
 0x1e3   : > { %3477 = vperm.xlu1 %10417, %v3351_v55  }
 0x1e5   : > { %3481 = vperm.xlu0 %10416, %v3355_v57  }
 0x1e7   : > { %3485 = vperm.xlu1 %10417, %v3359_v9  }
 0x1e9   : > { %3489 = vperm.xlu0 %10416, %v3363_v62  }
 0x1eb   : > { %3493 = vperm.xlu1 %10417, %v3367_v2  }
 0x1ed   : > { %3497 = vperm.xlu0 %10416, %v3371_v10  }
 0x1ef   : > { %3501 = vperm.xlu1 %10417, %v3375_v15  }
 0x1f1   : > { %3505 = vperm.xlu0 %10416, %v3379_v17  }
 0x1f3   : > { %3509 = vperm.xlu1 %10417, %v3383_v22  }
 0x1f5   : > { %3513 = vperm.xlu0 %10416, %v3387_v27  }
 0x1f7   : > { %3517 = vperm.xlu1 %10417, %v3391_v30  }
 0x1f9   : > { %3521 = vperm.xlu0 %10416, %v3395_v32  }
 0x1fb   : > { %3525 = vperm.xlu1 %10417, %v3399_v8  }
 0x1fd   : > { %3529 = vperm.xlu0 %10416, %v3403_v36  }
 0x1ff   : > { %3533 = vperm.xlu1 %10417, %v3407_v38   ;;  %v1184_v47 = vpop.permute.xlu0 %1183  ;;  %v1194_v49 = vpop.permute.xlu1 %1193 }
 0x201   : > { %3537 = vperm.xlu0 %10416, %v3411_v41  }
 0x203   : > { %3541 = vperm.xlu1 %10417, %v3415_v42   ;;  %v1189_v9 = vpop.permute.xlu0 %1188  ;;  %v1199_v1 = vpop.permute.xlu1 %1198 }
 0x205   : > { %3545 = vperm.xlu0 %10416, %v3419_v44  }
 0x207   : > { %3549 = vperm.xlu1 %10417, %v3423_v45  }
 0x273   : > { %v1047_v50 = vpop.f32.mrb[0].mxu0 }
 0x274   : > { %v1048_v51 = vadd.f32 %v9805_v46, %v1047_v50  ;;  %v1162_v52 = vpop.f32.mrb[0].mxu1  ;;  %v10059_v54 = vpop.f32.mrb[1].mxu0 }
 0x275   : > { %v1163_v53 = vadd.f32 %v9814_v48, %v1162_v52  ;;  %v10079_v56 = vpop.f32.mrb[1].mxu1  ;;  %v1050_v18 = vpop.f32.mrb[2].mxu0 }
 0x276   : > { %v12214_v55 = vmul.f32 %v1184_v47, %v1048_v51  ;;  %v1051_v58 = vadd.f32 %v9805_v46, %v1050_v18  ;;  %v1165_v59 = vpop.f32.mrb[2].mxu1  ;;  %v10060_v60 = vpop.f32.mrb[3].mxu0 }
 0x277   : > { %v12216_v57 = vmul.f32 %v1194_v49, %v1163_v53  ;;  %v1166_v61 = vadd.f32 %v9814_v48, %v1165_v59  ;;  %v10080_v62 = vpop.f32.mrb[3].mxu1 }
 0x278   : > { %17390 = vst [vmem:[#allocation32_spill] sm:$0xff] %v12214_v55  ;;  %v1219_v63 = vrot.slane %v12214_v55, %v12028_v7  ;;  %v12220_v2 = vmul.f32 %v1189_v9, %v1051_v58  ;;  %v1212_v39 = vcombine.high %v12214_v55, %v12214_v55 }
 0x279   : > { %17391 = vst [vmem:[#allocation33_spill] sm:$0xff] %v12216_v57  ;;  %v1310_v3 = vcombine.high %v12216_v57, %v12216_v57  ;;  %v12224_v6 = vmul.f32 %v1199_v1, %v1166_v61 }
 0x27a   : > { %17392 = vst [vmem:[#allocation34_spill] sm:$0xff] %v12220_v2  ;;  %v1235_v10 = vrot.slane %v1219_v63, %v12028_v7  ;;  %v1227_v11 = vcombine.high %v1219_v63, %v1219_v63  ;;  %v12229_v13 = vpack.c.bf16 %v12220_v2, %v12214_v55  ;;  %v1226_v58 = vrot.slane %v1212_v39, %v12028_v7 }
 0x27b   : > { %17393 = vst [vmem:[#allocation35_spill] sm:$0xff] %v12224_v6  ;;  %v12232_v14 = vrot.slane %v1310_v3, %v12028_v7  ;;  %v1366_v17 = vrot.slane %v12224_v6, %v12028_v7  ;;  %v12273_v53 = vpack.c.bf16 %v12224_v6, %v12216_v57 }
 0x27c   : > { %17394 = vst [vmem:[#allocation36_spill] sm:$0xff] %v12229_v13  ;;  %v1411_v15 = vrot.slane %v1235_v10, %v12053_v25  ;;  %v1249_v16 = vrot.slane %v1227_v11, %v12028_v7  ;;  %10225 = vmatprep.subr.bf16.mxu1 %v12229_v13  ;;  %v1257_v29 = vcombine.high %v1235_v10, %v1235_v10 }
 0x27d   : > { %v1326_v20 = vcombine.high %v12232_v14, %v12232_v14  ;;  %v1382_v28 = vrot.slane %v1366_v17, %v12028_v7  ;;  %v1374_v33 = vcombine.high %v1366_v17, %v1366_v17  ;;  %17395 = vst [vmem:[#allocation37_spill] sm:$0xff] %v12273_v53  ;;  %v1242_v11 = vrot.slane %v1226_v58, %v12028_v7 }
 0x27e   : > { %v1568_v21 = vmul.f32 %v1411_v15, %v12214_v55  ;;  %v1569_v12 = vmul.f32 %v1411_v15, %v12220_v2  ;;  %v1570_v22 = vmul.f32 %v1411_v15, %v12216_v57  ;;  %v1571_v24 = vmul.f32 %v1411_v15, %v12224_v6 }
 0x27f   : > { %v1415_v26 = vrot.slane %v1249_v16, %v12053_v25  ;;  %v12247_v27 = vrot.slane %v1326_v20, %v12028_v7  ;;  %v1507_v8 = vrot.slane %v1382_v28, %v12053_v25  ;;  %v1419_v36 = vrot.slane %v1257_v29, %v12053_v25 }
 0x280   : > { %v1696_v30 = vpack.c.bf16 %v1569_v12, %v1568_v21  ;;  %v1697_v19 = vpack.c.bf16 %v1571_v24, %v1570_v22  ;;  %v1396_v45 = vrot.slane %v1374_v33, %v12028_v7  ;;  %v1259_v46 = vcombine.high %v1249_v16, %v1249_v16 }
 0x281   : > { %v1572_v31 = vmul.f32 %v1415_v26, %v12214_v55  ;;  %v1573_v32 = vmul.f32 %v1415_v26, %v12220_v2  ;;  %v1358_v4 = vcombine.high %v12247_v27, %v12247_v27  ;;  %v1664_v37 = vmul.f32 %v1507_v8, %v12214_v55 }
 0x282   : > { %10097 = vmatprep.mubr.bf16.mxu0 %v1696_v30  ;;  %v1665_v38 = vmul.f32 %v1507_v8, %v12220_v2  ;;  %v1574_v43 = vmul.f32 %v1415_v26, %v12216_v57  ;;  %v1575_v44 = vmul.f32 %v1415_v26, %v12224_v6  ;;  %v1576_v49 = vmul.f32 %v1419_v36, %v12214_v55 }
 0x283   : > { %10098 = vmatmul.mubr.bf16.vlgmr.msra.gmra.mrb[4].mxu0 %v1697_v19  ;;  %v1698_v34 = vpack.c.bf16 %v1573_v32, %v1572_v31  ;;  %v1503_v35 = vrot.slane %v1358_v4, %v12053_v25  ;;  %v1577_v50 = vmul.f32 %v1419_v36, %v12220_v2  ;;  %v1511_v52 = vrot.slane %v1396_v45, %v12053_v25 }
 0x284   : > { %v1744_v51 = vpack.c.bf16 %v1665_v38, %v1664_v37  ;;  %v1699_v54 = vpack.c.bf16 %v1575_v44, %v1574_v43  ;;  %v1423_v18 = vrot.slane %v1259_v46, %v12053_v25  ;;  %v1666_v59 = vmul.f32 %v1507_v8, %v12216_v57 }
 0x285   : > { %10101 = vmatprep.mubr.bf16.mxu0 %v1698_v34  ;;  %v1660_v40 = vmul.f32 %v1503_v35, %v12214_v55  ;;  %v1661_v41 = vmul.f32 %v1503_v35, %v12220_v2  ;;  %v1662_v23 = vmul.f32 %v1503_v35, %v12216_v57  ;;  %v1663_v42 = vmul.f32 %v1503_v35, %v12224_v6 }
 0x286   : > { %v1700_v56 = vpack.c.bf16 %v1577_v50, %v1576_v49  ;;  %v1667_v60 = vmul.f32 %v1507_v8, %v12224_v6  ;;  %v1668_v9 = vmul.f32 %v1511_v52, %v12214_v55  ;;  %v1669_v61 = vmul.f32 %v1511_v52, %v12220_v2 }
 0x287   : > { %v1742_v47 = vpack.c.bf16 %v1661_v41, %v1660_v40  ;;  %v1743_v48 = vpack.c.bf16 %v1663_v42, %v1662_v23  ;;  %v1404_v62 = vcombine.high %v1382_v28, %v1382_v28  ;;  %v1578_v63 = vmul.f32 %v1419_v36, %v12216_v57 }
 0x288   : > { %v1579_v1 = vmul.f32 %v1419_v36, %v12224_v6  ;;  %v1580_v3 = vmul.f32 %v1423_v18, %v12214_v55  ;;  %v1581_v10 = vmul.f32 %v1423_v18, %v12220_v2  ;;  %v1745_v15 = vpack.c.bf16 %v1667_v60, %v1666_v59 }
 0x289   : > { %10189 = vmatprep.mubr.bf16.mxu1 %v1742_v47  ;;  %v1746_v16 = vpack.c.bf16 %v1669_v61, %v1668_v9  ;;  %v1515_v17 = vrot.slane %v1404_v62, %v12053_v25  ;;  %v1427_v12 = vrot.slane %v1242_v11, %v12053_v25  ;;  %v1228_v22 = vcombine.high %v1226_v58, %v1226_v58 }
 0x28a   : > { %10190 = vmatmul.mubr.bf16.vlgmr.msra.gmra.mrb[4].mxu1 %v1743_v48  ;;  %v1701_v20 = vpack.c.bf16 %v1579_v1, %v1578_v63  ;;  %v1702_v21 = vpack.c.bf16 %v1581_v10, %v1580_v3  ;;  %v1670_v24 = vmul.f32 %v1511_v52, %v12216_v57  ;;  %v1671_v26 = vmul.f32 %v1511_v52, %v12224_v6 }
 0x28b   : > { %10226 = vmatpush3.bf16.msra.mxu1 %v12229_v13  ;;  %10193 = vmatprep.mubr.bf16.mxu1 %v1744_v51  ;;  %v1672_v28 = vmul.f32 %v1515_v17, %v12214_v55  ;;  %v1673_v29 = vmul.f32 %v1515_v17, %v12220_v2  ;;  %v1406_v30 = vcombine.high %v1396_v45, %v1396_v45 }
 0x28c   : > { %10227 = vmatprep.subr.bf16.mxu1 %v12273_v53  ;;  %10102 = vmatmul.mubr.bf16.gmra.mrb[8].mxu0 %v1699_v54  ;;  %v1359_v19 = vcombine.high %v12224_v6, %v12224_v6  ;;  %v1582_v31 = vmul.f32 %v1423_v18, %v12216_v57  ;;  %v1583_v32 = vmul.f32 %v1423_v18, %v12224_v6 }
 0x28d   : > { %10105 = vmatprep.mubr.bf16.mxu0 %v1700_v56  ;;  %v1584_v4 = vmul.f32 %v1427_v12, %v12214_v55  ;;  %v1585_v8 = vmul.f32 %v1427_v12, %v12220_v2  ;;  %v1256_v33 = vrot.slane %v1228_v22, %v12028_v7  ;;  %v1747_v34 = vpack.c.bf16 %v1671_v26, %v1670_v24 }
 0x28e   : > { %v1748_v35 = vpack.c.bf16 %v1673_v29, %v1672_v28  ;;  %v1519_v36 = vrot.slane %v1406_v30, %v12053_v25  ;;  %v1373_v37 = vrot.slane %v1359_v19, %v12028_v7  ;;  %v1703_v38 = vpack.c.bf16 %v1583_v32, %v1582_v31 }
 0x28f   : > { %10228 = vmatpush3.bf16.msra.mxu1 %v12273_v53  ;;  %v1704_v39 = vpack.c.bf16 %v1585_v8, %v1584_v4  ;;  %v1431_v40 = vrot.slane %v1256_v33, %v12053_v25  ;;  %v1674_v41 = vmul.f32 %v1515_v17, %v12216_v57  ;;  %v1675_v23 = vmul.f32 %v1515_v17, %v12224_v6 }
 0x290   : > { %v1676_v42 = vmul.f32 %v1519_v36, %v12214_v55  ;;  %v1677_v43 = vmul.f32 %v1519_v36, %v12220_v2  ;;  %v1389_v44 = vrot.slane %v1373_v37, %v12028_v7  ;;  %v1586_v45 = vmul.f32 %v1427_v12, %v12216_v57 }
 0x291   : > { %v1587_v46 = vmul.f32 %v1427_v12, %v12224_v6  ;;  %v1588_v47 = vmul.f32 %v1431_v40, %v12214_v55  ;;  %v1589_v48 = vmul.f32 %v1431_v40, %v12220_v2  ;;  %v1258_v49 = vcombine.high %v1242_v11, %v1242_v11 }
 0x292   : > { %10194 = vmatmul.mubr.bf16.gmra.mrb[8].mxu1 %v1745_v15  ;;  %v1749_v50 = vpack.c.bf16 %v1675_v23, %v1674_v41  ;;  %v1750_v51 = vpack.c.bf16 %v1677_v43, %v1676_v42  ;;  %v1523_v52 = vrot.slane %v1389_v44, %v12053_v25  ;;  %v1375_v54 = vcombine.high %v1373_v37, %v1373_v37  ;;  %v9832_v23 = vld [vmem:[%s17009_s17] ss:$0 sm:$0xff] }
 0x293   : > { %10197 = vmatprep.mubr.bf16.mxu1 %v1746_v16  ;;  %v1705_v56 = vpack.c.bf16 %v1587_v46, %v1586_v45  ;;  %v1706_v18 = vpack.c.bf16 %v1589_v48, %v1588_v47  ;;  %v1435_v58 = vrot.slane %v1258_v49, %v12053_v25  ;;  %v1678_v59 = vmul.f32 %v1519_v36, %v12216_v57 }
 0x294   : > { %10106 = vmatmul.mubr.bf16.gmra.mrb[12].mxu0 %v1701_v20  ;;  %v1679_v60 = vmul.f32 %v1519_v36, %v12224_v6  ;;  %v1680_v9 = vmul.f32 %v1523_v52, %v12214_v55  ;;  %v1681_v61 = vmul.f32 %v1523_v52, %v12220_v2  ;;  %v1403_v62 = vrot.slane %v1375_v54, %v12028_v7 }
 0x295   : > { %10109 = vmatprep.mubr.bf16.mxu0 %v1702_v21  ;;  %v1590_v63 = vmul.f32 %v1431_v40, %v12216_v57  ;;  %v1591_v1 = vmul.f32 %v1431_v40, %v12224_v6  ;;  %v1592_v3 = vmul.f32 %v1435_v58, %v12214_v55  ;;  %v1593_v10 = vmul.f32 %v1435_v58, %v12220_v2 }
 0x296   : > { %v1260_v11 = vcombine.high %v1256_v33, %v1256_v33  ;;  %v1751_v15 = vpack.c.bf16 %v1679_v60, %v1678_v59  ;;  %v1752_v16 = vpack.c.bf16 %v1681_v61, %v1680_v9  ;;  %v1527_v17 = vrot.slane %v1403_v62, %v12053_v25  ;;  %4199 = vbcast.lane.b32.xlu1 %v9832_v23, 256 }
 0x297   : > { %v1707_v20 = vpack.c.bf16 %v1591_v1, %v1590_v63  ;;  %v1708_v21 = vpack.c.bf16 %v1593_v10, %v1592_v3  ;;  %v1268_v22 = vrot.slane %v12220_v2, %v12028_v7  ;;  %v1682_v24 = vmul.f32 %v1523_v52, %v12216_v57  ;;  %4203 = vbcast.lane.b32.xlu0 %v9832_v23, 264  ;;  %v12362_v10 = vpop.permute.xlu1 %2841 }
 0x298   : > { %v1439_v12 = vrot.slane %v1260_v11, %v12053_v25  ;;  %v1683_v26 = vmul.f32 %v1523_v52, %v12224_v6  ;;  %v1684_v28 = vmul.f32 %v1527_v17, %v12214_v55  ;;  %v1685_v29 = vmul.f32 %v1527_v17, %v12220_v2 }
 0x299   : > { %v1405_v30 = vcombine.high %v1389_v44, %v1389_v44  ;;  %v1594_v19 = vmul.f32 %v1435_v58, %v12216_v57  ;;  %v1595_v31 = vmul.f32 %v1435_v58, %v12224_v6  ;;  %v1284_v8 = vrot.slane %v1268_v22, %v12028_v7 }
 0x29a   : > { %10198 = vmatmul.mubr.bf16.gmra.mrb[12].mxu1 %v1747_v34  ;;  %v1596_v32 = vmul.f32 %v1439_v12, %v12214_v55  ;;  %v1597_v4 = vmul.f32 %v1439_v12, %v12220_v2  ;;  %v1753_v33 = vpack.c.bf16 %v1683_v26, %v1682_v24  ;;  %v1754_v34 = vpack.c.bf16 %v1685_v29, %v1684_v28 }
 0x29b   : > { %10201 = vmatprep.mubr.bf16.mxu1 %v1748_v35  ;;  %v1531_v35 = vrot.slane %v1405_v30, %v12053_v25  ;;  %v1709_v36 = vpack.c.bf16 %v1595_v31, %v1594_v19  ;;  %v1686_v40 = vmul.f32 %v1527_v17, %v12216_v57  ;;  %v1687_v41 = vmul.f32 %v1527_v17, %v12224_v6  ;;  %v12375_v31 = vpop.permute.xlu0 %2837 }
 0x29c   : > { %10110 = vmatmul.mubr.bf16.gmra.mrb[16].mxu0 %v1703_v38  ;;  %v1710_v37 = vpack.c.bf16 %v1597_v4, %v1596_v32  ;;  %v1443_v38 = vrot.slane %v1284_v8, %v12053_v25  ;;  %v1407_v44 = vcombine.high %v1403_v62, %v1403_v62  ;;  %v1598_v45 = vmul.f32 %v1439_v12, %v12216_v57 }
 0x29d   : > { %10113 = vmatprep.mubr.bf16.mxu0 %v1704_v39  ;;  %v1276_v39 = vcombine.high %v1268_v22, %v1268_v22  ;;  %v1688_v42 = vmul.f32 %v1531_v35, %v12214_v55  ;;  %v1689_v43 = vmul.f32 %v1531_v35, %v12220_v2  ;;  %v1599_v46 = vmul.f32 %v1439_v12, %v12224_v6  ;;  %v12367_v22 = vpop.permute.xlu1 %2849 }
 0x29e   : > { %v1600_v47 = vmul.f32 %v1443_v38, %v12214_v55  ;;  %v1601_v48 = vmul.f32 %v1443_v38, %v12220_v2  ;;  %v1535_v52 = vrot.slane %v1407_v44, %v12053_v25  ;;  %v1690_v58 = vmul.f32 %v1531_v35, %v12216_v57  ;;  %4207 = vbcast.lane.b32.xlu1 %v9832_v23, 272 }
 0x29f   : > { %v1298_v49 = vrot.slane %v1276_v39, %v12028_v7  ;;  %v1711_v54 = vpack.c.bf16 %v1599_v46, %v1598_v45  ;;  %v1691_v59 = vmul.f32 %v1531_v35, %v12224_v6  ;;  %v1602_v61 = vmul.f32 %v1443_v38, %v12216_v57 }
 0x2a0   : > { %v1692_v60 = vmul.f32 %v1535_v52, %v12214_v55  ;;  %v1693_v9 = vmul.f32 %v1535_v52, %v12220_v2  ;;  %v1603_v62 = vmul.f32 %v1443_v38, %v12224_v6  ;;  %v1306_v3 = vcombine.high %v1284_v8, %v1284_v8 }
 0x2a1   : > { %v1757_v11 = vpack.c.bf16 %v1691_v59, %v1690_v58  ;;  %v1695_v12 = vmul.f32 %v1535_v52, %v12224_v6  ;;  %v1308_v30 = vcombine.high %v1298_v49, %v1298_v49  ;;  %v1261_v19 = vcombine.high %v12220_v2, %v12220_v2  ;;  %v12379_v35 = vpop.permute.xlu1 %2857 }
 0x2a2   : > { %10202 = vmatmul.mubr.bf16.gmra.mrb[16].mxu1 %v1749_v50  ;;  %v1755_v50 = vpack.c.bf16 %v1687_v41, %v1686_v40  ;;  %4211 = vbcast.lane.b32.xlu1 %v9832_v23, 280 }
 0x2a3   : > { %10205 = vmatprep.mubr.bf16.mxu1 %v1750_v51  ;;  %v1756_v51 = vpack.c.bf16 %v1689_v43, %v1688_v42 }
 0x2a4   : > { %10114 = vmatmul.mubr.bf16.gmra.mrb[20].mxu0 %v1705_v56  ;;  %v1712_v56 = vpack.c.bf16 %v1601_v48, %v1600_v47 }
 0x2a5   : > { %10117 = vmatprep.mubr.bf16.mxu0 %v1706_v18  ;;  %v1447_v18 = vrot.slane %v1298_v49, %v12053_v25  ;;  %v12388_v23 = vpop.permute.xlu1 %2865 }
 0x2a6   : > { %17396 = vst [vmem:[#allocation38_spill] sm:$0xff] %v12388_v23 }
 0x2a7   : > { %v1604_v63 = vmul.f32 %v1447_v18, %v12214_v55  ;;  %v1605_v1 = vmul.f32 %v1447_v18, %v12220_v2  ;;  %v1606_v24 = vmul.f32 %v1447_v18, %v12216_v57  ;;  %v1607_v26 = vmul.f32 %v1447_v18, %v12224_v6 }
 0x2a9   : > { %v1714_v17 = vpack.c.bf16 %v1605_v1, %v1604_v63  ;;  %v1715_v4 = vpack.c.bf16 %v1607_v26, %v1606_v24 }
 0x2aa   : > { %10206 = vmatmul.mubr.bf16.gmra.mrb[20].mxu1 %v1751_v15  ;;  %v1758_v15 = vpack.c.bf16 %v1693_v9, %v1692_v60 }
 0x2ab   : > { %10209 = vmatprep.mubr.bf16.mxu1 %v1752_v16  ;;  %v1713_v16 = vpack.c.bf16 %v1603_v62, %v1602_v61 }
 0x2ac   : > { %10118 = vmatmul.mubr.bf16.gmra.mrb[24].mxu0 %v1707_v20  ;;  %v1451_v20 = vrot.slane %v1306_v3, %v12053_v25 }
 0x2ad   : > { %10121 = vmatprep.mubr.bf16.mxu0 %v1708_v21  ;;  %v1694_v21 = vmul.f32 %v1535_v52, %v12216_v57  ;;  %v12398_v52 = vpop.permute.xlu1 %2873 }
 0x2ae   : > { %v1608_v28 = vmul.f32 %v1451_v20, %v12214_v55  ;;  %v1609_v29 = vmul.f32 %v1451_v20, %v12220_v2  ;;  %v1611_v38 = vmul.f32 %v1451_v20, %v12224_v6  ;;  %17397 = vst [vmem:[#allocation39_spill] sm:$0xff] %v12398_v52 }
 0x2af   : > { %v1759_v32 = vpack.c.bf16 %v1695_v12, %v1694_v21 }
 0x2b0   : > { %v1716_v8 = vpack.c.bf16 %v1609_v29, %v1608_v28 }
 0x2b1   : > { %v12403_v59 = vpop.permute.xlu1 %2881 }
 0x2b2   : > { %10210 = vmatmul.mubr.bf16.gmra.mrb[24].mxu1 %v1753_v33  ;;  %v1455_v33 = vrot.slane %v1308_v30, %v12053_v25  ;;  %17398 = vst [vmem:[#allocation40_spill] sm:$0xff] %v12403_v59 }
 0x2b3   : > { %10213 = vmatprep.mubr.bf16.mxu1 %v1754_v34  ;;  %v1275_v34 = vrot.slane %v1261_v19, %v12028_v7 }
 0x2b4   : > { %10122 = vmatmul.mubr.bf16.gmra.mrb[28].mxu0 %v1709_v36  ;;  %v12381_v36 = vpop.permute.xlu0 %2845  ;;  %v1612_v39 = vmul.f32 %v1455_v33, %v12214_v55  ;;  %v1613_v40 = vmul.f32 %v1455_v33, %v12220_v2  ;;  %v1614_v47 = vmul.f32 %v1455_v33, %v12216_v57  ;;  %v1615_v48 = vmul.f32 %v1455_v33, %v12224_v6 }
 0x2b5   : > { %10125 = vmatprep.mubr.bf16.mxu0 %v1710_v37  ;;  %v1610_v37 = vmul.f32 %v1451_v20, %v12216_v57  ;;  %v1291_v41 = vrot.slane %v1275_v34, %v12028_v7  ;;  %v1277_v45 = vcombine.high %v1275_v34, %v1275_v34 }
 0x2b6   : > { %v1718_v43 = vpack.c.bf16 %v1613_v40, %v1612_v39 }
 0x2b7   : > { %v1717_v42 = vpack.c.bf16 %v1611_v38, %v1610_v37  ;;  %v1459_v44 = vrot.slane %v1291_v41, %v12053_v25  ;;  %v1307_v63 = vcombine.high %v1291_v41, %v1291_v41 }
 0x2b8   : > { %v12391_v46 = vpop.permute.xlu0 %2853 }
 0x2b9   : > { %v1616_v49 = vmul.f32 %v1459_v44, %v12214_v55  ;;  %v1618_v60 = vmul.f32 %v1459_v44, %v12216_v57  ;;  %v1619_v9 = vmul.f32 %v1459_v44, %v12224_v6 }
 0x2ba   : > { %10214 = vmatmul.mubr.bf16.gmra.mrb[28].mxu1 %v1755_v50  ;;  %v1617_v50 = vmul.f32 %v1459_v44, %v12220_v2 }
 0x2bb   : > { %10217 = vmatprep.mubr.bf16.mxu1 %v1756_v51  ;;  %v1305_v51 = vrot.slane %v1277_v45, %v12028_v7  ;;  %v1721_v3 = vpack.c.bf16 %v1619_v9, %v1618_v60 }
 0x2bc   : > { %10126 = vmatmul.mubr.bf16.gmra.mrb[32].mxu0 %v1711_v54  ;;  %v12400_v54 = vpop.permute.xlu0 %2861  ;;  %v1720_v18 = vpack.c.bf16 %v1617_v50, %v1616_v49 }
 0x2bd   : > { %10129 = vmatprep.mubr.bf16.mxu0 %v1712_v56  ;;  %v1719_v56 = vpack.c.bf16 %v1615_v48, %v1614_v47  ;;  %v1463_v58 = vrot.slane %v1305_v51, %v12053_v25  ;;  %v1309_v26 = vcombine.high %v1305_v51, %v1305_v51 }
 0x2bf   : > { %v1620_v61 = vmul.f32 %v1463_v58, %v12214_v55  ;;  %v1621_v62 = vmul.f32 %v1463_v58, %v12220_v2  ;;  %v1622_v20 = vmul.f32 %v1463_v58, %v12216_v57  ;;  %v1623_v21 = vmul.f32 %v1463_v58, %v12224_v6 }
 0x2c0   : > { %v12409_v1 = vpop.permute.xlu0 %2869  ;;  %v1471_v19 = vrot.slane %v1309_v26, %v12053_v25 }
 0x2c1   : > { %17399 = vst [vmem:[#allocation41_spill] sm:$0xff] %v12409_v1  ;;  %v1723_v29 = vpack.c.bf16 %v1623_v21, %v1622_v20 }
 0x2c2   : > { %10218 = vmatmul.mubr.bf16.gmra.mrb[32].mxu1 %v1757_v11  ;;  %v1722_v11 = vpack.c.bf16 %v1621_v62, %v1620_v61  ;;  %v1628_v34 = vmul.f32 %v1471_v19, %v12214_v55  ;;  %v1629_v37 = vmul.f32 %v1471_v19, %v12220_v2  ;;  %v1630_v47 = vmul.f32 %v1471_v19, %v12216_v57 }
 0x2c3   : > { %10221 = vmatprep.mubr.bf16.mxu1 %v1758_v15  ;;  %v1467_v15 = vrot.slane %v1307_v63, %v12053_v25  ;;  %v1631_v48 = vmul.f32 %v1471_v19, %v12224_v6 }
 0x2c4   : > { %10130 = vmatmul.mubr.bf16.gmra.mrb[36].mxu0 %v1713_v16  ;;  %v12412_v16 = vpop.permute.xlu1 %2889 }
 0x2c5   : > { %10133 = vmatprep.mubr.bf16.mxu0 %v1714_v17  ;;  %17400 = vst [vmem:[#allocation42_spill] sm:$0xff] %v12412_v16  ;;  %v12414_v17 = vpop.permute.xlu0 %2877  ;;  %v1624_v12 = vmul.f32 %v1467_v15, %v12214_v55  ;;  %v1625_v24 = vmul.f32 %v1467_v15, %v12220_v2  ;;  %v1627_v33 = vmul.f32 %v1467_v15, %v12224_v6 }
 0x2c6   : > { %17401 = vst [vmem:[#allocation43_spill] sm:$0xff] %v12414_v17 }
 0x2c7   : > { %v1724_v30 = vpack.c.bf16 %v1625_v24, %v1624_v12 }
 0x2c8   : > { %v12420_v28 = vpop.permute.xlu1 %2897 }
 0x2c9   : > { %17402 = vst [vmem:[#allocation44_spill] sm:$0xff] %v12420_v28 }
 0x2ca   : > { %10222 = vmatmul.mubr.bf16.gmra.mrb[36].mxu1 %v1759_v32  ;;  %v1317_v32 = vrot.slane %v12216_v57, %v12028_v7 }
 0x2cc   : > { %10134 = vmatmul.mubr.bf16.gmra.mrb[40].mxu0 %v1715_v4  ;;  %v12425_v4 = vpop.permute.xlu0 %2885  ;;  %v1333_v38 = vrot.slane %v1317_v32, %v12028_v7  ;;  %v12432_v39 = vpop.permute.xlu1 %2905  ;;  %v1325_v44 = vcombine.high %v1317_v32, %v1317_v32 }
 0x2cd   : > { %10137 = vmatprep.mubr.bf16.mxu0 %v1716_v8  ;;  %17403 = vst [vmem:[#allocation45_spill] sm:$0xff] %v12425_v4  ;;  %v1626_v8 = vmul.f32 %v1467_v15, %v12216_v57  ;;  %17404 = vst [vmem:[#allocation46_spill] sm:$0xff] %v12432_v39 }
 0x2ce   : > { %v1347_v51 = vrot.slane %v1325_v44, %v12028_v7  ;;  %v1355_v15 = vcombine.high %v1333_v38, %v1333_v38 }
 0x2cf   : > { %v1725_v41 = vpack.c.bf16 %v1627_v33, %v1626_v8 }
 0x2d0   : > { %v12434_v40 = vpop.permute.xlu0 %2893  ;;  %v12437_v45 = vpop.permute.xlu1 %2913  ;;  %v1479_v60 = vrot.slane %v1347_v51, %v12053_v25  ;;  %v1483_v24 = vrot.slane %v1355_v15, %v12053_v25  ;;  %v1357_v8 = vcombine.high %v1347_v51, %v1347_v51 }
 0x2d1   : > { %17405 = vst [vmem:[#allocation47_spill] sm:$0xff] %v12434_v40  ;;  %17406 = vst [vmem:[#allocation48_spill] sm:$0xff] %v12437_v45  ;;  %v12588_v40 = vld [vmem:[#allocation15 + $0x18] sm:$0xff] }
 0x2d2   : > { %v1640_v19 = vmul.f32 %v1483_v24, %v12214_v55  ;;  %v1641_v32 = vmul.f32 %v1483_v24, %v12220_v2  ;;  %v1643_v44 = vmul.f32 %v1483_v24, %v12224_v6 }
 0x2d4   : > { %10138 = vmatmul.mubr.bf16.gmra.mrb[44].mxu0 %v1717_v42  ;;  %v1726_v42 = vpack.c.bf16 %v1629_v37, %v1628_v34  ;;  %v12447_v9 = vpop.permute.xlu1 %2921 }
 0x2d5   : > { %10141 = vmatprep.mubr.bf16.mxu0 %v1718_v43  ;;  %v1475_v43 = vrot.slane %v1333_v38, %v12053_v25  ;;  %17408 = vst [vmem:[#allocation50_spill] sm:$0xff] %v12447_v9  ;;  %v1732_v38 = vpack.c.bf16 %v1641_v32, %v1640_v19  ;;  %v12568_v9 = vld [vmem:[#allocation13] sm:$0xff] }
 0x2d7   : > { %v1632_v49 = vmul.f32 %v1475_v43, %v12214_v55  ;;  %v1633_v50 = vmul.f32 %v1475_v43, %v12220_v2  ;;  %v1634_v62 = vmul.f32 %v1475_v43, %v12216_v57  ;;  %v1635_v63 = vmul.f32 %v1475_v43, %v12224_v6 }
 0x2d8   : > { %v12455_v20 = vpop.permute.xlu1 %2929  ;;  %v1642_v43 = vmul.f32 %v1483_v24, %v12216_v57 }
 0x2d9   : > { %v1728_v58 = vpack.c.bf16 %v1633_v50, %v1632_v49  ;;  %v1729_v21 = vpack.c.bf16 %v1635_v63, %v1634_v62  ;;  %v1340_v49 = vrot.slane %v12232_v14, %v12028_v7 }
 0x2da   : > { %v1733_v51 = vpack.c.bf16 %v1643_v44, %v1642_v43 }
 0x2dc   : > { %10142 = vmatmul.mubr.bf16.gmra.mrb[48].mxu0 %v1719_v56  ;;  %v12444_v56 = vpop.permute.xlu0 %2901  ;;  %v12464_v33 = vpop.permute.xlu1 %2937 }
 0x2dd   : > { %10145 = vmatprep.mubr.bf16.mxu0 %v1720_v18  ;;  %17407 = vst [vmem:[#allocation49_spill] sm:$0xff] %v12444_v56  ;;  %v1727_v18 = vpack.c.bf16 %v1631_v48, %v1630_v47 }
 0x2e0   : > { %v12449_v61 = vpop.permute.xlu0 %2909 }
 0x2e1   : > { %17409 = vst [vmem:[#allocation51_spill] sm:$0xff] %v12449_v61 }
 0x2e4   : > { %10146 = vmatmul.mubr.bf16.gmra.mrb[52].mxu0 %v1721_v3  ;;  %v1636_v3 = vmul.f32 %v1479_v60, %v12214_v55  ;;  %v12458_v26 = vpop.permute.xlu0 %2917 }
 0x2e5   : > { %10149 = vmatprep.mubr.bf16.mxu0 %v1722_v11  ;;  %v1637_v11 = vmul.f32 %v1479_v60, %v12220_v2  ;;  %17410 = vst [vmem:[#allocation52_spill] sm:$0xff] %v12458_v26 }
 0x2e7   : > { %v1730_v12 = vpack.c.bf16 %v1637_v11, %v1636_v3 }
 0x2e8   : > { %v12466_v34 = vpop.permute.xlu0 %2925 }
 0x2e9   : > { %17411 = vst [vmem:[#allocation53_spill] sm:$0xff] %v12466_v34 }
 0x2ec   : > { %10150 = vmatmul.mubr.bf16.gmra.mrb[56].mxu0 %v1723_v29  ;;  %v1638_v29 = vmul.f32 %v1479_v60, %v12216_v57  ;;  %v12477_v50 = vpop.permute.xlu0 %2933 }
 0x2ed   : > { %10153 = vmatprep.mubr.bf16.mxu0 %v1724_v30  ;;  %v1639_v30 = vmul.f32 %v1479_v60, %v12224_v6 }
 0x2ef   : > { %v1731_v37 = vpack.c.bf16 %v1639_v30, %v1638_v29 }
 0x2f0   : > { %v12482_v62 = vpop.permute.xlu0 %2941 }
 0x2f4   : > { %10154 = vmatmul.mubr.bf16.gmra.mrb[60].mxu0 %v1725_v41  ;;  %v1487_v41 = vrot.slane %v1357_v8, %v12053_v25  ;;  %v12492_v24 = vpop.permute.xlu0 %2949  ;;  %v1356_v8 = vcombine.high %v1340_v49, %v1340_v49 }
 0x2f5   : > { %10157 = vmatprep.mubr.bf16.mxu0 %v1726_v42  ;;  %v12469_v42 = vpop.permute.xlu1 %2945 }
 0x2f6   : > { %v1644_v47 = vmul.f32 %v1487_v41, %v12214_v55  ;;  %v1645_v48 = vmul.f32 %v1487_v41, %v12220_v2  ;;  %v1646_v63 = vmul.f32 %v1487_v41, %v12216_v57  ;;  %v1647_v3 = vmul.f32 %v1487_v41, %v12224_v6 }
 0x2f8   : > { %v1735_v15 = vpack.c.bf16 %v1647_v3, %v1646_v63 }
 0x2f9   : > { %v12480_v60 = vpop.permute.xlu1 %2953 }
 0x2fa   : > { %17412 = vst [vmem:[#allocation54_spill] sm:$0xff] %v12480_v60 }
 0x2fc   : > { %10158 = vmatmul.mubr.bf16.gmra.mrb[64].mxu0 %v1727_v18  ;;  %v1734_v18 = vpack.c.bf16 %v1645_v48, %v1644_v47 }
 0x2fd   : > { %10161 = vmatprep.mubr.bf16.mxu0 %v1728_v58  ;;  %v1491_v58 = vrot.slane %v1340_v49, %v12053_v25  ;;  %v12488_v14 = vpop.permute.xlu1 %2961 }
 0x2fe   : > { %17413 = vst [vmem:[#allocation55_spill] sm:$0xff] %v12488_v14 }
 0x2ff   : > { %v1648_v11 = vmul.f32 %v1491_v58, %v12214_v55  ;;  %v1649_v7 = vmul.f32 %v1491_v58, %v12220_v2  ;;  %v1650_v29 = vmul.f32 %v1491_v58, %v12216_v57  ;;  %v1651_v30 = vmul.f32 %v1491_v58, %v12224_v6 }
 0x301   : > { %v1737_v41 = vpack.c.bf16 %v1651_v30, %v1650_v29 }
 0x304   : > { %10162 = vmatmul.mubr.bf16.gmra.mrb[68].mxu0 %v1729_v21  ;;  %v1736_v21 = vpack.c.bf16 %v1649_v7, %v1648_v11 }
 0x305   : > { %10165 = vmatprep.mubr.bf16.mxu0 %v1730_v12  ;;  %v1495_v12 = vrot.slane %v12247_v27, %v12053_v25  ;;  %v1499_v27 = vrot.slane %v1356_v8, %v12053_v25 }
 0x307   : > { %v1652_v19 = vmul.f32 %v1495_v12, %v12214_v55  ;;  %v1653_v32 = vmul.f32 %v1495_v12, %v12220_v2  ;;  %v1654_v47 = vmul.f32 %v1495_v12, %v12216_v57  ;;  %v1655_v48 = vmul.f32 %v1495_v12, %v12224_v6 }
 0x308   : > { %v1657_v49 = vmul.f32 %v1499_v27, %v12220_v2  ;;  %v1658_v7 = vmul.f32 %v1499_v27, %v12216_v57  ;;  %v12553_v2 = vld [vmem:[#allocation15 + $0x10] sm:$0xff] }
 0x309   : > { %v1738_v43 = vpack.c.bf16 %v1653_v32, %v1652_v19  ;;  %v1739_v58 = vpack.c.bf16 %v1655_v48, %v1654_v47 }
 0x30c   : > { %10166 = vmatmul.mubr.bf16.gmra.mrb[72].mxu0 %v1731_v37  ;;  %v12498_v37 = vpop.permute.xlu1 %3429 }
 0x30d   : > { %10169 = vmatprep.mubr.bf16.mxu0 %v1732_v38  ;;  %v12500_v38 = vpop.permute.xlu0 %2957 }
 0x30e   : > { %17414 = vst [vmem:[#allocation56_spill] sm:$0xff] %v12500_v38 }
 0x310   : > { %v12503_v44 = vpop.permute.xlu1 %3437 }
 0x314   : > { %10170 = vmatmul.mubr.bf16.gmra.mrb[76].mxu0 %v1733_v51  ;;  %v1656_v51 = vmul.f32 %v1499_v27, %v12214_v55  ;;  %v12511_v3 = vpop.permute.xlu1 %3445  ;;  %v12551_v55 = vld [vmem:[#allocation13 + $0x10] sm:$0xff] }
 0x315   : > { %10173 = vmatprep.mubr.bf16.mxu0 %v1734_v18  ;;  %v12509_v18 = vpop.permute.xlu0 %3425 }
 0x316   : > { %v1740_v63 = vpack.c.bf16 %v1657_v49, %v1656_v51  ;;  %v12541_v49 = vld [vmem:[#allocation10] ss:$0 sm:$0xff] }
 0x319   : > { %v12513_v11 = vpop.permute.xlu0 %3433 }
 0x31c   : > { %10174 = vmatmul.mubr.bf16.gmra.mrb[80].mxu0 %v1735_v15  ;;  %v1659_v15 = vmul.f32 %v1499_v27, %v12224_v6 }
 0x31d   : > { %10177 = vmatprep.mubr.bf16.mxu0 %v1736_v21  ;;  %v12517_v21 = vpop.permute.xlu1 %3453  ;;  %v12519_v29 = vpop.permute.xlu0 %3441 }
 0x31e   : > { %17415 = vst [vmem:[#allocation57_spill] sm:$0xff] %v12517_v21  ;;  %v1741_v12 = vpack.c.bf16 %v1659_v15, %v1658_v7 }
 0x321   : > { %v12521_v30 = vpop.permute.xlu1 %3461  ;;  %v12523_v19 = vpop.permute.xlu0 %3449 }
 0x322   : > { %17416 = vst [vmem:[#allocation58_spill] sm:$0xff] %v12521_v30  ;;  %17417 = vst [vmem:[#allocation59_spill] sm:$0xff] %v12523_v19 }
 0x324   : > { %10178 = vmatmul.mubr.bf16.gmra.mrb[84].mxu0 %v1737_v41 }
 0x325   : > { %10181 = vmatprep.mubr.bf16.mxu0 %v1738_v43  ;;  %v12525_v32 = vpop.permute.xlu1 %3469  ;;  %v12527_v8 = vpop.permute.xlu0 %3457 }
 0x326   : > { %17418 = vst [vmem:[#allocation60_spill] sm:$0xff] %v12525_v32  ;;  %17419 = vst [vmem:[#allocation61_spill] sm:$0xff] %v12527_v8 }
 0x329   : > { %v12529_v41 = vpop.permute.xlu1 %3477  ;;  %v12531_v43 = vpop.permute.xlu0 %3465 }
 0x32a   : > { %17420 = vst [vmem:[#allocation62_spill] sm:$0xff] %v12529_v41  ;;  %17421 = vst [vmem:[#allocation63_spill] sm:$0xff] %v12531_v43 }
 0x32c   : > { %10182 = vmatmul.mubr.bf16.gmra.mrb[88].mxu0 %v1739_v58 }
 0x32d   : > { %10185 = vmatprep.mubr.bf16.mxu0 %v1740_v63  ;;  %v12533_v47 = vpop.permute.xlu1 %3485  ;;  %v12535_v27 = vpop.permute.xlu0 %3473 }
 0x32e   : > { %17422 = vst [vmem:[#allocation64_spill] sm:$0xff] %v12533_v47  ;;  %17423 = vst [vmem:[#allocation65_spill] sm:$0xff] %v12535_v27  ;;  %v12585_v47 = vld [vmem:[#allocation13 + $0x18] sm:$0xff] }
 0x331   : > { %v12537_v48 = vpop.permute.xlu1 %3493  ;;  %v12539_v51 = vpop.permute.xlu0 %3481 }
 0x332   : > { %17424 = vst [vmem:[#allocation66_spill] sm:$0xff] %v12537_v48  ;;  %17425 = vst [vmem:[#allocation67_spill] sm:$0xff] %v12539_v51 }
 0x334   : > { %10186 = vmatmul.mubr.bf16.gmra.mrb[92].mxu0 %v1741_v12 }
 0x335   : > { %v12543_v58 = vpop.permute.xlu1 %3501  ;;  %v12546_v12 = vpop.permute.xlu0 %3489 }
 0x336   : > { %17426 = vst [vmem:[#allocation68_spill] sm:$0xff] %v12543_v58  ;;  %17427 = vst [vmem:[#allocation69_spill] sm:$0xff] %v12546_v12  ;;  %v12571_v58 = vld [vmem:[#allocation15] sm:$0xff] }
 0x339   : > { %v12555_v25 = vpop.permute.xlu1 %3509  ;;  %v12557_v5 = vpop.permute.xlu0 %3497 }
 0x33a   : > { %17428 = vst [vmem:[#allocation70_spill] sm:$0xff] %v12555_v25  ;;  %17429 = vst [vmem:[#allocation71_spill] sm:$0xff] %v12557_v5 }
 0x33d   : > { %v12596_v32 = vpop.permute.xlu0 %3505 }
 0x33e   : > { %17430 = vst [vmem:[#allocation72_spill] sm:$0xff] %v12596_v32 }
 0x356   : > { %v10099_v63 = vpop.f32.mrb[4].mxu0 }
 0x357   : > { %v1874_v7 = vadd.f32 %v10099_v63, %v12541_v49  ;;  %v1865_v15 = vpop.f32.mrb[5].mxu0 }
 0x358   : > { %v1866_v0 = vadd.f32 %v12541_v49, %v1865_v15  ;;  %v10100_v53 = vpop.f32.mrb[6].mxu0 }
 0x359   : > { %10490 = vtanh.f32 %v1874_v7  ;;  %v1868_v13 = vpop.f32.mrb[7].mxu0  ;;  %v1877_v57 = vadd.f32 %v10100_v53, %v12541_v49  ;;  %v2966_v7 = vmul.f32 %v12375_v31, %v12551_v55  ;;  %v12566_v53 = vld [vmem:[#allocation15 + $0x8] sm:$0xff] }
 0x35a   : > { %v1869_v6 = vadd.f32 %v12541_v49, %v1868_v13  ;;  %10492 = vtanh.f32 %v1866_v0  ;;  %v3554_v0 = vmul.f32 %v12509_v18, %v12553_v2  ;;  %v12564_v13 = vld [vmem:[#allocation13 + $0x8] sm:$0xff]  ;;  %v3553_v39 = vmul.f32 %v12509_v18, %v12566_v53 }
 0x35b   : > { %v2965_v48 = vmul.f32 %v12375_v31, %v12564_v13 }
 0x35c   : > { %10494 = vtanh.f32 %v1869_v6  ;;  %v3682_v56 = vadd.f32 %v3554_v0, %v2966_v7  ;;  %v2967_v0 = vmul.f32 %v12375_v31, %v12585_v47 }
 0x35d   : > { %v10191_v63 = vpop.f32.mrb[4].mxu1  ;;  %10496 = vtanh.f32 %v1877_v57  ;;  %v2964_v57 = vmul.f32 %v12375_v31, %v12568_v9  ;;  %v3681_v4 = vadd.f32 %v3553_v39, %v2965_v48  ;;  %v3555_v39 = vmul.f32 %v12509_v18, %v12588_v40 }
 0x35e   : > { %v2242_v15 = vadd.f32 %v10191_v63, %v12541_v49  ;;  %v2233_v34 = vpop.f32.mrb[5].mxu1 }
 0x35f   : > { %v2234_v6 = vadd.f32 %v12541_v49, %v2233_v34  ;;  %v10103_v25 = vpop.f32.mrb[8].mxu0  ;;  %v10192_v26 = vpop.f32.mrb[6].mxu1 }
 0x360   : > { %10498 = vtanh.f32 %v2242_v15  ;;  %v2245_v63 = vadd.f32 %v10192_v26, %v12541_v49  ;;  %v1881_v45 = vpop.f32.mrb[9].mxu0  ;;  %v2236_v5 = vpop.f32.mrb[7].mxu1  ;;  %v1890_v12 = vadd.f32 %v10103_v25, %v12541_v49  ;;  %v3552_v26 = vmul.f32 %v12509_v18, %v12571_v58 }
 0x361   : > { %v10104_v61 = vpop.f32.mrb[10].mxu0  ;;  %v12580_v34 = vpop.permute.xlu1 %3517  ;;  %10500 = vtanh.f32 %v2234_v6  ;;  %v2237_v51 = vadd.f32 %v12541_v49, %v2236_v5  ;;  %v3058_v25 = vmul.f32 %v12455_v20, %v12551_v55  ;;  %v1882_v5 = vadd.f32 %v12541_v49, %v1881_v45 }
 0x362   : > { %v1884_v15 = vpop.f32.mrb[11].mxu0  ;;  %10502 = vtanh.f32 %v2245_v63  ;;  %v3646_v7 = vmul.f32 %v12580_v34, %v12553_v2  ;;  %v3644_v18 = vmul.f32 %v12580_v34, %v12571_v58 }
 0x363   : > { %v10491_v28 = vpop.eup %10490  ;;  %10504 = vtanh.f32 %v1890_v12 }
 0x364   : > { %v3810_v41 = vmul.f32 %v10491_v28, %v3682_v56  ;;  %v10493_v16 = vpop.eup %10492  ;;  %v3680_v28 = vadd.f32 %v3552_v26, %v2964_v57  ;;  %10506 = vtanh.f32 %v2237_v51  ;;  %v1893_v56 = vadd.f32 %v10104_v61, %v12541_v49 }
 0x365   : > { %v10195_v27 = vpop.f32.mrb[8].mxu1  ;;  %v3774_v45 = vadd.f32 %v3646_v7, %v3058_v25  ;;  %v3059_v61 = vmul.f32 %v12455_v20, %v12585_v47  ;;  %10508 = vtanh.f32 %v1882_v5  ;;  %v1885_v26 = vadd.f32 %v12541_v49, %v1884_v15 }
 0x366   : > { %v10495_v6 = vpop.eup %10494  ;;  %v2249_v63 = vpop.f32.mrb[9].mxu1  ;;  %3940 = vadd.xlane.f32.xlu0 %v3810_v41  ;;  %v3808_v30 = vmul.f32 %v10493_v16, %v3680_v28  ;;  %v3056_v41 = vmul.f32 %v12455_v20, %v12568_v9  ;;  %v3683_v16 = vadd.f32 %v3555_v39, %v2967_v0  ;;  %10510 = vtanh.f32 %v1893_v56 }
 0x367   : > { %v10196_v48 = vpop.f32.mrb[10].mxu1  ;;  %v10107_v59 = vpop.f32.mrb[12].mxu0  ;;  %v3809_v43 = vmul.f32 %v10495_v6, %v3681_v4  ;;  %v2258_v4 = vadd.f32 %v10195_v27, %v12541_v49  ;;  %v3558_v0 = vmul.f32 %v12498_v37, %v12553_v2  ;;  %v3057_v5 = vmul.f32 %v12455_v20, %v12564_v13 }
 0x368   : > { %v12602_v17 = vpop.f32.mrb[13].mxu0  ;;  %v2252_v31 = vpop.f32.mrb[11].mxu1  ;;  %v3772_v27 = vadd.f32 %v3644_v18, %v3056_v41  ;;  %v2250_v15 = vadd.f32 %v12541_v49, %v2249_v63  ;;  %v3645_v56 = vmul.f32 %v12580_v34, %v12566_v53 }
 0x369   : > { %v10497_v32 = vpop.eup %10496  ;;  %v12604_v12 = vpop.f32.mrb[14].mxu0  ;;  %3938 = vadd.xlane.f32.xlu1 %v3809_v43  ;;  %v3647_v43 = vmul.f32 %v12580_v34, %v12588_v40  ;;  %10512 = vtanh.f32 %v2258_v4  ;;  %v2968_v34 = vmul.f32 %v12362_v10, %v12568_v9 }
 0x36a   : > { %v10499_v51 = vpop.eup %10498  ;;  %v12613_v57 = vpop.f32.mrb[15].mxu0  ;;  %3936 = vadd.xlane.f32.xlu0 %v3808_v30  ;;  %v3811_v28 = vmul.f32 %v10497_v32, %v3683_v16  ;;  %v2970_v30 = vmul.f32 %v12362_v10, %v12551_v55  ;;  %10514 = vtanh.f32 %v1885_v26 }
 0x36b   : > { %v3902_v25 = vmul.f32 %v10499_v51, %v3774_v45  ;;  %v10501_v7 = vpop.eup %10500  ;;  %v12618_v6 = vpop.permute.xlu0 %3513  ;;  %v3775_v32 = vadd.f32 %v3647_v43, %v3059_v61  ;;  %v2261_v45 = vadd.f32 %v10196_v48, %v12541_v49  ;;  %v3556_v48 = vmul.f32 %v12498_v37, %v12571_v58 }
 0x36c   : > { %17431 = vst [vmem:[#allocation73_spill] sm:$0xff] %v12618_v6  ;;  %v10503_v52 = vpop.eup %10502  ;;  %v3900_v51 = vmul.f32 %v10501_v7, %v3772_v27  ;;  %v3686_v61 = vadd.f32 %v3558_v0, %v2970_v30  ;;  %v2971_v43 = vmul.f32 %v12362_v10, %v12585_v47  ;;  %10516 = vtanh.f32 %v2250_v15 }
 0x36d   : > { %v12620_v14 = vpop.f32.mrb[12].mxu1  ;;  %4124 = vadd.xlane.f32.xlu1 %v3902_v25  ;;  %v10505_v16 = vpop.eup %10504  ;;  %v3903_v63 = vmul.f32 %v10503_v52, %v3775_v32  ;;  %v1906_v7 = vadd.f32 %v10107_v59, %v12541_v49  ;;  %v3773_v27 = vadd.f32 %v3645_v56, %v3057_v5  ;;  %v3559_v30 = vmul.f32 %v12498_v37, %v12588_v40 }
 0x36e   : > { %v12629_v39 = vpop.f32.mrb[13].mxu1  ;;  %3942 = vadd.xlane.f32.xlu0 %v3811_v28  ;;  %v10507_v25 = vpop.eup %10506  ;;  %10518 = vtanh.f32 %v2261_v45  ;;  %v2253_v0 = vadd.f32 %v12541_v49, %v2252_v31  ;;  %v3814_v32 = vmul.f32 %v10505_v16, %v3686_v61  ;;  %v3684_v15 = vadd.f32 %v3556_v48, %v2968_v34 }
 0x36f   : > { %v12634_v41 = vpop.f32.mrb[16].mxu0  ;;  %v12636_v18 = vpop.f32.mrb[14].mxu1  ;;  %v3901_v6 = vmul.f32 %v10507_v25, %v3773_v27  ;;  %v2969_v5 = vmul.f32 %v12362_v10, %v12564_v13  ;;  %10520 = vtanh.f32 %v1906_v7  ;;  %v1898_v56 = vadd.f32 %v12541_v49, %v12602_v17 }
 0x370   : > { %v12638_v20 = vpop.f32.mrb[17].mxu0  ;;  %v12640_v4 = vpop.f32.mrb[15].mxu1  ;;  %v3687_v31 = vadd.f32 %v3559_v30, %v2971_v43  ;;  %v3557_v16 = vmul.f32 %v12498_v37, %v12566_v53  ;;  %10522 = vtanh.f32 %v2253_v0  ;;  %v3062_v34 = vmul.f32 %v12477_v50, %v12551_v55 }
 0x371   : > { %v12642_v28 = vpop.f32.mrb[18].mxu0  ;;  %4120 = vadd.xlane.f32.xlu1 %v3900_v51  ;;  %v12650_v26 = vpop.permute.xlu0 %3521  ;;  %10524 = vtanh.f32 %v1898_v56  ;;  %v2274_v30 = vadd.f32 %v12620_v14, %v12541_v49  ;;  %v3063_v14 = vmul.f32 %v12477_v50, %v12585_v47 }
 0x372   : > { %v12653_v52 = vpop.f32.mrb[19].mxu0  ;;  %4126 = vadd.xlane.f32.xlu0 %v3903_v63  ;;  %v10509_v51 = vpop.eup %10508  ;;  %v3650_v59 = vmul.f32 %v12650_v26, %v12553_v2  ;;  %v1909_v63 = vadd.f32 %v12604_v12, %v12541_v49  ;;  %v3648_v12 = vmul.f32 %v12650_v26, %v12571_v58 }
 0x373   : > { %v10511_v8 = vpop.eup %10510  ;;  %v3812_v10 = vmul.f32 %v10509_v51, %v3684_v15  ;;  %v3651_v51 = vmul.f32 %v12650_v26, %v12588_v40 }
 0x374   : > { %v10513_v17 = vpop.eup %10512  ;;  %v3815_v43 = vmul.f32 %v10511_v8, %v3687_v31  ;;  %v3778_v27 = vadd.f32 %v3650_v59, %v3062_v34  ;;  %10526 = vtanh.f32 %v1909_v63  ;;  %v1901_v8 = vadd.f32 %v12541_v49, %v12613_v57 }
 0x375   : > { %v12658_v1 = vpop.f32.mrb[16].mxu1  ;;  %3948 = vadd.xlane.f32.xlu1 %v3814_v32  ;;  %v10515_v7 = vpop.eup %10514  ;;  %v3685_v32 = vadd.f32 %v3557_v16, %v2969_v5  ;;  %v3060_v59 = vmul.f32 %v12477_v50, %v12568_v9  ;;  %v2974_v16 = vmul.f32 %v12381_v36, %v12551_v55  ;;  %v3562_v57 = vmul.f32 %v12513_v11, %v12553_v2 }
 0x376   : > { %v12666_v45 = vpop.f32.mrb[17].mxu1  ;;  %4122 = vadd.xlane.f32.xlu0 %v3901_v6  ;;  %v3906_v15 = vmul.f32 %v10513_v17, %v3778_v27  ;;  %v10517_v31 = vpop.eup %10516  ;;  %10528 = vtanh.f32 %v2274_v30  ;;  %v2266_v63 = vadd.f32 %v12541_v49, %v12629_v39  ;;  %v2277_v27 = vadd.f32 %v12636_v18, %v12541_v49 }
 0x377   : > { %v12672_v25 = vpop.f32.mrb[20].mxu0  ;;  %v12674_v61 = vpop.f32.mrb[18].mxu1  ;;  %v3813_v56 = vmul.f32 %v10515_v7, %v3685_v32  ;;  %v3776_v5 = vadd.f32 %v3648_v12, %v3060_v59  ;;  %v3649_v7 = vmul.f32 %v12650_v26, %v12566_v53  ;;  %10530 = vtanh.f32 %v1901_v8 }
 0x378   : > { %v12678_v48 = vpop.f32.mrb[21].mxu0  ;;  %v12680_v6 = vpop.f32.mrb[19].mxu1  ;;  %v3690_v8 = vadd.f32 %v3562_v57, %v2974_v16  ;;  %v2972_v18 = vmul.f32 %v12381_v36, %v12568_v9  ;;  %10532 = vtanh.f32 %v2266_v63  ;;  %v3563_v16 = vmul.f32 %v12513_v11, %v12588_v40 }
 0x379   : > { %v12682_v37 = vpop.f32.mrb[22].mxu0  ;;  %3944 = vadd.xlane.f32.xlu1 %v3812_v10  ;;  %v10519_v10 = vpop.eup %10518  ;;  %10534 = vtanh.f32 %v2277_v27  ;;  %v2269_v57 = vadd.f32 %v12541_v49, %v12640_v4 }
 0x37a   : > { %v12688_v0 = vpop.f32.mrb[23].mxu0  ;;  %3950 = vadd.xlane.f32.xlu0 %v3815_v43  ;;  %v3779_v43 = vadd.f32 %v3651_v51, %v3063_v14  ;;  %v10521_v30 = vpop.eup %10520  ;;  %v3061_v51 = vmul.f32 %v12477_v50, %v12564_v13  ;;  %v2975_v14 = vmul.f32 %v12381_v36, %v12585_v47  ;;  %v1922_v50 = vadd.f32 %v12634_v41, %v12541_v49 }
 0x37c   : > { %v3907_v38 = vmul.f32 %v10519_v10, %v3779_v43  ;;  %v3777_v43 = vadd.f32 %v3649_v7, %v3061_v51  ;;  %10536 = vtanh.f32 %v1922_v50  ;;  %v1914_v7 = vadd.f32 %v12541_v49, %v12638_v20 }
 0x37d   : > { %v12698_v34 = vpop.f32.mrb[20].mxu1  ;;  %4132 = vadd.xlane.f32.xlu1 %v3906_v15  ;;  %v3904_v15 = vmul.f32 %v10517_v31, %v3776_v5  ;;  %v3560_v31 = vmul.f32 %v12513_v11, %v12571_v58  ;;  %v12730_v5 = vpop.permute.xlu1 %3525  ;;  %v3691_v4 = vadd.f32 %v3563_v16, %v2975_v14  ;;  %10538 = vtanh.f32 %v2269_v57 }
 0x37e   : > { %v12706_v17 = vpop.f32.mrb[21].mxu1  ;;  %3946 = vadd.xlane.f32.xlu0 %v3813_v56  ;;  %v10523_v56 = vpop.eup %10522  ;;  %v3654_v41 = vmul.f32 %v12730_v5, %v12553_v2  ;;  %v1925_v51 = vadd.f32 %v12642_v28, %v12541_v49  ;;  %v3652_v28 = vmul.f32 %v12730_v5, %v12571_v58  ;;  %10540 = vtanh.f32 %v1914_v7 }
 0x37f   : > { %v12712_v12 = vpop.f32.mrb[24].mxu0  ;;  %v12714_v32 = vpop.f32.mrb[22].mxu1  ;;  %v3905_v23 = vmul.f32 %v10523_v56, %v3777_v43  ;;  %v3688_v63 = vadd.f32 %v3560_v31, %v2972_v18  ;;  %v3066_v18 = vmul.f32 %v12464_v33, %v12551_v55 }
 0x380   : > { %v12716_v59 = vpop.f32.mrb[25].mxu0  ;;  %v12718_v39 = vpop.f32.mrb[23].mxu1  ;;  %10542 = vtanh.f32 %v1925_v51  ;;  %v2282_v51 = vadd.f32 %v12541_v49, %v12666_v45 }
 0x381   : > { %v12722_v26 = vpop.f32.mrb[26].mxu0  ;;  %4128 = vadd.xlane.f32.xlu1 %v3904_v15  ;;  %v3818_v15 = vmul.f32 %v10521_v30, %v3690_v8  ;;  %v10525_v21 = vpop.eup %10524  ;;  %v3561_v30 = vmul.f32 %v12513_v11, %v12566_v53  ;;  %v3782_v43 = vadd.f32 %v3654_v41, %v3066_v18  ;;  %v3064_v41 = vmul.f32 %v12464_v33, %v12568_v9 }
 0x382   : > { %v12734_v10 = vpop.f32.mrb[27].mxu0  ;;  %4134 = vadd.xlane.f32.xlu0 %v3907_v38  ;;  %v10527_v60 = vpop.eup %10526  ;;  %v2973_v38 = vmul.f32 %v12381_v36, %v12564_v13  ;;  %v3816_v36 = vmul.f32 %v10525_v21, %v3688_v63  ;;  %v2290_v21 = vadd.f32 %v12658_v1, %v12541_v49  ;;  %v3067_v1 = vmul.f32 %v12464_v33, %v12585_v47 }
 0x383   : > { %v10529_v20 = vpop.eup %10528  ;;  %v3819_v14 = vmul.f32 %v10527_v60, %v3691_v4  ;;  %v1917_v60 = vadd.f32 %v12541_v49, %v12653_v52  ;;  %v3566_v52 = vmul.f32 %v12503_v44, %v12553_v2 }
 0x384   : > { %v10531_v50 = vpop.eup %10530  ;;  %v3689_v57 = vadd.f32 %v3561_v30, %v2973_v38  ;;  %v3910_v63 = vmul.f32 %v10529_v20, %v3782_v43  ;;  %v3780_v38 = vadd.f32 %v3652_v28, %v3064_v41  ;;  %v2978_v30 = vmul.f32 %v12367_v22, %v12551_v55 }
 0x385   : > { %v12740_v19 = vpop.f32.mrb[24].mxu1  ;;  %3956 = vadd.xlane.f32.xlu1 %v3818_v15  ;;  %v3655_v15 = vmul.f32 %v12730_v5, %v12588_v40  ;;  %v10533_v4 = vpop.eup %10532  ;;  %10544 = vtanh.f32 %v2290_v21  ;;  %v2293_v43 = vadd.f32 %v12674_v61, %v12541_v49  ;;  %v2976_v61 = vmul.f32 %v12367_v22, %v12568_v9 }
 0x386   : > { %v12748_v27 = vpop.f32.mrb[25].mxu1  ;;  %4130 = vadd.xlane.f32.xlu0 %v3905_v23  ;;  %v3817_v7 = vmul.f32 %v10531_v50, %v3689_v57  ;;  %v3653_v50 = vmul.f32 %v12730_v5, %v12566_v53  ;;  %10546 = vtanh.f32 %v1917_v60  ;;  %v3694_v60 = vadd.f32 %v3566_v52, %v2978_v30 }
 0x387   : > { %v12754_v56 = vpop.f32.mrb[28].mxu0  ;;  %v12756_v8 = vpop.f32.mrb[26].mxu1  ;;  %10548 = vtanh.f32 %v2282_v51  ;;  %v3567_v30 = vmul.f32 %v12503_v44, %v12588_v40  ;;  %v2285_v52 = vadd.f32 %v12541_v49, %v12680_v6 }
 0x388   : > { %v12760_v31 = vpop.f32.mrb[29].mxu0  ;;  %v12762_v23 = vpop.f32.mrb[27].mxu1  ;;  %10550 = vtanh.f32 %v2293_v43 }
 0x389   : > { %v12764_v11 = vpop.f32.mrb[30].mxu0  ;;  %3952 = vadd.xlane.f32.xlu1 %v3816_v36  ;;  %v10535_v36 = vpop.eup %10534 }
 0x38a   : > { %v12770_v16 = vpop.f32.mrb[31].mxu0  ;;  %3958 = vadd.xlane.f32.xlu0 %v3819_v14  ;;  %v3783_v14 = vadd.f32 %v3655_v15, %v3067_v1  ;;  %v10537_v21 = vpop.eup %10536  ;;  %v3065_v15 = vmul.f32 %v12464_v33, %v12564_v13  ;;  %v2979_v1 = vmul.f32 %v12367_v22, %v12585_v47  ;;  %v1938_v33 = vadd.f32 %v12672_v25, %v12541_v49 }
 0x38c   : > { %10552 = vtanh.f32 %v1938_v33  ;;  %v3695_v6 = vadd.f32 %v3567_v30, %v2979_v1 }
 0x38d   : > { %v12780_v18 = vpop.f32.mrb[28].mxu1  ;;  %4140 = vadd.xlane.f32.xlu1 %v3910_v63  ;;  %v3908_v63 = vmul.f32 %v10533_v4, %v3780_v38  ;;  %v3564_v4 = vmul.f32 %v12503_v44, %v12571_v58  ;;  %v12812_v38 = vpop.permute.xlu0 %3529  ;;  %10554 = vtanh.f32 %v2285_v52 }
 0x38e   : > { %v12788_v20 = vpop.f32.mrb[29].mxu1  ;;  %3954 = vadd.xlane.f32.xlu0 %v3817_v7  ;;  %v10539_v7 = vpop.eup %10538  ;;  %v3658_v25 = vmul.f32 %v12812_v38, %v12553_v2 }
 0x38f   : > { %17432 = vst [vmem:[#allocation74_spill] sm:$0xff] %v12788_v20  ;;  %v12794_v28 = vpop.f32.mrb[32].mxu0  ;;  %v12796_v57 = vpop.f32.mrb[30].mxu1  ;;  %v3911_v20 = vmul.f32 %v10535_v36, %v3783_v14  ;;  %v3781_v14 = vadd.f32 %v3653_v50, %v3065_v15  ;;  %v3692_v51 = vadd.f32 %v3564_v4, %v2976_v61  ;;  %v1930_v50 = vadd.f32 %v12541_v49, %v12678_v48 }
 0x390   : > { %17433 = vst [vmem:[#allocation75_spill] sm:$0xff] %v12794_v28  ;;  %v12798_v41 = vpop.f32.mrb[33].mxu0  ;;  %v12800_v45 = vpop.f32.mrb[31].mxu1  ;;  %v1941_v15 = vadd.f32 %v12682_v37, %v12541_v49  ;;  %v3070_v61 = vmul.f32 %v12482_v62, %v12551_v55  ;;  %v3656_v37 = vmul.f32 %v12812_v38, %v12571_v58 }
 0x391   : > { %17434 = vst [vmem:[#allocation76_spill] sm:$0xff] %v12798_v41  ;;  %17435 = vst [vmem:[#allocation77_spill] sm:$0xff] %v12800_v45  ;;  %v12804_v5 = vpop.f32.mrb[34].mxu0  ;;  %4136 = vadd.xlane.f32.xlu1 %v3908_v63  ;;  %v3822_v63 = vmul.f32 %v10537_v21, %v3694_v60  ;;  %v3909_v41 = vmul.f32 %v10539_v7, %v3781_v14  ;;  %v3565_v21 = vmul.f32 %v12503_v44, %v12566_v53 }
 0x392   : > { %17436 = vst [vmem:[#allocation78_spill] sm:$0xff] %v12804_v5  ;;  %v12816_v36 = vpop.f32.mrb[35].mxu0  ;;  %4142 = vadd.xlane.f32.xlu0 %v3911_v20  ;;  %v10541_v5 = vpop.eup %10540  ;;  %v2977_v20 = vmul.f32 %v12367_v22, %v12564_v13  ;;  %v3786_v14 = vadd.f32 %v3658_v25, %v3070_v61  ;;  %10556 = vtanh.f32 %v1930_v50  ;;  %v3068_v25 = vmul.f32 %v12482_v62, %v12568_v9 }
 0x393   : > { %v10543_v45 = vpop.eup %10542  ;;  %v3820_v22 = vmul.f32 %v10541_v5, %v3692_v51  ;;  %v2306_v5 = vadd.f32 %v12698_v34, %v12541_v49  ;;  %10558 = vtanh.f32 %v1941_v15  ;;  %v3071_v34 = vmul.f32 %v12482_v62, %v12585_v47 }
 0x394   : > { %v10545_v48 = vpop.eup %10544  ;;  %v3823_v1 = vmul.f32 %v10543_v45, %v3695_v6  ;;  %v3693_v52 = vadd.f32 %v3565_v21, %v2977_v20  ;;  %v1933_v45 = vadd.f32 %v12541_v49, %v12688_v0  ;;  %v3784_v20 = vadd.f32 %v3656_v37, %v3068_v25 }
 0x395   : > { %v12822_v28 = vpop.f32.mrb[32].mxu1  ;;  %3964 = vadd.xlane.f32.xlu1 %v3822_v63  ;;  %v10547_v33 = vpop.eup %10546  ;;  %v3659_v63 = vmul.f32 %v12812_v38, %v12588_v40  ;;  %v3914_v51 = vmul.f32 %v10545_v48, %v3786_v14  ;;  %v2982_v21 = vmul.f32 %v12391_v46, %v12551_v55  ;;  %v3570_v0 = vmul.f32 %v12519_v29, %v12553_v2 }
 0x396   : > { %v12830_v43 = vpop.f32.mrb[33].mxu1  ;;  %4138 = vadd.xlane.f32.xlu0 %v3909_v41  ;;  %v10549_v6 = vpop.eup %10548  ;;  %v3821_v50 = vmul.f32 %v10547_v33, %v3693_v52  ;;  %10560 = vtanh.f32 %v2306_v5  ;;  %v2298_v15 = vadd.f32 %v12541_v49, %v12706_v17  ;;  %v3657_v33 = vmul.f32 %v12812_v38, %v12566_v53 }
 0x397   : > { %v12836_v7 = vpop.f32.mrb[36].mxu0  ;;  %v12838_v60 = vpop.f32.mrb[34].mxu1  ;;  %10562 = vtanh.f32 %v1933_v45  ;;  %v2309_v14 = vadd.f32 %v12714_v32, %v12541_v49  ;;  %v3698_v45 = vadd.f32 %v3570_v0, %v2982_v21  ;;  %v2980_v32 = vmul.f32 %v12391_v46, %v12568_v9 }
 0x398   : > { %v12842_v4 = vpop.f32.mrb[37].mxu0  ;;  %v12844_v41 = vpop.f32.mrb[35].mxu1  ;;  %10564 = vtanh.f32 %v2298_v15  ;;  %v3571_v21 = vmul.f32 %v12519_v29, %v12588_v40  ;;  %v2301_v0 = vadd.f32 %v12541_v49, %v12718_v39  ;;  %v3569_v39 = vmul.f32 %v12519_v29, %v12566_v53 }
 0x399   : > { %v12846_v44 = vpop.f32.mrb[38].mxu0  ;;  %3960 = vadd.xlane.f32.xlu1 %v3820_v22  ;;  %v10551_v22 = vpop.eup %10550  ;;  %10566 = vtanh.f32 %v2309_v14  ;;  %v1957_v14 = vadd.f32 %v12722_v26, %v12541_v49  ;;  %v2322_v26 = vadd.f32 %v12740_v19, %v12541_v49 }
 0x39a   : > { %v12852_v30 = vpop.f32.mrb[39].mxu0  ;;  %3966 = vadd.xlane.f32.xlu0 %v3823_v1  ;;  %v3787_v1 = vadd.f32 %v3659_v63, %v3071_v34  ;;  %v10553_v5 = vpop.eup %10552  ;;  %v3069_v63 = vmul.f32 %v12482_v62, %v12564_v13  ;;  %v2983_v34 = vmul.f32 %v12391_v46, %v12585_v47 }
 0x39d   : > { %v12862_v61 = vpop.f32.mrb[36].mxu1  ;;  %4148 = vadd.xlane.f32.xlu1 %v3914_v51  ;;  %v3912_v51 = vmul.f32 %v10549_v6, %v3784_v20  ;;  %v3568_v6 = vmul.f32 %v12519_v29, %v12571_v58  ;;  %v3534_v20 = vpop.permute.xlu1 %3533 }
 0x39e   : > { %v12870_v48 = vpop.f32.mrb[37].mxu1  ;;  %3962 = vadd.xlane.f32.xlu0 %v3821_v50  ;;  %v10555_v50 = vpop.eup %10554  ;;  %v3660_v29 = vmul.f32 %v3534_v20, %v12571_v58 }
 0x39f   : > { %17437 = vst [vmem:[#allocation79_spill] sm:$0xff] %v12870_v48  ;;  %v12876_v37 = vpop.f32.mrb[40].mxu0  ;;  %v12878_v52 = vpop.f32.mrb[38].mxu1  ;;  %v3915_v48 = vmul.f32 %v10551_v22, %v3787_v1  ;;  %v1954_v22 = vadd.f32 %v12712_v12, %v12541_v49  ;;  %v3785_v1 = vadd.f32 %v3657_v33, %v3069_v63  ;;  %v3696_v15 = vadd.f32 %v3568_v6, %v2980_v32 }
 0x3a0   : > { %17438 = vst [vmem:[#allocation80_spill] sm:$0xff] %v12876_v37  ;;  %v12880_v25 = vpop.f32.mrb[41].mxu0  ;;  %v12882_v17 = vpop.f32.mrb[39].mxu1  ;;  %v3662_v37 = vmul.f32 %v3534_v20, %v12553_v2  ;;  %v2981_v12 = vmul.f32 %v12391_v46, %v12564_v13  ;;  %v3699_v33 = vadd.f32 %v3571_v21, %v2983_v34 }
 0x3a1   : > { %17439 = vst [vmem:[#allocation81_spill] sm:$0xff] %v12880_v25  ;;  %17440 = vst [vmem:[#allocation82_spill] sm:$0xff] %v12882_v17  ;;  %v12886_v38 = vpop.f32.mrb[42].mxu0  ;;  %4144 = vadd.xlane.f32.xlu1 %v3912_v51  ;;  %v3826_v51 = vmul.f32 %v10553_v5, %v3698_v45  ;;  %v3913_v25 = vmul.f32 %v10555_v50, %v3785_v1  ;;  %10568 = vtanh.f32 %v1954_v22 }
 0x3a2   : > { %17441 = vst [vmem:[#allocation83_spill] sm:$0xff] %v12886_v38  ;;  %v12896_v62 = vpop.f32.mrb[43].mxu0  ;;  %4150 = vadd.xlane.f32.xlu0 %v3915_v48  ;;  %v10557_v38 = vpop.eup %10556  ;;  %v1946_v48 = vadd.f32 %v12541_v49, %v12716_v59  ;;  %10570 = vtanh.f32 %v2301_v0  ;;  %v3074_v50 = vmul.f32 %v12469_v42, %v12551_v55  ;;  %v3663_v22 = vmul.f32 %v3534_v20, %v12588_v40 }
 0x3a3   : > { %v10559_v17 = vpop.eup %10558  ;;  %v3824_v63 = vmul.f32 %v10557_v38, %v3696_v15  ;;  %v3697_v38 = vadd.f32 %v3569_v39, %v2981_v12  ;;  %v2986_v12 = vmul.f32 %v12379_v35, %v12551_v55  ;;  %v3661_v39 = vmul.f32 %v3534_v20, %v12566_v53 }
 0x3a4   : > { %v10561_v46 = vpop.eup %10560  ;;  %v3827_v32 = vmul.f32 %v10559_v17, %v3699_v33  ;;  %v3790_v6 = vadd.f32 %v3662_v37, %v3074_v50  ;;  %10572 = vtanh.f32 %v1946_v48  ;;  %v1949_v17 = vadd.f32 %v12541_v49, %v12734_v10 }
 0x3a5   : > { %3972 = vadd.xlane.f32.xlu1 %v3826_v51  ;;  %v10563_v59 = vpop.eup %10562  ;;  %10574 = vtanh.f32 %v1957_v14  ;;  %v3072_v37 = vmul.f32 %v12469_v42, %v12568_v9  ;;  %v3075_v51 = vmul.f32 %v12469_v42, %v12585_v47  ;;  %v3574_v48 = vmul.f32 %v12511_v3, %v12553_v2 }
 0x3a6   : > { %4146 = vadd.xlane.f32.xlu0 %v3913_v25  ;;  %v3918_v1 = vmul.f32 %v10561_v46, %v3790_v6  ;;  %v10565_v21 = vpop.eup %10564  ;;  %v3825_v0 = vmul.f32 %v10563_v59, %v3697_v38  ;;  %10576 = vtanh.f32 %v2322_v26  ;;  %v2314_v10 = vadd.f32 %v12541_v49, %v12748_v27 }
 0x3a7   : > { %v12911_v5 = vpop.f32.mrb[44].mxu0  ;;  %v10567_v19 = vpop.eup %10566  ;;  %v3788_v15 = vadd.f32 %v3660_v29, %v3072_v37  ;;  %v3791_v33 = vadd.f32 %v3663_v22, %v3075_v51  ;;  %10578 = vtanh.f32 %v1949_v17  ;;  %v2325_v14 = vadd.f32 %v12756_v8, %v12541_v49 }
 0x3a8   : > { %v12915_v45 = vpop.f32.mrb[45].mxu0  ;;  %v3073_v6 = vmul.f32 %v12469_v42, %v12564_v13  ;;  %v3702_v26 = vadd.f32 %v3574_v48, %v2986_v12  ;;  %v2984_v20 = vmul.f32 %v12379_v35, %v12568_v9  ;;  %v3572_v8 = vmul.f32 %v12511_v3, %v12571_v58  ;;  %v3538_v22 = vpop.permute.xlu0 %3537 }
 0x3a9   : > { %v12917_v25 = vpop.f32.mrb[46].mxu0  ;;  %3968 = vadd.xlane.f32.xlu1 %v3824_v63  ;;  %v3916_v50 = vmul.f32 %v10565_v21, %v3788_v15  ;;  %v3919_v59 = vmul.f32 %v10567_v19, %v3791_v33  ;;  %v2987_v38 = vmul.f32 %v12379_v35, %v12585_v47  ;;  %10580 = vtanh.f32 %v2314_v10 }
 0x3aa   : > { %v12922_v34 = vpop.f32.mrb[47].mxu0  ;;  %3974 = vadd.xlane.f32.xlu0 %v3827_v32  ;;  %v1970_v17 = vadd.f32 %v12754_v56, %v12541_v49  ;;  %v3575_v37 = vmul.f32 %v12511_v3, %v12588_v40  ;;  %10582 = vtanh.f32 %v2325_v14  ;;  %v2317_v21 = vadd.f32 %v12541_v49, %v12762_v23 }
 0x3ab   : > { %v10569_v46 = vpop.eup %10568  ;;  %v3700_v12 = vadd.f32 %v3572_v8, %v2984_v20  ;;  %v3666_v48 = vmul.f32 %v3538_v22, %v12553_v2  ;;  %v2985_v56 = vmul.f32 %v12379_v35, %v12564_v13  ;;  %v1962_v10 = vadd.f32 %v12541_v49, %v12760_v31 }
 0x3ac   : > { %v10571_v29 = vpop.eup %10570  ;;  %10584 = vtanh.f32 %v1970_v17  ;;  %v3703_v33 = vadd.f32 %v3575_v37, %v2987_v38  ;;  %v3573_v23 = vmul.f32 %v12511_v3, %v12566_v53  ;;  %v3664_v3 = vmul.f32 %v3538_v22, %v12571_v58 }
 0x3ad   : > { %4156 = vadd.xlane.f32.xlu1 %v3918_v1  ;;  %v3789_v1 = vadd.f32 %v3661_v39, %v3073_v6  ;;  %10586 = vtanh.f32 %v2317_v21  ;;  %v1973_v39 = vadd.f32 %v12764_v11, %v12541_v49  ;;  %v2338_v11 = vadd.f32 %v12780_v18, %v12541_v49 }
 0x3ae   : > { %3970 = vadd.xlane.f32.xlu0 %v3825_v0  ;;  %v3830_v0 = vmul.f32 %v10569_v46, %v3702_v26  ;;  %v10573_v51 = vpop.eup %10572  ;;  %v3078_v46 = vmul.f32 %v12492_v24, %v12551_v55  ;;  %10588 = vtanh.f32 %v1962_v10  ;;  %v3701_v8 = vadd.f32 %v3573_v23, %v2985_v56 }
 0x3af   : > { %v12940_v63 = vpop.f32.mrb[48].mxu0  ;;  %v3917_v19 = vmul.f32 %v10571_v29, %v3789_v1  ;;  %v10575_v15 = vpop.eup %10574  ;;  %v3667_v38 = vmul.f32 %v3538_v22, %v12588_v40  ;;  %10590 = vtanh.f32 %v1973_v39  ;;  %v1965_v17 = vadd.f32 %v12541_v49, %v12770_v16  ;;  %v17443_v16 = vld [vmem:[#allocation74_spill] sm:$0xff] }
 0x3b0   : > { %v12942_v32 = vpop.f32.mrb[49].mxu0  ;;  %v10577_v35 = vpop.eup %10576  ;;  %v3831_v6 = vmul.f32 %v10575_v15, %v3703_v33  ;;  %v3794_v26 = vadd.f32 %v3666_v48, %v3078_v46  ;;  %v3076_v37 = vmul.f32 %v12492_v24, %v12568_v9  ;;  %v2990_v15 = vmul.f32 %v12400_v54, %v12551_v55 }
 0x3b1   : > { %v12946_v27 = vpop.f32.mrb[50].mxu0  ;;  %4152 = vadd.xlane.f32.xlu1 %v3916_v50  ;;  %v3828_v50 = vmul.f32 %v10573_v51, %v3700_v12  ;;  %v10579_v31 = vpop.eup %10578  ;;  %v3079_v51 = vmul.f32 %v12492_v24, %v12585_v47  ;;  %v17442_v12 = vld [vmem:[#allocation59_spill] sm:$0xff]  ;;  %10592 = vtanh.f32 %v2338_v11  ;;  %v2330_v56 = vadd.f32 %v12541_v49, %v17443_v16  ;;  %v13016_v11 = vld [vmem:[#allocation10] ss:$0 sm:$0xff] }
 0x3b2   : > { %v12956_v42 = vpop.f32.mrb[51].mxu0  ;;  %4158 = vadd.xlane.f32.xlu0 %v3919_v59  ;;  %v3922_v1 = vmul.f32 %v10577_v35, %v3794_v26  ;;  %v3578_v48 = vmul.f32 %v17442_v12, %v12553_v2  ;;  %v3665_v33 = vmul.f32 %v3538_v22, %v12566_v53  ;;  %10594 = vtanh.f32 %v1965_v17 }
 0x3b3   : > { %v10581_v21 = vpop.eup %10580  ;;  %v3795_v10 = vadd.f32 %v3667_v38, %v3079_v51  ;;  %v2341_v23 = vadd.f32 %v12796_v57, %v12541_v49  ;;  %v3077_v2 = vmul.f32 %v12492_v24, %v12564_v13  ;;  %v2988_v22 = vmul.f32 %v12400_v54, %v12568_v9  ;;  %v17444_v24 = vld [vmem:[#allocation75_spill] sm:$0xff] }
 0x3b4   : > { %v10583_v18 = vpop.eup %10582  ;;  %v3706_v26 = vadd.f32 %v3578_v48, %v2990_v15  ;;  %v3576_v49 = vmul.f32 %v17442_v12, %v12571_v58  ;;  %v2991_v57 = vmul.f32 %v12400_v54, %v12585_v47  ;;  %10596 = vtanh.f32 %v2330_v56  ;;  %v17445_v58 = vld [vmem:[#allocation77_spill] sm:$0xff]  ;;  %v17446_v48 = vld [vmem:[#allocation76_spill] sm:$0xff] }
 0x3b5   : > { %3980 = vadd.xlane.f32.xlu1 %v3830_v0  ;;  %v3829_v0 = vmul.f32 %v10579_v31, %v3701_v8  ;;  %v3923_v35 = vmul.f32 %v10583_v18, %v3795_v10  ;;  %v1986_v8 = vadd.f32 %v13016_v11, %v17444_v24  ;;  %v3793_v17 = vadd.f32 %v3665_v33, %v3077_v2  ;;  %v13026_v18 = vld [vmem:[#allocation15 + $0x10] sm:$0xff]  ;;  %v17447_v33 = vld [vmem:[#allocation78_spill] sm:$0xff] }
 0x3b6   : > { %4154 = vadd.xlane.f32.xlu0 %v3917_v19  ;;  %v3792_v19 = vadd.f32 %v3664_v3, %v3076_v37  ;;  %v10585_v46 = vpop.eup %10584  ;;  %v13014_v3 = vpop.permute.xlu1 %3541  ;;  %v3579_v9 = vmul.f32 %v17442_v12, %v12588_v40  ;;  %10598 = vtanh.f32 %v2341_v23  ;;  %v3704_v51 = vadd.f32 %v3576_v49, %v2988_v22  ;;  %v17448_v2 = vld [vmem:[#allocation54_spill] sm:$0xff] }
 0x3b7   : > { %v12971_v14 = vpop.f32.mrb[52].mxu0  ;;  %v3834_v47 = vmul.f32 %v10585_v46, %v3706_v26  ;;  %v2989_v15 = vmul.f32 %v12400_v54, %v12564_v13  ;;  %10600 = vtanh.f32 %v1986_v8  ;;  %v1978_v16 = vadd.f32 %v13016_v11, %v17446_v48 }
 0x3b8   : > { %v12975_v59 = vpop.f32.mrb[53].mxu0  ;;  %v3707_v56 = vadd.f32 %v3579_v9, %v2991_v57  ;;  %v3577_v10 = vmul.f32 %v17442_v12, %v12566_v53  ;;  %v1989_v23 = vadd.f32 %v13016_v11, %v17447_v33  ;;  %v13048_v12 = vld [vmem:[#allocation15] sm:$0xff]  ;;  %v2354_v24 = vadd.f32 %v13016_v11, %v12822_v28  ;;  %v13064_v28 = vld [vmem:[#allocation13 + $0x18] sm:$0xff]  ;;  %v13074_v33 = vld [vmem:[#allocation15 + $0x8] sm:$0xff] }
 0x3b9   : > { %v12977_v29 = vpop.f32.mrb[54].mxu0  ;;  %3976 = vadd.xlane.f32.xlu1 %v3828_v50  ;;  %v3920_v50 = vmul.f32 %v10581_v21, %v3792_v19  ;;  %v3670_v19 = vmul.f32 %v13026_v18, %v13014_v3  ;;  %v3668_v57 = vmul.f32 %v13048_v12, %v13014_v3  ;;  %v3671_v9 = vmul.f32 %v13014_v3, %v12588_v40 }
 0x3ba   : > { %v12982_v20 = vpop.f32.mrb[55].mxu0  ;;  %3982 = vadd.xlane.f32.xlu0 %v3831_v6  ;;  %v10587_v6 = vpop.eup %10586 }
 0x3bb   : > { %v10589_v37 = vpop.eup %10588  ;;  %v3921_v21 = vmul.f32 %v10587_v6, %v3793_v17  ;;  %v3705_v17 = vadd.f32 %v3577_v10, %v2989_v15  ;;  %v17449_v15 = vld [vmem:[#allocation38_spill] sm:$0xff] }
 0x3bc   : > { %v3832_v46 = vmul.f32 %v10589_v37, %v3704_v51  ;;  %v3083_v51 = vmul.f32 %v13064_v28, %v17448_v2 }
 0x3bd   : > { %4164 = vadd.xlane.f32.xlu1 %v3922_v1  ;;  %v2333_v1 = vadd.f32 %v13016_v11, %v17445_v58  ;;  %v1981_v58 = vadd.f32 %v13016_v11, %v12816_v36  ;;  %v17450_v36 = vld [vmem:[#allocation57_spill] sm:$0xff] }
 0x3be   : > { %3978 = vadd.xlane.f32.xlu0 %v3829_v0  ;;  %v10591_v0 = vpop.eup %10590  ;;  %v3799_v10 = vadd.f32 %v3671_v9, %v3083_v51  ;;  %v3580_v9 = vmul.f32 %v13048_v12, %v17450_v36 }
 0x3bf   : > { %v13000_v39 = vpop.f32.mrb[56].mxu0  ;;  %10602 = vtanh.f32 %v2333_v1  ;;  %v10593_v13 = vpop.eup %10592  ;;  %v3835_v26 = vmul.f32 %v10591_v0, %v3707_v56  ;;  %v2346_v56 = vadd.f32 %v13016_v11, %v12830_v43 }
 0x3c0   : > { %v13002_v55 = vpop.f32.mrb[57].mxu0  ;;  %v10595_v22 = vpop.eup %10594  ;;  %10604 = vtanh.f32 %v1978_v16  ;;  %v3582_v16 = vmul.f32 %v13026_v18, %v17450_v36 }
 0x3c1   : > { %v13006_v31 = vpop.f32.mrb[58].mxu0  ;;  %4160 = vadd.xlane.f32.xlu1 %v3920_v50  ;;  %10606 = vtanh.f32 %v1989_v23  ;;  %v3833_v0 = vmul.f32 %v10595_v22, %v3705_v17  ;;  %v3669_v23 = vmul.f32 %v13074_v33, %v13014_v3 }
 0x3c2   : > { %v13020_v38 = vpop.f32.mrb[59].mxu0  ;;  %4166 = vadd.xlane.f32.xlu0 %v3923_v35  ;;  %v13040_v35 = vld [vmem:[#allocation13 + $0x10] sm:$0xff]  ;;  %10608 = vtanh.f32 %v2354_v24 }
 0x3c3   : > { %v3082_v54 = vmul.f32 %v13040_v35, %v17448_v2  ;;  %v2994_v48 = vmul.f32 %v13040_v35, %v17449_v15  ;;  %10610 = vtanh.f32 %v1981_v58  ;;  %v2995_v58 = vmul.f32 %v13064_v28, %v17449_v15 }
 0x3c4   : > { %10612 = vtanh.f32 %v2346_v56 }
 0x3c5   : > { %3988 = vadd.xlane.f32.xlu1 %v3834_v47  ;;  %v3798_v53 = vadd.f32 %v3670_v19, %v3082_v54  ;;  %v13060_v47 = vld [vmem:[#allocation13] sm:$0xff]  ;;  %v3710_v3 = vadd.f32 %v3582_v16, %v2994_v48 }
 0x3c6   : > { %4162 = vadd.xlane.f32.xlu0 %v3921_v21  ;;  %v3080_v37 = vmul.f32 %v13060_v47, %v17448_v2  ;;  %v10597_v21 = vpop.eup %10596 }
 0x3c7   : > { %v13038_v50 = vpop.f32.mrb[60].mxu0  ;;  %v3926_v1 = vmul.f32 %v10593_v13, %v3798_v53  ;;  %v10599_v19 = vpop.eup %10598 }
 0x3c8   : > { %v13044_v6 = vpop.f32.mrb[61].mxu0  ;;  %v3796_v40 = vadd.f32 %v3668_v57, %v3080_v37  ;;  %v3927_v53 = vmul.f32 %v10599_v19, %v3799_v10  ;;  %v13084_v57 = vld [vmem:[#allocation13 + $0x8] sm:$0xff]  ;;  %v2002_v37 = vadd.f32 %v13016_v11, %v12836_v7  ;;  %v2349_v19 = vadd.f32 %v13016_v11, %v12844_v41 }
 0x3c9   : > { %v13046_v49 = vpop.f32.mrb[62].mxu0  ;;  %3984 = vadd.xlane.f32.xlu1 %v3832_v46  ;;  %v2357_v46 = vadd.f32 %v13016_v11, %v12838_v60  ;;  %v3081_v43 = vmul.f32 %v13084_v57, %v17448_v2  ;;  %v2992_v60 = vmul.f32 %v13060_v47, %v17449_v15  ;;  %v3581_v41 = vmul.f32 %v13074_v33, %v17450_v36 }
 0x3ca   : > { %v13054_v8 = vpop.f32.mrb[63].mxu0  ;;  %3990 = vadd.xlane.f32.xlu0 %v3835_v26  ;;  %v3924_v13 = vmul.f32 %v10597_v21, %v3796_v40  ;;  %v10601_v26 = vpop.eup %10600 }
 0x3cb   : > { %v10603_v24 = vpop.eup %10602  ;;  %v3797_v21 = vadd.f32 %v3669_v23, %v3081_v43  ;;  %10614 = vtanh.f32 %v2357_v46  ;;  %v3838_v40 = vmul.f32 %v10601_v26, %v3710_v3  ;;  %v3708_v10 = vadd.f32 %v3580_v9, %v2992_v60 }
 0x3cc   : > { %v10605_v48 = vpop.eup %10604  ;;  %v2993_v23 = vmul.f32 %v13084_v57, %v17449_v15  ;;  %10616 = vtanh.f32 %v2002_v37  ;;  %v2005_v26 = vadd.f32 %v13016_v11, %v12846_v44  ;;  %v2370_v44 = vadd.f32 %v13016_v11, %v12862_v61 }
 0x3cd   : > { %4172 = vadd.xlane.f32.xlu1 %v3926_v1  ;;  %v3546_v1 = vpop.permute.xlu0 %3545  ;;  %v3925_v16 = vmul.f32 %v10603_v24, %v3797_v21  ;;  %v10607_v56 = vpop.eup %10606  ;;  %10618 = vtanh.f32 %v2349_v19  ;;  %v3836_v43 = vmul.f32 %v10605_v48, %v3708_v10  ;;  %v17451_v24 = vld [vmem:[#allocation56_spill] sm:$0xff] }
 0x3ce   : > { %3986 = vadd.xlane.f32.xlu0 %v3833_v0  ;;  %v13100_v0 = vld [vmem:[#allocation15 + $0x18] sm:$0xff]  ;;  %v3674_v7 = vmul.f32 %v13026_v18, %v3546_v1  ;;  %v3086_v3 = vmul.f32 %v13040_v35, %v17451_v24  ;;  %v10609_v15 = vpop.eup %10608 }
 0x3cf   : > { %v13080_v54 = vpop.f32.mrb[64].mxu0  ;;  %v3583_v51 = vmul.f32 %v13100_v0, %v17450_v36  ;;  %v3672_v36 = vmul.f32 %v13048_v12, %v3546_v1  ;;  %v3675_v19 = vmul.f32 %v13100_v0, %v3546_v1 }
 0x3d0   : > { %v13082_v22 = vpop.f32.mrb[65].mxu0 }
 0x3d1   : > { %v13088_v17 = vpop.f32.mrb[66].mxu0  ;;  %4168 = vadd.xlane.f32.xlu1 %v3924_v13  ;;  %v1994_v13 = vadd.f32 %v13016_v11, %v12842_v4  ;;  %v3711_v46 = vadd.f32 %v3583_v51, %v2995_v58  ;;  %v10611_v4 = vpop.eup %10610  ;;  %v3802_v58 = vadd.f32 %v3674_v7, %v3086_v3  ;;  %v3709_v51 = vadd.f32 %v3581_v41, %v2993_v23  ;;  %v17454_v41 = vld [vmem:[#allocation61_spill] sm:$0xff] }
 0x3d2   : > { %v13098_v2 = vpop.f32.mrb[67].mxu0  ;;  %4174 = vadd.xlane.f32.xlu0 %v3927_v53  ;;  %v3087_v7 = vmul.f32 %v13064_v28, %v17451_v24 }
 0x3d3   : > { %v3839_v9 = vmul.f32 %v10607_v56, %v3711_v46  ;;  %10620 = vtanh.f32 %v1994_v13  ;;  %v3930_v48 = vmul.f32 %v10609_v15, %v3802_v58  ;;  %v10613_v56 = vpop.eup %10612  ;;  %v3837_v10 = vmul.f32 %v10611_v4, %v3709_v51  ;;  %v17453_v46 = vld [vmem:[#allocation41_spill] sm:$0xff] }
 0x3d4   : > { %10622 = vtanh.f32 %v2005_v26  ;;  %v2998_v23 = vmul.f32 %v13040_v35, %v17453_v46  ;;  %v3586_v26 = vmul.f32 %v13026_v18, %v17454_v41  ;;  %v3803_v3 = vadd.f32 %v3675_v19, %v3087_v7 }
 0x3d5   : > { %3996 = vadd.xlane.f32.xlu1 %v3838_v40  ;;  %v1997_v40 = vadd.f32 %v13016_v11, %v12852_v30  ;;  %v10615_v61 = vpop.eup %10614  ;;  %10624 = vtanh.f32 %v2370_v44  ;;  %v17455_v30 = vld [vmem:[#allocation79_spill] sm:$0xff]  ;;  %v3673_v15 = vmul.f32 %v13074_v33, %v3546_v1  ;;  %v3085_v44 = vmul.f32 %v13084_v57, %v17451_v24 }
 0x3d6   : > { %4170 = vadd.xlane.f32.xlu0 %v3925_v16  ;;  %v3084_v16 = vmul.f32 %v13060_v47, %v17451_v24  ;;  %v3714_v19 = vadd.f32 %v3586_v26, %v2998_v23  ;;  %v2996_v1 = vmul.f32 %v13060_v47, %v17453_v46  ;;  %v17459_v23 = vld [vmem:[#allocation82_spill] sm:$0xff] }
 0x3d7   : > { %v13115_v53 = vpop.f32.mrb[68].mxu0  ;;  %10626 = vtanh.f32 %v1997_v40  ;;  %v2999_v40 = vmul.f32 %v13064_v28, %v17453_v46  ;;  %v2365_v26 = vadd.f32 %v13016_v11, %v17459_v23 }
 0x3d8   : > { %v13119_v60 = vpop.f32.mrb[69].mxu0  ;;  %v3800_v13 = vadd.f32 %v3672_v36, %v3084_v16  ;;  %v10617_v36 = vpop.eup %10616 }
 0x3d9   : > { %v13121_v37 = vpop.f32.mrb[70].mxu0  ;;  %3992 = vadd.xlane.f32.xlu1 %v3836_v43  ;;  %v2362_v43 = vadd.f32 %v13016_v11, %v17455_v30  ;;  %v10619_v16 = vpop.eup %10618 }
 0x3da   : > { %v13126_v21 = vpop.f32.mrb[71].mxu0  ;;  %3998 = vadd.xlane.f32.xlu0 %v3839_v9  ;;  %v2373_v9 = vadd.f32 %v13016_v11, %v12878_v52  ;;  %v3928_v58 = vmul.f32 %v10613_v56, %v3800_v13  ;;  %v3584_v52 = vmul.f32 %v13048_v12, %v17454_v41  ;;  %v3550_v56 = vpop.permute.xlu1 %3549  ;;  %v3587_v13 = vmul.f32 %v13100_v0, %v17454_v41 }
 0x3db   : > { %17452 = vst [vmem:[#allocation59_spill] sm:$0xff] %v13126_v21  ;;  %10628 = vtanh.f32 %v2362_v43  ;;  %v3678_v21 = vmul.f32 %v13026_v18, %v3550_v56 }
 0x3dc   : > { %10630 = vtanh.f32 %v2373_v9  ;;  %v3712_v43 = vadd.f32 %v3584_v52, %v2996_v1  ;;  %v3715_v9 = vadd.f32 %v3587_v13, %v2999_v40  ;;  %v17462_v52 = vld [vmem:[#allocation55_spill] sm:$0xff]  ;;  %v2034_v13 = vadd.f32 %v13016_v11, %v12911_v5 }
 0x3dd   : > { %4180 = vadd.xlane.f32.xlu1 %v3930_v48  ;;  %v3931_v48 = vmul.f32 %v10615_v61, %v3803_v3  ;;  %v3801_v61 = vadd.f32 %v3673_v15, %v3085_v44  ;;  %v3842_v3 = vmul.f32 %v10617_v36, %v3714_v19  ;;  %v17460_v15 = vld [vmem:[#allocation81_spill] sm:$0xff]  ;;  %v3585_v44 = vmul.f32 %v13074_v33, %v17454_v41  ;;  %v17461_v36 = vld [vmem:[#allocation83_spill] sm:$0xff] }
 0x3de   : > { %3994 = vadd.xlane.f32.xlu0 %v3837_v10  ;;  %v17458_v10 = vld [vmem:[#allocation80_spill] sm:$0xff]  ;;  %v3676_v41 = vmul.f32 %v13048_v12, %v3550_v56 }
 0x3df   : > { %v13144_v4 = vpop.f32.mrb[72].mxu0  ;;  %v2018_v7 = vadd.f32 %v13016_v11, %v17458_v10  ;;  %v2997_v10 = vmul.f32 %v13084_v57, %v17453_v46 }
 0x3e0   : > { %v13146_v51 = vpop.f32.mrb[73].mxu0 }
 0x3e1   : > { %17456 = vst [vmem:[#allocation74_spill] sm:$0xff] %v13146_v51  ;;  %v13150_v30 = vpop.f32.mrb[74].mxu0  ;;  %4176 = vadd.xlane.f32.xlu1 %v3928_v58  ;;  %v10621_v58 = vpop.eup %10620  ;;  %10632 = vtanh.f32 %v2018_v7 }
 0x3e2   : > { %17457 = vst [vmem:[#allocation75_spill] sm:$0xff] %v13150_v30  ;;  %v13160_v24 = vpop.f32.mrb[75].mxu0  ;;  %4182 = vadd.xlane.f32.xlu0 %v3931_v48  ;;  %v3929_v30 = vmul.f32 %v10619_v16, %v3801_v61  ;;  %v10623_v51 = vpop.eup %10622  ;;  %v2010_v48 = vadd.f32 %v13016_v11, %v17460_v15  ;;  %10634 = vtanh.f32 %v2365_v26  ;;  %v2021_v16 = vadd.f32 %v13016_v11, %v17461_v36 }
 0x3e3   : > { %v3840_v1 = vmul.f32 %v10621_v58, %v3712_v43  ;;  %v3090_v61 = vmul.f32 %v13040_v35, %v17462_v52  ;;  %v10625_v46 = vpop.eup %10624  ;;  %v3843_v23 = vmul.f32 %v10623_v51, %v3715_v9  ;;  %v3713_v58 = vadd.f32 %v3585_v44, %v2997_v10  ;;  %v17465_v44 = vld [vmem:[#allocation58_spill] sm:$0xff] }
 0x3e4   : > { %10636 = vtanh.f32 %v2010_v48  ;;  %v3679_v43 = vmul.f32 %v13100_v0, %v3550_v56  ;;  %v2013_v51 = vadd.f32 %v13016_v11, %v12896_v62  ;;  %v3091_v48 = vmul.f32 %v13064_v28, %v17462_v52 }
 0x3e5   : > { %4004 = vadd.xlane.f32.xlu1 %v3842_v3  ;;  %v10627_v3 = vpop.eup %10626  ;;  %v3806_v40 = vadd.f32 %v3678_v21, %v3090_v61  ;;  %10638 = vtanh.f32 %v2021_v16  ;;  %v3088_v21 = vmul.f32 %v13060_v47, %v17462_v52  ;;  %v17464_v61 = vld [vmem:[#allocation39_spill] sm:$0xff]  ;;  %v3590_v16 = vmul.f32 %v13026_v18, %v17465_v44 }
 0x3e6   : > { %4178 = vadd.xlane.f32.xlu0 %v3929_v30  ;;  %v10629_v9 = vpop.eup %10628  ;;  %v3841_v36 = vmul.f32 %v10627_v3, %v3713_v58  ;;  %v3002_v10 = vmul.f32 %v13040_v35, %v17464_v61  ;;  %10640 = vtanh.f32 %v2034_v13  ;;  %v2026_v62 = vadd.f32 %v13016_v11, %v12915_v45 }
 0x3e7   : > { %v13175_v19 = vpop.f32.mrb[76].mxu0  ;;  %v3934_v15 = vmul.f32 %v10625_v46, %v3806_v40  ;;  %v10631_v5 = vpop.eup %10630  ;;  %v3807_v46 = vadd.f32 %v3679_v43, %v3091_v48  ;;  %10642 = vtanh.f32 %v2013_v51  ;;  %v2037_v3 = vadd.f32 %v13016_v11, %v12917_v25 }
 0x3e8   : > { %v13179_v7 = vpop.f32.mrb[77].mxu0  ;;  %v3089_v13 = vmul.f32 %v13084_v57, %v17462_v52  ;;  %v3718_v43 = vadd.f32 %v3590_v16, %v3002_v10  ;;  %v3588_v25 = vmul.f32 %v13048_v12, %v17465_v44  ;;  %v3003_v51 = vmul.f32 %v13064_v28, %v17464_v61 }
 0x3e9   : > { %v13181_v30 = vpop.f32.mrb[78].mxu0  ;;  %4000 = vadd.xlane.f32.xlu1 %v3840_v1  ;;  %v3804_v1 = vadd.f32 %v3676_v41, %v3088_v21  ;;  %v3935_v21 = vmul.f32 %v10631_v5, %v3807_v46  ;;  %10644 = vtanh.f32 %v2026_v62  ;;  %v3591_v48 = vmul.f32 %v13100_v0, %v17465_v44  ;;  %v17467_v46 = vld [vmem:[#allocation43_spill] sm:$0xff] }
 0x3ea   : > { %v13186_v26 = vpop.f32.mrb[79].mxu0  ;;  %4006 = vadd.xlane.f32.xlu0 %v3843_v23  ;;  %v3677_v23 = vmul.f32 %v13074_v33, %v3550_v56  ;;  %v3000_v56 = vmul.f32 %v13060_v47, %v17464_v61  ;;  %10646 = vtanh.f32 %v2037_v3  ;;  %v2029_v5 = vadd.f32 %v13016_v11, %v12922_v34 }
 0x3eb   : > { %17463 = vst [vmem:[#allocation77_spill] sm:$0xff] %v13186_v26  ;;  %v3932_v41 = vmul.f32 %v10629_v9, %v3804_v1  ;;  %v10633_v58 = vpop.eup %10632  ;;  %v2050_v9 = vadd.f32 %v13016_v11, %v12940_v63  ;;  %v3006_v62 = vmul.f32 %v13040_v35, %v17467_v46  ;;  %v3589_v3 = vmul.f32 %v13074_v33, %v17465_v44 }
 0x3ec   : > { %v10635_v26 = vpop.eup %10634  ;;  %v3805_v52 = vadd.f32 %v3677_v23, %v3089_v13  ;;  %v3846_v1 = vmul.f32 %v10633_v58, %v3718_v43  ;;  %v3716_v63 = vadd.f32 %v3588_v25, %v3000_v56  ;;  %v3001_v23 = vmul.f32 %v13084_v57, %v17464_v61 }
 0x3ed   : > { %4188 = vadd.xlane.f32.xlu1 %v3934_v15  ;;  %10648 = vtanh.f32 %v2050_v9  ;;  %v2042_v34 = vadd.f32 %v13016_v11, %v12942_v32  ;;  %v2053_v58 = vadd.f32 %v13016_v11, %v12946_v27  ;;  %v3004_v32 = vmul.f32 %v13060_v47, %v17467_v46 }
 0x3ee   : > { %4002 = vadd.xlane.f32.xlu0 %v3841_v36  ;;  %v10637_v10 = vpop.eup %10636  ;;  %v3933_v16 = vmul.f32 %v10635_v26, %v3805_v52  ;;  %v3719_v26 = vadd.f32 %v3591_v48, %v3003_v51  ;;  %10650 = vtanh.f32 %v2029_v5  ;;  %v3717_v9 = vadd.f32 %v3589_v3, %v3001_v23 }
 0x3ef   : > { %v13204_v40 = vpop.f32.mrb[80].mxu0  ;;  %v3844_v43 = vmul.f32 %v10637_v10, %v3716_v63  ;;  %10652 = vtanh.f32 %v2042_v34  ;;  %v2066_v27 = vadd.f32 %v13016_v11, %v12971_v14  ;;  %v3007_v5 = vmul.f32 %v13064_v28, %v17467_v46  ;;  %v17469_v14 = vld [vmem:[#allocation40_spill] sm:$0xff] }
 0x3f0   : > { %v13206_v15 = vpop.f32.mrb[81].mxu0  ;;  %10654 = vtanh.f32 %v2053_v58  ;;  %v3010_v3 = vmul.f32 %v13040_v35, %v17469_v14  ;;  %v17470_v34 = vld [vmem:[#allocation60_spill] sm:$0xff]  ;;  %v2058_v58 = vadd.f32 %v13016_v11, %v12975_v59 }
 0x3f1   : > { %v13210_v45 = vpop.f32.mrb[82].mxu0  ;;  %4184 = vadd.xlane.f32.xlu1 %v3932_v41  ;;  %v10639_v41 = vpop.eup %10638  ;;  %10656 = vtanh.f32 %v2066_v27 }
 0x3f2   : > { %17466 = vst [vmem:[#allocation76_spill] sm:$0xff] %v13210_v45  ;;  %v13220_v36 = vpop.f32.mrb[83].mxu0  ;;  %4190 = vadd.xlane.f32.xlu0 %v3935_v21  ;;  %v17468_v45 = vld [vmem:[#allocation63_spill] sm:$0xff]  ;;  %v10641_v56 = vpop.eup %10640  ;;  %v3847_v61 = vmul.f32 %v10639_v41, %v3719_v26  ;;  %v3598_v26 = vmul.f32 %v13026_v18, %v17470_v34 }
 0x3f3   : > { %v3594_v21 = vmul.f32 %v13026_v18, %v17468_v45  ;;  %v10643_v52 = vpop.eup %10642  ;;  %v3592_v51 = vmul.f32 %v13048_v12, %v17468_v45  ;;  %v3595_v10 = vmul.f32 %v13100_v0, %v17468_v45 }
 0x3f4   : > { %v10645_v41 = vpop.eup %10644  ;;  %v3845_v63 = vmul.f32 %v10643_v52, %v3717_v9  ;;  %v3726_v59 = vadd.f32 %v3598_v26, %v3010_v3 }
 0x3f5   : > { %4012 = vadd.xlane.f32.xlu1 %v3846_v1  ;;  %v3722_v44 = vadd.f32 %v3594_v21, %v3006_v62  ;;  %v10647_v21 = vpop.eup %10646  ;;  %v3720_v23 = vadd.f32 %v3592_v51, %v3004_v32 }
 0x3f6   : > { %4186 = vadd.xlane.f32.xlu0 %v3933_v16  ;;  %v2045_v16 = vadd.f32 %v13016_v11, %v12956_v42  ;;  %v3723_v42 = vadd.f32 %v3595_v10, %v3007_v5  ;;  %v3008_v5 = vmul.f32 %v13060_v47, %v17469_v14  ;;  %v2082_v10 = vadd.f32 %v13016_v11, %v13000_v39 }
 0x3f7   : > { %v13238_v13 = vpop.f32.mrb[84].mxu0  ;;  %v3850_v62 = vmul.f32 %v10641_v56, %v3722_v44  ;;  %v3593_v56 = vmul.f32 %v13074_v33, %v17468_v45  ;;  %v3848_v44 = vmul.f32 %v10645_v41, %v3720_v23  ;;  %v10649_v9 = vpop.eup %10648  ;;  %v3596_v45 = vmul.f32 %v13048_v12, %v17470_v34 }
 0x3f8   : > { %v13240_v25 = vpop.f32.mrb[85].mxu0  ;;  %10658 = vtanh.f32 %v2045_v16  ;;  %v10651_v51 = vpop.eup %10650  ;;  %v3599_v41 = vmul.f32 %v13100_v0, %v17470_v34 }
 0x3f9   : > { %v13242_v1 = vpop.f32.mrb[86].mxu0  ;;  %4008 = vadd.xlane.f32.xlu1 %v3844_v43  ;;  %v3005_v43 = vmul.f32 %v13084_v57, %v17467_v46  ;;  %v3851_v46 = vmul.f32 %v10647_v21, %v3723_v42  ;;  %10660 = vtanh.f32 %v2058_v58  ;;  %v3854_v21 = vmul.f32 %v10649_v9, %v3726_v59  ;;  %v10653_v23 = vpop.eup %10652  ;;  %v17471_v42 = vld [vmem:[#allocation45_spill] sm:$0xff] }
 0x3fa   : > { %v13250_v48 = vpop.f32.mrb[87].mxu0  ;;  %4014 = vadd.xlane.f32.xlu0 %v3847_v61  ;;  %v2069_v61 = vadd.f32 %v13016_v11, %v12977_v29  ;;  %v3011_v29 = vmul.f32 %v13064_v28, %v17469_v14  ;;  %v10655_v26 = vpop.eup %10654  ;;  %v3724_v58 = vadd.f32 %v3596_v45, %v3008_v5  ;;  %v3014_v39 = vmul.f32 %v13040_v35, %v17471_v42 }
 0x3fb   : > { %v2085_v9 = vadd.f32 %v13016_v11, %v13006_v31  ;;  %v10657_v5 = vpop.eup %10656  ;;  %v3015_v31 = vmul.f32 %v13064_v28, %v17471_v42 }
 0x3fc   : > { %10662 = vtanh.f32 %v2069_v61  ;;  %v3597_v61 = vmul.f32 %v13074_v33, %v17470_v34  ;;  %v3852_v59 = vmul.f32 %v10653_v23, %v3724_v58 }
 0x3fd   : > { %4020 = vadd.xlane.f32.xlu1 %v3850_v62  ;;  %v3721_v62 = vadd.f32 %v3593_v56, %v3005_v43  ;;  %v3009_v43 = vmul.f32 %v13084_v57, %v17469_v14  ;;  %10664 = vtanh.f32 %v2082_v10  ;;  %v2074_v56 = vadd.f32 %v13016_v11, %v13002_v55 }
 0x3fe   : > { %4010 = vadd.xlane.f32.xlu0 %v3845_v63  ;;  %v2061_v63 = vadd.f32 %v13016_v11, %v12982_v20  ;;  %v3727_v20 = vadd.f32 %v3599_v41, %v3011_v29  ;;  %v3012_v29 = vmul.f32 %v13060_v47, %v17471_v42  ;;  %v2098_v41 = vadd.f32 %v13016_v11, %v13038_v50 }
 0x3ff   : > { %v13270_v52 = vpop.f32.mrb[88].mxu0  ;;  %v3849_v3 = vmul.f32 %v10651_v51, %v3721_v62 }
 0x400   : > { %v13272_v32 = vpop.f32.mrb[89].mxu0  ;;  %10666 = vtanh.f32 %v2061_v63  ;;  %v3855_v14 = vmul.f32 %v10655_v26, %v3727_v20  ;;  %v17473_v20 = vld [vmem:[#allocation42_spill] sm:$0xff] }
 0x401   : > { %v13274_v27 = vpop.f32.mrb[90].mxu0  ;;  %4016 = vadd.xlane.f32.xlu1 %v3848_v44  ;;  %v17472_v44 = vld [vmem:[#allocation65_spill] sm:$0xff]  ;;  %10668 = vtanh.f32 %v2074_v56  ;;  %v3018_v50 = vmul.f32 %v13040_v35, %v17473_v20 }
 0x402   : > { %v13284_v16 = vpop.f32.mrb[91].mxu0  ;;  %4022 = vadd.xlane.f32.xlu0 %v3851_v46  ;;  %v3602_v46 = vmul.f32 %v13026_v18, %v17472_v44  ;;  %v10659_v10 = vpop.eup %10658  ;;  %v3600_v34 = vmul.f32 %v13048_v12, %v17472_v44  ;;  %v3603_v23 = vmul.f32 %v13100_v0, %v17472_v44  ;;  %10670 = vtanh.f32 %v2085_v9 }
 0x403   : > { %v10661_v58 = vpop.eup %10660  ;;  %10672 = vtanh.f32 %v2098_v41  ;;  %v3601_v9 = vmul.f32 %v13074_v33, %v17472_v44  ;;  %v2114_v44 = vadd.f32 %v13016_v11, %v13080_v54 }
 0x404   : > { %v3730_v55 = vadd.f32 %v3602_v46, %v3014_v39  ;;  %v3728_v56 = vadd.f32 %v3600_v34, %v3012_v29 }
 0x405   : > { %4028 = vadd.xlane.f32.xlu1 %v3854_v21  ;;  %v3725_v21 = vadd.f32 %v3597_v61, %v3009_v43  ;;  %v3013_v43 = vmul.f32 %v13084_v57, %v17471_v42  ;;  %v2090_v61 = vadd.f32 %v13016_v11, %v13044_v6  ;;  %v3016_v42 = vmul.f32 %v13060_v47, %v17473_v20 }
 0x406   : > { %4018 = vadd.xlane.f32.xlu0 %v3849_v3  ;;  %v2077_v3 = vadd.f32 %v13016_v11, %v13020_v38  ;;  %v3858_v26 = vmul.f32 %v10657_v5, %v3730_v55  ;;  %v10663_v46 = vpop.eup %10662  ;;  %v3731_v38 = vadd.f32 %v3603_v23, %v3015_v31  ;;  %v2101_v5 = vadd.f32 %v13016_v11, %v13046_v49  ;;  %v13344_v23 = vpop.permute.xlu1 %4199 }
 0x407   : > { %v13302_v51 = vpop.f32.mrb[92].mxu0  ;;  %v3853_v39 = vmul.f32 %v10659_v10, %v3725_v21  ;;  %v3856_v10 = vmul.f32 %v10661_v58, %v3728_v56  ;;  %v10665_v55 = vpop.eup %10664  ;;  %v3019_v31 = vmul.f32 %v13064_v28, %v17473_v20  ;;  %v3729_v49 = vadd.f32 %v3601_v9, %v3013_v43 }
 0x408   : > { %v13304_v45 = vpop.f32.mrb[93].mxu0  ;;  %10674 = vtanh.f32 %v2077_v3  ;;  %v3859_v29 = vmul.f32 %v10663_v46, %v3731_v38  ;;  %v2093_v3 = vadd.f32 %v13016_v11, %v13054_v8  ;;  %v2106_v38 = vadd.f32 %v13016_v11, %v13082_v22 }
 0x409   : > { %v13306_v62 = vpop.f32.mrb[94].mxu0  ;;  %4024 = vadd.xlane.f32.xlu1 %v3852_v59  ;;  %v17474_v59 = vld [vmem:[#allocation62_spill] sm:$0xff]  ;;  %10676 = vtanh.f32 %v2090_v61  ;;  %v3017_v61 = vmul.f32 %v13084_v57, %v17473_v20 }
 0x40a   : > { %v13316_v63 = vpop.f32.mrb[95].mxu0  ;;  %4030 = vadd.xlane.f32.xlu0 %v3855_v14  ;;  %v3606_v14 = vmul.f32 %v13026_v18, %v17474_v59  ;;  %v10667_v34 = vpop.eup %10666  ;;  %v3604_v6 = vmul.f32 %v13048_v12, %v17474_v59  ;;  %v3607_v41 = vmul.f32 %v13100_v0, %v17474_v59  ;;  %10678 = vtanh.f32 %v2101_v5 }
 0x40b   : > { %v10669_v58 = vpop.eup %10668  ;;  %10680 = vtanh.f32 %v2114_v44  ;;  %v3605_v9 = vmul.f32 %v13074_v33, %v17474_v59  ;;  %v2117_v5 = vadd.f32 %v13016_v11, %v13088_v17  ;;  %v2130_v17 = vadd.f32 %v13016_v11, %v13115_v53 }
 0x40c   : > { %v3734_v21 = vadd.f32 %v3606_v14, %v3018_v50  ;;  %v10671_v46 = vpop.eup %10670  ;;  %v3732_v56 = vadd.f32 %v3604_v6, %v3016_v42  ;;  %v17475_v50 = vld [vmem:[#allocation47_spill] sm:$0xff]  ;;  %v3735_v8 = vadd.f32 %v3607_v41, %v3019_v31  ;;  %10682 = vtanh.f32 %v2093_v3  ;;  %v13370_v6 = vpop.permute.xlu0 %4203 }
 0x40d   : > { %4036 = vadd.xlane.f32.xlu1 %v3858_v26  ;;  %v3022_v54 = vmul.f32 %v13040_v35, %v17475_v50  ;;  %v17476_v14 = vld [vmem:[#allocation67_spill] sm:$0xff]  ;;  %v3020_v22 = vmul.f32 %v13060_v47, %v17475_v50  ;;  %v3023_v59 = vmul.f32 %v13064_v28, %v17475_v50  ;;  %10684 = vtanh.f32 %v2106_v38 }
 0x40e   : > { %4026 = vadd.xlane.f32.xlu0 %v3853_v39  ;;  %v3862_v26 = vmul.f32 %v10665_v55, %v3734_v21  ;;  %v3857_v39 = vmul.f32 %v10667_v34, %v3729_v49  ;;  %v3610_v43 = vmul.f32 %v13026_v18, %v17476_v14  ;;  %v10673_v55 = vpop.eup %10672  ;;  %v13360_v21 = vpop.permute.xlu1 %4207  ;;  %v3608_v42 = vmul.f32 %v13048_v12, %v17476_v14 }
 0x40f   : > { %v3733_v31 = vadd.f32 %v3605_v9, %v3017_v61  ;;  %v3611_v44 = vmul.f32 %v13100_v0, %v17476_v14  ;;  %10686 = vtanh.f32 %v2117_v5  ;;  %v2109_v49 = vadd.f32 %v13016_v11, %v13098_v2 }
 0x410   : > { %v3738_v20 = vadd.f32 %v3610_v43, %v3022_v54  ;;  %v3021_v43 = vmul.f32 %v13084_v57, %v17475_v50  ;;  %10688 = vtanh.f32 %v2130_v17  ;;  %v2122_v61 = vadd.f32 %v13016_v11, %v13119_v60 }
 0x411   : > { %4032 = vadd.xlane.f32.xlu1 %v3856_v10  ;;  %v3860_v10 = vmul.f32 %v10669_v58, %v3732_v56  ;;  %v17478_v56 = vld [vmem:[#allocation64_spill] sm:$0xff]  ;;  %v3739_v2 = vadd.f32 %v3611_v44, %v3023_v59  ;;  %v3609_v38 = vmul.f32 %v13074_v33, %v17476_v14  ;;  %10690 = vtanh.f32 %v2109_v49  ;;  %v17479_v59 = vld [vmem:[#allocation59_spill] sm:$0xff] }
 0x412   : > { %4038 = vadd.xlane.f32.xlu0 %v3859_v29  ;;  %v3863_v29 = vmul.f32 %v10671_v46, %v3735_v8  ;;  %v10675_v34 = vpop.eup %10674  ;;  %v3866_v41 = vmul.f32 %v10673_v55, %v3738_v20  ;;  %v17477_v46 = vld [vmem:[#allocation44_spill] sm:$0xff]  ;;  %v3614_v54 = vmul.f32 %v13026_v18, %v17478_v56  ;;  %v13386_v8 = vpop.permute.xlu1 %4211  ;;  %v2133_v9 = vadd.f32 %v13016_v11, %v13121_v37 }
 0x413   : > { %v10677_v3 = vpop.eup %10676  ;;  %v3026_v53 = vmul.f32 %v13040_v35, %v17477_v46  ;;  %v13390_v55 = vpop.xlane.xlu0 %3940  ;;  %v3024_v60 = vmul.f32 %v13060_v47, %v17477_v46  ;;  %v3612_v14 = vmul.f32 %v13048_v12, %v17478_v56  ;;  %v3027_v20 = vmul.f32 %v13064_v28, %v17477_v46 }
 0x414   : > { %v10679_v58 = vpop.eup %10678  ;;  %10692 = vtanh.f32 %v2122_v61  ;;  %v2146_v37 = vadd.f32 %v13016_v11, %v13144_v4  ;;  %v2125_v17 = vadd.f32 %v13016_v11, %v17479_v59 }
 0x415   : > { %4044 = vadd.xlane.f32.xlu1 %v3862_v26  ;;  %v3861_v26 = vmul.f32 %v10675_v34, %v3733_v31  ;;  %v3867_v50 = vmul.f32 %v10679_v58, %v3739_v2  ;;  %v3742_v34 = vadd.f32 %v3614_v54, %v3026_v53  ;;  %10694 = vtanh.f32 %v2133_v9  ;;  %v17480_v58 = vld [vmem:[#allocation49_spill] sm:$0xff] }
 0x416   : > { %4034 = vadd.xlane.f32.xlu0 %v3857_v39  ;;  %v3736_v39 = vadd.f32 %v3608_v42, %v3020_v22  ;;  %v3737_v22 = vadd.f32 %v3609_v38, %v3021_v43  ;;  %v3615_v42 = vmul.f32 %v13100_v0, %v17478_v56  ;;  %v13404_v31 = vpop.xlane.xlu1 %3938  ;;  %v3030_v4 = vmul.f32 %v13040_v35, %v17480_v58  ;;  %v17482_v43 = vld [vmem:[#allocation74_spill] sm:$0xff] }
 0x417   : > { %v3025_v54 = vmul.f32 %v13084_v57, %v17477_v46  ;;  %10696 = vtanh.f32 %v2146_v37  ;;  %v2138_v61 = vadd.f32 %v13016_v11, %v17482_v43  ;;  %v13414_v2 = vpop.xlane.xlu0 %3936  ;;  %v3613_v9 = vmul.f32 %v13074_v33, %v17478_v56  ;;  %v17484_v43 = vld [vmem:[#allocation46_spill] sm:$0xff] }
 0x418   : > { %v3864_v5 = vmul.f32 %v10677_v3, %v3736_v39  ;;  %v17481_v39 = vld [vmem:[#allocation69_spill] sm:$0xff]  ;;  %v3743_v38 = vadd.f32 %v3615_v42, %v3027_v20  ;;  %10698 = vtanh.f32 %v2125_v17  ;;  %v3028_v46 = vmul.f32 %v13060_v47, %v17480_v58 }
 0x419   : > { %4040 = vadd.xlane.f32.xlu1 %v3860_v10  ;;  %v10681_v10 = vpop.eup %10680  ;;  %v3618_v53 = vmul.f32 %v13026_v18, %v17481_v39  ;;  %v3616_v20 = vmul.f32 %v13048_v12, %v17481_v39  ;;  %v3031_v56 = vmul.f32 %v13064_v28, %v17480_v58  ;;  %10700 = vtanh.f32 %v2138_v61 }
 0x41a   : > { %4046 = vadd.xlane.f32.xlu0 %v3863_v29  ;;  %v10683_v29 = vpop.eup %10682  ;;  %v3870_v44 = vmul.f32 %v10681_v10, %v3742_v34  ;;  %v2162_v42 = vadd.f32 %v13016_v11, %v13175_v19  ;;  %v3741_v59 = vadd.f32 %v3613_v9, %v3025_v54  ;;  %v2141_v17 = vadd.f32 %v13016_v11, %v13160_v24 }
 0x41b   : > { %v10685_v49 = vpop.eup %10684  ;;  %v3746_v37 = vadd.f32 %v3618_v53, %v3030_v4  ;;  %v3744_v4 = vadd.f32 %v3616_v20, %v3028_v46  ;;  %v3034_v61 = vmul.f32 %v13040_v35, %v17484_v43  ;;  %v2154_v54 = vadd.f32 %v13016_v11, %v13179_v7 }
 0x41c   : > { %v10687_v3 = vpop.eup %10686  ;;  %v3029_v24 = vmul.f32 %v13084_v57, %v17480_v58  ;;  %v3617_v9 = vmul.f32 %v13074_v33, %v17481_v39 }
 0x41d   : > { %4052 = vadd.xlane.f32.xlu1 %v3866_v41  ;;  %v3865_v41 = vmul.f32 %v10683_v29, %v3737_v22  ;;  %v10689_v29 = vpop.eup %10688  ;;  %v3871_v34 = vmul.f32 %v10687_v3, %v3743_v38  ;;  %v3619_v22 = vmul.f32 %v13100_v0, %v17481_v39  ;;  %v17485_v38 = vld [vmem:[#allocation66_spill] sm:$0xff]  ;;  %v3035_v39 = vmul.f32 %v13064_v28, %v17484_v43 }
 0x41e   : > { %4042 = vadd.xlane.f32.xlu0 %v3861_v26  ;;  %v3740_v26 = vadd.f32 %v3612_v14, %v3024_v60  ;;  %v10691_v60 = vpop.eup %10690  ;;  %v13422_v14 = vpop.xlane.xlu1 %4124  ;;  %v3622_v19 = vmul.f32 %v13026_v18, %v17485_v38  ;;  %v3745_v58 = vadd.f32 %v3617_v9, %v3029_v24 }
 0x41f   : > { %v3869_v3 = vmul.f32 %v10691_v60, %v3741_v59  ;;  %v3747_v53 = vadd.f32 %v3619_v22, %v3031_v56  ;;  %v3032_v60 = vmul.f32 %v13060_v47, %v17484_v43 }
 0x420   : > { %v3750_v46 = vadd.f32 %v3622_v19, %v3034_v61  ;;  %v3621_v61 = vmul.f32 %v13074_v33, %v17485_v38 }
 0x421   : > { %4048 = vadd.xlane.f32.xlu1 %v3864_v5  ;;  %v17483_v5 = vld [vmem:[#allocation75_spill] sm:$0xff] }
 0x422   : > { %4054 = vadd.xlane.f32.xlu0 %v3867_v50  ;;  %v2149_v10 = vadd.f32 %v13016_v11, %v17483_v5  ;;  %v3868_v50 = vmul.f32 %v10685_v49, %v3740_v26  ;;  %v10693_v49 = vpop.eup %10692  ;;  %v13446_v5 = vpop.xlane.xlu1 %4120  ;;  %v3620_v11 = vmul.f32 %v13048_v12, %v17485_v38 }
 0x423   : > { %v10695_v26 = vpop.eup %10694 }
 0x424   : > { %10702 = vtanh.f32 %v2149_v10  ;;  %v3872_v10 = vmul.f32 %v10693_v49, %v3744_v4 }
 0x425   : > { %4060 = vadd.xlane.f32.xlu1 %v3870_v44  ;;  %v3874_v44 = vmul.f32 %v10689_v29, %v3746_v37  ;;  %10704 = vtanh.f32 %v2162_v42  ;;  %v3875_v29 = vmul.f32 %v10695_v26, %v3747_v53  ;;  %v3623_v37 = vmul.f32 %v13100_v0, %v17485_v38 }
 0x426   : > { %4050 = vadd.xlane.f32.xlu0 %v3865_v41  ;;  %v13434_v41 = vpop.xlane.xlu0 %3942  ;;  %10706 = vtanh.f32 %v2141_v17  ;;  %v13458_v59 = vpop.xlane.xlu1 %3948  ;;  %v3748_v17 = vadd.f32 %v3620_v11, %v3032_v60  ;;  %v3033_v53 = vmul.f32 %v13084_v57, %v17484_v43 }
 0x427   : > { %10708 = vtanh.f32 %v2154_v54  ;;  %v3751_v4 = vadd.f32 %v3623_v37, %v3035_v39  ;;  %v13488_v37 = vadd.f32 %v13360_v21, %v13390_v55 }
 0x429   : > { %4056 = vadd.xlane.f32.xlu1 %v3868_v50  ;;  %v10697_v50 = vpop.eup %10696  ;;  %17489 = vst [vmem:[#allocation54_spill] sm:$0xff] %v13488_v37 }
 0x42a   : > { %4062 = vadd.xlane.f32.xlu0 %v3871_v34  ;;  %v10699_v34 = vpop.eup %10698  ;;  %v13452_v7 = vpop.xlane.xlu0 %4126  ;;  %v3878_v20 = vmul.f32 %v10697_v50, %v3750_v46 }
 0x42b   : > { %v10701_v56 = vpop.eup %10700  ;;  %v3873_v22 = vmul.f32 %v10699_v34, %v3745_v58  ;;  %v13474_v43 = vpop.xlane.xlu1 %3944 }
 0x42c   : > { %v3876_v19 = vmul.f32 %v10701_v56, %v3748_v17  ;;  %v13495_v56 = vadd.f32 %v13370_v6, %v13404_v31 }
 0x42d   : > { %4068 = vadd.xlane.f32.xlu1 %v3874_v44  ;;  %v17486_v44 = vld [vmem:[#allocation51_spill] sm:$0xff] }
 0x42e   : > { %4058 = vadd.xlane.f32.xlu0 %v3869_v3  ;;  %v10703_v42 = vpop.eup %10702  ;;  %v3038_v49 = vmul.f32 %v13040_v35, %v17486_v44  ;;  %v17487_v3 = vld [vmem:[#allocation71_spill] sm:$0xff]  ;;  %v13468_v24 = vpop.xlane.xlu0 %4122  ;;  %v3036_v35 = vmul.f32 %v13060_v47, %v17486_v44  ;;  %v13482_v47 = vadd.f32 %v13386_v8, %v13434_v41  ;;  %17490 = vst [vmem:[#allocation38_spill] sm:$0xff] %v13495_v56 }
 0x42f   : > { %v3626_v26 = vmul.f32 %v13026_v18, %v17487_v3  ;;  %v10705_v54 = vpop.eup %10704  ;;  %v3879_v9 = vmul.f32 %v10703_v42, %v3751_v4  ;;  %v3624_v18 = vmul.f32 %v13048_v12, %v17487_v3  ;;  %v13478_v39 = vpop.xlane.xlu1 %4132  ;;  %v13500_v41 = vadd.f32 %v13344_v23, %v13414_v2  ;;  %v13508_v42 = vld [vmem:[#allocation10] ss:$0 sm:$0xff] }
 0x430   : > { %17488 = vst [vmem:[#allocation78_spill] sm:$0xff] %v13482_v47  ;;  %v2165_v31 = vadd.f32 %v13508_v42, %v13181_v30  ;;  %v2178_v17 = vadd.f32 %v13508_v42, %v13204_v40  ;;  %v3627_v4 = vmul.f32 %v13100_v0, %v17487_v3  ;;  %v17494_v40 = vld [vmem:[#allocation68_spill] sm:$0xff] }
 0x431   : > { %4064 = vadd.xlane.f32.xlu1 %v3872_v10  ;;  %v10707_v10 = vpop.eup %10706  ;;  %v3754_v50 = vadd.f32 %v3626_v26, %v3038_v49  ;;  %v3752_v60 = vadd.f32 %v3624_v18, %v3036_v35  ;;  %17491 = vst [vmem:[#allocation57_spill] sm:$0xff] %v13500_v41  ;;  %v17492_v49 = vld [vmem:[#allocation77_spill] sm:$0xff]  ;;  %v3039_v26 = vmul.f32 %v13064_v28, %v17486_v44 }
 0x432   : > { %4070 = vadd.xlane.f32.xlu0 %v3875_v29  ;;  %v3749_v29 = vadd.f32 %v3621_v61, %v3033_v53  ;;  %v10709_v38 = vpop.eup %10708  ;;  %v13476_v11 = vpop.xlane.xlu0 %3950  ;;  %10710 = vtanh.f32 %v2165_v31  ;;  %v2157_v2 = vadd.f32 %v13508_v42, %v17492_v49  ;;  %v13520_v61 = vld [vmem:[#allocation13 + $0x10] sm:$0xff]  ;;  %v3625_v28 = vmul.f32 %v13074_v33, %v17487_v3 }
 0x433   : > { %v3882_v34 = vmul.f32 %v10705_v54, %v3754_v50  ;;  %v3880_v58 = vmul.f32 %v10709_v38, %v3752_v60  ;;  %v13484_v12 = vpop.xlane.xlu1 %4128  ;;  %10712 = vtanh.f32 %v2178_v17  ;;  %v13524_v54 = vld [vmem:[#allocation15 + $0x10] sm:$0xff]  ;;  %v3037_v50 = vmul.f32 %v13084_v57, %v17486_v44 }
 0x434   : > { %v3877_v46 = vmul.f32 %v10707_v10, %v3749_v29  ;;  %10714 = vtanh.f32 %v2157_v2  ;;  %v3755_v10 = vadd.f32 %v3627_v4, %v3039_v26  ;;  %v13540_v57 = vadd.f32 %v13386_v8, %v13452_v7 }
 0x435   : > { %4076 = vadd.xlane.f32.xlu1 %v3878_v20  ;;  %v3753_v38 = vadd.f32 %v3625_v28, %v3037_v50  ;;  %v13549_v3 = vadd.f32 %v13360_v21, %v13422_v14  ;;  %v13556_v49 = vadd.f32 %v13344_v23, %v13446_v5  ;;  %v13561_v7 = vadd.f32 %v13360_v21, %v13458_v59  ;;  %v13575_v5 = vld [vmem:[#allocation13] sm:$0xff] }
 0x436   : > { %4066 = vadd.xlane.f32.xlu0 %v3873_v22  ;;  %v13490_v20 = vpop.xlane.xlu0 %3946  ;;  %17495 = vst [vmem:[#allocation56_spill] sm:$0xff] %v13540_v57  ;;  %v13568_v14 = vadd.f32 %v13344_v23, %v13474_v43  ;;  %v2170_v26 = vadd.f32 %v13508_v42, %v13206_v15  ;;  %v17500_v43 = vld [vmem:[#allocation76_spill] sm:$0xff]  ;;  %v2173_v50 = vadd.f32 %v13508_v42, %v13220_v36 }
 0x437   : > { %v13502_v22 = vpop.xlane.xlu1 %3956  ;;  %17496 = vst [vmem:[#allocation41_spill] sm:$0xff] %v13549_v3  ;;  %17497 = vst [vmem:[#allocation61_spill] sm:$0xff] %v13556_v49 }
 0x438   : > { %17498 = vst [vmem:[#allocation79_spill] sm:$0xff] %v13561_v7  ;;  %17499 = vst [vmem:[#allocation80_spill] sm:$0xff] %v13568_v14  ;;  %10716 = vtanh.f32 %v2170_v26  ;;  %v13597_v26 = vld [vmem:[#allocation13 + $0x8] sm:$0xff] }
 0x439   : > { %4072 = vadd.xlane.f32.xlu1 %v3876_v19  ;;  %v17493_v19 = vld [vmem:[#allocation48_spill] sm:$0xff] }
 0x43a   : > { %4078 = vadd.xlane.f32.xlu0 %v3879_v9  ;;  %v13505_v55 = vpop.xlane.xlu0 %4134  ;;  %v3042_v30 = vmul.f32 %v13520_v61, %v17493_v19  ;;  %v3630_v9 = vmul.f32 %v13524_v54, %v17494_v40  ;;  %v3040_v59 = vmul.f32 %v13575_v5, %v17493_v19  ;;  %v3041_v36 = vmul.f32 %v13597_v26, %v17493_v19 }
 0x43c   : > { %v10711_v53 = vpop.eup %10710 }
 0x43d   : > { %4084 = vadd.xlane.f32.xlu1 %v3882_v34  ;;  %v10713_v35 = vpop.eup %10712  ;;  %v3883_v18 = vmul.f32 %v10711_v53, %v3755_v10  ;;  %v3758_v34 = vadd.f32 %v3630_v9, %v3042_v30  ;;  %v13579_v53 = vld [vmem:[#allocation15] sm:$0xff]  ;;  %v2181_v9 = vadd.f32 %v13508_v42, %v17500_v43 }
 0x43e   : > { %4074 = vadd.xlane.f32.xlu0 %v3877_v46  ;;  %v13532_v0 = vpop.xlane.xlu0 %4130  ;;  %v10715_v29 = vpop.eup %10714  ;;  %v3628_v30 = vmul.f32 %v13579_v53, %v17494_v40 }
 0x43f   : > { %v3886_v46 = vmul.f32 %v10713_v35, %v3758_v34  ;;  %v3881_v60 = vmul.f32 %v10715_v29, %v3753_v38  ;;  %10718 = vtanh.f32 %v2181_v9  ;;  %v13593_v34 = vld [vmem:[#allocation15 + $0x18] sm:$0xff] }
 0x440   : > { %v3756_v15 = vadd.f32 %v3628_v30, %v3040_v59  ;;  %10720 = vtanh.f32 %v2173_v50  ;;  %v3631_v38 = vmul.f32 %v13593_v34, %v17494_v40  ;;  %v13601_v59 = vld [vmem:[#allocation15 + $0x8] sm:$0xff] }
 0x441   : > { %4080 = vadd.xlane.f32.xlu1 %v3880_v58  ;;  %v13534_v58 = vpop.xlane.xlu1 %3952  ;;  %v3629_v30 = vmul.f32 %v13601_v59, %v17494_v40 }
 0x442   : > { %v13536_v31 = vpop.xlane.xlu0 %3958  ;;  %v10717_v10 = vpop.eup %10716 }
 0x443   : > { %v3884_v28 = vmul.f32 %v10717_v10, %v3756_v15  ;;  %v3757_v50 = vadd.f32 %v3629_v30, %v3041_v36  ;;  %v13634_v36 = vadd.f32 %v13360_v21, %v13478_v39  ;;  %v13641_v30 = vadd.f32 %v13344_v23, %v13484_v12 }
 0x444   : > { %v13655_v39 = vadd.f32 %v13344_v23, %v13534_v58  ;;  %v2197_v58 = vadd.f32 %v13508_v42, %v13242_v1 }
 0x445   : > { %v13542_v33 = vpop.xlane.xlu1 %4140  ;;  %17504 = vst [vmem:[#allocation55_spill] sm:$0xff] %v13634_v36  ;;  %17505 = vst [vmem:[#allocation39_spill] sm:$0xff] %v13641_v30 }
 0x446   : > { %v13544_v44 = vpop.xlane.xlu0 %3954  ;;  %17507 = vst [vmem:[#allocation43_spill] sm:$0xff] %v13655_v39 }
 0x449   : > { %v13587_v35 = vpop.xlane.xlu1 %4136 }
 0x44a   : > { %v13551_v17 = vpop.xlane.xlu0 %4142 }
 0x44d   : > { %v13607_v15 = vpop.xlane.xlu1 %3964 }
 0x44e   : > { %v13563_v2 = vpop.xlane.xlu0 %4138 }
 0x451   : > { %v13620_v40 = vpop.xlane.xlu1 %3960 }
 0x452   : > { %4483 = vperm.xlu1 %10417, %v13482_v47   ;;  %v13572_v4 = vpop.xlane.xlu0 %3966 }
 0x454   : > { %4480 = vperm.xlu0 %10416, %v13488_v37  }
 0x456   : > { %4477 = vperm.xlu1 %10417, %v13495_v56   ;;  %v13605_v43 = vpop.xlane.xlu0 %3962 }
 0x458   : > { %4474 = vperm.xlu0 %10416, %v13500_v41   ;;  %v17530_v41 = vld [vmem:[#allocation70_spill] sm:$0xff] }
 0x477   : > { %4086 = vadd.xlane.f32.xlu0 %v3883_v18  ;;  %v13589_v18 = vld [vmem:[#allocation13 + $0x18] sm:$0xff] }
 0x478   : > { %v3043_v29 = vmul.f32 %v13589_v18, %v17493_v19  ;;  %v13618_v19 = vadd.f32 %v13386_v8, %v13476_v11 }
 0x47a   : > { %4092 = vadd.xlane.f32.xlu1 %v3886_v46  ;;  %v10719_v46 = vpop.eup %10718  ;;  %17502 = vst [vmem:[#allocation81_spill] sm:$0xff] %v13618_v19 }
 0x47b   : > { %4082 = vadd.xlane.f32.xlu0 %v3881_v60  ;;  %v3759_v60 = vadd.f32 %v3631_v38, %v3043_v29  ;;  %v10721_v10 = vpop.eup %10720  ;;  %v13613_v38 = vpop.xlane.xlu0 %4150 }
 0x47c   : > { %v3885_v29 = vmul.f32 %v10721_v10, %v3757_v50  ;;  %v13650_v10 = vadd.f32 %v13360_v21, %v13502_v22 }
 0x47d   : > { %v3887_v9 = vmul.f32 %v10719_v46, %v3759_v60  ;;  %v13625_v46 = vadd.f32 %v13370_v6, %v13490_v20  ;;  %v2194_v20 = vadd.f32 %v13508_v42, %v13238_v13  ;;  %v17508_v13 = vld [vmem:[#allocation52_spill] sm:$0xff] }
 0x47e   : > { %17506 = vst [vmem:[#allocation58_spill] sm:$0xff] %v13650_v10  ;;  %v3046_v50 = vmul.f32 %v13520_v61, %v17508_v13 }
 0x47f   : > { %17503 = vst [vmem:[#allocation83_spill] sm:$0xff] %v13625_v46  ;;  %v13630_v60 = vpop.xlane.xlu0 %4146  ;;  %10722 = vtanh.f32 %v2194_v20 }
 0x480   : > { %10724 = vtanh.f32 %v2197_v58 }
 0x483   : > { %v13636_v11 = vpop.xlane.xlu0 %3974 }
 0x489   : > { %v10723_v22 = vpop.eup %10722 }
 0x48a   : > { %v10725_v1 = vpop.eup %10724 }
 0x48b   : > { %4759 = vperm.xlu1 %10417, %v13540_v57  }
 0x491   : > { %4756 = vperm.xlu0 %10416, %v13549_v3  }
 0x495   : > { %4750 = vperm.xlu0 %10416, %v13556_v49  }
 0x499   : > { %4492 = vperm.xlu0 %10416, %v13561_v7  }
 0x49d   : > { %4486 = vperm.xlu0 %10416, %v13568_v14  }
 0x4af   : > { %4088 = vadd.xlane.f32.xlu1 %v3884_v28  ;;  %v13611_v28 = vadd.f32 %v13370_v6, %v13468_v24  ;;  %v13627_v24 = vpop.xlane.xlu1 %4148 }
 0x4b1   : > { %17501 = vst [vmem:[#allocation82_spill] sm:$0xff] %v13611_v28 }
 0x4bc   : > { %4094 = vadd.xlane.f32.xlu0 %v3887_v9  ;;  %v13645_v9 = vpop.xlane.xlu0 %3970 }
 0x4c0   : > { %4753 = vperm.xlu1 %10417, %v13611_v28   ;;  %4090 = vadd.xlane.f32.xlu0 %v3885_v29  ;;  %v13657_v12 = vpop.xlane.xlu0 %4158  ;;  %v17509_v29 = vld [vmem:[#allocation72_spill] sm:$0xff]  ;;  %v13666_v28 = vpop.xlane.xlu1 %4144 }
 0x4c1   : > { %v3634_v3 = vmul.f32 %v13524_v54, %v17509_v29 }
 0x4c3   : > { %v3762_v20 = vadd.f32 %v3634_v3, %v3046_v50  ;;  %v3047_v3 = vmul.f32 %v13589_v18, %v17508_v13  ;;  %v3635_v50 = vmul.f32 %v13593_v34, %v17509_v29 }
 0x4c4   : > { %4495 = vperm.xlu1 %10417, %v13618_v19   ;;  %v13664_v49 = vpop.xlane.xlu0 %4154 }
 0x4c5   : > { %v3890_v57 = vmul.f32 %v10723_v22, %v3762_v20  ;;  %v13686_v22 = vpop.xlane.xlu1 %3972  ;;  %v3633_v20 = vmul.f32 %v13601_v59, %v17509_v29 }
 0x4c8   : > { %4489 = vperm.xlu1 %10417, %v13625_v46  }
 0x4c9   : > { %v13697_v14 = vpop.xlane.xlu1 %3968 }
 0x4d6   : > { %4768 = vperm.xlu0 %10416, %v13634_v36   ;;  %v13668_v36 = vpop.xlane.xlu0 %3982 }
 0x4da   : > { %4762 = vperm.xlu0 %10416, %v13641_v30   ;;  %v2189_v30 = vadd.f32 %v13508_v42, %v13250_v48  ;;  %v3763_v48 = vadd.f32 %v3635_v50, %v3047_v3  ;;  %v2186_v3 = vadd.f32 %v13508_v42, %v13240_v25  ;;  %v13703_v50 = vpop.xlane.xlu1 %4156 }
 0x4dc   : > { %10726 = vtanh.f32 %v2189_v30  ;;  %v3045_v30 = vmul.f32 %v13597_v26, %v17508_v13 }
 0x4dd   : > { %10728 = vtanh.f32 %v2186_v3 }
 0x4de   : > { %4504 = vperm.xlu0 %10416, %v13650_v10   ;;  %v13674_v10 = vpop.xlane.xlu0 %3978  ;;  %v3761_v7 = vadd.f32 %v3633_v20, %v3045_v30 }
 0x4e2   : > { %4498 = vperm.xlu0 %10416, %v13655_v39   ;;  %v13676_v19 = vpop.xlane.xlu0 %4166  ;;  %v3891_v39 = vmul.f32 %v10725_v1, %v3763_v48  ;;  %v13707_v1 = vpop.xlane.xlu1 %4152  ;;  %v3632_v48 = vmul.f32 %v13579_v53, %v17509_v29 }
 0x4e6   : > { %v13693_v58 = vpop.xlane.xlu0 %4162  ;;  %v10727_v46 = vpop.eup %10726 }
 0x4e7   : > { %17511 = vst [vmem:[#allocation40_spill] sm:$0xff] %v13693_v58  ;;  %v13719_v25 = vpop.xlane.xlu1 %3980  ;;  %v10729_v30 = vpop.eup %10728 }
 0x4ea   : > { %v13695_v47 = vpop.xlane.xlu0 %3990 }
 0x4eb   : > { %17512 = vst [vmem:[#allocation60_spill] sm:$0xff] %v13695_v47  ;;  %v13733_v29 = vpop.xlane.xlu1 %3976 }
 0x4ec   : > { %4100 = vadd.xlane.f32.xlu1 %v3890_v57  ;;  %v13684_v57 = vadd.f32 %v13386_v8, %v13505_v55  ;;  %v3889_v55 = vmul.f32 %v10727_v46, %v3761_v7  ;;  %v13713_v7 = vadd.f32 %v13360_v21, %v13542_v33  ;;  %v3044_v46 = vmul.f32 %v13575_v5, %v17508_v13 }
 0x4ed   : > { %v13731_v13 = vadd.f32 %v13360_v21, %v13607_v15 }
 0x4ee   : > { %17510 = vst [vmem:[#allocation63_spill] sm:$0xff] %v13684_v57  ;;  %17516 = vst [vmem:[#allocation62_spill] sm:$0xff] %v13713_v7  ;;  %v3760_v3 = vadd.f32 %v3632_v48, %v3044_v46 }
 0x4ef   : > { %17519 = vst [vmem:[#allocation44_spill] sm:$0xff] %v13731_v13 }
 0x4f0   : > { %v3888_v33 = vmul.f32 %v10729_v30, %v3760_v3  ;;  %v13753_v30 = vadd.f32 %v13370_v6, %v13532_v0  ;;  %v2205_v0 = vadd.f32 %v13508_v42, %v13284_v16 }
 0x4f2   : > { %17524 = vst [vmem:[#allocation74_spill] sm:$0xff] %v13753_v30 }
 0x4fd   : > { %4771 = vperm.xlu1 %10417, %v13684_v57   ;;  %v13699_v57 = vpop.xlane.xlu0 %3986 }
 0x4fe   : > { %17513 = vst [vmem:[#allocation45_spill] sm:$0xff] %v13699_v57 }
 0x501   : > { %4102 = vadd.xlane.f32.xlu0 %v3891_v39  ;;  %v13705_v37 = vpop.xlane.xlu0 %4174 }
 0x502   : > { %17514 = vst [vmem:[#allocation65_spill] sm:$0xff] %v13705_v37 }
 0x505   : > { %4098 = vadd.xlane.f32.xlu0 %v3889_v55  ;;  %v13709_v39 = vpop.xlane.xlu0 %4170  ;;  %v13726_v55 = vadd.f32 %v13344_v23, %v13587_v35  ;;  %v13742_v35 = vpop.xlane.xlu1 %4164 }
 0x506   : > { %17515 = vst [vmem:[#allocation42_spill] sm:$0xff] %v13709_v39 }
 0x507   : > { %17518 = vst [vmem:[#allocation67_spill] sm:$0xff] %v13726_v55 }
 0x509   : > { %v13722_v20 = vpop.xlane.xlu0 %3998  ;;  %v13747_v48 = vpop.xlane.xlu1 %4160 }
 0x50a   : > { %17517 = vst [vmem:[#allocation47_spill] sm:$0xff] %v13722_v20 }
 0x50d   : > { %v13735_v56 = vpop.xlane.xlu0 %3994  ;;  %v13758_v3 = vpop.xlane.xlu1 %3988 }
 0x50e   : > { %17520 = vst [vmem:[#allocation64_spill] sm:$0xff] %v13735_v56 }
 0x511   : > { %v13745_v46 = vpop.xlane.xlu0 %4182 }
 0x512   : > { %17522 = vst [vmem:[#allocation49_spill] sm:$0xff] %v13745_v46 }
 0x515   : > { %v13749_v15 = vpop.xlane.xlu0 %4178 }
 0x516   : > { %17523 = vst [vmem:[#allocation69_spill] sm:$0xff] %v13749_v15 }
 0x51b   : > { %4780 = vperm.xlu0 %10416, %v13713_v7   ;;  %v13740_v7 = vadd.f32 %v13344_v23, %v13620_v40  ;;  %v2213_v40 = vadd.f32 %v13508_v42, %v13274_v27 }
 0x51d   : > { %17521 = vst [vmem:[#allocation59_spill] sm:$0xff] %v13740_v7  ;;  %10730 = vtanh.f32 %v2213_v40  ;;  %v3639_v40 = vmul.f32 %v13593_v34, %v17530_v41 }
 0x51e   : > { %10732 = vtanh.f32 %v2205_v0 }
 0x51f   : > { %4774 = vperm.xlu0 %10416, %v13726_v55   ;;  %v13764_v55 = vpop.xlane.xlu0 %4006 }
 0x520   : > { %17526 = vst [vmem:[#allocation46_spill] sm:$0xff] %v13764_v55 }
 0x521   : > { %4096 = vadd.xlane.f32.xlu1 %v3888_v33  ;;  %v13762_v33 = vadd.f32 %v13386_v8, %v13536_v31  ;;  %v17529_v31 = vld [vmem:[#allocation50_spill] sm:$0xff] }
 0x522   : > { %v3049_v15 = vmul.f32 %v13597_v26, %v17529_v31 }
 0x523   : > { %4516 = vperm.xlu0 %10416, %v13731_v13   ;;  %17525 = vst [vmem:[#allocation75_spill] sm:$0xff] %v13762_v33  ;;  %v13773_v13 = vpop.xlane.xlu1 %3984  ;;  %v13775_v27 = vpop.xlane.xlu0 %4002 }
 0x524   : > { %17528 = vst [vmem:[#allocation51_spill] sm:$0xff] %v13775_v27  ;;  %v3637_v27 = vmul.f32 %v13601_v59, %v17530_v41 }
 0x526   : > { %v3765_v20 = vadd.f32 %v3637_v27, %v3049_v15  ;;  %v3638_v15 = vmul.f32 %v13524_v54, %v17530_v41 }
 0x527   : > { %4510 = vperm.xlu0 %10416, %v13740_v7   ;;  %v3051_v7 = vmul.f32 %v13589_v18, %v17529_v31  ;;  %v13784_v16 = vpop.xlane.xlu0 %4190  ;;  %v10731_v55 = vpop.eup %10730 }
 0x528   : > { %17531 = vst [vmem:[#allocation71_spill] sm:$0xff] %v13784_v16  ;;  %v10733_v0 = vpop.eup %10732  ;;  %v2210_v16 = vadd.f32 %v13508_v42, %v13270_v52 }
 0x529   : > { %v3893_v39 = vmul.f32 %v10733_v0, %v3765_v20 }
 0x52a   : > { %10734 = vtanh.f32 %v2210_v16  ;;  %v13816_v16 = vadd.f32 %v13360_v21, %v13627_v24 }
 0x52b   : > { %v13792_v56 = vpop.xlane.xlu0 %4186 }
 0x52c   : > { %17532 = vst [vmem:[#allocation77_spill] sm:$0xff] %v13792_v56  ;;  %17536 = vst [vmem:[#allocation52_spill] sm:$0xff] %v13816_v16 }
 0x532   : > { %4765 = vperm.xlu1 %10417, %v13753_v30   ;;  %v13771_v30 = vadd.f32 %v13370_v6, %v13544_v44  ;;  %v3767_v44 = vadd.f32 %v3639_v40, %v3051_v7  ;;  %v13798_v40 = vpop.xlane.xlu0 %4014 }
 0x533   : > { %17533 = vst [vmem:[#allocation48_spill] sm:$0xff] %v13798_v40  ;;  %v13823_v40 = vadd.f32 %v13344_v23, %v13666_v28 }
 0x534   : > { %17527 = vst [vmem:[#allocation66_spill] sm:$0xff] %v13771_v30  ;;  %v10735_v52 = vpop.eup %10734 }
 0x535   : > { %17538 = vst [vmem:[#allocation50_spill] sm:$0xff] %v13823_v40 }
 0x536   : > { %4507 = vperm.xlu1 %10417, %v13762_v33   ;;  %v13782_v33 = vpop.xlane.xlu1 %4172 }
 0x53a   : > { %4501 = vperm.xlu1 %10417, %v13771_v30   ;;  %v3895_v30 = vmul.f32 %v10731_v55, %v3767_v44  ;;  %v13790_v46 = vpop.xlane.xlu1 %4168  ;;  %v13802_v55 = vpop.xlane.xlu0 %4010  ;;  %v3050_v44 = vmul.f32 %v13520_v61, %v17529_v31 }
 0x53b   : > { %17534 = vst [vmem:[#allocation68_spill] sm:$0xff] %v13802_v55 }
 0x53e   : > { %v13796_v7 = vpop.xlane.xlu1 %3996 }
 0x542   : > { %v13800_v37 = vpop.xlane.xlu1 %3992 }
 0x546   : > { %4110 = vadd.xlane.f32.xlu0 %v3895_v30  ;;  %v13808_v20 = vpop.xlane.xlu1 %4180  ;;  %v3766_v30 = vadd.f32 %v3638_v15, %v3050_v44  ;;  %v13832_v44 = vadd.f32 %v13360_v21, %v13686_v22  ;;  %v13839_v15 = vadd.f32 %v13344_v23, %v13697_v14  ;;  %v2229_v14 = vadd.f32 %v13508_v42, %v13306_v62  ;;  %v17549_v62 = vld [vmem:[#allocation73_spill] sm:$0xff] }
 0x548   : > { %v3894_v27 = vmul.f32 %v10735_v52, %v3766_v30  ;;  %17540 = vst [vmem:[#allocation84_spill] sm:$0xff] %v13832_v44  ;;  %17541 = vst [vmem:[#allocation85_spill] sm:$0xff] %v13839_v15  ;;  %v13846_v52 = vadd.f32 %v13386_v8, %v13551_v17  ;;  %10736 = vtanh.f32 %v2229_v14  ;;  %v2221_v17 = vadd.f32 %v13508_v42, %v13316_v63 }
 0x54a   : > { %4106 = vadd.xlane.f32.xlu0 %v3893_v39  ;;  %v13810_v39 = vpop.xlane.xlu0 %4022  ;;  %v13812_v0 = vpop.xlane.xlu1 %4176  ;;  %17543 = vst [vmem:[#allocation87_spill] sm:$0xff] %v13846_v52  ;;  %10738 = vtanh.f32 %v2221_v17 }
 0x54b   : > { %17535 = vst [vmem:[#allocation76_spill] sm:$0xff] %v13810_v39 }
 0x54e   : > { %v13818_v55 = vpop.xlane.xlu0 %4018  ;;  %v13825_v56 = vpop.xlane.xlu1 %4004 }
 0x54f   : > { %17537 = vst [vmem:[#allocation72_spill] sm:$0xff] %v13818_v55 }
 0x552   : > { %v13827_v39 = vpop.xlane.xlu0 %4030  ;;  %v13835_v24 = vpop.xlane.xlu1 %4000 }
 0x553   : > { %17539 = vst [vmem:[#allocation70_spill] sm:$0xff] %v13827_v39  ;;  %v3643_v39 = vmul.f32 %v13593_v34, %v17549_v62  ;;  %v10737_v14 = vpop.eup %10736  ;;  %v3048_v34 = vmul.f32 %v13575_v5, %v17529_v31 }
 0x554   : > { %v10739_v57 = vpop.eup %10738 }
 0x556   : > { %v13841_v28 = vpop.xlane.xlu0 %4026  ;;  %v13848_v30 = vpop.xlane.xlu1 %4188 }
 0x557   : > { %17542 = vst [vmem:[#allocation86_spill] sm:$0xff] %v13841_v28 }
 0x55a   : > { %v13851_v22 = vpop.xlane.xlu0 %4038 }
 0x55b   : > { %17544 = vst [vmem:[#allocation88_spill] sm:$0xff] %v13851_v22 }
 0x55e   : > { %4108 = vadd.xlane.f32.xlu1 %v3894_v27  ;;  %v13853_v27 = vpop.xlane.xlu1 %4184 }
 0x560   : > { %4792 = vperm.xlu0 %10416, %v13816_v16   ;;  %v13855_v16 = vpop.xlane.xlu0 %4034 }
 0x561   : > { %17545 = vst [vmem:[#allocation89_spill] sm:$0xff] %v13855_v16  ;;  %v17548_v16 = vld [vmem:[#allocation53_spill] sm:$0xff] }
 0x562   : > { %v3055_v28 = vmul.f32 %v13589_v18, %v17548_v16 }
 0x564   : > { %4786 = vperm.xlu0 %10416, %v13823_v40   ;;  %v13859_v40 = vpop.xlane.xlu1 %4012  ;;  %v3771_v63 = vadd.f32 %v3643_v39, %v3055_v28 }
 0x568   : > { %4528 = vperm.xlu0 %10416, %v13832_v44   ;;  %v13863_v44 = vpop.xlane.xlu0 %4046 }
 0x569   : > { %17546 = vst [vmem:[#allocation90_spill] sm:$0xff] %v13863_v44  ;;  %v3053_v44 = vmul.f32 %v13597_v26, %v17548_v16 }
 0x56c   : > { %4522 = vperm.xlu0 %10416, %v13839_v15   ;;  %v13867_v15 = vpop.xlane.xlu1 %4008  ;;  %v13869_v22 = vpop.xlane.xlu0 %4042 }
 0x56d   : > { %17547 = vst [vmem:[#allocation91_spill] sm:$0xff] %v13869_v22  ;;  %v3899_v22 = vmul.f32 %v10737_v14, %v3771_v63  ;;  %v13909_v63 = vadd.f32 %v13360_v21, %v13703_v50  ;;  %v13929_v50 = vadd.f32 %v13370_v6, %v13605_v43 }
 0x56f   : > { %4783 = vperm.xlu1 %10417, %v13846_v52   ;;  %v2202_v52 = vadd.f32 %v13508_v42, %v13272_v32  ;;  %v3641_v32 = vmul.f32 %v13601_v59, %v17549_v62  ;;  %17552 = vst [vmem:[#allocation92_spill] sm:$0xff] %v13909_v63  ;;  %17555 = vst [vmem:[#allocation95_spill] sm:$0xff] %v13929_v50 }
 0x570   : > { %v13875_v55 = vpop.xlane.xlu1 %4020  ;;  %v13881_v17 = vpop.xlane.xlu0 %4054 }
 0x571   : > { %10740 = vtanh.f32 %v2202_v52  ;;  %17550 = vst [vmem:[#allocation53_spill] sm:$0xff] %v13881_v17  ;;  %v3769_v18 = vadd.f32 %v3641_v32, %v3053_v44  ;;  %v3636_v52 = vmul.f32 %v13579_v53, %v17530_v41  ;;  %v13917_v32 = vadd.f32 %v13386_v8, %v13572_v4 }
 0x573   : > { %v3897_v39 = vmul.f32 %v10739_v57, %v3769_v18  ;;  %v3764_v59 = vadd.f32 %v3636_v52, %v3048_v34  ;;  %v13905_v57 = vadd.f32 %v13370_v6, %v13563_v2  ;;  %17553 = vst [vmem:[#allocation93_spill] sm:$0xff] %v13917_v32  ;;  %v13923_v2 = vadd.f32 %v13344_v23, %v13707_v1 }
 0x574   : > { %v13887_v47 = vpop.xlane.xlu1 %4016  ;;  %v13889_v26 = vpop.xlane.xlu0 %4050  ;;  %v13933_v34 = vadd.f32 %v13360_v21, %v13719_v25  ;;  %v13943_v1 = vadd.f32 %v13344_v23, %v13733_v29  ;;  %v13952_v25 = vadd.f32 %v13360_v21, %v13742_v35  ;;  %v2226_v35 = vadd.f32 %v13508_v42, %v13302_v51 }
 0x575   : > { %17551 = vst [vmem:[#allocation73_spill] sm:$0xff] %v13905_v57  ;;  %17554 = vst [vmem:[#allocation94_spill] sm:$0xff] %v13923_v2 }
 0x576   : > { %17556 = vst [vmem:[#allocation96_spill] sm:$0xff] %v13933_v34  ;;  %17557 = vst [vmem:[#allocation97_spill] sm:$0xff] %v13943_v1  ;;  %10742 = vtanh.f32 %v2226_v35  ;;  %v3642_v35 = vmul.f32 %v13524_v54, %v17549_v62 }
 0x577   : > { %17558 = vst [vmem:[#allocation98_spill] sm:$0xff] %v13952_v25 }
 0x578   : > { %v13891_v17 = vpop.xlane.xlu1 %4028 }
 0x57b   : > { %v10741_v28 = vpop.eup %10740 }
 0x57c   : > { %v3892_v58 = vmul.f32 %v10741_v28, %v3764_v59  ;;  %v13895_v44 = vpop.xlane.xlu1 %4024  ;;  %v13959_v59 = vadd.f32 %v13344_v23, %v13747_v48  ;;  %v13977_v48 = vadd.f32 %v13344_v23, %v13773_v13  ;;  %v3054_v13 = vmul.f32 %v13520_v61, %v17548_v16 }
 0x57d   : > { %v14011_v61 = vadd.f32 %v13344_v23, %v13800_v37  ;;  %v14029_v37 = vadd.f32 %v13344_v23, %v13812_v0  ;;  %v14047_v0 = vadd.f32 %v13344_v23, %v13835_v24  ;;  %v14064_v24 = vadd.f32 %v13344_v23, %v13853_v27 }
 0x57e   : > { %17559 = vst [vmem:[#allocation99_spill] sm:$0xff] %v13959_v59  ;;  %17561 = vst [vmem:[#allocation101_spill] sm:$0xff] %v13977_v48 }
 0x57f   : > { %17566 = vst [vmem:[#allocation106_spill] sm:$0xff] %v14011_v61  ;;  %17569 = vst [vmem:[#allocation109_spill] sm:$0xff] %v14029_v37 }
 0x580   : > { %v13899_v14 = vpop.xlane.xlu1 %4036  ;;  %17572 = vst [vmem:[#allocation112_spill] sm:$0xff] %v14047_v0  ;;  %17574 = vst [vmem:[#allocation114_spill] sm:$0xff] %v14064_v24 }
 0x58b   : > { %4118 = vadd.xlane.f32.xlu0 %v3899_v22  ;;  %v13893_v22 = vpop.xlane.xlu0 %4062 }
 0x58f   : > { %4114 = vadd.xlane.f32.xlu0 %v3897_v39  ;;  %v13897_v31 = vpop.xlane.xlu0 %4058 }
 0x593   : > { %4104 = vadd.xlane.f32.xlu1 %v3892_v58  ;;  %v13901_v41 = vpop.xlane.xlu0 %4070  ;;  %v13912_v58 = vpop.xlane.xlu1 %4032 }
 0x597   : > { %v13919_v18 = vpop.xlane.xlu0 %4066  ;;  %v13935_v4 = vpop.xlane.xlu1 %4044 }
 0x59b   : > { %v13937_v52 = vpop.xlane.xlu0 %4078  ;;  %v13945_v39 = vpop.xlane.xlu1 %4040 }
 0x59f   : > { %v13948_v43 = vpop.xlane.xlu0 %4074  ;;  %v13961_v29 = vpop.xlane.xlu1 %4052 }
 0x5a3   : > { %v13955_v28 = vpop.permute.xlu0 %4480 }
 0x5a4   : > { %4777 = vperm.xlu1 %10417, %v13905_v57  }
 0x5a5   : > { %4804 = vperm.xlu0 %10416, %v13909_v63   ;;  %v13966_v63 = vadd.f32 %v13360_v21, %v13758_v3  ;;  %v13984_v3 = vadd.f32 %v13360_v21, %v13782_v33 }
 0x5a7   : > { %17560 = vst [vmem:[#allocation100_spill] sm:$0xff] %v13966_v63  ;;  %17562 = vst [vmem:[#allocation102_spill] sm:$0xff] %v13984_v3 }
 0x5a8   : > { %4519 = vperm.xlu1 %10417, %v13917_v32  }
 0x5a9   : > { %4798 = vperm.xlu0 %10416, %v13923_v2   ;;  %v13968_v2 = vpop.permute.xlu0 %4474 }
 0x5ac   : > { %4513 = vperm.xlu1 %10417, %v13929_v50  }
 0x5ad   : > { %4540 = vperm.xlu0 %10416, %v13933_v34   ;;  %v13979_v57 = vpop.xlane.xlu0 %4086  ;;  %v10743_v34 = vpop.eup %10742 }
 0x5b1   : > { %4534 = vperm.xlu0 %10416, %v13943_v1   ;;  %v13989_v51 = vpop.xlane.xlu0 %4082  ;;  %v3770_v1 = vadd.f32 %v3642_v35, %v3054_v13  ;;  %v14043_v35 = vadd.f32 %v13386_v8, %v13613_v38 }
 0x5b3   : > { %17571 = vst [vmem:[#allocation111_spill] sm:$0xff] %v14043_v35 }
 0x5b5   : > { %4816 = vperm.xlu0 %10416, %v13952_v25   ;;  %v13972_v25 = vpop.xlane.xlu1 %4048  ;;  %v14002_v33 = vpop.permute.xlu0 %4756 }
 0x5b6   : > { %17564 = vst [vmem:[#allocation104_spill] sm:$0xff] %v14002_v33 }
 0x5b9   : > { %4810 = vperm.xlu0 %10416, %v13959_v59   ;;  %v13986_v59 = vpop.xlane.xlu1 %4060  ;;  %v14015_v32 = vpop.permute.xlu0 %4750 }
 0x5ba   : > { %17567 = vst [vmem:[#allocation107_spill] sm:$0xff] %v14015_v32 }
 0x5bd   : > { %4552 = vperm.xlu0 %10416, %v13966_v63   ;;  %v13993_v63 = vadd.f32 %v13344_v23, %v13790_v46  ;;  %v3898_v46 = vmul.f32 %v10743_v34, %v3770_v1  ;;  %v14025_v34 = vpop.permute.xlu0 %4492  ;;  %v14034_v1 = vadd.f32 %v13360_v21, %v13825_v56  ;;  %v14057_v56 = vadd.f32 %v13360_v21, %v13848_v30 }
 0x5bf   : > { %17563 = vst [vmem:[#allocation103_spill] sm:$0xff] %v13993_v63  ;;  %17570 = vst [vmem:[#allocation110_spill] sm:$0xff] %v14034_v1 }
 0x5c0   : > { %17573 = vst [vmem:[#allocation113_spill] sm:$0xff] %v14057_v56 }
 0x5c1   : > { %4546 = vperm.xlu0 %10416, %v13977_v48   ;;  %v13999_v48 = vpop.xlane.xlu1 %4056 }
 0x5c5   : > { %4828 = vperm.xlu0 %10416, %v13984_v3   ;;  %v14006_v3 = vadd.f32 %v13360_v21, %v13796_v7  ;;  %v14013_v54 = vpop.xlane.xlu1 %4068 }
 0x5c7   : > { %17565 = vst [vmem:[#allocation105_spill] sm:$0xff] %v14006_v3 }
 0x5c9   : > { %4822 = vperm.xlu0 %10416, %v13993_v63   ;;  %v14020_v63 = vadd.f32 %v13360_v21, %v13808_v20  ;;  %v14022_v7 = vpop.xlane.xlu1 %4064  ;;  %v14038_v20 = vpop.permute.xlu0 %4486 }
 0x5cb   : > { %17568 = vst [vmem:[#allocation108_spill] sm:$0xff] %v14020_v63 }
 0x5cd   : > { %4564 = vperm.xlu0 %10416, %v14006_v3   ;;  %v14036_v13 = vpop.xlane.xlu1 %4076 }
 0x5d0   : > { %4116 = vadd.xlane.f32.xlu1 %v3898_v46  ;;  %v14049_v46 = vpop.xlane.xlu0 %4094 }
 0x5d1   : > { %4558 = vperm.xlu0 %10416, %v14011_v61   ;;  %v14125_v61 = vadd.f32 %v13360_v21, %v13899_v14  ;;  %v14143_v14 = vadd.f32 %v13360_v21, %v13935_v4  ;;  %v14163_v4 = vadd.f32 %v13370_v6, %v13630_v60  ;;  %v14183_v60 = vadd.f32 %v13360_v21, %v13986_v59 }
 0x5d3   : > { %17581 = vst [vmem:[#allocation121_spill] sm:$0xff] %v14125_v61  ;;  %17584 = vst [vmem:[#allocation124_spill] sm:$0xff] %v14143_v14 }
 0x5d4   : > { %v14060_v38 = vpop.xlane.xlu0 %4090  ;;  %17588 = vst [vmem:[#allocation128_spill] sm:$0xff] %v14163_v4  ;;  %17591 = vst [vmem:[#allocation131_spill] sm:$0xff] %v14183_v60 }
 0x5d5   : > { %4840 = vperm.xlu0 %10416, %v14020_v63   ;;  %v14051_v63 = vpop.xlane.xlu1 %4072 }
 0x5d9   : > { %4834 = vperm.xlu0 %10416, %v14029_v37   ;;  %v14069_v37 = vpop.permute.xlu0 %4768 }
 0x5dd   : > { %4576 = vperm.xlu0 %10416, %v14034_v1   ;;  %v14066_v1 = vpop.xlane.xlu1 %4084  ;;  %v14082_v27 = vpop.permute.xlu0 %4762 }
 0x5e1   : > { %4795 = vperm.xlu1 %10417, %v14043_v35   ;;  %4570 = vperm.xlu0 %10416, %v14047_v0   ;;  %v14073_v0 = vadd.f32 %v13360_v21, %v13859_v40  ;;  %v14075_v30 = vpop.xlane.xlu1 %4080  ;;  %v14089_v35 = vadd.f32 %v13360_v21, %v13875_v55 }
 0x5e3   : > { %17575 = vst [vmem:[#allocation115_spill] sm:$0xff] %v14073_v0  ;;  %17577 = vst [vmem:[#allocation117_spill] sm:$0xff] %v14089_v35 }
 0x5e5   : > { %4852 = vperm.xlu0 %10416, %v14057_v56   ;;  %v14080_v56 = vadd.f32 %v13344_v23, %v13867_v15  ;;  %v14091_v40 = vpop.permute.xlu1 %4483  ;;  %v14098_v15 = vadd.f32 %v13344_v23, %v13887_v47  ;;  %v3640_v47 = vmul.f32 %v13579_v53, %v17549_v62 }
 0x5e7   : > { %17576 = vst [vmem:[#allocation116_spill] sm:$0xff] %v14080_v56  ;;  %17578 = vst [vmem:[#allocation118_spill] sm:$0xff] %v14098_v15 }
 0x5e9   : > { %4846 = vperm.xlu0 %10416, %v14064_v24   ;;  %v2218_v24 = vadd.f32 %v13508_v42, %v13304_v45  ;;  %v14100_v3 = vpop.permute.xlu1 %4477  ;;  %v14105_v45 = vadd.f32 %v13360_v21, %v13891_v17 }
 0x5eb   : > { %10744 = vtanh.f32 %v2218_v24  ;;  %17579 = vst [vmem:[#allocation119_spill] sm:$0xff] %v14105_v45  ;;  %v3052_v24 = vmul.f32 %v13575_v5, %v17548_v16  ;;  %v14134_v16 = vadd.f32 %v13344_v23, %v13912_v58 }
 0x5ed   : > { %4588 = vperm.xlu0 %10416, %v14073_v0   ;;  %v14094_v0 = vpop.permute.xlu0 %4504  ;;  %v14109_v55 = vpop.xlane.xlu1 %4092  ;;  %v3768_v17 = vadd.f32 %v3640_v47, %v3052_v24  ;;  %17583 = vst [vmem:[#allocation123_spill] sm:$0xff] %v14134_v16  ;;  %v14150_v24 = vadd.f32 %v13344_v23, %v13945_v39  ;;  %v14157_v47 = vadd.f32 %v13360_v21, %v13961_v29 }
 0x5ee   : > { %v14171_v39 = vadd.f32 %v13344_v23, %v13972_v25  ;;  %v14175_v29 = vadd.f32 %v13386_v8, %v13636_v11  ;;  %v14195_v11 = vadd.f32 %v13344_v23, %v13999_v48  ;;  %v14213_v48 = vadd.f32 %v13370_v6, %v13664_v49 }
 0x5ef   : > { %17586 = vst [vmem:[#allocation126_spill] sm:$0xff] %v14150_v24  ;;  %17587 = vst [vmem:[#allocation127_spill] sm:$0xff] %v14157_v47  ;;  %v14233_v49 = vadd.f32 %v13360_v21, %v14036_v13 }
 0x5f0   : > { %17589 = vst [vmem:[#allocation129_spill] sm:$0xff] %v14171_v39  ;;  %17590 = vst [vmem:[#allocation130_spill] sm:$0xff] %v14175_v29 }
 0x5f1   : > { %4582 = vperm.xlu0 %10416, %v14080_v56   ;;  %v14107_v42 = vpop.permute.xlu0 %4498  ;;  %17593 = vst [vmem:[#allocation133_spill] sm:$0xff] %v14195_v11  ;;  %17596 = vst [vmem:[#allocation136_spill] sm:$0xff] %v14213_v48 }
 0x5f2   : > { %17600 = vst [vmem:[#allocation140_spill] sm:$0xff] %v14233_v49 }
 0x5f5   : > { %4600 = vperm.xlu0 %10416, %v14089_v35   ;;  %v14118_v35 = vadd.f32 %v13344_v23, %v13895_v44  ;;  %v14120_v56 = vpop.xlane.xlu0 %4102 }
 0x5f7   : > { %17580 = vst [vmem:[#allocation120_spill] sm:$0xff] %v14118_v35 }
 0x5f9   : > { %4594 = vperm.xlu0 %10416, %v14098_v15   ;;  %v10745_v15 = vpop.eup %10744  ;;  %v14130_v53 = vpop.xlane.xlu0 %4098 }
 0x5fa   : > { %v3896_v5 = vmul.f32 %v10745_v15, %v3768_v17 }
 0x5fd   : > { %4612 = vperm.xlu0 %10416, %v14105_v45   ;;  %v14127_v45 = vpop.permute.xlu1 %4759  ;;  %v14139_v44 = vpop.permute.xlu0 %4780 }
 0x5fe   : > { %17582 = vst [vmem:[#allocation122_spill] sm:$0xff] %v14127_v45 }
 0x601   : > { %4606 = vperm.xlu0 %10416, %v14118_v35   ;;  %v14136_v62 = vpop.xlane.xlu1 %4088  ;;  %v14152_v58 = vpop.permute.xlu0 %4774  ;;  %v17605_v35 = vld [vmem:[#allocation40_spill] sm:$0xff] }
 0x605   : > { %4112 = vadd.xlane.f32.xlu1 %v3896_v5  ;;  %4624 = vperm.xlu0 %10416, %v14125_v61   ;;  %v14145_v15 = vpop.permute.xlu1 %4753  ;;  %v14166_v5 = vpop.permute.xlu0 %4516 }
 0x606   : > { %17585 = vst [vmem:[#allocation125_spill] sm:$0xff] %v14145_v15 }
 0x609   : > { %4618 = vperm.xlu0 %10416, %v14134_v16   ;;  %v14159_v17 = vpop.permute.xlu1 %4495  ;;  %v14189_v25 = vpop.permute.xlu0 %4510 }
 0x60d   : > { %4636 = vperm.xlu0 %10416, %v14143_v14   ;;  %v14177_v14 = vpop.permute.xlu1 %4489  ;;  %v14201_v59 = vpop.xlane.xlu0 %4110 }
 0x611   : > { %4630 = vperm.xlu0 %10416, %v14150_v24   ;;  %v4101_v24 = vpop.xlane.xlu1 %4100 }
 0x615   : > { %4648 = vperm.xlu0 %10416, %v14157_v47   ;;  %v14187_v47 = vadd.f32 %v13370_v6, %v13645_v9  ;;  %v14207_v9 = vadd.f32 %v13360_v21, %v14013_v54  ;;  %v14225_v54 = vadd.f32 %v13386_v8, %v13668_v36  ;;  %v14245_v36 = vadd.f32 %v13344_v23, %v14051_v63 }
 0x616   : > { %4789 = vperm.xlu1 %10417, %v14163_v4   ;;  %v14263_v63 = vadd.f32 %v13370_v6, %v17605_v35  ;;  %v14283_v35 = vadd.f32 %v13360_v21, %v14109_v55 }
 0x617   : > { %17592 = vst [vmem:[#allocation132_spill] sm:$0xff] %v14187_v47  ;;  %17595 = vst [vmem:[#allocation135_spill] sm:$0xff] %v14207_v9 }
 0x618   : > { %17598 = vst [vmem:[#allocation138_spill] sm:$0xff] %v14225_v54  ;;  %17602 = vst [vmem:[#allocation142_spill] sm:$0xff] %v14245_v36 }
 0x619   : > { %4642 = vperm.xlu0 %10416, %v14171_v39   ;;  %v14199_v39 = vadd.f32 %v13386_v8, %v13657_v12  ;;  %v14216_v12 = vpop.xlane.xlu0 %4106  ;;  %17606 = vst [vmem:[#allocation40_spill] sm:$0xff] %v14263_v63  ;;  %17610 = vst [vmem:[#allocation146_spill] sm:$0xff] %v14283_v35 }
 0x61a   : > { %4531 = vperm.xlu1 %10417, %v14175_v29  }
 0x61b   : > { %17594 = vst [vmem:[#allocation134_spill] sm:$0xff] %v14199_v39 }
 0x61d   : > { %4660 = vperm.xlu0 %10416, %v14183_v60   ;;  %v14209_v60 = vpop.permute.xlu1 %4771  ;;  %v14228_v16 = vpop.permute.xlu0 %4792 }
 0x61e   : > { %4525 = vperm.xlu1 %10417, %v14187_v47   ;;  %17599 = vst [vmem:[#allocation139_spill] sm:$0xff] %v14228_v16 }
 0x621   : > { %4654 = vperm.xlu0 %10416, %v14195_v11   ;;  %v14221_v11 = vadd.f32 %v13344_v23, %v14022_v7  ;;  %v4097_v61 = vpop.xlane.xlu1 %4096  ;;  %v14251_v13 = vpop.permute.xlu0 %4786 }
 0x622   : > { %4807 = vperm.xlu1 %10417, %v14199_v39  }
 0x623   : > { %17597 = vst [vmem:[#allocation137_spill] sm:$0xff] %v14221_v11 }
 0x625   : > { %4672 = vperm.xlu0 %10416, %v14207_v9   ;;  %v14237_v9 = vadd.f32 %v13370_v6, %v13674_v10  ;;  %v14239_v7 = vpop.permute.xlu1 %4765  ;;  %v14257_v10 = vadd.f32 %v13360_v21, %v14066_v1 }
 0x626   : > { %4801 = vperm.xlu1 %10417, %v14213_v48  }
 0x627   : > { %17601 = vst [vmem:[#allocation141_spill] sm:$0xff] %v14237_v9  ;;  %17604 = vst [vmem:[#allocation144_spill] sm:$0xff] %v14257_v10 }
 0x629   : > { %4666 = vperm.xlu0 %10416, %v14221_v11   ;;  %v14249_v11 = vadd.f32 %v13386_v8, %v13676_v19  ;;  %v14266_v19 = vpop.permute.xlu0 %4528 }
 0x62a   : > { %4543 = vperm.xlu1 %10417, %v14225_v54  }
 0x62b   : > { %17603 = vst [vmem:[#allocation143_spill] sm:$0xff] %v14249_v11 }
 0x62d   : > { %4684 = vperm.xlu0 %10416, %v14233_v49   ;;  %v14259_v49 = vpop.permute.xlu1 %4507 }
 0x62e   : > { %4537 = vperm.xlu1 %10417, %v14237_v9  }
 0x631   : > { %4678 = vperm.xlu0 %10416, %v14245_v36   ;;  %v14271_v36 = vadd.f32 %v13344_v23, %v14075_v30  ;;  %v14277_v39 = vpop.permute.xlu1 %4501  ;;  %v14289_v30 = vpop.permute.xlu0 %4522 }
 0x632   : > { %4819 = vperm.xlu1 %10417, %v14249_v11   ;;  %v17608_v11 = vld [vmem:[#allocation60_spill] sm:$0xff] }
 0x633   : > { %17607 = vst [vmem:[#allocation145_spill] sm:$0xff] %v14271_v36  ;;  %v14275_v1 = vadd.f32 %v13386_v8, %v17608_v11  ;;  %v14295_v11 = vadd.f32 %v13344_v23, %v14136_v62 }
 0x635   : > { %4696 = vperm.xlu0 %10416, %v14257_v10   ;;  %17609 = vst [vmem:[#allocation60_spill] sm:$0xff] %v14275_v1  ;;  %v17611_v10 = vld [vmem:[#allocation45_spill] sm:$0xff]  ;;  %v4109_v48 = vpop.xlane.xlu1 %4108  ;;  %17613 = vst [vmem:[#allocation147_spill] sm:$0xff] %v14295_v11  ;;  %v14301_v55 = vpop.xlane.xlu0 %4118 }
 0x636   : > { %4813 = vperm.xlu1 %10417, %v14263_v63   ;;  %v14287_v63 = vadd.f32 %v13370_v6, %v17611_v10  ;;  %v14306_v10 = vadd.f32 %v13360_v21, %v4101_v24 }
 0x638   : > { %17612 = vst [vmem:[#allocation45_spill] sm:$0xff] %v14287_v63  ;;  %17616 = vst [vmem:[#allocation148_spill] sm:$0xff] %v14306_v10 }
 0x639   : > { %4690 = vperm.xlu0 %10416, %v14271_v36   ;;  %v17614_v36 = vld [vmem:[#allocation65_spill] sm:$0xff]  ;;  %v14315_v62 = vpop.xlane.xlu0 %4114 }
 0x63a   : > { %4555 = vperm.xlu1 %10417, %v14275_v1   ;;  %v14299_v4 = vadd.f32 %v13386_v8, %v17614_v36  ;;  %v17618_v1 = vld [vmem:[#allocation42_spill] sm:$0xff]  ;;  %v14319_v36 = vadd.f32 %v13344_v23, %v4097_v61 }
 0x63c   : > { %17615 = vst [vmem:[#allocation65_spill] sm:$0xff] %v14299_v4  ;;  %17620 = vst [vmem:[#allocation150_spill] sm:$0xff] %v14319_v36 }
 0x63d   : > { %4708 = vperm.xlu0 %10416, %v14283_v35   ;;  %v14308_v35 = vpop.permute.xlu1 %4783  ;;  %v14326_v54 = vpop.permute.xlu0 %4804 }
 0x63e   : > { %4549 = vperm.xlu1 %10417, %v14287_v63   ;;  %17617 = vst [vmem:[#allocation149_spill] sm:$0xff] %v14308_v35  ;;  %v14312_v63 = vadd.f32 %v13370_v6, %v17618_v1  ;;  %17623 = vst [vmem:[#allocation151_spill] sm:$0xff] %v14326_v54  ;;  %v14330_v1 = vadd.f32 %v13360_v21, %v4109_v48 }
 0x640   : > { %17619 = vst [vmem:[#allocation42_spill] sm:$0xff] %v14312_v63  ;;  %17624 = vst [vmem:[#allocation152_spill] sm:$0xff] %v14330_v1 }
 0x641   : > { %4702 = vperm.xlu0 %10416, %v14295_v11   ;;  %v4105_v11 = vpop.xlane.xlu1 %4104 }
 0x642   : > { %4831 = vperm.xlu1 %10417, %v14299_v4   ;;  %v17621_v4 = vld [vmem:[#allocation47_spill] sm:$0xff] }
 0x643   : > { %v14323_v24 = vadd.f32 %v13386_v8, %v17621_v4  ;;  %v14341_v4 = vadd.f32 %v13344_v23, %v4105_v11  ;;  %v17632_v11 = vld [vmem:[#allocation46_spill] sm:$0xff] }
 0x645   : > { %4720 = vperm.xlu0 %10416, %v14306_v10   ;;  %17622 = vst [vmem:[#allocation47_spill] sm:$0xff] %v14323_v24  ;;  %v17625_v10 = vld [vmem:[#allocation64_spill] sm:$0xff]  ;;  %v14336_v61 = vpop.permute.xlu1 %4777  ;;  %17627 = vst [vmem:[#allocation153_spill] sm:$0xff] %v14341_v4 }
 0x646   : > { %4825 = vperm.xlu1 %10417, %v14312_v63   ;;  %v14334_v63 = vadd.f32 %v13370_v6, %v17625_v10  ;;  %v17630_v10 = vld [vmem:[#allocation69_spill] sm:$0xff] }
 0x648   : > { %17626 = vst [vmem:[#allocation64_spill] sm:$0xff] %v14334_v63 }
 0x649   : > { %4714 = vperm.xlu0 %10416, %v14319_v36   ;;  %v17628_v36 = vld [vmem:[#allocation49_spill] sm:$0xff]  ;;  %v14351_v48 = vpop.permute.xlu1 %4519 }
 0x64a   : > { %4567 = vperm.xlu1 %10417, %v14323_v24   ;;  %v14345_v9 = vadd.f32 %v13386_v8, %v17628_v36  ;;  %v14347_v24 = vpop.permute.xlu0 %4798  ;;  %v14362_v36 = vadd.f32 %v13386_v8, %v17632_v11 }
 0x64c   : > { %17629 = vst [vmem:[#allocation49_spill] sm:$0xff] %v14345_v9  ;;  %17633 = vst [vmem:[#allocation46_spill] sm:$0xff] %v14362_v36 }
 0x64d   : > { %4732 = vperm.xlu0 %10416, %v14330_v1   ;;  %v14355_v1 = vadd.f32 %v13370_v6, %v17630_v10  ;;  %v14364_v29 = vpop.permute.xlu1 %4513 }
 0x64e   : > { %4561 = vperm.xlu1 %10417, %v14334_v63   ;;  %v14357_v63 = vpop.permute.xlu0 %4540 }
 0x64f   : > { %17631 = vst [vmem:[#allocation69_spill] sm:$0xff] %v14355_v1 }
 0x651   : > { %4726 = vperm.xlu0 %10416, %v14341_v4   ;;  %v17634_v4 = vld [vmem:[#allocation51_spill] sm:$0xff] }
 0x652   : > { %4843 = vperm.xlu1 %10417, %v14345_v9   ;;  %v14369_v9 = vadd.f32 %v13370_v6, %v17634_v4  ;;  %v14371_v47 = vpop.permute.xlu0 %4534  ;;  %v17640_v4 = vld [vmem:[#allocation77_spill] sm:$0xff] }
 0x654   : > { %17635 = vst [vmem:[#allocation51_spill] sm:$0xff] %v14369_v9 }
 0x656   : > { %4837 = vperm.xlu1 %10417, %v14355_v1   ;;  %v17637_v1 = vld [vmem:[#allocation71_spill] sm:$0xff]  ;;  %v14382_v45 = vpop.permute.xlu0 %4816 }
 0x657   : > { %v14379_v11 = vadd.f32 %v13386_v8, %v17637_v1  ;;  %17639 = vst [vmem:[#allocation155_spill] sm:$0xff] %v14382_v45  ;;  %v17644_v1 = vld [vmem:[#allocation68_spill] sm:$0xff] }
 0x659   : > { %17638 = vst [vmem:[#allocation71_spill] sm:$0xff] %v14379_v11 }
 0x65a   : > { %4579 = vperm.xlu1 %10417, %v14362_v36   ;;  %v14387_v36 = vadd.f32 %v13370_v6, %v17640_v4  ;;  %v17646_v4 = vld [vmem:[#allocation76_spill] sm:$0xff] }
 0x65c   : > { %17641 = vst [vmem:[#allocation77_spill] sm:$0xff] %v14387_v36 }
 0x65d   : > { %v4117_v10 = vpop.xlane.xlu1 %4116 }
 0x65e   : > { %v14374_v50 = vadd.f32 %v13360_v21, %v4117_v10  ;;  %4573 = vperm.xlu1 %10417, %v14369_v9   ;;  %v17642_v21 = vld [vmem:[#allocation48_spill] sm:$0xff]  ;;  %v14394_v9 = vpop.permute.xlu0 %4810 }
 0x65f   : > { %v14392_v10 = vadd.f32 %v13386_v8, %v17642_v21  ;;  %v17648_v21 = vld [vmem:[#allocation72_spill] sm:$0xff] }
 0x660   : > { %17636 = vst [vmem:[#allocation154_spill] sm:$0xff] %v14374_v50  ;;  %4744 = vperm.xlu0 %10416, %v14374_v50   ;;  %v14399_v50 = vadd.f32 %v13370_v6, %v17644_v1  ;;  %v17650_v1 = vld [vmem:[#allocation70_spill] sm:$0xff] }
 0x661   : > { %17643 = vst [vmem:[#allocation48_spill] sm:$0xff] %v14392_v10 }
 0x662   : > { %4855 = vperm.xlu1 %10417, %v14379_v11   ;;  %17645 = vst [vmem:[#allocation68_spill] sm:$0xff] %v14399_v50  ;;  %v14401_v33 = vpop.permute.xlu0 %4552  ;;  %v14406_v11 = vadd.f32 %v13386_v8, %v17646_v4  ;;  %v17653_v4 = vld [vmem:[#allocation86_spill] sm:$0xff] }
 0x664   : > { %17647 = vst [vmem:[#allocation76_spill] sm:$0xff] %v14406_v11 }
 0x666   : > { %4849 = vperm.xlu1 %10417, %v14387_v36   ;;  %v14411_v36 = vadd.f32 %v13370_v6, %v17648_v21  ;;  %v14413_v15 = vpop.permute.xlu0 %4546  ;;  %v17655_v21 = vld [vmem:[#allocation88_spill] sm:$0xff] }
 0x668   : > { %17649 = vst [vmem:[#allocation72_spill] sm:$0xff] %v14411_v36 }
 0x66a   : > { %4591 = vperm.xlu1 %10417, %v14392_v10   ;;  %v14418_v10 = vadd.f32 %v13386_v8, %v17650_v1  ;;  %v14420_v32 = vpop.permute.xlu0 %4828  ;;  %v17658_v1 = vld [vmem:[#allocation89_spill] sm:$0xff] }
 0x66b   : > { %17652 = vst [vmem:[#allocation156_spill] sm:$0xff] %v14420_v32 }
 0x66c   : > { %17651 = vst [vmem:[#allocation70_spill] sm:$0xff] %v14418_v10 }
 0x66e   : > { %4585 = vperm.xlu1 %10417, %v14399_v50   ;;  %v14425_v50 = vadd.f32 %v13370_v6, %v17653_v4  ;;  %v14432_v45 = vpop.permute.xlu0 %4822  ;;  %v17660_v4 = vld [vmem:[#allocation90_spill] sm:$0xff] }
 0x66f   : > { %17657 = vst [vmem:[#allocation157_spill] sm:$0xff] %v14432_v45 }
 0x670   : > { %17654 = vst [vmem:[#allocation86_spill] sm:$0xff] %v14425_v50 }
 0x672   : > { %4603 = vperm.xlu1 %10417, %v14406_v11   ;;  %v14430_v11 = vadd.f32 %v13386_v8, %v17655_v21  ;;  %v14439_v32 = vpop.permute.xlu0 %4564  ;;  %v17662_v21 = vld [vmem:[#allocation91_spill] sm:$0xff] }
 0x674   : > { %17656 = vst [vmem:[#allocation88_spill] sm:$0xff] %v14430_v11 }
 0x676   : > { %4597 = vperm.xlu1 %10417, %v14411_v36   ;;  %v14437_v36 = vadd.f32 %v13370_v6, %v17658_v1  ;;  %v14451_v35 = vpop.permute.xlu0 %4558  ;;  %v17665_v1 = vld [vmem:[#allocation53_spill] sm:$0xff] }
 0x677   : > { %v14458_v54 = vadd.f32 %v13386_v8, %v17665_v1  ;;  %v14476_v1 = vadd.f32 %v13386_v8, %v13893_v22  ;;  %v14494_v22 = vadd.f32 %v13386_v8, %v13901_v41 }
 0x678   : > { %17659 = vst [vmem:[#allocation89_spill] sm:$0xff] %v14437_v36 }
 0x679   : > { %17666 = vst [vmem:[#allocation53_spill] sm:$0xff] %v14458_v54  ;;  %17670 = vst [vmem:[#allocation162_spill] sm:$0xff] %v14476_v1 }
 0x67a   : > { %4615 = vperm.xlu1 %10417, %v14418_v10   ;;  %v14444_v10 = vadd.f32 %v13386_v8, %v17660_v4  ;;  %17674 = vst [vmem:[#allocation166_spill] sm:$0xff] %v14494_v22 }
 0x67c   : > { %17661 = vst [vmem:[#allocation90_spill] sm:$0xff] %v14444_v10 }
 0x67e   : > { %4609 = vperm.xlu1 %10417, %v14425_v50   ;;  %v14449_v50 = vadd.f32 %v13370_v6, %v17662_v21  ;;  %v14468_v21 = vadd.f32 %v13370_v6, %v13889_v26 }
 0x680   : > { %17663 = vst [vmem:[#allocation91_spill] sm:$0xff] %v14449_v50  ;;  %17669 = vst [vmem:[#allocation161_spill] sm:$0xff] %v14468_v21 }
 0x682   : > { %4627 = vperm.xlu1 %10417, %v14430_v11   ;;  %v14453_v11 = vpop.permute.xlu1 %4795 }
 0x683   : > { %17664 = vst [vmem:[#allocation158_spill] sm:$0xff] %v14453_v11 }
 0x686   : > { %4621 = vperm.xlu1 %10417, %v14437_v36   ;;  %v14460_v36 = vpop.permute.xlu0 %4840 }
 0x687   : > { %17667 = vst [vmem:[#allocation159_spill] sm:$0xff] %v14460_v36 }
 0x68a   : > { %4639 = vperm.xlu1 %10417, %v14444_v10  }
 0x68e   : > { %4633 = vperm.xlu1 %10417, %v14449_v50   ;;  %v14478_v50 = vpop.permute.xlu0 %4834 }
 0x68f   : > { %17671 = vst [vmem:[#allocation163_spill] sm:$0xff] %v14478_v50 }
 0x692   : > { %v4113_v4 = vpop.xlane.xlu1 %4112  ;;  %4651 = vperm.xlu1 %10417, %v14458_v54   ;;  %v14487_v26 = vpop.permute.xlu0 %4576 }
 0x693   : > { %v14464_v10 = vadd.f32 %v13344_v23, %v4113_v4  ;;  %v14485_v23 = vadd.f32 %v13370_v6, %v13897_v31  ;;  %17673 = vst [vmem:[#allocation165_spill] sm:$0xff] %v14487_v26 }
 0x695   : > { %17668 = vst [vmem:[#allocation160_spill] sm:$0xff] %v14464_v10  ;;  %4738 = vperm.xlu0 %10416, %v14464_v10   ;;  %17672 = vst [vmem:[#allocation164_spill] sm:$0xff] %v14485_v23 }
 0x696   : > { %v14471_v11 = vpop.permute.xlu1 %4789  ;;  %4645 = vperm.xlu1 %10417, %v14468_v21   ;;  %v14503_v31 = vpop.permute.xlu0 %4570 }
 0x697   : > { %17677 = vst [vmem:[#allocation169_spill] sm:$0xff] %v14503_v31 }
 0x69a   : > { %v14480_v54 = vpop.permute.xlu1 %4531  ;;  %4663 = vperm.xlu1 %10417, %v14476_v1   ;;  %v14501_v1 = vadd.f32 %v13370_v6, %v13919_v18  ;;  %v14512_v41 = vpop.permute.xlu0 %4852  ;;  %v14519_v18 = vadd.f32 %v13370_v6, %v13948_v43  ;;  %v17685_v43 = vlaneseq }
 0x69b   : > { %17679 = vst [vmem:[#allocation171_spill] sm:$0xff] %v14512_v41 }
 0x69c   : > { %17676 = vst [vmem:[#allocation168_spill] sm:$0xff] %v14501_v1  ;;  %17680 = vst [vmem:[#allocation172_spill] sm:$0xff] %v14519_v18  ;;  %v4858_v41 = vand.u32 127, %v17685_v43 }
 0x69e   : > { %v14489_v4 = vpop.permute.xlu1 %4525  ;;  %4657 = vperm.xlu1 %10417, %v14485_v23   ;;  %v14510_v23 = vadd.f32 %v13386_v8, %v13937_v52  ;;  %v14528_v52 = vpop.permute.xlu0 %4846  ;;  %v4877_v50 = vadd.s32 4294967272, %v4858_v41 }
 0x69f   : > { %17682 = vst [vmem:[#allocation174_spill] sm:$0xff] %v14528_v52  ;;  %v4870_v52 = vadd.s32 4294967280, %v4858_v41 }
 0x6a0   : > { %17678 = vst [vmem:[#allocation170_spill] sm:$0xff] %v14510_v23 }
 0x6a2   : > { %v14496_v10 = vpop.permute.xlu1 %4807  ;;  %4675 = vperm.xlu1 %10417, %v14494_v22  }
 0x6a3   : > { %17675 = vst [vmem:[#allocation167_spill] sm:$0xff] %v14496_v10  ;;  %v14538_v10 = vpop.permute.xlu0 %4588 }
 0x6a4   : > { %17686 = vst [vmem:[#allocation177_spill] sm:$0xff] %v14538_v10  ;;  %v14558_v10 = vadd.f32 %v13370_v6, %v14060_v38 }
 0x6a6   : > { %v14505_v21 = vpop.permute.xlu1 %4801  ;;  %4669 = vperm.xlu1 %10417, %v14501_v1   ;;  %v14526_v1 = vadd.f32 %v13386_v8, %v13979_v57  ;;  %v4863_v57 = vadd.s32 4294967288, %v4858_v41  ;;  %17689 = vst [vmem:[#allocation179_spill] sm:$0xff] %v14558_v10 }
 0x6a8   : > { %17681 = vst [vmem:[#allocation173_spill] sm:$0xff] %v14526_v1 }
 0x6aa   : > { %v14514_v26 = vpop.permute.xlu1 %4543  ;;  %4687 = vperm.xlu1 %10417, %v14510_v23   ;;  %v14535_v23 = vadd.f32 %v13370_v6, %v13989_v51  ;;  %v17688_v51 = vld [vmem:[#allocation30_spill] sm:$0xff] }
 0x6ab   : > { %v14554_v43 = vsub.s32 %v4863_v57, %v17688_v51  ;;  %v14565_v45 = vsub.s32 %v4870_v52, %v17688_v51  ;;  %v14581_v52 = vsub.s32 %v4877_v50, %v17688_v51 }
 0x6ac   : > { %17684 = vst [vmem:[#allocation176_spill] sm:$0xff] %v14535_v23 }
 0x6ad   : > { %v4867_v57 = vrot.slane %v14100_v3, %v14554_v43  ;;  %v4874_v50 = vrot.slane %v13955_v28, %v14565_v45  ;;  %v4881_v28 = vrot.slane %v14091_v40, %v14581_v52 }
 0x6ae   : > { %v14521_v22 = vpop.permute.xlu1 %4537  ;;  %4681 = vperm.xlu1 %10417, %v14519_v18   ;;  %v14545_v18 = vadd.f32 %v13386_v8, %v14049_v46  ;;  %v4891_v46 = vrot.slane %v14177_v14, %v14554_v43  ;;  %v14578_v14 = vadd.f32 %v13386_v8, %v14120_v56 }
 0x6b0   : > { %17687 = vst [vmem:[#allocation178_spill] sm:$0xff] %v14545_v18  ;;  %17690 = vst [vmem:[#allocation180_spill] sm:$0xff] %v14578_v14 }
 0x6b2   : > { %v14530_v31 = vpop.permute.xlu1 %4819  ;;  %4699 = vperm.xlu1 %10417, %v14526_v1   ;;  %v14551_v1 = vsub.s32 %v4858_v41, %v17688_v51  ;;  %v4910_v41 = vrot.slane %v14277_v39, %v14554_v43  ;;  %v14604_v51 = vadd.f32 %v13370_v6, %v14130_v53 }
 0x6b3   : > { %17683 = vst [vmem:[#allocation175_spill] sm:$0xff] %v14530_v31 }
 0x6b4   : > { %v4862_v16 = vrot.slane %v13968_v2, %v14551_v1  ;;  %v4887_v38 = vrot.slane %v14038_v20, %v14551_v1  ;;  %v4906_v3 = vrot.slane %v14107_v42, %v14551_v1  ;;  %v4896_v2 = vrot.slane %v14025_v34, %v14565_v45 }
 0x6b5   : > { %v4929_v42 = vrot.slane %v14364_v29, %v14554_v43  ;;  %v4915_v34 = vrot.slane %v14094_v0, %v14565_v45  ;;  %v4925_v29 = vrot.slane %v14189_v25, %v14551_v1 }
 0x6b6   : > { %v14540_v36 = vpop.permute.xlu1 %4813  ;;  %4693 = vperm.xlu1 %10417, %v14535_v23   ;;  %v14560_v23 = vpop.permute.xlu0 %4582  ;;  %v4869_v56 = vsel %vm4868_vm1, %v4867_v57, %v4862_v16  ;;  %v4901_v16 = vrot.slane %v14159_v17, %v14581_v52  ;;  %v4944_v57 = vrot.slane %v14289_v30, %v14551_v1  ;;  %v4920_v17 = vrot.slane %v14259_v49, %v14581_v52 }
 0x6b7   : > { %v4876_v0 = vsel %vm4875_vm2, %v4874_v50, %v4869_v56  ;;  %v4930_v25 = vsel %vm4868_vm1, %v4929_v42, %v4925_v29  ;;  %v14634_v30 = vadd.f32 %v13386_v8, %v14201_v59 }
 0x6ba   : > { %v14547_v31 = vpop.permute.xlu1 %4555  ;;  %4711 = vperm.xlu1 %10417, %v14545_v18   ;;  %v14588_v20 = vpop.permute.xlu0 %4600 }
 0x6be   : > { %v4550_v18 = vpop.permute.xlu1 %4549  ;;  %4705 = vperm.xlu1 %10417, %v14558_v10   ;;  %v4892_v10 = vsel %vm4868_vm1, %v4891_v46, %v4887_v38  ;;  %v4911_v46 = vsel %vm4868_vm1, %v4910_v41, %v4906_v3  ;;  %v4934_v3 = vrot.slane %v14166_v5, %v14565_v45  ;;  %v4883_v5 = vsel %vm4882_vm3, %v4881_v28, %v4876_v0 }
 0x6bf   : > { %v4897_v38 = vsel %vm4875_vm2, %v4896_v2, %v4892_v10  ;;  %v4967_v10 = vrot.slane %v14521_v22, %v14554_v43  ;;  %v4916_v53 = vsel %vm4875_vm2, %v4915_v34, %v4911_v46  ;;  %v4963_v22 = vrot.slane %v14371_v47, %v14551_v1  ;;  %v14638_v2 = vpop.permute.xlu0 %4594 }
 0x6c0   : > { %v4902_v40 = vsel %vm4882_vm3, %v4901_v16, %v4897_v38  ;;  %v4921_v49 = vsel %vm4882_vm3, %v4920_v17, %v4916_v53  ;;  %v4953_v47 = vrot.slane %v14266_v19, %v14565_v45  ;;  %v4935_v59 = vsel %vm4875_vm2, %v4934_v3, %v4930_v25 }
 0x6c1   : > { %v4968_v56 = vsel %vm4868_vm1, %v4967_v10, %v4963_v22  ;;  %v4972_v46 = vrot.slane %v14357_v63, %v14565_v45  ;;  %v4939_v38 = vrot.slane %v14351_v48, %v14581_v52  ;;  %v4991_v19 = vrot.slane %v14401_v33, %v14565_v45 }
 0x6c2   : > { %v14590_v39 = vpop.permute.xlu1 %4831  ;;  %4723 = vperm.xlu1 %10417, %v14578_v14   ;;  %v4948_v14 = vrot.slane %v14489_v4, %v14554_v43  ;;  %v4986_v4 = vrot.slane %v4550_v18, %v14554_v43  ;;  %v4982_v18 = vrot.slane %v14413_v15, %v14551_v1  ;;  %v14660_v63 = vadd.f32 %v13370_v6, %v14216_v12 }
 0x6c3   : > { %v4958_v16 = vrot.slane %v14480_v54, %v14581_v52  ;;  %v4973_v29 = vsel %vm4875_vm2, %v4972_v46, %v4968_v56  ;;  %v4940_v10 = vsel %vm4882_vm3, %v4939_v38, %v4935_v59  ;;  %v4977_v48 = vrot.slane %v14514_v26, %v14581_v52  ;;  %v14673_v53 = vpop.permute.xlu0 %4612 }
 0x6c4   : > { %v4949_v50 = vsel %vm4868_vm1, %v4948_v14, %v4944_v57  ;;  %v4987_v15 = vsel %vm4868_vm1, %v4986_v4, %v4982_v18  ;;  %v5474_v14 = vsel %vm5473_vm4, %v4902_v40, %v4883_v5  ;;  %v14671_v0 = vadd.f32 %v13386_v8, %v14301_v55 }
 0x6c5   : > { %v4954_v34 = vsel %vm4875_vm2, %v4953_v47, %v4949_v50  ;;  %v5476_v28 = vsel %vm5475_vm5, %v4921_v49, %v5474_v14  ;;  %v4992_v33 = vsel %vm4875_vm2, %v4991_v19, %v4987_v15  ;;  %v4996_v54 = vrot.slane %v14547_v31, %v14581_v52 }
 0x6c6   : > { %v14621_v41 = vpop.permute.xlu1 %4825  ;;  %4717 = vperm.xlu1 %10417, %v14604_v51   ;;  %v4959_v12 = vsel %vm4882_vm3, %v4958_v16, %v4954_v34  ;;  %v5001_v26 = vrot.slane %v14451_v35, %v14551_v1  ;;  %v4978_v40 = vsel %vm4882_vm3, %v4977_v48, %v4973_v29  ;;  %v5010_v8 = vrot.slane %v14439_v32, %v14565_v45  ;;  %v17692_v48 = vld [vmem:[#allocation157_spill] sm:$0xff] }
 0x6c7   : > { %v4997_v55 = vsel %vm4882_vm3, %v4996_v54, %v4992_v33  ;;  %v5478_v17 = vsel %vm5477_vm6, %v4940_v10, %v5476_v28  ;;  %v14699_v49 = vadd.f32 %v13370_v6, %v14315_v62  ;;  %v14701_v47 = vpop.permute.xlu0 %4606  ;;  %v5328_v46 = vrot.slane %v14239_v7, %v14554_v43  ;;  %v17691_v10 = vld [vmem:[#allocation139_spill] sm:$0xff] }
 0x6c8   : > { %v5480_v22 = vsel %vm5479_vm7, %v4959_v12, %v5478_v17  ;;  %v5347_v15 = vrot.slane %v14336_v61, %v14554_v43  ;;  %v5324_v6 = vrot.slane %v14082_v27, %v14551_v1  ;;  %v5343_v38 = vrot.slane %v14152_v58, %v14551_v1  ;;  %v17694_v54 = vld [vmem:[#allocation163_spill] sm:$0xff] }
 0x6c9   : > { %v5482_v32 = vsel %vm5481_vm8, %v4978_v40, %v5480_v22  ;;  %v5385_v19 = vrot.slane %v14505_v21, %v14554_v43  ;;  %v5333_v7 = vrot.slane %v14069_v37, %v14565_v45  ;;  %v5362_v27 = vrot.slane %v14251_v13, %v14551_v1  ;;  %v17695_v40 = vld [vmem:[#allocation149_spill] sm:$0xff]  ;;  %v17697_v22 = vld [vmem:[#allocation156_spill] sm:$0xff] }
 0x6ca   : > { %v4568_v42 = vpop.permute.xlu1 %4567  ;;  %4735 = vperm.xlu1 %10417, %v14634_v30   ;;  %v5484_v50 = vsel %vm5483_vm9, %v4997_v55, %v5482_v32  ;;  %v5329_v61 = vsel %vm4868_vm1, %v5328_v46, %v5324_v6  ;;  %v5404_v34 = vrot.slane %v14540_v36, %v14554_v43  ;;  %v5348_v28 = vsel %vm4868_vm1, %v5347_v15, %v5343_v38  ;;  %v17696_v55 = vld [vmem:[#allocation155_spill] sm:$0xff]  ;;  %v17698_v32 = vld [vmem:[#allocation158_spill] sm:$0xff] }
 0x6cb   : > { %v5015_v31 = vrot.slane %v4568_v42, %v14581_v52  ;;  %v14712_v62 = vpop.permute.xlu0 %4624  ;;  %v5366_v42 = vrot.slane %v14471_v11, %v14554_v43  ;;  %v5338_v11 = vrot.slane %v14209_v60, %v14581_v52  ;;  %v5381_v58 = vrot.slane %v14347_v24, %v14551_v1  ;;  %v17699_v46 = vld [vmem:[#allocation159_spill] sm:$0xff] }
 0x6cc   : > { %v5423_v21 = vrot.slane %v14621_v41, %v14554_v43  ;;  %v5352_v37 = vrot.slane %v14139_v44, %v14565_v45  ;;  %v5400_v13 = vrot.slane %v14394_v9, %v14551_v1  ;;  %v5334_v60 = vsel %vm4875_vm2, %v5333_v7, %v5329_v61  ;;  %v17693_v9 = vld [vmem:[#allocation151_spill] sm:$0xff] }
 0x6cd   : > { %v5367_v16 = vsel %vm4868_vm1, %v5366_v42, %v5362_v27  ;;  %v5371_v24 = vrot.slane %v17691_v10, %v14565_v45  ;;  %v5419_v41 = vrot.slane %v17692_v48, %v14551_v1  ;;  %v5386_v33 = vsel %vm4868_vm1, %v5385_v19, %v5381_v58  ;;  %v17700_v6 = vld [vmem:[#allocation167_spill] sm:$0xff] }
 0x6ce   : > { %v4562_v57 = vpop.permute.xlu1 %4561  ;;  %4729 = vperm.xlu1 %10417, %v14660_v63   ;;  %v5353_v44 = vsel %vm4875_vm2, %v5352_v37, %v5348_v28  ;;  %v5390_v12 = vrot.slane %v17693_v9, %v14565_v45  ;;  %v5409_v17 = vrot.slane %v17696_v55, %v14565_v45  ;;  %v5447_v15 = vrot.slane %v17699_v46, %v14565_v45  ;;  %v17701_v7 = vld [vmem:[#allocation175_spill] sm:$0xff] }
 0x6cf   : > { %v5005_v4 = vrot.slane %v4562_v57, %v14554_v43  ;;  %v5438_v57 = vrot.slane %v17694_v54, %v14551_v1  ;;  %v5395_v42 = vrot.slane %v17700_v6, %v14581_v52  ;;  %v5414_v61 = vrot.slane %v17701_v7, %v14581_v52 }
 0x6d0   : > { %v5433_v58 = vrot.slane %v14590_v39, %v14581_v52 }
 0x6d1   : > { %v5006_v25 = vsel %vm4868_vm1, %v5005_v4, %v5001_v26  ;;  %v14755_v26 = vpop.permute.xlu0 %4618  ;;  %v5405_v4 = vsel %vm4868_vm1, %v5404_v34, %v5400_v13  ;;  %v5339_v34 = vsel %vm4882_vm3, %v5338_v11, %v5334_v60 }
 0x6d2   : > { %v14690_v35 = vpop.permute.xlu1 %4843  ;;  %4747 = vperm.xlu1 %10417, %v14671_v0   ;;  %v5011_v3 = vsel %vm4875_vm2, %v5010_v8, %v5006_v25  ;;  %v5357_v8 = vrot.slane %v17695_v40, %v14581_v52  ;;  %v5424_v25 = vsel %vm4868_vm1, %v5423_v21, %v5419_v41  ;;  %v5410_v38 = vsel %vm4875_vm2, %v5409_v17, %v5405_v4  ;;  %v17703_v41 = vld [vmem:[#allocation171_spill] sm:$0xff] }
 0x6d3   : > { %v5016_v18 = vsel %vm4882_vm3, %v5015_v31, %v5011_v3  ;;  %v5372_v31 = vsel %vm4875_vm2, %v5371_v24, %v5367_v16  ;;  %v5428_v3 = vrot.slane %v17697_v22, %v14565_v45  ;;  %v5415_v16 = vsel %vm4882_vm3, %v5414_v61, %v5410_v38  ;;  %v17702_v24 = vld [vmem:[#allocation174_spill] sm:$0xff] }
 0x6d4   : > { %v5486_v56 = vsel %vm5485_vm10, %v5016_v18, %v5484_v50  ;;  %v5376_v18 = vrot.slane %v17698_v32, %v14581_v52  ;;  %v5391_v50 = vsel %vm4875_vm2, %v5390_v12, %v5386_v33  ;;  %v5457_v11 = vrot.slane %v17702_v24, %v14551_v1  ;;  %v17706_v24 = vld [vmem:[#allocation177_spill] sm:$0xff] }
 0x6d5   : > { %v5513_v5 = vsel %vm5512_vm11, %v5486_v56, -inf  ;;  %v5429_v27 = vsel %vm4875_vm2, %v5428_v3, %v5424_v25  ;;  %v5396_v28 = vsel %vm4882_vm3, %v5395_v42, %v5391_v50  ;;  %v14786_v13 = vpop.permute.xlu0 %4636  ;;  %v5466_v33 = vrot.slane %v17703_v41, %v14565_v45 }
 0x6d6   : > { %v4838_v59 = vpop.permute.xlu1 %4837  ;;  %4741 = vperm.xlu1 %10417, %v14699_v49   ;;  %5514 = vmax.xlane.f32.xlu0 %v5513_v5  ;;  %v5377_v19 = vsel %vm4882_vm3, %v5376_v18, %v5372_v31  ;;  %v5434_v39 = vsel %vm4882_vm3, %v5433_v58, %v5429_v27 }
 0x6d7   : > { %v5442_v36 = vrot.slane %v4838_v59, %v14554_v43  ;;  %v5358_v59 = vsel %vm4882_vm3, %v5357_v8, %v5353_v44 }
 0x6d8   : > { %v5501_v37 = vsel %vm5473_vm4, %v5358_v59, %v5339_v34 }
 0x6d9   : > { %v5443_v56 = vsel %vm4868_vm1, %v5442_v36, %v5438_v57  ;;  %v5452_v36 = vrot.slane %v14690_v35, %v14581_v52  ;;  %v5502_v60 = vsel %vm5475_vm5, %v5377_v19, %v5501_v37  ;;  %v4631_v17 = vpop.permute.xlu0 %4630 }
 0x6da   : > { %v14716_v14 = vpop.permute.xlu1 %4579  ;;  %v5448_v21 = vsel %vm4875_vm2, %v5447_v15, %v5443_v56  ;;  %v5503_v9 = vsel %vm5477_vm6, %v5396_v28, %v5502_v60  ;;  %v17704_v28 = vld [vmem:[#allocation165_spill] sm:$0xff]  ;;  %v5058_v60 = vrot.slane %v14638_v2, %v14551_v1  ;;  %v5096_v2 = vrot.slane %v14755_v26, %v14551_v1 }
 0x6db   : > { %v5453_v44 = vsel %vm4882_vm3, %v5452_v36, %v5448_v21  ;;  %v5504_v54 = vsel %vm5479_vm7, %v5415_v16, %v5503_v9  ;;  %v5029_v58 = vrot.slane %v17704_v28, %v14565_v45  ;;  %v5039_v21 = vrot.slane %v14560_v23, %v14551_v1  ;;  %v17705_v36 = vld [vmem:[#allocation169_spill] sm:$0xff] }
 0x6dc   : > { %v5505_v40 = vsel %vm5481_vm8, %v5434_v39, %v5504_v54  ;;  %v5067_v39 = vrot.slane %v14588_v20, %v14565_v45  ;;  %v5077_v23 = vrot.slane %v14701_v47, %v14551_v1  ;;  %v5115_v47 = vrot.slane %v4631_v17, %v14551_v1 }
 0x6dd   : > { %v5506_v55 = vsel %vm5483_vm9, %v5453_v44, %v5505_v40  ;;  %v14811_v3 = vpop.permute.xlu0 %4648  ;;  %v5105_v44 = vrot.slane %v14712_v62, %v14565_v45 }
 0x6de   : > { %v14742_v29 = vpop.permute.xlu1 %4573 }
 0x6df   : > { %v5024_v37 = vrot.slane %v14742_v29, %v14554_v43 }
 0x6e1   : > { %v4643_v50 = vpop.permute.xlu0 %4642 }
 0x6e2   : > { %v4856_v5 = vpop.permute.xlu1 %4855  ;;  %v5134_v62 = vrot.slane %v4643_v50, %v14551_v1 }
 0x6e3   : > { %v5471_v12 = vrot.slane %v4856_v5, %v14581_v52 }
 0x6e5   : > { %v14813_v5 = vpop.permute.xlu0 %4660 }
 0x6e6   : > { %v4850_v10 = vpop.permute.xlu1 %4849 }
 0x6e7   : > { %v5461_v48 = vrot.slane %v4850_v10, %v14554_v43  ;;  %v5020_v10 = vrot.slane %v17705_v36, %v14551_v1 }
 0x6e9   : > { %v5462_v35 = vsel %vm4868_vm1, %v5461_v48, %v5457_v11  ;;  %v14815_v15 = vpop.permute.xlu0 %4654  ;;  %v5048_v11 = vrot.slane %v17706_v24, %v14565_v45 }
 0x6ea   : > { %v14803_v57 = vpop.permute.xlu1 %4591  ;;  %v5467_v4 = vsel %vm4875_vm2, %v5466_v33, %v5462_v35  ;;  %v5086_v33 = vrot.slane %v14673_v53, %v14565_v45  ;;  %v5025_v35 = vsel %vm4868_vm1, %v5024_v37, %v5020_v10  ;;  %v5124_v53 = vrot.slane %v14786_v13, %v14565_v45 }
 0x6eb   : > { %v5472_v8 = vsel %vm4882_vm3, %v5471_v12, %v5467_v4 }
 0x6ec   : > { %v5507_v31 = vsel %vm5485_vm10, %v5472_v8, %v5506_v55  ;;  %v5143_v8 = vrot.slane %v14811_v3, %v14565_v45  ;;  %v5053_v55 = vrot.slane %v14803_v57, %v14581_v52 }
 0x6ed   : > { %v5522_v25 = vsel %vm5512_vm11, %v5507_v31, -inf  ;;  %v14817_v42 = vpop.permute.xlu0 %4672 }
 0x6ee   : > { %v4586_v22 = vpop.permute.xlu1 %4585  ;;  %5523 = vmax.xlane.f32.xlu0 %v5522_v25  ;;  %v5030_v25 = vsel %vm4875_vm2, %v5029_v58, %v5025_v35 }
 0x6ef   : > { %v5043_v61 = vrot.slane %v4586_v22, %v14554_v43 }
 0x6f1   : > { %v14819_v7 = vpop.permute.xlu0 %4666  ;;  %v5044_v29 = vsel %vm4868_vm1, %v5043_v61, %v5039_v21 }
 0x6f2   : > { %v4604_v32 = vpop.permute.xlu1 %4603  ;;  %v5049_v26 = vsel %vm4875_vm2, %v5048_v11, %v5044_v29 }
 0x6f3   : > { %v5072_v13 = vrot.slane %v4604_v32, %v14581_v52  ;;  %v5054_v3 = vsel %vm4882_vm3, %v5053_v55, %v5049_v26 }
 0x6f5   : > { %v14849_v9 = vpop.permute.xlu0 %4684 }
 0x6f6   : > { %v4598_v18 = vpop.permute.xlu1 %4597 }
 0x6f7   : > { %v5062_v27 = vrot.slane %v4598_v18, %v14554_v43 }
 0x6f9   : > { %v5063_v20 = vsel %vm4868_vm1, %v5062_v27, %v5058_v60 }
 0x6fa   : > { %v4616_v56 = vpop.permute.xlu1 %4615  ;;  %v5068_v17 = vsel %vm4875_vm2, %v5067_v39, %v5063_v20 }
 0x6fb   : > { %v5091_v57 = vrot.slane %v4616_v56, %v14581_v52  ;;  %v5073_v61 = vsel %vm4882_vm3, %v5072_v13, %v5068_v17 }
 0x6fe   : > { %v4610_v59 = vpop.permute.xlu1 %4609 }
 0x6ff   : > { %v5081_v16 = vrot.slane %v4610_v59, %v14554_v43  ;;  %v5034_v59 = vrot.slane %v14716_v14, %v14581_v52 }
 0x701   : > { %v5082_v54 = vsel %vm4868_vm1, %v5081_v16, %v5077_v23  ;;  %v5035_v28 = vsel %vm4882_vm3, %v5034_v59, %v5030_v25 }
 0x702   : > { %v4628_v46 = vpop.permute.xlu1 %4627  ;;  %v5087_v22 = vsel %vm4875_vm2, %v5086_v33, %v5082_v54  ;;  %v5487_v37 = vsel %vm5473_vm4, %v5054_v3, %v5035_v28 }
 0x703   : > { %v5110_v27 = vrot.slane %v4628_v46, %v14581_v52  ;;  %v5092_v58 = vsel %vm4882_vm3, %v5091_v57, %v5087_v22  ;;  %v5153_v46 = vrot.slane %v14815_v15, %v14551_v1  ;;  %v5488_v10 = vsel %vm5475_vm5, %v5073_v61, %v5487_v37  ;;  %v17707_v61 = vld [vmem:[#allocation107_spill] sm:$0xff] }
 0x706   : > { %v4622_v6 = vpop.permute.xlu1 %4621 }
 0x707   : > { %v5100_v48 = vrot.slane %v4622_v6, %v14554_v43 }
 0x709   : > { %v5101_v40 = vsel %vm4868_vm1, %v5100_v48, %v5096_v2  ;;  %v5489_v48 = vsel %vm5477_vm6, %v5092_v58, %v5488_v10  ;;  %v17708_v58 = vld [vmem:[#allocation125_spill] sm:$0xff] }
 0x70a   : > { %v4640_v38 = vpop.permute.xlu1 %4639  ;;  %v5106_v6 = vsel %vm4875_vm2, %v5105_v44, %v5101_v40 }
 0x70b   : > { %v5129_v21 = vrot.slane %v4640_v38, %v14581_v52  ;;  %v5111_v56 = vsel %vm4882_vm3, %v5110_v27, %v5106_v6  ;;  %v5162_v38 = vrot.slane %v14813_v5, %v14565_v45  ;;  %v5305_v27 = vrot.slane %v17707_v61, %v14551_v1 }
 0x70c   : > { %v5490_v23 = vsel %vm5479_vm7, %v5111_v56, %v5489_v48  ;;  %v5181_v48 = vrot.slane %v14817_v42, %v14565_v45 }
 0x70e   : > { %v4634_v19 = vpop.permute.xlu1 %4633 }
 0x70f   : > { %v5119_v41 = vrot.slane %v4634_v19, %v14554_v43  ;;  %v4679_v19 = vpop.permute.xlu0 %4678 }
 0x710   : > { %v5191_v59 = vrot.slane %v4679_v19, %v14551_v1 }
 0x711   : > { %v5120_v31 = vsel %vm4868_vm1, %v5119_v41, %v5115_v47 }
 0x712   : > { %v4652_v34 = vpop.permute.xlu1 %4651  ;;  %v5125_v32 = vsel %vm4875_vm2, %v5124_v53, %v5120_v31 }
 0x713   : > { %v5148_v16 = vrot.slane %v4652_v34, %v14581_v52  ;;  %v5130_v11 = vsel %vm4882_vm3, %v5129_v21, %v5125_v32  ;;  %v4697_v15 = vpop.permute.xlu0 %4696  ;;  %v5309_v21 = vrot.slane %v17708_v58, %v14554_v43 }
 0x714   : > { %v5491_v33 = vsel %vm5481_vm8, %v5130_v11, %v5490_v23 }
 0x716   : > { %v4646_v12 = vpop.permute.xlu1 %4645 }
 0x717   : > { %v5138_v4 = vrot.slane %v4646_v12, %v14554_v43  ;;  %v4691_v47 = vpop.permute.xlu0 %4690 }
 0x718   : > { %v5210_v32 = vrot.slane %v4691_v47, %v14551_v1 }
 0x719   : > { %v5139_v18 = vsel %vm4868_vm1, %v5138_v4, %v5134_v62 }
 0x71a   : > { %v4664_v50 = vpop.permute.xlu1 %4663  ;;  %v5144_v14 = vsel %vm4875_vm2, %v5143_v8, %v5139_v18 }
 0x71b   : > { %v5149_v60 = vsel %vm4882_vm3, %v5148_v16, %v5144_v14  ;;  %v5167_v39 = vrot.slane %v4664_v50, %v14581_v52  ;;  %v4709_v54 = vpop.permute.xlu0 %4708  ;;  %v5172_v14 = vrot.slane %v14819_v7, %v14551_v1  ;;  %v5200_v16 = vrot.slane %v14849_v9, %v14565_v45 }
 0x71c   : > { %v5492_v5 = vsel %vm5483_vm9, %v5149_v60, %v5491_v33  ;;  %v5238_v9 = vrot.slane %v4709_v54, %v14565_v45 }
 0x71e   : > { %v4658_v36 = vpop.permute.xlu1 %4657 }
 0x71f   : > { %v5157_v24 = vrot.slane %v4658_v36, %v14554_v43  ;;  %v4703_v62 = vpop.permute.xlu0 %4702 }
 0x720   : > { %v5229_v19 = vrot.slane %v4703_v62, %v14551_v1  ;;  %v17709_v62 = vld [vmem:[#allocation104_spill] sm:$0xff] }
 0x721   : > { %v5158_v34 = vsel %vm4868_vm1, %v5157_v24, %v5153_v46  ;;  %v5219_v24 = vrot.slane %v4697_v15, %v14565_v45 }
 0x722   : > { %v14898_v29 = vpop.permute.xlu1 %4675  ;;  %v5163_v41 = vsel %vm4875_vm2, %v5162_v38, %v5158_v34 }
 0x723   : > { %v5168_v44 = vsel %vm4882_vm3, %v5167_v39, %v5163_v41  ;;  %v4721_v40 = vpop.permute.xlu0 %4720  ;;  %v5186_v47 = vrot.slane %v14898_v29, %v14581_v52 }
 0x724   : > { %v5493_v2 = vsel %vm5485_vm10, %v5168_v44, %v5492_v5  ;;  %v5257_v23 = vrot.slane %v4721_v40, %v14565_v45 }
 0x725   : > { %v5516_v20 = vsel %vm5512_vm11, %v5493_v2, -inf }
 0x726   : > { %v4670_v12 = vpop.permute.xlu1 %4669  ;;  %5517 = vmax.xlane.f32.xlu1 %v5516_v20 }
 0x727   : > { %v4715_v17 = vpop.permute.xlu0 %4714  ;;  %v5176_v57 = vrot.slane %v4670_v12, %v14554_v43 }
 0x728   : > { %v5248_v36 = vrot.slane %v4715_v17, %v14551_v1  ;;  %v5310_v17 = vsel %vm4868_vm1, %v5309_v21, %v5305_v27 }
 0x729   : > { %v5177_v7 = vsel %vm4868_vm1, %v5176_v57, %v5172_v14 }
 0x72a   : > { %v4688_v35 = vpop.permute.xlu1 %4687  ;;  %v5182_v2 = vsel %vm4875_vm2, %v5181_v48, %v5177_v7  ;;  %v17714_v48 = vld [vmem:[#allocation57_spill] sm:$0xff] }
 0x72b   : > { %v4733_v25 = vpop.permute.xlu0 %4732  ;;  %v5205_v15 = vrot.slane %v4688_v35, %v14581_v52 }
 0x72c   : > { %v5276_v5 = vrot.slane %v4733_v25, %v14565_v45  ;;  %v5187_v25 = vsel %vm4882_vm3, %v5186_v47, %v5182_v2 }
 0x72e   : > { %v4682_v4 = vpop.permute.xlu1 %4681 }
 0x72f   : > { %v5195_v22 = vrot.slane %v4682_v4, %v14554_v43  ;;  %v4727_v3 = vpop.permute.xlu0 %4726 }
 0x730   : > { %v5267_v11 = vrot.slane %v4727_v3, %v14551_v1 }
 0x731   : > { %v5196_v37 = vsel %vm4868_vm1, %v5195_v22, %v5191_v59 }
 0x732   : > { %v4700_v53 = vpop.permute.xlu1 %4699  ;;  %v5201_v39 = vsel %vm4875_vm2, %v5200_v16, %v5196_v37 }
 0x733   : > { %v4745_v38 = vpop.permute.xlu0 %4744  ;;  %v5224_v42 = vrot.slane %v4700_v53, %v14581_v52  ;;  %v5206_v54 = vsel %vm4882_vm3, %v5205_v15, %v5201_v39  ;;  %v17715_v39 = vld [vmem:[#allocation38_spill] sm:$0xff] }
 0x736   : > { %v4694_v26 = vpop.permute.xlu1 %4693 }
 0x737   : > { %v5214_v50 = vrot.slane %v4694_v26, %v14554_v43  ;;  %v4739_v12 = vpop.permute.xlu0 %4738  ;;  %v5314_v26 = vrot.slane %v17709_v62, %v14565_v45  ;;  %v17721_v62 = vld [vmem:[#allocation83_spill] sm:$0xff] }
 0x738   : > { %v5286_v22 = vrot.slane %v4739_v12, %v14551_v1 }
 0x739   : > { %v5215_v46 = vsel %vm4868_vm1, %v5214_v50, %v5210_v32  ;;  %v5494_v50 = vsel %vm5473_vm4, %v5206_v54, %v5187_v25  ;;  %v17720_v54 = vld [vmem:[#allocation79_spill] sm:$0xff] }
 0x73a   : > { %v4712_v8 = vpop.permute.xlu1 %4711  ;;  %v5220_v41 = vsel %vm4875_vm2, %v5219_v24, %v5215_v46  ;;  %v17711_v24 = vld [vmem:[#allocation30_spill] sm:$0xff] }
 0x73b   : > { %v5243_v35 = vrot.slane %v4712_v8, %v14581_v52  ;;  %v5225_v40 = vsel %vm4882_vm3, %v5224_v42, %v5220_v41  ;;  %v14991_v41 = vsub.s32 2, %v17711_v24  ;;  %v17719_v42 = vld [vmem:[#allocation78_spill] sm:$0xff] }
 0x73c   : > { %v5495_v57 = vsel %vm5475_vm5, %v5225_v40, %v5494_v50  ;;  %v17725_v50 = vld [vmem:[#allocation58_spill] sm:$0xff] }
 0x73d   : > { %17717 = vst [vmem:[#allocation157_spill] sm:$0xff] %v14991_v41 }
 0x73e   : > { %v4706_v55 = vpop.permute.xlu1 %4705 }
 0x73f   : > { %v5233_v6 = vrot.slane %v4706_v55, %v14554_v43 }
 0x741   : > { %v5234_v60 = vsel %vm4868_vm1, %v5233_v6, %v5229_v19 }
 0x742   : > { %v4724_v31 = vpop.permute.xlu1 %4723  ;;  %v5239_v20 = vsel %vm4875_vm2, %v5238_v9, %v5234_v60 }
 0x743   : > { %v5262_v55 = vrot.slane %v4724_v31, %v14581_v52  ;;  %v5244_v29 = vsel %vm4882_vm3, %v5243_v35, %v5239_v20  ;;  %v5295_v31 = vrot.slane %v4745_v38, %v14565_v45  ;;  %v17713_v38 = vld [vmem:[#allocation31_spill] sm:$0xff] }
 0x744   : > { %v5496_v32 = vsel %vm5477_vm6, %v5244_v29, %v5495_v57  ;;  %v17724_v29 = vld [vmem:[#allocation81_spill] sm:$0xff] }
 0x746   : > { %v4718_v13 = vpop.permute.xlu1 %4717 }
 0x747   : > { %v5252_v28 = vrot.slane %v4718_v13, %v14554_v43 }
 0x749   : > { %v5253_v34 = vsel %vm4868_vm1, %v5252_v28, %v5248_v36  ;;  %v17710_v28 = vld [vmem:[#allocation122_spill] sm:$0xff] }
 0x74a   : > { %v4736_v18 = vpop.permute.xlu1 %4735  ;;  %v5258_v4 = vsel %vm4875_vm2, %v5257_v23, %v5253_v34  ;;  %v5319_v58 = vrot.slane %v17710_v28, %v14581_v52  ;;  %v17716_v23 = vld [vmem:[#allocation54_spill] sm:$0xff] }
 0x74b   : > { %v5281_v13 = vrot.slane %v4736_v18, %v14581_v52  ;;  %v5263_v59 = vsel %vm4882_vm3, %v5262_v55, %v5258_v4  ;;  %v5315_v18 = vsel %vm4875_vm2, %v5314_v26, %v5310_v17  ;;  %v15000_v55 = vsub.s32 3, %v17711_v24 }
 0x74c   : > { %v5497_v14 = vsel %vm5479_vm7, %v5263_v59, %v5496_v32  ;;  %v17730_v32 = vld [vmem:[#allocation59_spill] sm:$0xff] }
 0x74d   : > { %17722 = vst [vmem:[#allocation151_spill] sm:$0xff] %v15000_v55 }
 0x74e   : > { %v4730_v56 = vpop.permute.xlu1 %4729 }
 0x74f   : > { %v5271_v10 = vrot.slane %v4730_v56, %v14554_v43  ;;  %v5320_v56 = vsel %vm4882_vm3, %v5319_v58, %v5315_v18  ;;  %v15015_v18 = vsub.s32 4, %v17711_v24 }
 0x751   : > { %v5272_v33 = vsel %vm4868_vm1, %v5271_v10, %v5267_v11  ;;  %v14981_v11 = vsub.s32 1, %v17711_v24  ;;  %17729 = vst [vmem:[#allocation155_spill] sm:$0xff] %v15015_v18 }
 0x752   : > { %v4748_v44 = vpop.permute.xlu1 %4747  ;;  %v5277_v53 = vsel %vm4875_vm2, %v5276_v5, %v5272_v33  ;;  %v17718_v33 = vld [vmem:[#allocation80_spill] sm:$0xff] }
 0x753   : > { %v5282_v6 = vsel %vm4882_vm3, %v5281_v13, %v5277_v53  ;;  %v5300_v61 = vrot.slane %v4748_v44, %v14581_v52  ;;  %17712 = vst [vmem:[#allocation139_spill] sm:$0xff] %v14981_v11  ;;  %v17723_v53 = vld [vmem:[#allocation43_spill] sm:$0xff] }
 0x754   : > { %v5498_v37 = vsel %vm5481_vm8, %v5282_v6, %v5497_v14  ;;  %v17728_v6 = vld [vmem:[#allocation66_spill] sm:$0xff] }
 0x756   : > { %v4742_v8 = vpop.permute.xlu1 %4741 }
 0x757   : > { %v5290_v3 = vrot.slane %v4742_v8, %v14554_v43 }
 0x759   : > { %v5291_v27 = vsel %vm4868_vm1, %v5290_v3, %v5286_v22 }
 0x75a   : > { %v5296_v21 = vsel %vm4875_vm2, %v5295_v31, %v5291_v27 }
 0x75b   : > { %v5301_v19 = vsel %vm4882_vm3, %v5300_v61, %v5296_v21 }
 0x75c   : > { %v5499_v16 = vsel %vm5483_vm9, %v5301_v19, %v5498_v37  ;;  %v17733_v19 = vld [vmem:[#allocation75_spill] sm:$0xff] }
 0x75d   : > { %v5500_v36 = vsel %vm5485_vm10, %v5320_v56, %v5499_v16 }
 0x75e   : > { %v5519_v46 = vsel %vm5512_vm11, %v5500_v36, -inf  ;;  %v17734_v36 = vld [vmem:[#allocation44_spill] sm:$0xff] }
 0x75f   : > { %5520 = vmax.xlane.f32.xlu0 %v5519_v46 }
 0x763   : > { %v14978_v10 = vpop.xlane.xlu0 %5514 }
 0x764   : > { %v5532_v7 = vrot.slane %v14978_v10, %v17713_v38  ;;  %v5536_v60 = vrot.slane %v14978_v10, %v14981_v11  ;;  %v5540_v47 = vrot.slane %v14978_v10, %v14991_v41  ;;  %v5544_v22 = vrot.slane %v14978_v10, %v15000_v55 }
 0x765   : > { %v5548_v16 = vrot.slane %v14978_v10, %v15015_v18 }
 0x766   : > { %v5689_v9 = vsub.f32 %v17714_v48, %v5532_v7  ;;  %v5690_v34 = vsub.f32 %v17715_v39, %v5532_v7  ;;  %v5691_v15 = vsub.f32 %v17716_v23, %v5532_v7  ;;  %v5693_v44 = vsub.f32 %v17718_v33, %v5536_v60 }
 0x767   : > { %v5692_v20 = vsub.f32 %v17719_v42, %v5532_v7  ;;  %v5695_v35 = vsub.f32 %v17720_v54, %v5536_v60  ;;  %v5694_v26 = vsub.f32 %v17721_v62, %v5536_v60  ;;  %v5697_v17 = vsub.f32 %v17723_v53, %v5540_v47  ;;  %v17742_v42 = vld [vmem:[#allocation93_spill] sm:$0xff]  ;;  %v17743_v54 = vld [vmem:[#allocation84_spill] sm:$0xff] }
 0x768   : > { %v5817_v5 = vmul.f32 1.442695, %v5689_v9  ;;  %v5819_v2 = vmul.f32 1.442695, %v5690_v34  ;;  %v5821_v12 = vmul.f32 1.442695, %v5691_v15  ;;  %v5696_v13 = vsub.f32 %v17724_v29, %v5536_v60 }
 0x769   : > { %v5825_v4 = vmul.f32 1.442695, %v5693_v44  ;;  %v5823_v40 = vmul.f32 1.442695, %v5692_v20  ;;  %v5829_v25 = vmul.f32 1.442695, %v5695_v35  ;;  %v5699_v59 = vsub.f32 %v17725_v50, %v5540_v47 }
 0x76a   : > { %10746 = vpow2.f32 %v5817_v5  ;;  %v5827_v8 = vmul.f32 1.442695, %v5694_v26  ;;  %v5833_v3 = vmul.f32 1.442695, %v5697_v17  ;;  %v5698_v61 = vsub.f32 %v17728_v6, %v5540_v47  ;;  %v17737_v9 = vld [vmem:[#allocation95_spill] sm:$0xff]  ;;  %v17739_v15 = vld [vmem:[#allocation85_spill] sm:$0xff] }
 0x76b   : > { %10748 = vpow2.f32 %v5819_v2  ;;  %v5831_v27 = vmul.f32 1.442695, %v5696_v13  ;;  %v5701_v28 = vsub.f32 %v17730_v32, %v5544_v22  ;;  %v5837_v58 = vmul.f32 1.442695, %v5699_v59  ;;  %v17748_v29 = vld [vmem:[#allocation97_spill] sm:$0xff]  ;;  %v17751_v59 = vld [vmem:[#allocation130_spill] sm:$0xff] }
 0x76c   : > { %10750 = vpow2.f32 %v5821_v12  ;;  %v5700_v37 = vsub.f32 %v17733_v19, %v5540_v47  ;;  %v5835_v56 = vmul.f32 1.442695, %v5698_v61  ;;  %v5703_v46 = vsub.f32 %v17734_v36, %v5544_v22 }
 0x76d   : > { %10752 = vpow2.f32 %v5825_v4  ;;  %v5841_v7 = vmul.f32 1.442695, %v5701_v28  ;;  %v5702_v39 = vsub.f32 %v17737_v9, %v5544_v22  ;;  %v15036_v23 = vsub.s32 5, %v17711_v24 }
 0x76e   : > { %10754 = vpow2.f32 %v5823_v40  ;;  %v5839_v34 = vmul.f32 1.442695, %v5700_v37  ;;  %v5705_v33 = vsub.f32 %v17739_v15, %v5548_v16  ;;  %v5845_v44 = vmul.f32 1.442695, %v5703_v46  ;;  %v17746_v40 = vld [vmem:[#allocation132_spill] sm:$0xff]  ;;  %v17755_v37 = vld [vmem:[#allocation141_spill] sm:$0xff] }
 0x76f   : > { %10756 = vpow2.f32 %v5829_v25  ;;  %17738 = vst [vmem:[#allocation175_spill] sm:$0xff] %v15036_v23  ;;  %v5704_v20 = vsub.f32 %v17742_v42, %v5544_v22  ;;  %v5843_v12 = vmul.f32 1.442695, %v5702_v39  ;;  %v5552_v47 = vrot.slane %v14978_v10, %v15036_v23  ;;  %v17757_v46 = vld [vmem:[#allocation101_spill] sm:$0xff]  ;;  %v17760_v15 = vld [vmem:[#allocation138_spill] sm:$0xff]  ;;  %v17761_v42 = vld [vmem:[#allocation100_spill] sm:$0xff] }
 0x770   : > { %10758 = vpow2.f32 %v5827_v8  ;;  %v5707_v35 = vsub.f32 %v17743_v54, %v5548_v16  ;;  %v5849_v4 = vmul.f32 1.442695, %v5705_v33  ;;  %v5706_v53 = vsub.f32 %v17746_v40, %v5548_v16 }
 0x771   : > { %10760 = vpow2.f32 %v5833_v3  ;;  %v5847_v17 = vmul.f32 1.442695, %v5704_v20  ;;  %v15057_v25 = vsub.s32 6, %v17711_v24  ;;  %v5709_v13 = vsub.f32 %v17748_v29, %v5552_v47 }
 0x772   : > { %10762 = vpow2.f32 %v5831_v27  ;;  %v5853_v8 = vmul.f32 1.442695, %v5707_v35  ;;  %v5708_v3 = vsub.f32 %v17751_v59, %v5548_v16  ;;  %v5851_v6 = vmul.f32 1.442695, %v5706_v53  ;;  %v17752_v27 = vld [vmem:[#allocation96_spill] sm:$0xff]  ;;  %v17765_v53 = vld [vmem:[#allocation106_spill] sm:$0xff] }
 0x773   : > { %10764 = vpow2.f32 %v5837_v58  ;;  %17747 = vst [vmem:[#allocation177_spill] sm:$0xff] %v15057_v25  ;;  %v5556_v61 = vrot.slane %v14978_v10, %v15057_v25  ;;  %v5711_v32 = vsub.f32 %v17752_v27, %v5552_v47  ;;  %v5857_v28 = vmul.f32 1.442695, %v5709_v13  ;;  %v17768_v59 = vld [vmem:[#allocation60_spill] sm:$0xff]  ;;  %v17769_v27 = vld [vmem:[#allocation105_spill] sm:$0xff] }
 0x774   : > { %v15007_v31 = vpop.eup %10746  ;;  %10766 = vpow2.f32 %v5835_v56  ;;  %v5710_v56 = vsub.f32 %v17755_v37, %v5552_v47  ;;  %v5855_v16 = vmul.f32 1.442695, %v5708_v3  ;;  %v15078_v36 = vsub.s32 7, %v17711_v24 }
 0x775   : > { %17726 = vst [vmem:[#allocation163_spill] sm:$0xff] %v15007_v31  ;;  %v15009_v57 = vpop.eup %10748  ;;  %6202 = vperm.xlu1 %10417, %v15007_v31   ;;  %10768 = vpow2.f32 %v5841_v7  ;;  %v5713_v7 = vsub.f32 %v17757_v46, %v5556_v61  ;;  %v5861_v9 = vmul.f32 1.442695, %v5711_v32  ;;  %v5712_v33 = vsub.f32 %v17760_v15, %v5552_v47  ;;  %v17772_v46 = vld [vmem:[#allocation64_spill] sm:$0xff] }
 0x776   : > { %17727 = vst [vmem:[#allocation149_spill] sm:$0xff] %v15009_v57  ;;  %6205 = vperm.xlu0 %10416, %v15009_v57   ;;  %v15018_v21 = vpop.eup %10750  ;;  %10770 = vpow2.f32 %v5839_v34  ;;  %17756 = vst [vmem:[#allocation30_spill] sm:$0xff] %v15078_v36  ;;  %v5560_v24 = vrot.slane %v14978_v10, %v15078_v36  ;;  %v5715_v20 = vsub.f32 %v17761_v42, %v5556_v61 }
 0x777   : > { %17731 = vst [vmem:[#allocation156_spill] sm:$0xff] %v15018_v21  ;;  %v15020_v14 = vpop.eup %10752  ;;  %10772 = vpow2.f32 %v5845_v44  ;;  %v5859_v44 = vmul.f32 1.442695, %v5710_v56  ;;  %v5863_v47 = vmul.f32 1.442695, %v5712_v33  ;;  %v5716_v3 = vsub.f32 %v17768_v59, %v5556_v61  ;;  %v17773_v33 = vld [vmem:[#allocation39_spill] sm:$0xff] }
 0x778   : > { %17732 = vst [vmem:[#allocation158_spill] sm:$0xff] %v15020_v14  ;;  %v15028_v60 = vpop.eup %10754  ;;  %10774 = vpow2.f32 %v5843_v12  ;;  %v5865_v12 = vmul.f32 1.442695, %v5713_v7  ;;  %v5869_v10 = vmul.f32 1.442695, %v5715_v20  ;;  %v5719_v32 = vsub.f32 %v17769_v27, %v5560_v24 }
 0x779   : > { %6208 = vperm.xlu1 %10417, %v15018_v21   ;;  %17735 = vst [vmem:[#allocation159_spill] sm:$0xff] %v15028_v60  ;;  %v15030_v48 = vpop.eup %10756  ;;  %10776 = vpow2.f32 %v5849_v4  ;;  %v17764_v4 = vld [vmem:[#allocation45_spill] sm:$0xff]  ;;  %v5718_v7 = vsub.f32 %v17772_v46, %v5560_v24 }
 0x77a   : > { %6214 = vperm.xlu0 %10416, %v15020_v14   ;;  %17736 = vst [vmem:[#allocation167_spill] sm:$0xff] %v15030_v48  ;;  %v15039_v5 = vpop.eup %10758  ;;  %10778 = vpow2.f32 %v5847_v17  ;;  %v5714_v40 = vsub.f32 %v17764_v4, %v5556_v61  ;;  %v5717_v17 = vsub.f32 %v17765_v53, %v5560_v24  ;;  %v5871_v61 = vmul.f32 1.442695, %v5716_v3 }
 0x77b   : > { %17740 = vst [vmem:[#allocation174_spill] sm:$0xff] %v15039_v5  ;;  %v15041_v2 = vpop.eup %10760  ;;  %10780 = vpow2.f32 %v5853_v8  ;;  %v15101_v13 = vpop.xlane.xlu0 %5523 }
 0x77c   : > { %17741 = vst [vmem:[#allocation171_spill] sm:$0xff] %v15041_v2  ;;  %v15049_v62 = vpop.eup %10762  ;;  %10782 = vpow2.f32 %v5851_v6  ;;  %v5867_v6 = vmul.f32 1.442695, %v5714_v40  ;;  %v5628_v37 = vrot.slane %v15101_v13, %v17713_v38  ;;  %v15120_v15 = vrot.slane %v15101_v13, %v14981_v11 }
 0x77d   : > { %6211 = vperm.xlu1 %10417, %v15028_v60   ;;  %17744 = vst [vmem:[#allocation165_spill] sm:$0xff] %v15049_v62  ;;  %v15051_v26 = vpop.eup %10764  ;;  %10784 = vpow2.f32 %v5857_v28  ;;  %v5873_v28 = vmul.f32 1.442695, %v5717_v17  ;;  %v5875_v40 = vmul.f32 1.442695, %v5718_v7 }
 0x77e   : > { %6220 = vperm.xlu0 %10416, %v15030_v48   ;;  %17745 = vst [vmem:[#allocation169_spill] sm:$0xff] %v15051_v26  ;;  %v15060_v22 = vpop.eup %10766  ;;  %10786 = vpow2.f32 %v5855_v16 }
 0x77f   : > { %17749 = vst [vmem:[#allocation107_spill] sm:$0xff] %v15060_v22  ;;  %v15062_v50 = vpop.eup %10768  ;;  %10788 = vpow2.f32 %v5861_v9  ;;  %v5877_v9 = vmul.f32 1.442695, %v5719_v32  ;;  %v17781_v32 = vld [vmem:[#allocation62_spill] sm:$0xff] }
 0x780   : > { %17750 = vst [vmem:[#allocation125_spill] sm:$0xff] %v15062_v50  ;;  %v15070_v58 = vpop.eup %10770  ;;  %10790 = vpow2.f32 %v5859_v44  ;;  %v5785_v44 = vsub.f32 %v17773_v33, %v5628_v37 }
 0x781   : > { %6217 = vperm.xlu1 %10417, %v15039_v5   ;;  %17753 = vst [vmem:[#allocation104_spill] sm:$0xff] %v15070_v58  ;;  %v15072_v19 = vpop.eup %10772  ;;  %10792 = vpow2.f32 %v5865_v12  ;;  %v17776_v12 = vld [vmem:[#allocation47_spill] sm:$0xff] }
 0x782   : > { %6226 = vperm.xlu0 %10416, %v15041_v2   ;;  %17754 = vst [vmem:[#allocation122_spill] sm:$0xff] %v15072_v19  ;;  %v15081_v39 = vpop.eup %10774  ;;  %10794 = vpow2.f32 %v5863_v47  ;;  %v5720_v4 = vsub.f32 %v17776_v12, %v5560_v24  ;;  %v17777_v47 = vld [vmem:[#allocation67_spill] sm:$0xff]  ;;  %v6009_v17 = vmul.f32 1.442695, %v5785_v44  ;;  %v15141_v24 = vrot.slane %v15101_v13, %v14991_v41  ;;  %v17785_v12 = vld [vmem:[#allocation128_spill] sm:$0xff] }
 0x783   : > { %17758 = vst [vmem:[#allocation57_spill] sm:$0xff] %v15081_v39  ;;  %v15083_v34 = vpop.eup %10776  ;;  %10796 = vpow2.f32 %v5869_v10  ;;  %v5789_v53 = vsub.f32 %v17777_v47, %v15120_v15 }
 0x784   : > { %17759 = vst [vmem:[#allocation38_spill] sm:$0xff] %v15083_v34  ;;  %v15091_v54 = vpop.eup %10778  ;;  %10798 = vpow2.f32 %v5867_v6  ;;  %v5879_v3 = vmul.f32 1.442695, %v5720_v4  ;;  %v17780_v6 = vld [vmem:[#allocation74_spill] sm:$0xff]  ;;  %v5794_v4 = vsub.f32 %v17785_v12, %v15141_v24 }
 0x785   : > { %6223 = vperm.xlu1 %10417, %v15049_v62   ;;  %17762 = vst [vmem:[#allocation54_spill] sm:$0xff] %v15091_v54  ;;  %v15093_v35 = vpop.eup %10780  ;;  %10800 = vpow2.f32 %v5873_v28  ;;  %v5786_v27 = vsub.f32 %v17780_v6, %v5628_v37  ;;  %v5791_v28 = vsub.f32 %v17781_v32, %v15120_v15  ;;  %v6017_v46 = vmul.f32 1.442695, %v5789_v53 }
 0x786   : > { %6232 = vperm.xlu0 %10416, %v15051_v26   ;;  %17763 = vst [vmem:[#allocation80_spill] sm:$0xff] %v15093_v35  ;;  %v15099_v29 = vpop.eup %10782  ;;  %10802 = vpow2.f32 %v5871_v61 }
 0x787   : > { %17766 = vst [vmem:[#allocation78_spill] sm:$0xff] %v15099_v29  ;;  %v15103_v8 = vpop.eup %10784  ;;  %10804 = vpow2.f32 %v5877_v9  ;;  %v17784_v9 = vld [vmem:[#allocation73_spill] sm:$0xff]  ;;  %v6011_v44 = vmul.f32 1.442695, %v5786_v27  ;;  %v17789_v27 = vld [vmem:[#allocation63_spill] sm:$0xff] }
 0x788   : > { %17767 = vst [vmem:[#allocation79_spill] sm:$0xff] %v15103_v8  ;;  %v15111_v56 = vpop.eup %10786  ;;  %10806 = vpow2.f32 %v5875_v40  ;;  %v5790_v33 = vsub.f32 %v17784_v9, %v15120_v15  ;;  %v6021_v40 = vmul.f32 1.442695, %v5791_v28  ;;  %v5788_v32 = vsub.f32 %v17789_v27, %v5628_v37  ;;  %v17792_v28 = vld [vmem:[#allocation50_spill] sm:$0xff]  ;;  %v17796_v27 = vld [vmem:[#allocation87_spill] sm:$0xff] }
 0x789   : > { %6229 = vperm.xlu1 %10417, %v15060_v22   ;;  %17770 = vst [vmem:[#allocation83_spill] sm:$0xff] %v15111_v56  ;;  %v15113_v16 = vpop.eup %10788  ;;  %10808 = vpow2.f32 %v6009_v17  ;;  %v17788_v17 = vld [vmem:[#allocation55_spill] sm:$0xff]  ;;  %v6027_v9 = vmul.f32 1.442695, %v5794_v4  ;;  %v5793_v12 = vsub.f32 %v17792_v28, %v15141_v24  ;;  %v17797_v28 = vld [vmem:[#allocation136_spill] sm:$0xff] }
 0x78a   : > { %6238 = vperm.xlu0 %10416, %v15062_v50   ;;  %17771 = vst [vmem:[#allocation43_spill] sm:$0xff] %v15113_v16  ;;  %v15123_v42 = vpop.eup %10790  ;;  %10810 = vpow2.f32 %v5879_v3  ;;  %v5787_v6 = vsub.f32 %v17788_v17, %v5628_v37  ;;  %v6019_v3 = vmul.f32 1.442695, %v5790_v33  ;;  %v5640_v33 = vrot.slane %v15101_v13, %v15000_v55  ;;  %v17793_v37 = vld [vmem:[#allocation52_spill] sm:$0xff] }
 0x78b   : > { %17774 = vst [vmem:[#allocation81_spill] sm:$0xff] %v15123_v42  ;;  %v15125_v20 = vpop.eup %10792  ;;  %10812 = vpow2.f32 %v6017_v46  ;;  %v6015_v4 = vmul.f32 1.442695, %v5788_v32 }
 0x78c   : > { %17775 = vst [vmem:[#allocation58_spill] sm:$0xff] %v15125_v20  ;;  %v15132_v10 = vpop.eup %10794  ;;  %10814 = vpow2.f32 %v6011_v44  ;;  %v5795_v44 = vsub.f32 %v17793_v37, %v15141_v24 }
 0x78d   : > { %6235 = vperm.xlu1 %10417, %v15070_v58   ;;  %17778 = vst [vmem:[#allocation66_spill] sm:$0xff] %v15132_v10  ;;  %v15134_v59 = vpop.eup %10796  ;;  %10816 = vpow2.f32 %v6021_v40 }
 0x78e   : > { %6244 = vperm.xlu0 %10416, %v15072_v19   ;;  %17779 = vst [vmem:[#allocation59_spill] sm:$0xff] %v15134_v59  ;;  %v15145_v7 = vpop.eup %10798  ;;  %10818 = vpow2.f32 %v6019_v3  ;;  %v6025_v3 = vmul.f32 1.442695, %v5793_v12 }
 0x78f   : > { %17782 = vst [vmem:[#allocation75_spill] sm:$0xff] %v15145_v7  ;;  %v15147_v61 = vpop.eup %10800  ;;  %10820 = vpow2.f32 %v6027_v9  ;;  %v17800_v9 = vld [vmem:[#allocation94_spill] sm:$0xff] }
 0x790   : > { %17783 = vst [vmem:[#allocation44_spill] sm:$0xff] %v15147_v61  ;;  %v15155_v47 = vpop.eup %10802 }
 0x791   : > { %6241 = vperm.xlu1 %10417, %v15081_v39   ;;  %17786 = vst [vmem:[#allocation95_spill] sm:$0xff] %v15155_v47  ;;  %v15157_v53 = vpop.eup %10804 }
 0x792   : > { %6250 = vperm.xlu0 %10416, %v15083_v34   ;;  %17787 = vst [vmem:[#allocation85_spill] sm:$0xff] %v15157_v53 }
 0x795   : > { %6247 = vperm.xlu1 %10417, %v15091_v54  }
 0x796   : > { %6256 = vperm.xlu0 %10416, %v15093_v35  }
 0x799   : > { %6253 = vperm.xlu1 %10417, %v15099_v29  }
 0x79a   : > { %6262 = vperm.xlu0 %10416, %v15103_v8  }
 0x79d   : > { %6259 = vperm.xlu1 %10417, %v15111_v56  }
 0x79e   : > { %6268 = vperm.xlu0 %10416, %v15113_v16  }
 0x7a1   : > { %6265 = vperm.xlu1 %10417, %v15123_v42  }
 0x7a2   : > { %6274 = vperm.xlu0 %10416, %v15125_v20  }
 0x7a5   : > { %6271 = vperm.xlu1 %10417, %v15132_v10  }
 0x7a6   : > { %6280 = vperm.xlu0 %10416, %v15134_v59   ;;  %v15163_v59 = vpop.eup %10806 }
 0x7a7   : > { %17790 = vst [vmem:[#allocation93_spill] sm:$0xff] %v15163_v59  ;;  %v15165_v46 = vpop.eup %10808 }
 0x7a8   : > { %17791 = vst [vmem:[#allocation84_spill] sm:$0xff] %v15165_v46  ;;  %v15175_v40 = vpop.eup %10810 }
 0x7a9   : > { %6277 = vperm.xlu1 %10417, %v15145_v7   ;;  %17794 = vst [vmem:[#allocation132_spill] sm:$0xff] %v15175_v40  ;;  %v15177_v17 = vpop.eup %10812 }
 0x7aa   : > { %6286 = vperm.xlu0 %10416, %v15147_v61   ;;  %17795 = vst [vmem:[#allocation97_spill] sm:$0xff] %v15177_v17  ;;  %v15184_v37 = vpop.eup %10814 }
 0x7ab   : > { %17798 = vst [vmem:[#allocation130_spill] sm:$0xff] %v15184_v37  ;;  %v15186_v32 = vpop.eup %10816 }
 0x7ac   : > { %17799 = vst [vmem:[#allocation96_spill] sm:$0xff] %v15186_v32 }
 0x7ad   : > { %6283 = vperm.xlu1 %10417, %v15155_v47   ;;  %v6013_v47 = vmul.f32 1.442695, %v5787_v6  ;;  %v5792_v6 = vsub.f32 %v17796_v27, %v15120_v15  ;;  %v5644_v15 = vrot.slane %v15101_v13, %v15015_v18 }
 0x7ae   : > { %6292 = vperm.xlu0 %10416, %v15157_v53   ;;  %v6029_v53 = vmul.f32 1.442695, %v5795_v44  ;;  %v15194_v44 = vpop.eup %10818 }
 0x7af   : > { %10822 = vpow2.f32 %v6013_v47  ;;  %v17801_v47 = vld [vmem:[#allocation92_spill] sm:$0xff]  ;;  %17802 = vst [vmem:[#allocation141_spill] sm:$0xff] %v15194_v44  ;;  %v15196_v27 = vpop.eup %10820 }
 0x7b0   : > { %10824 = vpow2.f32 %v6015_v4  ;;  %v5799_v12 = vsub.f32 %v17801_v47, %v5640_v33  ;;  %17803 = vst [vmem:[#allocation101_spill] sm:$0xff] %v15196_v27 }
 0x7b1   : > { %6289 = vperm.xlu1 %10417, %v15163_v59   ;;  %v5797_v59 = vsub.f32 %v17800_v9, %v5640_v33  ;;  %10826 = vpow2.f32 %v6025_v3  ;;  %v17805_v3 = vld [vmem:[#allocation40_spill] sm:$0xff] }
 0x7b2   : > { %6490 = vperm.xlu0 %10416, %v15165_v46   ;;  %v5798_v46 = vsub.f32 %v17797_v28, %v5640_v33  ;;  %10828 = vpow2.f32 %v6029_v53  ;;  %v17804_v28 = vld [vmem:[#allocation111_spill] sm:$0xff] }
 0x7b3   : > { %v5796_v9 = vsub.f32 %v17804_v28, %v15141_v24  ;;  %v17809_v24 = vld [vmem:[#allocation98_spill] sm:$0xff] }
 0x7b4   : > { %v6035_v4 = vmul.f32 1.442695, %v5798_v46  ;;  %v17808_v46 = vld [vmem:[#allocation99_spill] sm:$0xff] }
 0x7b5   : > { %6295 = vperm.xlu1 %10417, %v15175_v40   ;;  %v6023_v40 = vmul.f32 1.442695, %v5792_v6  ;;  %v6033_v6 = vmul.f32 1.442695, %v5797_v59  ;;  %v5648_v59 = vrot.slane %v15101_v13, %v15036_v23 }
 0x7b6   : > { %6502 = vperm.xlu0 %10416, %v15177_v17   ;;  %v6037_v17 = vmul.f32 1.442695, %v5799_v12 }
 0x7b7   : > { %10830 = vpow2.f32 %v6023_v40  ;;  %v5803_v40 = vsub.f32 %v17809_v24, %v5644_v15 }
 0x7b8   : > { %10832 = vpow2.f32 %v6035_v4 }
 0x7b9   : > { %6493 = vperm.xlu1 %10417, %v15184_v37   ;;  %v15203_v47 = vpop.eup %10822  ;;  %v5801_v37 = vsub.f32 %v17808_v46, %v5644_v15  ;;  %10834 = vpow2.f32 %v6033_v6  ;;  %v17813_v6 = vld [vmem:[#allocation42_spill] sm:$0xff] }
 0x7ba   : > { %6508 = vperm.xlu0 %10416, %v15186_v32   ;;  %v5802_v32 = vsub.f32 %v17805_v3, %v5644_v15  ;;  %17806 = vst [vmem:[#allocation138_spill] sm:$0xff] %v15203_v47  ;;  %v15205_v53 = vpop.eup %10824  ;;  %10836 = vpow2.f32 %v6037_v17  ;;  %v17812_v3 = vld [vmem:[#allocation134_spill] sm:$0xff]  ;;  %v5806_v46 = vsub.f32 %v17813_v6, %v5648_v59  ;;  %v17820_v6 = vld [vmem:[#allocation143_spill] sm:$0xff] }
 0x7bb   : > { %17807 = vst [vmem:[#allocation100_spill] sm:$0xff] %v15205_v53  ;;  %v15213_v12 = vpop.eup %10826 }
 0x7bc   : > { %v6043_v4 = vmul.f32 1.442695, %v5802_v32  ;;  %17810 = vst [vmem:[#allocation45_spill] sm:$0xff] %v15213_v12  ;;  %v15215_v28 = vpop.eup %10828  ;;  %v17816_v32 = vld [vmem:[#allocation103_spill] sm:$0xff] }
 0x7bd   : > { %6505 = vperm.xlu1 %10417, %v15194_v44   ;;  %v6031_v44 = vmul.f32 1.442695, %v5796_v9  ;;  %17811 = vst [vmem:[#allocation106_spill] sm:$0xff] %v15215_v28  ;;  %v6041_v9 = vmul.f32 1.442695, %v5801_v37  ;;  %v5805_v24 = vsub.f32 %v17816_v32, %v5648_v59  ;;  %v17817_v37 = vld [vmem:[#allocation102_spill] sm:$0xff] }
 0x7be   : > { %6517 = vperm.xlu0 %10416, %v15196_v27   ;;  %v5800_v27 = vsub.f32 %v17812_v3, %v5640_v33  ;;  %v5652_v33 = vrot.slane %v15101_v13, %v15057_v25 }
 0x7bf   : > { %10838 = vpow2.f32 %v6031_v44  ;;  %v5807_v44 = vsub.f32 %v17817_v37, %v5648_v59 }
 0x7c0   : > { %10840 = vpow2.f32 %v6043_v4  ;;  %v6039_v61 = vmul.f32 1.442695, %v5800_v27  ;;  %v6051_v4 = vmul.f32 1.442695, %v5806_v46  ;;  %v6049_v27 = vmul.f32 1.442695, %v5805_v24 }
 0x7c1   : > { %6496 = vperm.xlu1 %10417, %v15203_v47   ;;  %v15221_v47 = vpop.eup %10830  ;;  %10842 = vpow2.f32 %v6041_v9  ;;  %v17821_v9 = vld [vmem:[#allocation69_spill] sm:$0xff] }
 0x7c2   : > { %6499 = vperm.xlu0 %10416, %v15205_v53   ;;  %v6045_v53 = vmul.f32 1.442695, %v5803_v40  ;;  %17814 = vst [vmem:[#allocation60_spill] sm:$0xff] %v15221_v47  ;;  %v15223_v17 = vpop.eup %10832  ;;  %v5810_v32 = vsub.f32 %v17821_v9, %v5652_v33  ;;  %v17824_v46 = vld [vmem:[#allocation109_spill] sm:$0xff] }
 0x7c3   : > { %17815 = vst [vmem:[#allocation105_spill] sm:$0xff] %v15223_v17  ;;  %v15231_v40 = vpop.eup %10834  ;;  %v5809_v37 = vsub.f32 %v17824_v46, %v5652_v33  ;;  %v17828_v9 = vld [vmem:[#allocation65_spill] sm:$0xff] }
 0x7c4   : > { %10844 = vpow2.f32 %v6045_v53  ;;  %17818 = vst [vmem:[#allocation64_spill] sm:$0xff] %v15231_v40  ;;  %v15233_v3 = vpop.eup %10836 }
 0x7c5   : > { %6514 = vperm.xlu1 %10417, %v15213_v12   ;;  %17819 = vst [vmem:[#allocation39_spill] sm:$0xff] %v15233_v3  ;;  %10846 = vpow2.f32 %v6039_v61  ;;  %v5656_v61 = vrot.slane %v15101_v13, %v15078_v36 }
 0x7c6   : > { %6520 = vperm.xlu0 %10416, %v15215_v28   ;;  %v5804_v28 = vsub.f32 %v17820_v6, %v5644_v15  ;;  %10848 = vpow2.f32 %v6051_v4  ;;  %v17825_v15 = vld [vmem:[#allocation108_spill] sm:$0xff]  ;;  %v6059_v4 = vmul.f32 1.442695, %v5810_v32 }
 0x7c7   : > { %10850 = vpow2.f32 %v6049_v27  ;;  %v5811_v24 = vsub.f32 %v17825_v15, %v5652_v33  ;;  %v17829_v27 = vld [vmem:[#allocation77_spill] sm:$0xff]  ;;  %v17832_v15 = vld [vmem:[#allocation114_spill] sm:$0xff] }
 0x7c8   : > { %v5814_v46 = vsub.f32 %v17829_v27, %v5656_v61  ;;  %v17836_v27 = vld [vmem:[#allocation113_spill] sm:$0xff] }
 0x7c9   : > { %6511 = vperm.xlu1 %10417, %v15221_v47   ;;  %v15239_v12 = vpop.eup %10838  ;;  %v6047_v47 = vmul.f32 1.442695, %v5804_v28  ;;  %v6057_v28 = vmul.f32 1.442695, %v5809_v37  ;;  %v6061_v13 = vmul.f32 1.442695, %v5811_v24 }
 0x7ca   : > { %6529 = vperm.xlu0 %10416, %v15223_v17   ;;  %v6053_v17 = vmul.f32 1.442695, %v5807_v44  ;;  %17822 = vst [vmem:[#allocation47_spill] sm:$0xff] %v15239_v12  ;;  %v15241_v53 = vpop.eup %10840  ;;  %v6067_v37 = vmul.f32 1.442695, %v5814_v46 }
 0x7cb   : > { %17823 = vst [vmem:[#allocation67_spill] sm:$0xff] %v15241_v53  ;;  %v15249_v44 = vpop.eup %10842 }
 0x7cc   : > { %10852 = vpow2.f32 %v6053_v17  ;;  %17826 = vst [vmem:[#allocation74_spill] sm:$0xff] %v15249_v44  ;;  %v15259_v17 = vpop.xlane.xlu1 %5517 }
 0x7cd   : > { %6526 = vperm.xlu1 %10417, %v15231_v40   ;;  %10854 = vpow2.f32 %v6047_v47  ;;  %v17833_v47 = vld [vmem:[#allocation49_spill] sm:$0xff]  ;;  %v5564_v24 = vrot.slane %v15259_v17, %v17713_v38 }
 0x7ce   : > { %6532 = vperm.xlu0 %10416, %v15233_v3   ;;  %v15251_v6 = vpop.eup %10844  ;;  %v5808_v3 = vsub.f32 %v17828_v9, %v5648_v59  ;;  %10856 = vpow2.f32 %v6059_v4  ;;  %v5812_v59 = vsub.f32 %v17833_v47, %v5652_v33  ;;  %v17837_v33 = vld [vmem:[#allocation112_spill] sm:$0xff]  ;;  %v17840_v47 = vld [vmem:[#allocation71_spill] sm:$0xff] }
 0x7cf   : > { %17827 = vst [vmem:[#allocation62_spill] sm:$0xff] %v15251_v6  ;;  %10858 = vpow2.f32 %v6057_v28 }
 0x7d0   : > { %v6055_v40 = vmul.f32 1.442695, %v5808_v3  ;;  %10860 = vpow2.f32 %v6061_v13  ;;  %v6063_v28 = vmul.f32 1.442695, %v5812_v59  ;;  %v5721_v13 = vsub.f32 %v17837_v33, %v5564_v24 }
 0x7d1   : > { %6523 = vperm.xlu1 %10417, %v15239_v12  }
 0x7d2   : > { %6541 = vperm.xlu0 %10416, %v15241_v53   ;;  %v15257_v53 = vpop.eup %10846  ;;  %10862 = vpow2.f32 %v6055_v40  ;;  %v5568_v40 = vrot.slane %v15259_v17, %v14981_v11 }
 0x7d3   : > { %17830 = vst [vmem:[#allocation73_spill] sm:$0xff] %v15257_v53  ;;  %v15261_v32 = vpop.eup %10848  ;;  %10864 = vpow2.f32 %v6067_v37  ;;  %v5881_v37 = vmul.f32 1.442695, %v5721_v13  ;;  %v17848_v13 = vld [vmem:[#allocation46_spill] sm:$0xff] }
 0x7d4   : > { %17831 = vst [vmem:[#allocation128_spill] sm:$0xff] %v15261_v32  ;;  %v15269_v4 = vpop.eup %10850 }
 0x7d5   : > { %6538 = vperm.xlu1 %10417, %v15249_v44   ;;  %v5813_v44 = vsub.f32 %v17832_v15, %v5656_v61  ;;  %17834 = vst [vmem:[#allocation55_spill] sm:$0xff] %v15269_v4 }
 0x7d6   : > { %6544 = vperm.xlu0 %10416, %v15251_v6   ;;  %v15271_v9 = vpop.eup %10852  ;;  %v5815_v6 = vsub.f32 %v17836_v27, %v5656_v61 }
 0x7d7   : > { %17835 = vst [vmem:[#allocation63_spill] sm:$0xff] %v15271_v9  ;;  %v6065_v3 = vmul.f32 1.442695, %v5813_v44  ;;  %v15277_v46 = vpop.eup %10854  ;;  %v17841_v44 = vld [vmem:[#allocation110_spill] sm:$0xff] }
 0x7d8   : > { %17838 = vst [vmem:[#allocation50_spill] sm:$0xff] %v15277_v46  ;;  %v15279_v15 = vpop.eup %10856  ;;  %v5723_v59 = vsub.f32 %v17841_v44, %v5564_v24 }
 0x7d9   : > { %6535 = vperm.xlu1 %10417, %v15257_v53   ;;  %17839 = vst [vmem:[#allocation52_spill] sm:$0xff] %v15279_v15  ;;  %10866 = vpow2.f32 %v6065_v3  ;;  %v15287_v27 = vpop.eup %10858 }
 0x7da   : > { %6553 = vperm.xlu0 %10416, %v15261_v32   ;;  %v5816_v32 = vsub.f32 %v17840_v47, %v5656_v61  ;;  %10868 = vpow2.f32 %v6063_v28  ;;  %17842 = vst [vmem:[#allocation87_spill] sm:$0xff] %v15287_v27  ;;  %v15289_v33 = vpop.eup %10860  ;;  %v17844_v61 = vld [vmem:[#allocation51_spill] sm:$0xff]  ;;  %v5885_v47 = vmul.f32 1.442695, %v5723_v59 }
 0x7db   : > { %17843 = vst [vmem:[#allocation136_spill] sm:$0xff] %v15289_v33  ;;  %v5722_v3 = vsub.f32 %v17844_v61, %v5564_v24 }
 0x7dd   : > { %6550 = vperm.xlu1 %10417, %v15269_v4   ;;  %v6069_v4 = vmul.f32 1.442695, %v5815_v6  ;;  %v17845_v6 = vld [vmem:[#allocation116_spill] sm:$0xff] }
 0x7de   : > { %6556 = vperm.xlu0 %10416, %v15271_v9   ;;  %v6071_v9 = vmul.f32 1.442695, %v5816_v32  ;;  %v5725_v28 = vsub.f32 %v17845_v6, %v5568_v40  ;;  %v15304_v32 = vrot.slane %v15259_v17, %v14991_v41 }
 0x7df   : > { %10870 = vpow2.f32 %v6069_v4  ;;  %v17849_v4 = vld [vmem:[#allocation115_spill] sm:$0xff] }
 0x7e0   : > { %10872 = vpow2.f32 %v5881_v37  ;;  %v5727_v61 = vsub.f32 %v17849_v4, %v5568_v40  ;;  %v5889_v59 = vmul.f32 1.442695, %v5725_v28 }
 0x7e1   : > { %6547 = vperm.xlu1 %10417, %v15277_v46   ;;  %10874 = vpow2.f32 %v6071_v9  ;;  %v5724_v46 = vsub.f32 %v17848_v13, %v5564_v24  ;;  %v17852_v9 = vld [vmem:[#allocation68_spill] sm:$0xff] }
 0x7e2   : > { %6565 = vperm.xlu0 %10416, %v15279_v15   ;;  %v15295_v15 = vpop.eup %10862  ;;  %10876 = vpow2.f32 %v5885_v47 }
 0x7e3   : > { %17846 = vst [vmem:[#allocation94_spill] sm:$0xff] %v15295_v15  ;;  %v15297_v44 = vpop.eup %10864  ;;  %v5887_v24 = vmul.f32 1.442695, %v5724_v46  ;;  %v15327_v46 = vrot.slane %v15259_v17, %v15000_v55 }
 0x7e4   : > { %17847 = vst [vmem:[#allocation92_spill] sm:$0xff] %v15297_v44  ;;  %v15307_v37 = vpop.eup %10866 }
 0x7e5   : > { %6562 = vperm.xlu1 %10417, %v15287_v27   ;;  %v5883_v27 = vmul.f32 1.442695, %v5722_v3  ;;  %17850 = vst [vmem:[#allocation111_spill] sm:$0xff] %v15307_v37  ;;  %v15309_v6 = vpop.eup %10868  ;;  %v17853_v3 = vld [vmem:[#allocation118_spill] sm:$0xff] }
 0x7e6   : > { %6568 = vperm.xlu0 %10416, %v15289_v33   ;;  %17851 = vst [vmem:[#allocation40_spill] sm:$0xff] %v15309_v6  ;;  %v5726_v33 = vsub.f32 %v17852_v9, %v5568_v40  ;;  %v5729_v13 = vsub.f32 %v17853_v3, %v15304_v32 }
 0x7e7   : > { %10878 = vpow2.f32 %v5883_v27 }
 0x7e8   : > { %10880 = vpow2.f32 %v5889_v59  ;;  %v5891_v27 = vmul.f32 1.442695, %v5726_v33  ;;  %v5897_v9 = vmul.f32 1.442695, %v5729_v13  ;;  %v17860_v33 = vld [vmem:[#allocation72_spill] sm:$0xff] }
 0x7e9   : > { %6559 = vperm.xlu1 %10417, %v15295_v15   ;;  %v15316_v4 = vpop.eup %10870  ;;  %10882 = vpow2.f32 %v5887_v24 }
 0x7ea   : > { %6577 = vperm.xlu0 %10416, %v15297_v44   ;;  %v5893_v44 = vmul.f32 1.442695, %v5727_v61  ;;  %17854 = vst [vmem:[#allocation99_spill] sm:$0xff] %v15316_v4  ;;  %v15318_v28 = vpop.eup %10872  ;;  %v17857_v61 = vld [vmem:[#allocation117_spill] sm:$0xff] }
 0x7eb   : > { %17855 = vst [vmem:[#allocation98_spill] sm:$0xff] %v15318_v28  ;;  %v5731_v59 = vsub.f32 %v17857_v61, %v15304_v32  ;;  %v15331_v3 = vpop.eup %10874 }
 0x7ec   : > { %v15320_v47 = vpop.xlane.xlu0 %5520  ;;  %10884 = vpow2.f32 %v5893_v44  ;;  %17858 = vst [vmem:[#allocation134_spill] sm:$0xff] %v15331_v3  ;;  %v17861_v44 = vld [vmem:[#allocation86_spill] sm:$0xff] }
 0x7ed   : > { %6574 = vperm.xlu1 %10417, %v15307_v37   ;;  %v17856_v37 = vld [vmem:[#allocation48_spill] sm:$0xff]  ;;  %10886 = vpow2.f32 %v5891_v27  ;;  %v5734_v13 = vsub.f32 %v17861_v44, %v15327_v46  ;;  %v5901_v61 = vmul.f32 1.442695, %v5731_v59  ;;  %v15359_v59 = vrot.slane %v15259_v17, %v15015_v18 }
 0x7ee   : > { %6571 = vperm.xlu0 %10416, %v15309_v6   ;;  %v5728_v15 = vsub.f32 %v17856_v37, %v5568_v40  ;;  %v5730_v37 = vsub.f32 %v17860_v33, %v15304_v32  ;;  %10888 = vpow2.f32 %v5897_v9  ;;  %v17864_v27 = vld [vmem:[#allocation120_spill] sm:$0xff]  ;;  %v17865_v9 = vld [vmem:[#allocation119_spill] sm:$0xff] }
 0x7ef   : > { %v5735_v44 = vsub.f32 %v17865_v9, %v15327_v46 }
 0x7f0   : > { %v5895_v24 = vmul.f32 1.442695, %v5728_v15  ;;  %v5733_v15 = vsub.f32 %v17864_v27, %v15327_v46  ;;  %v5899_v33 = vmul.f32 1.442695, %v5730_v37  ;;  %v17868_v37 = vld [vmem:[#allocation76_spill] sm:$0xff] }
 0x7f1   : > { %6580 = vperm.xlu1 %10417, %v15316_v4   ;;  %v15335_v4 = vpop.eup %10876  ;;  %v5909_v9 = vmul.f32 1.442695, %v5735_v44  ;;  %v17873_v44 = vld [vmem:[#allocation121_spill] sm:$0xff] }
 0x7f2   : > { %6298 = vperm.xlu0 %10416, %v15318_v28   ;;  %17859 = vst [vmem:[#allocation42_spill] sm:$0xff] %v15335_v4  ;;  %v15345_v28 = vpop.eup %10878  ;;  %10890 = vpow2.f32 %v5895_v24  ;;  %v5732_v24 = vsub.f32 %v17868_v37, %v15304_v32  ;;  %v17872_v32 = vld [vmem:[#allocation123_spill] sm:$0xff]  ;;  %v5739_v37 = vsub.f32 %v17873_v44, %v15359_v59 }
 0x7f3   : > { %17862 = vst [vmem:[#allocation103_spill] sm:$0xff] %v15345_v28  ;;  %v15349_v12 = vpop.eup %10880  ;;  %10892 = vpow2.f32 %v5901_v61  ;;  %v17869_v61 = vld [vmem:[#allocation89_spill] sm:$0xff] }
 0x7f4   : > { %v15333_v6 = vpop.permute.xlu1 %6202  ;;  %17863 = vst [vmem:[#allocation102_spill] sm:$0xff] %v15349_v12  ;;  %10894 = vpow2.f32 %v5899_v33  ;;  %v5903_v33 = vmul.f32 1.442695, %v5732_v24  ;;  %v5917_v44 = vmul.f32 1.442695, %v5739_v37  ;;  %v15423_v37 = vrot.slane %v15259_v17, %v15057_v25 }
 0x7f5   : > { %v15337_v40 = vpop.permute.xlu0 %6205  ;;  %6583 = vperm.xlu1 %10417, %v15331_v3   ;;  %v15363_v3 = vpop.eup %10882 }
 0x7f6   : > { %6304 = vperm.xlu0 %10416, %v15335_v4   ;;  %v5907_v4 = vmul.f32 1.442695, %v5734_v13  ;;  %17866 = vst [vmem:[#allocation143_spill] sm:$0xff] %v15363_v3  ;;  %v5738_v13 = vsub.f32 %v17869_v61, %v15359_v59 }
 0x7f8   : > { %v15347_v53 = vpop.permute.xlu1 %6208  ;;  %10896 = vpow2.f32 %v5907_v4  ;;  %v15391_v4 = vrot.slane %v15259_v17, %v15036_v23  ;;  %v5915_v61 = vmul.f32 1.442695, %v5738_v13 }
 0x7f9   : > { %v15351_v10 = vpop.permute.xlu0 %6214  ;;  %6301 = vperm.xlu1 %10417, %v15345_v28   ;;  %v15367_v28 = vpop.eup %10884 }
 0x7fa   : > { %6310 = vperm.xlu0 %10416, %v15349_v12   ;;  %17867 = vst [vmem:[#allocation69_spill] sm:$0xff] %v15367_v28  ;;  %v5905_v12 = vmul.f32 1.442695, %v5733_v15  ;;  %v15377_v7 = vpop.eup %10886  ;;  %v5737_v15 = vsub.f32 %v17872_v32, %v15359_v59 }
 0x7fb   : > { %17870 = vst [vmem:[#allocation109_spill] sm:$0xff] %v15377_v7  ;;  %v15381_v56 = vpop.eup %10888 }
 0x7fc   : > { %v15365_v16 = vpop.permute.xlu1 %6211  ;;  %17871 = vst [vmem:[#allocation108_spill] sm:$0xff] %v15381_v56  ;;  %10898 = vpow2.f32 %v5905_v12  ;;  %v17876_v12 = vld [vmem:[#allocation70_spill] sm:$0xff] }
 0x7fd   : > { %v15369_v27 = vpop.permute.xlu0 %6220  ;;  %6307 = vperm.xlu1 %10417, %v15363_v3   ;;  %10900 = vpow2.f32 %v5909_v9  ;;  %v5736_v24 = vsub.f32 %v17876_v12, %v15327_v46  ;;  %v17877_v9 = vld [vmem:[#allocation91_spill] sm:$0xff]  ;;  %v17880_v46 = vld [vmem:[#allocation126_spill] sm:$0xff] }
 0x7fe   : > { %6316 = vperm.xlu0 %10416, %v15367_v28   ;;  %v15395_v28 = vpop.eup %10890  ;;  %10902 = vpow2.f32 %v5903_v33  ;;  %v5742_v13 = vsub.f32 %v17877_v9, %v15391_v4 }
 0x7ff   : > { %17874 = vst [vmem:[#allocation65_spill] sm:$0xff] %v15395_v28  ;;  %10904 = vpow2.f32 %v5915_v61  ;;  %v5911_v33 = vmul.f32 1.442695, %v5736_v24  ;;  %v17881_v61 = vld [vmem:[#allocation124_spill] sm:$0xff] }
 0x800   : > { %v15379_v20 = vpop.permute.xlu1 %6217  ;;  %v5743_v12 = vsub.f32 %v17881_v61, %v15391_v4  ;;  %v5923_v9 = vmul.f32 1.442695, %v5742_v13 }
 0x801   : > { %v15383_v35 = vpop.permute.xlu0 %6226  ;;  %6313 = vperm.xlu1 %10417, %v15377_v7   ;;  %v15399_v7 = vpop.eup %10892 }
 0x802   : > { %6322 = vperm.xlu0 %10416, %v15381_v56   ;;  %17875 = vst [vmem:[#allocation77_spill] sm:$0xff] %v15399_v7  ;;  %v5913_v56 = vmul.f32 1.442695, %v5737_v15  ;;  %v15409_v42 = vpop.eup %10894  ;;  %v5741_v15 = vsub.f32 %v17880_v46, %v15391_v4  ;;  %v5925_v61 = vmul.f32 1.442695, %v5743_v12  ;;  %v5592_v12 = vrot.slane %v15259_v17, %v15078_v36 }
 0x803   : > { %17878 = vst [vmem:[#allocation114_spill] sm:$0xff] %v15409_v42  ;;  %v15413_v54 = vpop.eup %10896 }
 0x804   : > { %v15397_v3 = vpop.permute.xlu1 %6223  ;;  %17879 = vst [vmem:[#allocation49_spill] sm:$0xff] %v15413_v54  ;;  %10906 = vpow2.f32 %v5913_v56  ;;  %v17884_v56 = vld [vmem:[#allocation88_spill] sm:$0xff] }
 0x805   : > { %v15401_v32 = vpop.permute.xlu0 %6232  ;;  %6319 = vperm.xlu1 %10417, %v15395_v28   ;;  %10908 = vpow2.f32 %v5917_v44  ;;  %v5740_v24 = vsub.f32 %v17884_v56, %v15359_v59  ;;  %v17885_v44 = vld [vmem:[#allocation161_spill] sm:$0xff] }
 0x806   : > { %6328 = vperm.xlu0 %10416, %v15399_v7   ;;  %v15427_v7 = vpop.eup %10898  ;;  %10910 = vpow2.f32 %v5911_v33  ;;  %v5746_v13 = vsub.f32 %v17885_v44, %v15423_v37  ;;  %v17888_v59 = vld [vmem:[#allocation129_spill] sm:$0xff] }
 0x807   : > { %17882 = vst [vmem:[#allocation113_spill] sm:$0xff] %v15427_v7  ;;  %10912 = vpow2.f32 %v5923_v9  ;;  %v5919_v33 = vmul.f32 1.442695, %v5740_v24  ;;  %v17889_v9 = vld [vmem:[#allocation127_spill] sm:$0xff] }
 0x808   : > { %v15411_v8 = vpop.permute.xlu1 %6229  ;;  %v5747_v56 = vsub.f32 %v17889_v9, %v15423_v37  ;;  %v5931_v44 = vmul.f32 1.442695, %v5746_v13 }
 0x809   : > { %v15415_v19 = vpop.permute.xlu0 %6238  ;;  %6325 = vperm.xlu1 %10417, %v15409_v42   ;;  %v15431_v42 = vpop.eup %10900 }
 0x80a   : > { %6337 = vperm.xlu0 %10416, %v15413_v54   ;;  %17883 = vst [vmem:[#allocation112_spill] sm:$0xff] %v15431_v42  ;;  %v5921_v54 = vmul.f32 1.442695, %v5741_v15  ;;  %v15441_v29 = vpop.eup %10902  ;;  %v5745_v15 = vsub.f32 %v17888_v59, %v15423_v37  ;;  %v17893_v59 = vld [vmem:[#allocation164_spill] sm:$0xff]  ;;  %v5933_v13 = vmul.f32 1.442695, %v5747_v56 }
 0x80b   : > { %17886 = vst [vmem:[#allocation71_spill] sm:$0xff] %v15441_v29  ;;  %v15445_v39 = vpop.eup %10904 }
 0x80c   : > { %v15429_v28 = vpop.permute.xlu1 %6235  ;;  %17887 = vst [vmem:[#allocation110_spill] sm:$0xff] %v15445_v39  ;;  %10914 = vpow2.f32 %v5921_v54  ;;  %v17892_v54 = vld [vmem:[#allocation90_spill] sm:$0xff]  ;;  %v5929_v17 = vmul.f32 1.442695, %v5745_v15  ;;  %v17897_v15 = vld [vmem:[#allocation131_spill] sm:$0xff] }
 0x80d   : > { %v15433_v46 = vpop.permute.xlu0 %6244  ;;  %6334 = vperm.xlu1 %10417, %v15427_v7   ;;  %10916 = vpow2.f32 %v5925_v61  ;;  %v5744_v24 = vsub.f32 %v17892_v54, %v15391_v4  ;;  %v5750_v61 = vsub.f32 %v17893_v59, %v5592_v12  ;;  %v5751_v54 = vsub.f32 %v17897_v15, %v5592_v12  ;;  %v17901_v15 = vld [vmem:[#allocation137_spill] sm:$0xff] }
 0x80e   : > { %6340 = vperm.xlu0 %10416, %v15431_v42   ;;  %v15457_v42 = vpop.eup %10906  ;;  %10918 = vpow2.f32 %v5919_v33 }
 0x80f   : > { %17890 = vst [vmem:[#allocation51_spill] sm:$0xff] %v15457_v42  ;;  %10920 = vpow2.f32 %v5931_v44  ;;  %v5927_v33 = vmul.f32 1.442695, %v5744_v24  ;;  %v5939_v56 = vmul.f32 1.442695, %v5750_v61  ;;  %v15484_v44 = vrot.slane %v15320_v47, %v17713_v38 }
 0x810   : > { %v15443_v34 = vpop.permute.xlu1 %6241  ;;  %10922 = vpow2.f32 %v5929_v17  ;;  %v5941_v61 = vmul.f32 1.442695, %v5751_v54  ;;  %v17905_v54 = vld [vmem:[#allocation142_spill] sm:$0xff] }
 0x811   : > { %v15447_v50 = vpop.permute.xlu0 %6250  ;;  %6331 = vperm.xlu1 %10417, %v15441_v29   ;;  %v15461_v29 = vpop.eup %10908  ;;  %10924 = vpow2.f32 %v5933_v13  ;;  %v5600_v13 = vrot.slane %v15320_v47, %v14981_v11 }
 0x812   : > { %6349 = vperm.xlu0 %10416, %v15445_v39   ;;  %17891 = vst [vmem:[#allocation116_spill] sm:$0xff] %v15461_v29  ;;  %v15470_v9 = vpop.eup %10910  ;;  %10926 = vpow2.f32 %v5927_v33 }
 0x813   : > { %17894 = vst [vmem:[#allocation46_spill] sm:$0xff] %v15470_v9  ;;  %v15474_v26 = vpop.eup %10912  ;;  %10928 = vpow2.f32 %v5939_v56  ;;  %v5757_v56 = vsub.f32 %v17905_v54, %v5600_v13 }
 0x814   : > { %v15459_v7 = vpop.permute.xlu1 %6247  ;;  %17895 = vst [vmem:[#allocation115_spill] sm:$0xff] %v15474_v26 }
 0x815   : > { %v15463_v58 = vpop.permute.xlu0 %6256  ;;  %6346 = vperm.xlu1 %10417, %v15457_v42   ;;  %v17896_v42 = vld [vmem:[#allocation133_spill] sm:$0xff]  ;;  %v5953_v54 = vmul.f32 1.442695, %v5757_v56 }
 0x816   : > { %6352 = vperm.xlu0 %10416, %v15461_v29   ;;  %v5749_v4 = vsub.f32 %v17896_v42, %v5592_v12  ;;  %v15486_v59 = vpop.eup %10914  ;;  %v17900_v42 = vld [vmem:[#allocation53_spill] sm:$0xff] }
 0x817   : > { %17898 = vst [vmem:[#allocation68_spill] sm:$0xff] %v15486_v59  ;;  %v15490_v48 = vpop.eup %10916  ;;  %v5748_v24 = vsub.f32 %v17900_v42, %v15423_v37  ;;  %v17904_v37 = vld [vmem:[#allocation162_spill] sm:$0xff] }
 0x818   : > { %v15472_v39 = vpop.permute.xlu1 %6253  ;;  %17899 = vst [vmem:[#allocation118_spill] sm:$0xff] %v15490_v48  ;;  %v5937_v17 = vmul.f32 1.442695, %v5749_v4  ;;  %v15502_v22 = vpop.eup %10918  ;;  %v5752_v4 = vsub.f32 %v17904_v37, %v5592_v12 }
 0x819   : > { %v15476_v62 = vpop.permute.xlu0 %6262  ;;  %6343 = vperm.xlu1 %10417, %v15470_v9   ;;  %17902 = vst [vmem:[#allocation48_spill] sm:$0xff] %v15502_v22  ;;  %v5935_v33 = vmul.f32 1.442695, %v5748_v24  ;;  %v17908_v24 = vld [vmem:[#allocation168_spill] sm:$0xff] }
 0x81a   : > { %6361 = vperm.xlu0 %10416, %v15474_v26   ;;  %v5753_v26 = vsub.f32 %v17901_v15, %v15484_v44  ;;  %10930 = vpow2.f32 %v5937_v17  ;;  %v5943_v12 = vmul.f32 1.442695, %v5752_v4  ;;  %v5754_v17 = vsub.f32 %v17908_v24, %v15484_v44 }
 0x81b   : > { %10932 = vpow2.f32 %v5941_v61  ;;  %v17909_v61 = vld [vmem:[#allocation140_spill] sm:$0xff] }
 0x81c   : > { %v15488_v29 = vpop.permute.xlu1 %6259  ;;  %v5945_v42 = vmul.f32 1.442695, %v5753_v26  ;;  %10934 = vpow2.f32 %v5935_v33  ;;  %v15528_v26 = vrot.slane %v15320_v47, %v14991_v41  ;;  %v5759_v37 = vsub.f32 %v17909_v61, %v5600_v13  ;;  %v17912_v33 = vld [vmem:[#allocation172_spill] sm:$0xff] }
 0x81d   : > { %v15492_v9 = vpop.permute.xlu0 %6268  ;;  %6358 = vperm.xlu1 %10417, %v15486_v59   ;;  %v15506_v59 = vpop.eup %10920  ;;  %v5758_v24 = vsub.f32 %v17912_v33, %v5600_v13  ;;  %v17913_v61 = vld [vmem:[#allocation176_spill] sm:$0xff] }
 0x81e   : > { %6364 = vperm.xlu0 %10416, %v15490_v48   ;;  %17903 = vst [vmem:[#allocation117_spill] sm:$0xff] %v15506_v59  ;;  %v15514_v15 = vpop.eup %10922  ;;  %10936 = vpow2.f32 %v5945_v42  ;;  %v5762_v42 = vsub.f32 %v17913_v61, %v15528_v26  ;;  %v5957_v56 = vmul.f32 1.442695, %v5759_v37  ;;  %v15558_v37 = vrot.slane %v15320_v47, %v15000_v55 }
 0x81f   : > { %17906 = vst [vmem:[#allocation72_spill] sm:$0xff] %v15514_v15  ;;  %v15518_v14 = vpop.eup %10924  ;;  %10938 = vpow2.f32 %v5943_v12  ;;  %v17916_v12 = vld [vmem:[#allocation135_spill] sm:$0xff]  ;;  %v5955_v33 = vmul.f32 1.442695, %v5758_v24 }
 0x820   : > { %v15504_v2 = vpop.permute.xlu1 %6265  ;;  %17907 = vst [vmem:[#allocation86_spill] sm:$0xff] %v15518_v14  ;;  %10940 = vpow2.f32 %v5953_v54  ;;  %v17917_v54 = vld [vmem:[#allocation170_spill] sm:$0xff] }
 0x821   : > { %v15508_v5 = vpop.permute.xlu0 %6274  ;;  %6355 = vperm.xlu1 %10417, %v15502_v22   ;;  %v5760_v61 = vsub.f32 %v17917_v54, %v5600_v13  ;;  %v17922_v13 = vld [vmem:[#allocation147_spill] sm:$0xff] }
 0x822   : > { %6373 = vperm.xlu0 %10416, %v15506_v59   ;;  %v15531_v59 = vpop.eup %10926 }
 0x823   : > { %17910 = vst [vmem:[#allocation120_spill] sm:$0xff] %v15531_v59 }
 0x824   : > { %v15516_v48 = vpop.permute.xlu1 %6271 }
 0x825   : > { %v15520_v60 = vpop.permute.xlu0 %6280  ;;  %6370 = vperm.xlu1 %10417, %v15514_v15   ;;  %v15535_v15 = vpop.eup %10928 }
 0x826   : > { %6376 = vperm.xlu0 %10416, %v15518_v14   ;;  %17911 = vst [vmem:[#allocation119_spill] sm:$0xff] %v15535_v15  ;;  %v5947_v14 = vmul.f32 1.442695, %v5754_v17  ;;  %v15544_v21 = vpop.eup %10930  ;;  %v5755_v17 = vsub.f32 %v17916_v12, %v15484_v44 }
 0x827   : > { %17914 = vst [vmem:[#allocation76_spill] sm:$0xff] %v15544_v21  ;;  %v15548_v31 = vpop.eup %10932 }
 0x828   : > { %v15533_v22 = vpop.permute.xlu1 %6277  ;;  %17915 = vst [vmem:[#allocation89_spill] sm:$0xff] %v15548_v31  ;;  %10942 = vpow2.f32 %v5947_v14  ;;  %v17921_v14 = vld [vmem:[#allocation145_spill] sm:$0xff]  ;;  %v5949_v12 = vmul.f32 1.442695, %v5755_v17  ;;  %v17927_v17 = vld [vmem:[#allocation166_spill] sm:$0xff] }
 0x829   : > { %v15537_v4 = vpop.permute.xlu0 %6286  ;;  %6367 = vperm.xlu1 %10417, %v15531_v59   ;;  %10944 = vpow2.f32 %v5957_v56  ;;  %v15561_v59 = vpop.eup %10934  ;;  %v5761_v24 = vsub.f32 %v17921_v14, %v15528_v26  ;;  %v5959_v56 = vmul.f32 1.442695, %v5760_v61  ;;  %v17928_v61 = vld [vmem:[#allocation146_spill] sm:$0xff] }
 0x82a   : > { %6385 = vperm.xlu0 %10416, %v15535_v15   ;;  %v5963_v15 = vmul.f32 1.442695, %v5762_v42  ;;  %17918 = vst [vmem:[#allocation123_spill] sm:$0xff] %v15561_v59  ;;  %10946 = vpow2.f32 %v5955_v33  ;;  %v5765_v42 = vsub.f32 %v17922_v13, %v15558_v37  ;;  %v5756_v33 = vsub.f32 %v17927_v17, %v15484_v44 }
 0x82b   : > { %v5961_v14 = vmul.f32 1.442695, %v5761_v24  ;;  %v5767_v13 = vsub.f32 %v17928_v61, %v15558_v37  ;;  %v17932_v24 = vld [vmem:[#allocation144_spill] sm:$0xff] }
 0x82c   : > { %v15546_v57 = vpop.permute.xlu1 %6283  ;;  %10948 = vpow2.f32 %v5963_v15  ;;  %v15589_v15 = vrot.slane %v15320_v47, %v15015_v18  ;;  %v5951_v17 = vmul.f32 1.442695, %v5756_v33  ;;  %v17936_v33 = vld [vmem:[#allocation179_spill] sm:$0xff] }
 0x82d   : > { %v15550_v41 = vpop.permute.xlu0 %6292  ;;  %6382 = vperm.xlu1 %10417, %v15544_v21   ;;  %v15565_v21 = vpop.eup %10936  ;;  %10950 = vpow2.f32 %v5949_v12  ;;  %v5763_v12 = vsub.f32 %v17932_v24, %v15528_v26 }
 0x82e   : > { %6388 = vperm.xlu0 %10416, %v15548_v31   ;;  %17919 = vst [vmem:[#allocation121_spill] sm:$0xff] %v15565_v21  ;;  %v15575_v54 = vpop.eup %10938  ;;  %10952 = vpow2.f32 %v5959_v56  ;;  %v5973_v56 = vmul.f32 1.442695, %v5767_v13 }
 0x82f   : > { %17923 = vst [vmem:[#allocation91_spill] sm:$0xff] %v15575_v54  ;;  %v15579_v55 = vpop.eup %10940  ;;  %10954 = vpow2.f32 %v5961_v14  ;;  %v5766_v14 = vsub.f32 %v17936_v33, %v15558_v37  ;;  %v5965_v24 = vmul.f32 1.442695, %v5763_v12  ;;  %v17941_v12 = vld [vmem:[#allocation173_spill] sm:$0xff] }
 0x830   : > { %v15563_v11 = vpop.permute.xlu1 %6289  ;;  %17925 = vst [vmem:[#allocation124_spill] sm:$0xff] %v15579_v55 }
 0x831   : > { %v15567_v38 = vpop.permute.xlu0 %6490  ;;  %6379 = vperm.xlu1 %10417, %v15561_v59  }
 0x832   : > { %17920 = vst [vmem:[#allocation70_spill] sm:$0xff] %v15567_v38  ;;  %6394 = vperm.xlu0 %10416, %v15565_v21   ;;  %v5969_v21 = vmul.f32 1.442695, %v5765_v42  ;;  %v15593_v59 = vpop.eup %10942  ;;  %v5770_v42 = vsub.f32 %v14604_v51, %v15589_v15  ;;  %v15621_v51 = vrot.slane %v15320_v47, %v15036_v23 }
 0x833   : > { %17929 = vst [vmem:[#allocation161_spill] sm:$0xff] %v15593_v59 }
 0x834   : > { %v15577_v31 = vpop.permute.xlu1 %6295  ;;  %10956 = vpow2.f32 %v5969_v21  ;;  %v17937_v21 = vld [vmem:[#allocation148_spill] sm:$0xff] }
 0x835   : > { %17924 = vst [vmem:[#allocation126_spill] sm:$0xff] %v15577_v31  ;;  %v15581_v38 = vpop.permute.xlu0 %6502  ;;  %6391 = vperm.xlu1 %10417, %v15575_v54   ;;  %v15597_v54 = vpop.eup %10944  ;;  %10958 = vpow2.f32 %v5951_v17  ;;  %v5771_v13 = vsub.f32 %v17937_v21, %v15589_v15  ;;  %v5764_v17 = vsub.f32 %v17941_v12, %v15528_v26  ;;  %v17944_v26 = vld [vmem:[#allocation150_spill] sm:$0xff] }
 0x836   : > { %17926 = vst [vmem:[#allocation88_spill] sm:$0xff] %v15581_v38  ;;  %6406 = vperm.xlu0 %10416, %v15579_v55   ;;  %17930 = vst [vmem:[#allocation129_spill] sm:$0xff] %v15597_v54  ;;  %v15607_v61 = vpop.eup %10946  ;;  %10960 = vpow2.f32 %v5973_v56 }
 0x837   : > { %17933 = vst [vmem:[#allocation90_spill] sm:$0xff] %v15607_v61  ;;  %v15611_v18 = vpop.eup %10948  ;;  %10962 = vpow2.f32 %v5965_v24  ;;  %v5981_v56 = vmul.f32 1.442695, %v5771_v13  ;;  %v5967_v24 = vmul.f32 1.442695, %v5764_v17 }
 0x838   : > { %v15595_v31 = vpop.permute.xlu1 %6493  ;;  %17934 = vst [vmem:[#allocation164_spill] sm:$0xff] %v15611_v18 }
 0x839   : > { %v15599_v44 = vpop.permute.xlu0 %6508  ;;  %6397 = vperm.xlu1 %10417, %v15593_v59   ;;  %v15625_v59 = vpop.eup %10950 }
 0x83a   : > { %17931 = vst [vmem:[#allocation127_spill] sm:$0xff] %v15599_v44  ;;  %6412 = vperm.xlu0 %10416, %v15597_v54   ;;  %v5979_v54 = vmul.f32 1.442695, %v5770_v42  ;;  %17938 = vst [vmem:[#allocation131_spill] sm:$0xff] %v15625_v59  ;;  %v5774_v42 = vsub.f32 %v14660_v63, %v15621_v51  ;;  %v15653_v63 = vrot.slane %v15320_v47, %v15057_v25 }
 0x83c   : > { %v15609_v55 = vpop.permute.xlu1 %6505  ;;  %10964 = vpow2.f32 %v5979_v54  ;;  %v17945_v54 = vld [vmem:[#allocation152_spill] sm:$0xff]  ;;  %v5987_v12 = vmul.f32 1.442695, %v5774_v42  ;;  %v5778_v42 = vsub.f32 %v14699_v49, %v15653_v63  ;;  %v15685_v49 = vrot.slane %v15320_v47, %v15078_v36 }
 0x83d   : > { %v15613_v44 = vpop.permute.xlu0 %6517  ;;  %6409 = vperm.xlu1 %10417, %v15607_v61   ;;  %v15629_v61 = vpop.eup %10952  ;;  %v5775_v13 = vsub.f32 %v17945_v54, %v15621_v51 }
 0x83e   : > { %17935 = vst [vmem:[#allocation133_spill] sm:$0xff] %v15613_v44  ;;  %6421 = vperm.xlu0 %10416, %v15611_v18   ;;  %17939 = vst [vmem:[#allocation53_spill] sm:$0xff] %v15629_v61  ;;  %v5971_v18 = vmul.f32 1.442695, %v5766_v14  ;;  %v15639_v21 = vpop.eup %10954  ;;  %v5769_v14 = vsub.f32 %v17944_v26, %v15589_v15 }
 0x83f   : > { %17942 = vst [vmem:[#allocation162_spill] sm:$0xff] %v15639_v21  ;;  %v15643_v38 = vpop.eup %10956 }
 0x840   : > { %v15627_v44 = vpop.permute.xlu1 %6496  ;;  %17943 = vst [vmem:[#allocation142_spill] sm:$0xff] %v15643_v38  ;;  %10966 = vpow2.f32 %v5971_v18  ;;  %v17950_v18 = vld [vmem:[#allocation178_spill] sm:$0xff] }
 0x841   : > { %v15631_v33 = vpop.permute.xlu0 %6499  ;;  %6400 = vperm.xlu1 %10417, %v15625_v59   ;;  %10968 = vpow2.f32 %v5981_v56  ;;  %v5768_v17 = vsub.f32 %v17950_v18, %v15558_v37  ;;  %v5989_v56 = vmul.f32 1.442695, %v5775_v13  ;;  %v17953_v37 = vld [vmem:[#allocation153_spill] sm:$0xff]  ;;  %v17954_v13 = vld [vmem:[#allocation154_spill] sm:$0xff]  ;;  %v5995_v18 = vmul.f32 1.442695, %v5778_v42 }
 0x842   : > { %17940 = vst [vmem:[#allocation137_spill] sm:$0xff] %v15631_v33  ;;  %6415 = vperm.xlu0 %10416, %v15629_v61   ;;  %v15657_v61 = vpop.eup %10958  ;;  %10970 = vpow2.f32 %v5967_v24 }
 0x843   : > { %17946 = vst [vmem:[#allocation168_spill] sm:$0xff] %v15657_v61  ;;  %10972 = vpow2.f32 %v5987_v12  ;;  %v5975_v24 = vmul.f32 1.442695, %v5768_v17  ;;  %v5779_v12 = vsub.f32 %v17954_v13, %v15653_v63 }
 0x844   : > { %v15641_v23 = vpop.permute.xlu1 %6514 }
 0x845   : > { %v15645_v33 = vpop.permute.xlu0 %6520  ;;  %6418 = vperm.xlu1 %10417, %v15639_v21   ;;  %v15661_v21 = vpop.eup %10960  ;;  %v5997_v13 = vmul.f32 1.442695, %v5779_v12  ;;  %v5780_v12 = vsub.f32 %v14671_v0, %v15653_v63  ;;  %v17966_v0 = vld [vmem:[#allocation56_spill] sm:$0xff] }
 0x846   : > { %6430 = vperm.xlu0 %10416, %v15643_v38   ;;  %17948 = vst [vmem:[#allocation172_spill] sm:$0xff] %v15661_v21  ;;  %v5977_v38 = vmul.f32 1.442695, %v5769_v14  ;;  %v15671_v54 = vpop.eup %10962  ;;  %v5773_v14 = vsub.f32 %v17953_v37, %v15621_v51 }
 0x847   : > { %17951 = vst [vmem:[#allocation135_spill] sm:$0xff] %v15671_v54 }
 0x848   : > { %v15659_v59 = vpop.permute.xlu1 %6511  ;;  %10974 = vpow2.f32 %v5977_v38  ;;  %v17959_v38 = vld [vmem:[#allocation180_spill] sm:$0xff]  ;;  %v5985_v47 = vmul.f32 1.442695, %v5773_v14 }
 0x849   : > { %17947 = vst [vmem:[#allocation140_spill] sm:$0xff] %v15659_v59  ;;  %v15663_v26 = vpop.permute.xlu0 %6529  ;;  %6403 = vperm.xlu1 %10417, %v15657_v61   ;;  %v15675_v59 = vpop.eup %10964  ;;  %10976 = vpow2.f32 %v5989_v56  ;;  %v5772_v17 = vsub.f32 %v17959_v38, %v15589_v15  ;;  %v17960_v56 = vld [vmem:[#allocation82_spill] sm:$0xff]  ;;  %v17963_v15 = vld [vmem:[#allocation160_spill] sm:$0xff] }
 0x84a   : > { %17949 = vst [vmem:[#allocation176_spill] sm:$0xff] %v15663_v26  ;;  %6436 = vperm.xlu0 %10416, %v15661_v21   ;;  %17952 = vst [vmem:[#allocation170_spill] sm:$0xff] %v15675_v59  ;;  %v15689_v21 = vpop.eup %10966  ;;  %10978 = vpow2.f32 %v5975_v24  ;;  %v5782_v42 = vsub.f32 %v17960_v56, %v15685_v49  ;;  %v5777_v14 = vsub.f32 %v17963_v15, %v15653_v63 }
 0x84b   : > { %17955 = vst [vmem:[#allocation145_spill] sm:$0xff] %v15689_v21  ;;  %10980 = vpow2.f32 %v5995_v18  ;;  %v5983_v24 = vmul.f32 1.442695, %v5772_v17  ;;  %v5776_v17 = vsub.f32 %v14634_v30, %v15621_v51  ;;  %v5784_v63 = vsub.f32 %v17966_v0, %v15685_v49  ;;  %v17969_v30 = vld [vmem:[#allocation61_spill] sm:$0xff] }
 0x84c   : > { %v15673_v25 = vpop.permute.xlu1 %6526  ;;  %10982 = vpow2.f32 %v5985_v47  ;;  %v6003_v18 = vmul.f32 1.442695, %v5782_v42  ;;  %v5993_v47 = vmul.f32 1.442695, %v5777_v14  ;;  %v5999_v42 = vmul.f32 1.442695, %v5780_v12 }
 0x84d   : > { %v15677_v26 = vpop.permute.xlu0 %6532  ;;  %6424 = vperm.xlu1 %10417, %v15671_v54   ;;  %v15693_v54 = vpop.eup %10968  ;;  %10984 = vpow2.f32 %v5997_v13  ;;  %v5781_v51 = vsub.f32 %v17969_v30, %v15685_v49  ;;  %v5991_v14 = vmul.f32 1.442695, %v5776_v17 }
 0x84e   : > { %6445 = vperm.xlu0 %10416, %v15675_v59   ;;  %17957 = vst [vmem:[#allocation166_spill] sm:$0xff] %v15693_v54  ;;  %v15703_v59 = vpop.eup %10970  ;;  %10986 = vpow2.f32 %v5983_v24  ;;  %v6007_v24 = vmul.f32 1.442695, %v5784_v63 }
 0x84f   : > { %17961 = vst [vmem:[#allocation144_spill] sm:$0xff] %v15703_v59  ;;  %10988 = vpow2.f32 %v6003_v18  ;;  %v6001_v17 = vmul.f32 1.442695, %v5781_v51 }
 0x850   : > { %v15691_v61 = vpop.permute.xlu1 %6523  ;;  %10990 = vpow2.f32 %v5993_v47 }
 0x851   : > { %17956 = vst [vmem:[#allocation147_spill] sm:$0xff] %v15691_v61  ;;  %v15695_v37 = vpop.permute.xlu0 %6541  ;;  %6433 = vperm.xlu1 %10417, %v15689_v21   ;;  %v15707_v61 = vpop.eup %10972  ;;  %10992 = vpow2.f32 %v5999_v42 }
 0x852   : > { %17958 = vst [vmem:[#allocation146_spill] sm:$0xff] %v15695_v37  ;;  %6448 = vperm.xlu0 %10416, %v15693_v54   ;;  %17962 = vst [vmem:[#allocation179_spill] sm:$0xff] %v15707_v61  ;;  %v15717_v38 = vpop.eup %10974  ;;  %10994 = vpow2.f32 %v5991_v14 }
 0x853   : > { %17964 = vst [vmem:[#allocation148_spill] sm:$0xff] %v15717_v38  ;;  %v15721_v54 = vpop.eup %10976  ;;  %10996 = vpow2.f32 %v6007_v24  ;;  %v6588_v24 = vrot.slane %v15333_v6, %v14551_v1 }
 0x854   : > { %v15705_v36 = vpop.permute.xlu1 %6538  ;;  %17965 = vst [vmem:[#allocation173_spill] sm:$0xff] %v15721_v54  ;;  %v15731_v13 = vpop.eup %10978  ;;  %10998 = vpow2.f32 %v6001_v17 }
 0x855   : > { %v15709_v37 = vpop.permute.xlu0 %6544  ;;  %6427 = vperm.xlu1 %10417, %v15703_v59   ;;  %17967 = vst [vmem:[#allocation150_spill] sm:$0xff] %v15731_v13 }
 0x856   : > { %6457 = vperm.xlu0 %10416, %v15707_v61   ;;  %v15735_v61 = vpop.eup %10980 }
 0x857   : > { %17968 = vst [vmem:[#allocation152_spill] sm:$0xff] %v15735_v61  ;;  %v15743_v12 = vpop.eup %10982 }
 0x858   : > { %v15719_v56 = vpop.permute.xlu1 %6535  ;;  %v15747_v0 = vpop.eup %10984 }
 0x859   : > { %v15723_v21 = vpop.permute.xlu0 %6553  ;;  %6442 = vperm.xlu1 %10417, %v15717_v38   ;;  %17970 = vst [vmem:[#allocation178_spill] sm:$0xff] %v15747_v0  ;;  %v15755_v47 = vpop.eup %10986 }
 0x85a   : > { %6460 = vperm.xlu0 %10416, %v15721_v54   ;;  %17972 = vst [vmem:[#allocation153_spill] sm:$0xff] %v15755_v47  ;;  %v15759_v42 = vpop.eup %10988 }
 0x85b   : > { %17973 = vst [vmem:[#allocation154_spill] sm:$0xff] %v15759_v42 }
 0x85c   : > { %v15733_v15 = vpop.permute.xlu1 %6550 }
 0x85d   : > { %v15737_v59 = vpop.permute.xlu0 %6556  ;;  %6439 = vperm.xlu1 %10417, %v15731_v13   ;;  %v17971_v13 = vld [vmem:[#allocation41_spill] sm:$0xff] }
 0x85e   : > { %6469 = vperm.xlu0 %10416, %v15735_v61   ;;  %v5783_v38 = vsub.f32 %v17971_v13, %v15685_v49  ;;  %v6611_v49 = vrot.slane %v15379_v20, %v14554_v43  ;;  %v15767_v13 = vpop.eup %10990  ;;  %v6630_v20 = vrot.slane %v15411_v8, %v14554_v43  ;;  %v6621_v8 = vrot.slane %v15397_v3, %v14581_v52 }
 0x85f   : > { %17974 = vst [vmem:[#allocation180_spill] sm:$0xff] %v15767_v13  ;;  %v15771_v14 = vpop.eup %10992 }
 0x860   : > { %v15745_v18 = vpop.permute.xlu1 %6547  ;;  %v6005_v61 = vmul.f32 1.442695, %v5783_v38  ;;  %17975 = vst [vmem:[#allocation82_spill] sm:$0xff] %v15771_v14  ;;  %v6607_v38 = vrot.slane %v15351_v10, %v14551_v1  ;;  %v6616_v10 = vrot.slane %v15369_v27, %v14565_v45  ;;  %v6645_v27 = vrot.slane %v15415_v19, %v14551_v1 }
 0x861   : > { %v15749_v54 = vpop.permute.xlu0 %6565  ;;  %6454 = vperm.xlu1 %10417, %v15743_v12   ;;  %v6635_v19 = vrot.slane %v15401_v32, %v14565_v45  ;;  %v6678_v32 = vrot.slane %v15488_v29, %v14581_v52 }
 0x862   : > { %6472 = vperm.xlu0 %10416, %v15747_v0   ;;  %v6592_v0 = vrot.slane %v15337_v40, %v14554_v43  ;;  %11000 = vpow2.f32 %v6005_v61  ;;  %v6612_v6 = vsel %vm4868_vm1, %v6611_v49, %v6607_v38  ;;  %v6649_v40 = vrot.slane %v15443_v34, %v14554_v43 }
 0x863   : > { %v6626_v61 = vrot.slane %v15383_v35, %v14551_v1  ;;  %v6602_v38 = vrot.slane %v15365_v16, %v14581_v52  ;;  %v6687_v35 = vrot.slane %v15504_v2, %v14554_v43  ;;  %v6664_v16 = vrot.slane %v15447_v50, %v14551_v1 }
 0x864   : > { %v15757_v63 = vpop.permute.xlu1 %6562  ;;  %v6593_v34 = vsel %vm4868_vm1, %v6592_v0, %v6588_v24  ;;  %v6640_v0 = vrot.slane %v15429_v28, %v14581_v52  ;;  %v6650_v2 = vsel %vm4868_vm1, %v6649_v40, %v6645_v27  ;;  %v6659_v24 = vrot.slane %v15459_v7, %v14581_v52 }
 0x865   : > { %v15761_v30 = vpop.permute.xlu0 %6568  ;;  %6451 = vperm.xlu1 %10417, %v15755_v47   ;;  %v15790_v47 = vpop.eup %10994  ;;  %v6631_v3 = vsel %vm4868_vm1, %v6630_v20, %v6626_v61  ;;  %v6654_v50 = vrot.slane %v15433_v46, %v14565_v45  ;;  %v6673_v7 = vrot.slane %v15463_v58, %v14565_v45 }
 0x866   : > { %6481 = vperm.xlu0 %10416, %v15759_v42   ;;  %v6597_v42 = vrot.slane %v15347_v53, %v14565_v45  ;;  %v15802_v49 = vpop.eup %10996  ;;  %v6636_v40 = vsel %vm4875_vm2, %v6635_v19, %v6631_v3 }
 0x867   : > { %v15828_v20 = vpop.eup %10998  ;;  %v6641_v29 = vsel %vm4882_vm3, %v6640_v0, %v6636_v40 }
 0x868   : > { %v15769_v51 = vpop.permute.xlu1 %6559  ;;  %v6598_v46 = vsel %vm4875_vm2, %v6597_v42, %v6593_v34 }
 0x869   : > { %v15779_v17 = vpop.permute.xlu0 %6577  ;;  %6466 = vperm.xlu1 %10417, %v15767_v13   ;;  %v6603_v58 = vsel %vm4882_vm3, %v6602_v38, %v6598_v46  ;;  %v6706_v38 = vrot.slane %v15533_v22, %v14554_v43  ;;  %v7048_v22 = vrot.slane %v15595_v31, %v14554_v43  ;;  %v17976_v46 = vld [vmem:[#allocation70_spill] sm:$0xff] }
 0x86a   : > { %6475 = vperm.xlu0 %10416, %v15771_v14   ;;  %v6668_v14 = vrot.slane %v15472_v39, %v14554_v43  ;;  %v6617_v39 = vsel %vm4875_vm2, %v6616_v10, %v6612_v6  ;;  %v6683_v6 = vrot.slane %v15476_v62, %v14551_v1 }
 0x86b   : > { %v6622_v28 = vsel %vm4882_vm3, %v6621_v8, %v6617_v39  ;;  %v6697_v8 = vrot.slane %v15516_v48, %v14581_v52  ;;  %v6692_v39 = vrot.slane %v15492_v9, %v14565_v45 }
 0x86c   : > { %v15800_v53 = vpop.permute.xlu1 %6574  ;;  %v6669_v10 = vsel %vm4868_vm1, %v6668_v14, %v6664_v16  ;;  %v6688_v62 = vsel %vm4868_vm1, %v6687_v35, %v6683_v6  ;;  %v6655_v14 = vsel %vm4875_vm2, %v6654_v50, %v6650_v2  ;;  %v15855_v48 = vpop.eup %11000  ;;  %v7193_v16 = vsel %vm5473_vm4, %v6622_v28, %v6603_v58 }
 0x86d   : > { %v15811_v13 = vpop.permute.xlu0 %6571  ;;  %6463 = vperm.xlu1 %10417, %v15790_v47   ;;  %v6660_v35 = vsel %vm4882_vm3, %v6659_v24, %v6655_v14  ;;  %v6674_v3 = vsel %vm4875_vm2, %v6673_v7, %v6669_v10  ;;  %v6693_v42 = vsel %vm4875_vm2, %v6692_v39, %v6688_v62  ;;  %v7194_v0 = vsel %vm5475_vm5, %v6641_v29, %v7193_v16  ;;  %v17977_v14 = vld [vmem:[#allocation88_spill] sm:$0xff]  ;;  %v17980_v16 = vld [vmem:[#allocation137_spill] sm:$0xff] }
 0x86e   : > { %6487 = vperm.xlu0 %10416, %v15802_v49   ;;  %v6679_v19 = vsel %vm4882_vm3, %v6678_v32, %v6674_v3  ;;  %v6698_v9 = vsel %vm4882_vm3, %v6697_v8, %v6693_v42  ;;  %v7195_v24 = vsel %vm5477_vm6, %v6660_v35, %v7194_v0  ;;  %v6702_v28 = vrot.slane %v15508_v5, %v14551_v1 }
 0x86f   : > { %v7196_v6 = vsel %vm5479_vm7, %v6679_v19, %v7195_v24  ;;  %v6725_v50 = vrot.slane %v15563_v11, %v14554_v43  ;;  %v6711_v10 = vrot.slane %v15520_v60, %v14565_v45  ;;  %v7067_v32 = vrot.slane %v15609_v55, %v14554_v43  ;;  %v17981_v24 = vld [vmem:[#allocation140_spill] sm:$0xff] }
 0x870   : > { %v15836_v61 = vpop.permute.xlu1 %6580  ;;  %v15884_v7 = vsel %vm5481_vm8, %v6698_v9, %v7196_v6  ;;  %v6707_v62 = vsel %vm4868_vm1, %v6706_v38, %v6702_v28  ;;  %v6721_v5 = vrot.slane %v15537_v4, %v14551_v1  ;;  %v7053_v11 = vrot.slane %v15627_v44, %v14565_v45  ;;  %v17978_v44 = vld [vmem:[#allocation126_spill] sm:$0xff] }
 0x871   : > { %v15844_v27 = vpop.permute.xlu0 %6298  ;;  %6478 = vperm.xlu1 %10417, %v15828_v20   ;;  %v7082_v60 = vrot.slane %v15641_v23, %v14551_v1  ;;  %v6716_v55 = vrot.slane %v15546_v57, %v14581_v52  ;;  %v6730_v8 = vrot.slane %v15550_v41, %v14565_v45  ;;  %v7044_v29 = vrot.slane %v17976_v46, %v14551_v1  ;;  %v17979_v23 = vld [vmem:[#allocation133_spill] sm:$0xff] }
 0x872   : > { %v7063_v4 = vrot.slane %v17977_v14, %v14551_v1  ;;  %v6726_v39 = vsel %vm4868_vm1, %v6725_v50, %v6721_v5  ;;  %v6735_v58 = vrot.slane %v17978_v44, %v14581_v52  ;;  %v7086_v35 = vrot.slane %v17979_v23, %v14554_v43 }
 0x873   : > { %v7101_v57 = vrot.slane %v15673_v25, %v14551_v1  ;;  %v7049_v3 = vsel %vm4868_vm1, %v7048_v22, %v7044_v29  ;;  %v7058_v19 = vrot.slane %v17980_v16, %v14581_v52  ;;  %v7091_v42 = vrot.slane %v15645_v33, %v14565_v45  ;;  %v17982_v25 = vld [vmem:[#allocation176_spill] sm:$0xff] }
 0x874   : > { %v15860_v34 = vpop.permute.xlu1 %6583  ;;  %v7068_v41 = vsel %vm4868_vm1, %v7067_v32, %v7063_v4  ;;  %v7054_v9 = vsel %vm4875_vm2, %v7053_v11, %v7049_v3  ;;  %v7087_v38 = vsel %vm4868_vm1, %v7086_v35, %v7082_v60  ;;  %v7077_v6 = vrot.slane %v17981_v24, %v14581_v52  ;;  %v17983_v32 = vld [vmem:[#allocation127_spill] sm:$0xff] }
 0x875   : > { %v15866_v2 = vpop.permute.xlu0 %6304  ;;  %6484 = vperm.xlu1 %10417, %v15855_v48   ;;  %v7105_v28 = vrot.slane %v17982_v25, %v14554_v43  ;;  %v6712_v22 = vsel %vm4875_vm2, %v6711_v10, %v6707_v62  ;;  %v7072_v5 = vrot.slane %v17983_v32, %v14565_v45  ;;  %v7110_v33 = vrot.slane %v15677_v26, %v14565_v45 }
 0x876   : > { %v6731_v11 = vsel %vm4875_vm2, %v6730_v8, %v6726_v39  ;;  %v6717_v60 = vsel %vm4882_vm3, %v6716_v55, %v6712_v22  ;;  %v7120_v29 = vrot.slane %v15705_v36, %v14551_v1  ;;  %v7059_v4 = vsel %vm4882_vm3, %v7058_v19, %v7054_v9  ;;  %v17984_v8 = vld [vmem:[#allocation147_spill] sm:$0xff]  ;;  %v17985_v36 = vld [vmem:[#allocation146_spill] sm:$0xff] }
 0x877   : > { %v7106_v46 = vsel %vm4868_vm1, %v7105_v28, %v7101_v57  ;;  %v6736_v14 = vsel %vm4882_vm3, %v6735_v58, %v6731_v11  ;;  %v7092_v10 = vsel %vm4875_vm2, %v7091_v42, %v7087_v38  ;;  %v7073_v62 = vsel %vm4875_vm2, %v7072_v5, %v7068_v41 }
 0x878   : > { %v15881_v40 = vpop.permute.xlu1 %6301  ;;  %v7139_v26 = vrot.slane %v15733_v15, %v14551_v1  ;;  %v7078_v55 = vsel %vm4882_vm3, %v7077_v6, %v7073_v62  ;;  %v7096_v39 = vrot.slane %v17984_v8, %v14581_v52  ;;  %v7124_v23 = vrot.slane %v17985_v36, %v14554_v43 }
 0x879   : > { %v15893_v31 = vpop.permute.xlu0 %6310  ;;  %v7158_v58 = vrot.slane %v15757_v63, %v14551_v1  ;;  %v7111_v57 = vsel %vm4875_vm2, %v7110_v33, %v7106_v46  ;;  %v7129_v15 = vrot.slane %v15709_v37, %v14565_v45  ;;  %v7115_v3 = vrot.slane %v15719_v56, %v14581_v52 }
 0x87a   : > { %v7143_v41 = vrot.slane %v15723_v21, %v14554_v43  ;;  %v7125_v16 = vsel %vm4868_vm1, %v7124_v23, %v7120_v29  ;;  %v7148_v19 = vrot.slane %v15737_v59, %v14565_v45  ;;  %v7134_v63 = vrot.slane %v15745_v18, %v14581_v52 }
 0x87b   : > { %v7162_v42 = vrot.slane %v15749_v54, %v14554_v43  ;;  %v7167_v37 = vrot.slane %v15761_v30, %v14565_v45  ;;  %v7153_v56 = vrot.slane %v15769_v51, %v14581_v52  ;;  %v7177_v21 = vrot.slane %v15800_v53, %v14551_v1 }
 0x87c   : > { %v15916_v0 = vpop.permute.xlu1 %6307  ;;  %v7144_v9 = vsel %vm4868_vm1, %v7143_v41, %v7139_v26  ;;  %v7097_v59 = vsel %vm4882_vm3, %v7096_v39, %v7092_v10  ;;  %v7172_v54 = vrot.slane %v15811_v13, %v14581_v52  ;;  %v7186_v24 = vrot.slane %v15836_v61, %v14565_v45 }
 0x87d   : > { %v15924_v50 = vpop.permute.xlu0 %6316  ;;  %v7163_v18 = vsel %vm4868_vm1, %v7162_v42, %v7158_v58  ;;  %v7130_v30 = vsel %vm4875_vm2, %v7129_v15, %v7125_v16  ;;  %v7116_v51 = vsel %vm4882_vm3, %v7115_v3, %v7111_v57  ;;  %v7181_v53 = vrot.slane %v15779_v17, %v14554_v43 }
 0x87e   : > { %v7191_v25 = vrot.slane %v15860_v34, %v14581_v52  ;;  %v7214_v28 = vsel %vm5473_vm4, %v7078_v55, %v7059_v4  ;;  %v7149_v22 = vsel %vm4875_vm2, %v7148_v19, %v7144_v9  ;;  %v7135_v13 = vsel %vm4882_vm3, %v7134_v63, %v7130_v30 }
 0x87f   : > { %v7198_v61 = vsel %vm5483_vm9, %v6717_v60, %v15884_v7  ;;  %v7215_v32 = vsel %vm5475_vm5, %v7097_v59, %v7214_v28  ;;  %v7168_v5 = vsel %vm4875_vm2, %v7167_v37, %v7163_v18  ;;  %v7154_v33 = vsel %vm4882_vm3, %v7153_v56, %v7149_v22 }
 0x880   : > { %v15942_v44 = vpop.permute.xlu1 %6313  ;;  %v7182_v17 = vsel %vm4868_vm1, %v7181_v53, %v7177_v21  ;;  %v7216_v34 = vsel %vm5477_vm6, %v7116_v51, %v7215_v32  ;;  %v7173_v46 = vsel %vm4882_vm3, %v7172_v54, %v7168_v5  ;;  %v7199_v10 = vsel %vm5485_vm10, %v6736_v14, %v7198_v61 }
 0x881   : > { %v15951_v35 = vpop.permute.xlu0 %6322  ;;  %v7187_v29 = vsel %vm4875_vm2, %v7186_v24, %v7182_v17  ;;  %v7217_v7 = vsel %vm5479_vm7, %v7135_v13, %v7216_v34  ;;  %v7225_v55 = vsel %vm5512_vm11, %v7199_v10, 0.0  ;;  %v6744_v9 = vrot.slane %v15881_v40, %v14554_v43 }
 0x882   : > { %v7192_v60 = vsel %vm4882_vm3, %v7191_v25, %v7187_v29  ;;  %v7218_v62 = vsel %vm5481_vm8, %v7154_v33, %v7217_v7  ;;  %v6763_v37 = vrot.slane %v15942_v44, %v14554_v43  ;;  %v6740_v59 = vrot.slane %v15844_v27, %v14551_v1 }
 0x883   : > { %v7219_v8 = vsel %vm5483_vm9, %v7173_v46, %v7218_v62  ;;  %v6759_v18 = vrot.slane %v15893_v31, %v14551_v1  ;;  %v6778_v24 = vrot.slane %v15951_v35, %v14551_v1  ;;  %v6749_v51 = vrot.slane %v15866_v2, %v14565_v45 }
 0x884   : > { %v15974_v38 = vpop.permute.xlu1 %6319  ;;  %v7220_v36 = vsel %vm5485_vm10, %v7192_v60, %v7219_v8  ;;  %v6745_v30 = vsel %vm4868_vm1, %v6744_v9, %v6740_v59  ;;  %v6768_v27 = vrot.slane %v15924_v50, %v14565_v45 }
 0x885   : > { %v15982_v6 = vpop.permute.xlu0 %6328  ;;  %v7234_v58 = vsel %vm5512_vm11, %v7220_v36, 0.0  ;;  %v6764_v40 = vsel %vm4868_vm1, %v6763_v37, %v6759_v18  ;;  %v6773_v44 = vrot.slane %v15974_v38, %v14581_v52  ;;  %v6750_v22 = vsel %vm4875_vm2, %v6749_v51, %v6745_v30 }
 0x886   : > { %v6787_v25 = vrot.slane %v15982_v6, %v14565_v45  ;;  %v6754_v38 = vrot.slane %v15916_v0, %v14581_v52  ;;  %v6769_v13 = vsel %vm4875_vm2, %v6768_v27, %v6764_v40 }
 0x887   : > { %v6774_v50 = vsel %vm4882_vm3, %v6773_v44, %v6769_v13 }
 0x888   : > { %v6326_v11 = vpop.permute.xlu1 %6325 }
 0x889   : > { %v6338_v4 = vpop.permute.xlu0 %6337  ;;  %v6782_v56 = vrot.slane %v6326_v11, %v14554_v43 }
 0x88a   : > { %v6801_v61 = vrot.slane %v6338_v4, %v14554_v43 }
 0x88b   : > { %v6783_v53 = vsel %vm4868_vm1, %v6782_v56, %v6778_v24 }
 0x88c   : > { %v6335_v26 = vpop.permute.xlu1 %6334  ;;  %v6788_v32 = vsel %vm4875_vm2, %v6787_v25, %v6783_v53 }
 0x88d   : > { %7226 = vadd.xlane.f32.xlu0 %v7225_v55  ;;  %v6341_v39 = vpop.permute.xlu0 %6340  ;;  %v6797_v35 = vrot.slane %v6335_v26, %v14551_v1 }
 0x88e   : > { %v6806_v5 = vrot.slane %v6341_v39, %v14565_v45 }
 0x88f   : > { %v6802_v34 = vsel %vm4868_vm1, %v6801_v61, %v6797_v35 }
 0x890   : > { %v6332_v23 = vpop.permute.xlu1 %6331 }
 0x891   : > { %7235 = vadd.xlane.f32.xlu0 %v7234_v58  ;;  %v6350_v14 = vpop.permute.xlu0 %6349  ;;  %v6792_v33 = vrot.slane %v6332_v23, %v14581_v52  ;;  %v6755_v23 = vsel %vm4882_vm3, %v6754_v38, %v6750_v22  ;;  %v6807_v58 = vsel %vm4875_vm2, %v6806_v5, %v6802_v34 }
 0x892   : > { %v6820_v17 = vrot.slane %v6350_v14, %v14554_v43 }
 0x893   : > { %v6793_v14 = vsel %vm4882_vm3, %v6792_v33, %v6788_v32 }
 0x894   : > { %v6347_v57 = vpop.permute.xlu1 %6346 }
 0x895   : > { %v6353_v15 = vpop.permute.xlu0 %6352  ;;  %v6816_v2 = vrot.slane %v6347_v57, %v14551_v1 }
 0x896   : > { %v6825_v46 = vrot.slane %v6353_v15, %v14565_v45 }
 0x897   : > { %v6821_v7 = vsel %vm4868_vm1, %v6820_v17, %v6816_v2 }
 0x898   : > { %v6344_v3 = vpop.permute.xlu1 %6343 }
 0x899   : > { %v6362_v41 = vpop.permute.xlu0 %6361  ;;  %v6811_v29 = vrot.slane %v6344_v3, %v14581_v52  ;;  %v6826_v3 = vsel %vm4875_vm2, %v6825_v46, %v6821_v7 }
 0x89a   : > { %v6839_v4 = vrot.slane %v6362_v41, %v14554_v43 }
 0x89b   : > { %v6812_v41 = vsel %vm4882_vm3, %v6811_v29, %v6807_v58 }
 0x89c   : > { %v6359_v16 = vpop.permute.xlu1 %6358 }
 0x89d   : > { %v6365_v19 = vpop.permute.xlu0 %6364  ;;  %v6835_v6 = vrot.slane %v6359_v16, %v14551_v1 }
 0x89e   : > { %v6844_v60 = vrot.slane %v6365_v19, %v14565_v45 }
 0x89f   : > { %v6840_v55 = vsel %vm4868_vm1, %v6839_v4, %v6835_v6 }
 0x8a0   : > { %v6356_v63 = vpop.permute.xlu1 %6355  ;;  %v6845_v9 = vsel %vm4875_vm2, %v6844_v60, %v6840_v55 }
 0x8a1   : > { %v6374_v42 = vpop.permute.xlu0 %6373  ;;  %v6830_v62 = vrot.slane %v6356_v63, %v14581_v52 }
 0x8a2   : > { %v6858_v26 = vrot.slane %v6374_v42, %v14554_v43  ;;  %v7200_v42 = vsel %vm5473_vm4, %v6774_v50, %v6755_v23 }
 0x8a3   : > { %v6831_v37 = vsel %vm4882_vm3, %v6830_v62, %v6826_v3 }
 0x8a4   : > { %v6371_v21 = vpop.permute.xlu1 %6370 }
 0x8a5   : > { %v6377_v54 = vpop.permute.xlu0 %6376  ;;  %v6854_v0 = vrot.slane %v6371_v21, %v14551_v1  ;;  %v7201_v21 = vsel %vm5475_vm5, %v6793_v14, %v7200_v42 }
 0x8a6   : > { %v6863_v8 = vrot.slane %v6377_v54, %v14565_v45  ;;  %v7202_v24 = vsel %vm5477_vm6, %v6812_v41, %v7201_v21 }
 0x8a7   : > { %v6859_v57 = vsel %vm4868_vm1, %v6858_v26, %v6854_v0  ;;  %v7203_v44 = vsel %vm5479_vm7, %v6831_v37, %v7202_v24 }
 0x8a8   : > { %v6368_v31 = vpop.permute.xlu1 %6367  ;;  %v6864_v59 = vsel %vm4875_vm2, %v6863_v8, %v6859_v57 }
 0x8a9   : > { %v6386_v28 = vpop.permute.xlu0 %6385  ;;  %v6849_v39 = vrot.slane %v6368_v31, %v14581_v52 }
 0x8aa   : > { %v6877_v16 = vrot.slane %v6386_v28, %v14554_v43 }
 0x8ab   : > { %v6850_v18 = vsel %vm4882_vm3, %v6849_v39, %v6845_v9 }
 0x8ac   : > { %v6383_v11 = vpop.permute.xlu1 %6382  ;;  %v7204_v31 = vsel %vm5481_vm8, %v6850_v18, %v7203_v44 }
 0x8ad   : > { %v6389_v10 = vpop.permute.xlu0 %6388  ;;  %v6873_v36 = vrot.slane %v6383_v11, %v14551_v1 }
 0x8ae   : > { %v6882_v56 = vrot.slane %v6389_v10, %v14565_v45 }
 0x8af   : > { %v6878_v54 = vsel %vm4868_vm1, %v6877_v16, %v6873_v36 }
 0x8b0   : > { %v6380_v15 = vpop.permute.xlu1 %6379  ;;  %v6883_v53 = vsel %vm4875_vm2, %v6882_v56, %v6878_v54 }
 0x8b1   : > { %v6868_v19 = vrot.slane %v6380_v15, %v14581_v52  ;;  %v6395_v63 = vpop.permute.xlu0 %6394 }
 0x8b2   : > { %v6892_v58 = vrot.slane %v6395_v63, %v14551_v1 }
 0x8b3   : > { %v6869_v30 = vsel %vm4882_vm3, %v6868_v19, %v6864_v59 }
 0x8b4   : > { %v6392_v40 = vpop.permute.xlu1 %6391  ;;  %v7205_v35 = vsel %vm5483_vm9, %v6869_v30, %v7204_v31 }
 0x8b5   : > { %v6887_v51 = vrot.slane %v6392_v40, %v14581_v52  ;;  %v6407_v27 = vpop.permute.xlu0 %6406 }
 0x8b6   : > { %v6911_v39 = vrot.slane %v6407_v27, %v14551_v1 }
 0x8b7   : > { %v6888_v25 = vsel %vm4882_vm3, %v6887_v51, %v6883_v53 }
 0x8b8   : > { %v6398_v28 = vpop.permute.xlu1 %6397  ;;  %v7206_v22 = vsel %vm5485_vm10, %v6888_v25, %v7205_v35 }
 0x8b9   : > { %v6413_v38 = vpop.permute.xlu0 %6412  ;;  %v7228_v13 = vsel %vm5512_vm11, %v7206_v22, 0.0  ;;  %v6896_v36 = vrot.slane %v6398_v28, %v14554_v43 }
 0x8ba   : > { %7229 = vadd.xlane.f32.xlu1 %v7228_v13  ;;  %v6920_v57 = vrot.slane %v6413_v38, %v14565_v45 }
 0x8bb   : > { %v6897_v16 = vsel %vm4868_vm1, %v6896_v36, %v6892_v58 }
 0x8bc   : > { %v6410_v2 = vpop.permute.xlu1 %6409 }
 0x8bd   : > { %v6422_v50 = vpop.permute.xlu0 %6421  ;;  %v6915_v8 = vrot.slane %v6410_v2, %v14554_v43 }
 0x8be   : > { %v6934_v9 = vrot.slane %v6422_v50, %v14554_v43 }
 0x8bf   : > { %v6916_v14 = vsel %vm4868_vm1, %v6915_v8, %v6911_v39 }
 0x8c0   : > { %v6401_v61 = vpop.permute.xlu1 %6400  ;;  %v6921_v37 = vsel %vm4875_vm2, %v6920_v57, %v6916_v14 }
 0x8c1   : > { %v6416_v32 = vpop.permute.xlu0 %6415  ;;  %v6901_v15 = vrot.slane %v6401_v61, %v14565_v45 }
 0x8c2   : > { %v6925_v21 = vrot.slane %v6416_v32, %v14581_v52 }
 0x8c3   : > { %v6902_v24 = vsel %vm4875_vm2, %v6901_v15, %v6897_v16 }
 0x8c4   : > { %v6419_v6 = vpop.permute.xlu1 %6418 }
 0x8c5   : > { %v6431_v5 = vpop.permute.xlu0 %6430  ;;  %v6930_v3 = vrot.slane %v6419_v6, %v14551_v1 }
 0x8c6   : > { %v6949_v59 = vrot.slane %v6431_v5, %v14551_v1 }
 0x8c7   : > { %v6935_v30 = vsel %vm4868_vm1, %v6934_v9, %v6930_v3 }
 0x8c8   : > { %v6404_v33 = vpop.permute.xlu1 %6403 }
 0x8c9   : > { %v6437_v17 = vpop.permute.xlu0 %6436  ;;  %v6906_v63 = vrot.slane %v6404_v33, %v14581_v52 }
 0x8ca   : > { %v6958_v51 = vrot.slane %v6437_v17, %v14565_v45 }
 0x8cb   : > { %v6907_v35 = vsel %vm4882_vm3, %v6906_v63, %v6902_v24 }
 0x8cc   : > { %v6425_v0 = vpop.permute.xlu1 %6424 }
 0x8cd   : > { %v6446_v11 = vpop.permute.xlu0 %6445  ;;  %v6939_v18 = vrot.slane %v6425_v0, %v14565_v45  ;;  %v6926_v0 = vsel %vm4882_vm3, %v6925_v21, %v6921_v37 }
 0x8ce   : > { %v6972_v40 = vrot.slane %v6446_v11, %v14554_v43 }
 0x8cf   : > { %v6940_v2 = vsel %vm4875_vm2, %v6939_v18, %v6935_v30  ;;  %v17988_v30 = vld [vmem:[#allocation157_spill] sm:$0xff] }
 0x8d0   : > { %v6434_v34 = vpop.permute.xlu1 %6433 }
 0x8d1   : > { %v6449_v46 = vpop.permute.xlu0 %6448  ;;  %v6953_v19 = vrot.slane %v6434_v34, %v14554_v43 }
 0x8d2   : > { %v6977_v50 = vrot.slane %v6449_v46, %v14565_v45  ;;  %v7207_v46 = vsel %vm5473_vm4, %v6926_v0, %v6907_v35  ;;  %v17991_v35 = vld [vmem:[#allocation149_spill] sm:$0xff] }
 0x8d3   : > { %v6954_v27 = vsel %vm4868_vm1, %v6953_v19, %v6949_v59  ;;  %v17986_v59 = vld [vmem:[#allocation31_spill] sm:$0xff] }
 0x8d4   : > { %v6428_v29 = vpop.permute.xlu1 %6427  ;;  %v6959_v33 = vsel %vm4875_vm2, %v6958_v51, %v6954_v27  ;;  %v17989_v51 = vld [vmem:[#allocation151_spill] sm:$0xff] }
 0x8d5   : > { %v6458_v4 = vpop.permute.xlu0 %6457  ;;  %v6944_v44 = vrot.slane %v6428_v29, %v14581_v52 }
 0x8d6   : > { %v6991_v53 = vrot.slane %v6458_v4, %v14554_v43 }
 0x8d7   : > { %v6945_v6 = vsel %vm4882_vm3, %v6944_v44, %v6940_v2  ;;  %v17993_v2 = vld [vmem:[#allocation159_spill] sm:$0xff] }
 0x8d8   : > { %v6443_v10 = vpop.permute.xlu1 %6442 }
 0x8d9   : > { %v6461_v7 = vpop.permute.xlu0 %6460  ;;  %v6968_v56 = vrot.slane %v6443_v10, %v14551_v1 }
 0x8da   : > { %v6996_v5 = vrot.slane %v6461_v7, %v14565_v45  ;;  %v7208_v7 = vsel %vm5475_vm5, %v6945_v6, %v7207_v46  ;;  %v17995_v6 = vld [vmem:[#allocation174_spill] sm:$0xff] }
 0x8db   : > { %v6973_v28 = vsel %vm4868_vm1, %v6972_v40, %v6968_v56 }
 0x8dc   : > { %v6440_v60 = vpop.permute.xlu1 %6439  ;;  %v6978_v34 = vsel %vm4875_vm2, %v6977_v50, %v6973_v28 }
 0x8dd   : > { %v6470_v62 = vpop.permute.xlu0 %6469  ;;  %v6963_v31 = vrot.slane %v6440_v60, %v14581_v52 }
 0x8de   : > { %v7010_v17 = vrot.slane %v6470_v62, %v14554_v43 }
 0x8df   : > { %v6964_v11 = vsel %vm4882_vm3, %v6963_v31, %v6959_v33  ;;  %v17990_v31 = vld [vmem:[#allocation163_spill] sm:$0xff] }
 0x8e0   : > { %v6455_v26 = vpop.permute.xlu1 %6454  ;;  %v7209_v39 = vsel %vm5477_vm6, %v6964_v11, %v7208_v7  ;;  %v17997_v11 = vld [vmem:[#allocation107_spill] sm:$0xff] }
 0x8e1   : > { %v6473_v55 = vpop.permute.xlu0 %6472  ;;  %v6987_v54 = vrot.slane %v6455_v26, %v14551_v1 }
 0x8e2   : > { %v7015_v26 = vrot.slane %v6473_v55, %v14565_v45 }
 0x8e3   : > { %v6992_v61 = vsel %vm4868_vm1, %v6991_v53, %v6987_v54  ;;  %v17987_v54 = vld [vmem:[#allocation139_spill] sm:$0xff] }
 0x8e4   : > { %v6452_v23 = vpop.permute.xlu1 %6451  ;;  %v6997_v60 = vsel %vm4875_vm2, %v6996_v5, %v6992_v61  ;;  %v17994_v61 = vld [vmem:[#allocation158_spill] sm:$0xff] }
 0x8e5   : > { %v6482_v41 = vpop.permute.xlu0 %6481  ;;  %v6982_v22 = vrot.slane %v6452_v23, %v14581_v52 }
 0x8e6   : > { %v7029_v58 = vrot.slane %v6482_v41, %v14554_v43 }
 0x8e7   : > { %v6983_v4 = vsel %vm4882_vm3, %v6982_v22, %v6978_v34  ;;  %v17992_v22 = vld [vmem:[#allocation156_spill] sm:$0xff] }
 0x8e8   : > { %v6467_v42 = vpop.permute.xlu1 %6466  ;;  %v7210_v23 = vsel %vm5479_vm7, %v6983_v4, %v7209_v39 }
 0x8e9   : > { %v7006_v38 = vrot.slane %v6467_v42, %v14551_v1  ;;  %v6476_v13 = vpop.permute.xlu0 %6475 }
 0x8ea   : > { %v7020_v15 = vrot.slane %v6476_v13, %v14581_v52 }
 0x8eb   : > { %v7011_v10 = vsel %vm4868_vm1, %v7010_v17, %v7006_v38  ;;  %v17996_v17 = vld [vmem:[#allocation171_spill] sm:$0xff] }
 0x8ec   : > { %v6464_v25 = vpop.permute.xlu1 %6463  ;;  %v7016_v14 = vsel %vm4875_vm2, %v7015_v26, %v7011_v10  ;;  %v17999_v26 = vld [vmem:[#allocation167_spill] sm:$0xff] }
 0x8ed   : > { %v7001_v32 = vrot.slane %v6464_v25, %v14581_v52  ;;  %v6488_v36 = vpop.permute.xlu0 %6487  ;;  %v7021_v42 = vsel %vm4882_vm3, %v7020_v15, %v7016_v14 }
 0x8ee   : > { %v7039_v16 = vrot.slane %v6488_v36, %v14581_v52 }
 0x8ef   : > { %v7002_v62 = vsel %vm4882_vm3, %v7001_v32, %v6997_v60  ;;  %v17998_v60 = vld [vmem:[#allocation155_spill] sm:$0xff] }
 0x8f0   : > { %v6479_v29 = vpop.permute.xlu1 %6478  ;;  %v7211_v55 = vsel %vm5481_vm8, %v7002_v62, %v7210_v23  ;;  %v18000_v23 = vld [vmem:[#allocation165_spill] sm:$0xff] }
 0x8f1   : > { %v7025_v8 = vrot.slane %v6479_v29, %v14551_v1  ;;  %v7212_v41 = vsel %vm5483_vm9, %v7021_v42, %v7211_v55 }
 0x8f3   : > { %v7030_v19 = vsel %vm4868_vm1, %v7029_v58, %v7025_v8 }
 0x8f4   : > { %v6485_v57 = vpop.permute.xlu1 %6484 }
 0x8f5   : > { %v7034_v3 = vrot.slane %v6485_v57, %v14565_v45 }
 0x8f7   : > { %v7035_v9 = vsel %vm4875_vm2, %v7034_v3, %v7030_v19  ;;  %v18001_v3 = vld [vmem:[#allocation169_spill] sm:$0xff] }
 0x8f8   : > { %v7040_v37 = vsel %vm4882_vm3, %v7039_v16, %v7035_v9  ;;  %v18002_v16 = vld [vmem:[#allocation104_spill] sm:$0xff]  ;;  %v18003_v9 = vld [vmem:[#allocation175_spill] sm:$0xff] }
 0x8f9   : > { %v7213_v63 = vsel %vm5485_vm10, %v7040_v37, %v7212_v41 }
 0x8fa   : > { %v7231_v56 = vsel %vm5512_vm11, %v7213_v63, 0.0 }
 0x8fb   : > { %7232 = vadd.xlane.f32.xlu0 %v7231_v56 }
 0x91a   : > { %v16148_v21 = vpop.xlane.xlu0 %7226 }
 0x91b   : > { %v7244_v18 = vrot.slane %v16148_v21, %v17986_v59  ;;  %v7248_v24 = vrot.slane %v16148_v21, %v17987_v54  ;;  %v7252_v40 = vrot.slane %v16148_v21, %v17988_v30  ;;  %v7256_v27 = vrot.slane %v16148_v21, %v17989_v51 }
 0x91c   : > { %v7260_v7 = vrot.slane %v16148_v21, %v17998_v60  ;;  %v7264_v37 = vrot.slane %v16148_v21, %v18003_v9 }
 0x91d   : > { %11002 = vrcp.f32 %v7244_v18  ;;  %v18004_v18 = vld [vmem:[#allocation125_spill] sm:$0xff] }
 0x91e   : > { %11004 = vrcp.f32 %v7248_v24 }
 0x91f   : > { %11006 = vrcp.f32 %v7252_v40  ;;  %v18005_v40 = vld [vmem:[#allocation57_spill] sm:$0xff] }
 0x920   : > { %11008 = vrcp.f32 %v7256_v27 }
 0x921   : > { %11010 = vrcp.f32 %v7260_v7 }
 0x922   : > { %11012 = vrcp.f32 %v7264_v37 }
 0x927   : > { %v11003_v44 = vpop.eup %11002 }
 0x928   : > { %v11005_v53 = vpop.eup %11004  ;;  %v7402_v25 = vmul.f32 %v11003_v44, %v17990_v31  ;;  %v7403_v28 = vmul.f32 %v11003_v44, %v17991_v35  ;;  %v7404_v38 = vmul.f32 %v11003_v44, %v17992_v22  ;;  %v7405_v50 = vmul.f32 %v11003_v44, %v17993_v2  ;;  %v18006_v35 = vld [vmem:[#allocation177_spill] sm:$0xff]  ;;  %v18007_v22 = vld [vmem:[#allocation38_spill] sm:$0xff] }
 0x929   : > { %v11007_v13 = vpop.eup %11006  ;;  %v7407_v32 = vmul.f32 %v11005_v53, %v17994_v61  ;;  %v7408_v5 = vmul.f32 %v11005_v53, %v17995_v6  ;;  %v7409_v62 = vmul.f32 %v11005_v53, %v17999_v26  ;;  %v7410_v58 = vmul.f32 %v11005_v53, %v18000_v23  ;;  %v18013_v26 = vld [vmem:[#allocation81_spill] sm:$0xff] }
 0x92a   : > { %v7561_v33 = vpack.c.bf16 %v7403_v28, %v7402_v25  ;;  %v7412_v0 = vmul.f32 %v11007_v13, %v17996_v17  ;;  %v7413_v34 = vmul.f32 %v11007_v13, %v17997_v11  ;;  %v7562_v4 = vpack.c.bf16 %v7405_v50, %v7404_v38  ;;  %v11009_v42 = vpop.eup %11008 }
 0x92b   : > { %v7563_v10 = vpack.c.bf16 %v7408_v5, %v7407_v32  ;;  %v7564_v15 = vpack.c.bf16 %v7410_v58, %v7409_v62  ;;  %v7414_v55 = vmul.f32 %v11007_v13, %v18001_v3  ;;  %v7415_v19 = vmul.f32 %v11007_v13, %v18002_v16  ;;  %v11011_v27 = vpop.eup %11010  ;;  %v18008_v13 = vld [vmem:[#allocation78_spill] sm:$0xff]  ;;  %v18015_v58 = vld [vmem:[#allocation83_spill] sm:$0xff]  ;;  %v16188_v16 = vpop.xlane.xlu0 %7235 }
 0x92c   : > { %v7690_v29 = vunpack.c.h.b16 %v7561_v33  ;;  %v7689_v46 = vunpack.c.l.b16 %v7561_v33  ;;  %v7691_v8 = vunpack.c.l.b16 %v7562_v4  ;;  %v7565_v36 = vpack.c.bf16 %v7413_v34, %v7412_v0  ;;  %v18009_v32 = vld [vmem:[#allocation122_spill] sm:$0xff]  ;;  %v11013_v17 = vpop.eup %11012 }
 0x92d   : > { %v7693_v39 = vunpack.c.l.b16 %v7563_v10  ;;  %v7694_v14 = vunpack.c.h.b16 %v7563_v10  ;;  %v7692_v41 = vunpack.c.h.b16 %v7562_v4  ;;  %v7695_v63 = vunpack.c.l.b16 %v7564_v15  ;;  %v18010_v5 = vld [vmem:[#allocation54_spill] sm:$0xff]  ;;  %v18012_v10 = vld [vmem:[#allocation79_spill] sm:$0xff] }
 0x92e   : > { %7821 = vperm.xlu0 %10416, %v7690_v29   ;;  %7818 = vperm.xlu1 %10417, %v7689_v46   ;;  %v7697_v57 = vunpack.c.l.b16 %v7565_v36  ;;  %v7566_v56 = vpack.c.bf16 %v7415_v19, %v7414_v55  ;;  %v7417_v24 = vmul.f32 %v11009_v42, %v18004_v18  ;;  %v7418_v44 = vmul.f32 %v11009_v42, %v18005_v40  ;;  %v18011_v46 = vld [vmem:[#allocation30_spill] sm:$0xff]  ;;  %v18018_v18 = vld [vmem:[#allocation43_spill] sm:$0xff] }
 0x92f   : > { %v7698_v31 = vunpack.c.h.b16 %v7565_v36  ;;  %v7268_v28 = vrot.slane %v16148_v21, %v18006_v35  ;;  %v7422_v38 = vmul.f32 %v11011_v27, %v18007_v22  ;;  %v7423_v2 = vmul.f32 %v11011_v27, %v18008_v13  ;;  %v18014_v36 = vld [vmem:[#allocation80_spill] sm:$0xff]  ;;  %v18019_v40 = vld [vmem:[#allocation66_spill] sm:$0xff] }
 0x930   : > { %v7699_v53 = vunpack.c.l.b16 %v7566_v56  ;;  %v7567_v25 = vpack.c.bf16 %v7418_v44, %v7417_v24  ;;  %v7696_v61 = vunpack.c.h.b16 %v7564_v15  ;;  %v7419_v6 = vmul.f32 %v11009_v42, %v18009_v32  ;;  %v18020_v13 = vld [vmem:[#allocation44_spill] sm:$0xff] }
 0x931   : > { %v7420_v33 = vmul.f32 %v11009_v42, %v18010_v5  ;;  %11014 = vrcp.f32 %v7268_v28  ;;  %v7700_v0 = vunpack.c.h.b16 %v7566_v56  ;;  %v7569_v34 = vpack.c.bf16 %v7423_v2, %v7422_v38  ;;  %v18016_v42 = vld [vmem:[#allocation58_spill] sm:$0xff]  ;;  %v18022_v5 = vld [vmem:[#allocation59_spill] sm:$0xff] }
 0x932   : > { %7824 = vperm.xlu0 %10416, %v7691_v8   ;;  %7830 = vperm.xlu1 %10417, %v7693_v39   ;;  %v7702_v50 = vunpack.c.h.b16 %v7567_v25  ;;  %v7701_v11 = vunpack.c.l.b16 %v7567_v25  ;;  %v7272_v4 = vrot.slane %v16148_v21, %v18011_v46  ;;  %v7427_v7 = vmul.f32 %v11013_v17, %v18012_v10 }
 0x933   : > { %v7568_v29 = vpack.c.bf16 %v7420_v33, %v7419_v6  ;;  %v7428_v62 = vmul.f32 %v11013_v17, %v18013_v26  ;;  %v7705_v8 = vunpack.c.l.b16 %v7569_v34  ;;  %v7424_v23 = vmul.f32 %v11011_v27, %v18014_v36  ;;  %v18025_v36 = vld [vmem:[#allocation132_spill] sm:$0xff] }
 0x934   : > { %11016 = vrcp.f32 %v7272_v4  ;;  %v7706_v55 = vunpack.c.h.b16 %v7569_v34  ;;  %v7429_v24 = vmul.f32 %v11013_v17, %v18018_v18  ;;  %v7430_v44 = vmul.f32 %v11013_v17, %v18019_v40  ;;  %v18023_v17 = vld [vmem:[#allocation95_spill] sm:$0xff] }
 0x935   : > { %v7703_v39 = vunpack.c.l.b16 %v7568_v29  ;;  %v7704_v3 = vunpack.c.h.b16 %v7568_v29  ;;  %v7344_v38 = vrot.slane %v16188_v16, %v17987_v54  ;;  %v7348_v10 = vrot.slane %v16188_v16, %v17988_v30 }
 0x936   : > { %7842 = vperm.xlu0 %10416, %v7697_v57   ;;  %7833 = vperm.xlu1 %10417, %v7694_v14   ;;  %v7425_v14 = vmul.f32 %v11011_v27, %v18015_v58  ;;  %v7571_v57 = vpack.c.bf16 %v7428_v62, %v7427_v7  ;;  %v7340_v27 = vrot.slane %v16188_v16, %v17986_v59  ;;  %v18026_v58 = vld [vmem:[#allocation84_spill] sm:$0xff] }
 0x937   : > { %v7572_v22 = vpack.c.bf16 %v7430_v44, %v7429_v24 }
 0x938   : > { %v7570_v21 = vpack.c.bf16 %v7425_v14, %v7424_v23  ;;  %v7709_v19 = vunpack.c.l.b16 %v7571_v57  ;;  %v7710_v25 = vunpack.c.h.b16 %v7571_v57  ;;  %11018 = vrcp.f32 %v7340_v27  ;;  %v18030_v27 = vld [vmem:[#allocation96_spill] sm:$0xff] }
 0x939   : > { %v7711_v6 = vunpack.c.l.b16 %v7572_v22  ;;  %11020 = vrcp.f32 %v7344_v38 }
 0x93a   : > { %7827 = vperm.xlu0 %10416, %v7692_v41   ;;  %7836 = vperm.xlu1 %10417, %v7695_v63   ;;  %v7707_v41 = vunpack.c.l.b16 %v7570_v21  ;;  %v18017_v63 = vld [vmem:[#allocation75_spill] sm:$0xff]  ;;  %11022 = vrcp.f32 %v7348_v10 }
 0x93b   : > { %v11015_v15 = vpop.eup %11014 }
 0x93c   : > { %v7432_v37 = vmul.f32 %v11015_v15, %v18016_v42  ;;  %v7433_v56 = vmul.f32 %v11015_v15, %v18017_v63  ;;  %v7434_v33 = vmul.f32 %v11015_v15, %v18022_v5  ;;  %v7352_v42 = vrot.slane %v16188_v16, %v17989_v51  ;;  %v18029_v63 = vld [vmem:[#allocation141_spill] sm:$0xff] }
 0x93d   : > { %v18034_v5 = vld [vmem:[#allocation45_spill] sm:$0xff] }
 0x93e   : > { %7848 = vperm.xlu0 %10416, %v7699_v53   ;;  %7845 = vperm.xlu1 %10417, %v7698_v31   ;;  %v11017_v53 = vpop.eup %11016  ;;  %v7708_v31 = vunpack.c.h.b16 %v7570_v21  ;;  %v7573_v28 = vpack.c.bf16 %v7433_v56, %v7432_v37  ;;  %v18027_v21 = vld [vmem:[#allocation130_spill] sm:$0xff]  ;;  %v18028_v37 = vld [vmem:[#allocation97_spill] sm:$0xff]  ;;  %11024 = vrcp.f32 %v7352_v42 }
 0x93f   : > { %v7437_v2 = vmul.f32 %v11017_v53, %v18020_v13  ;;  %v7440_v23 = vmul.f32 %v11017_v53, %v18025_v36  ;;  %v18032_v13 = vld [vmem:[#allocation138_spill] sm:$0xff]  ;;  %v18037_v36 = vld [vmem:[#allocation47_spill] sm:$0xff] }
 0x940   : > { %v7713_v32 = vunpack.c.l.b16 %v7573_v28  ;;  %v7714_v34 = vunpack.c.h.b16 %v7573_v28 }
 0x942   : > { %7857 = vperm.xlu0 %10416, %v7702_v50   ;;  %7839 = vperm.xlu1 %10417, %v7696_v61   ;;  %v18021_v50 = vld [vmem:[#allocation93_spill] sm:$0xff]  ;;  %v11019_v7 = vpop.eup %11018 }
 0x943   : > { %v7438_v61 = vmul.f32 %v11017_v53, %v18021_v50  ;;  %v7522_v14 = vmul.f32 %v11019_v7, %v18026_v58  ;;  %v11021_v57 = vpop.eup %11020  ;;  %v18033_v50 = vld [vmem:[#allocation100_spill] sm:$0xff] }
 0x944   : > { %v7528_v56 = vmul.f32 %v11021_v57, %v18029_v63  ;;  %v11023_v28 = vpop.eup %11022  ;;  %v7364_v63 = vrot.slane %v16188_v16, %v18006_v35 }
 0x945   : > { %v7575_v29 = vpack.c.bf16 %v7438_v61, %v7437_v2  ;;  %v7524_v2 = vmul.f32 %v11019_v7, %v18032_v13  ;;  %v7525_v61 = vmul.f32 %v11019_v7, %v18033_v50 }
 0x946   : > { %7851 = vperm.xlu0 %10416, %v7700_v0   ;;  %7854 = vperm.xlu1 %10417, %v7701_v11   ;;  %v7435_v0 = vmul.f32 %v11015_v15, %v18023_v17  ;;  %v7712_v11 = vunpack.c.h.b16 %v7572_v22 }
 0x947   : > { %v7717_v26 = vunpack.c.l.b16 %v7575_v29 }
 0x948   : > { %v7574_v4 = vpack.c.bf16 %v7435_v0, %v7434_v33  ;;  %v7532_v33 = vmul.f32 %v11023_v28, %v18034_v5 }
 0x94a   : > { %7866 = vperm.xlu0 %10416, %v7705_v8   ;;  %7860 = vperm.xlu1 %10417, %v7703_v39   ;;  %v7715_v62 = vunpack.c.l.b16 %v7574_v4  ;;  %v18024_v8 = vld [vmem:[#allocation85_spill] sm:$0xff]  ;;  %v7716_v15 = vunpack.c.h.b16 %v7574_v4 }
 0x94b   : > { %v7439_v39 = vmul.f32 %v11017_v53, %v18024_v8  ;;  %v7529_v53 = vmul.f32 %v11021_v57, %v18030_v27  ;;  %v18036_v8 = vld [vmem:[#allocation106_spill] sm:$0xff] }
 0x94e   : > { %7863 = vperm.xlu0 %10416, %v7704_v3   ;;  %7869 = vperm.xlu1 %10417, %v7706_v55   ;;  %v7718_v3 = vunpack.c.h.b16 %v7575_v29  ;;  %v7576_v55 = vpack.c.bf16 %v7440_v23, %v7439_v39  ;;  %v7534_v39 = vmul.f32 %v11023_v28, %v18036_v8  ;;  %v7535_v23 = vmul.f32 %v11023_v28, %v18037_v36 }
 0x950   : > { %v7720_v18 = vunpack.c.h.b16 %v7576_v55  ;;  %v7719_v24 = vunpack.c.l.b16 %v7576_v55  ;;  %v7614_v42 = vpack.c.bf16 %v7535_v23, %v7534_v39  ;;  %v18048_v23 = vld [vmem:[#allocation63_spill] sm:$0xff] }
 0x952   : > { %7878 = vperm.xlu0 %10416, %v7709_v19   ;;  %7872 = vperm.xlu1 %10417, %v7707_v41   ;;  %v7523_v19 = vmul.f32 %v11019_v7, %v18027_v21  ;;  %v7527_v41 = vmul.f32 %v11021_v57, %v18028_v37  ;;  %v11025_v7 = vpop.eup %11024 }
 0x954   : > { %v7609_v40 = vpack.c.bf16 %v7523_v19, %v7522_v14  ;;  %v7611_v44 = vpack.c.bf16 %v7528_v56, %v7527_v41  ;;  %v7795_v56 = vunpack.c.l.b16 %v7614_v42 }
 0x956   : > { %7875 = vperm.xlu0 %10416, %v7708_v31   ;;  %7881 = vperm.xlu1 %10417, %v7710_v25   ;;  %v18031_v31 = vld [vmem:[#allocation60_spill] sm:$0xff]  ;;  %v7786_v22 = vunpack.c.h.b16 %v7609_v40  ;;  %v7785_v38 = vunpack.c.l.b16 %v7609_v40  ;;  %v7790_v17 = vunpack.c.h.b16 %v7611_v44  ;;  %v7789_v0 = vunpack.c.l.b16 %v7611_v44  ;;  %v18041_v44 = vld [vmem:[#allocation73_spill] sm:$0xff] }
 0x957   : > { %v7530_v25 = vmul.f32 %v11021_v57, %v18031_v31  ;;  %v18038_v57 = vld [vmem:[#allocation64_spill] sm:$0xff]  ;;  %v7540_v27 = vmul.f32 %v11025_v7, %v18041_v44 }
 0x95a   : > { %7890 = vperm.xlu0 %10416, %v7713_v32   ;;  %7884 = vperm.xlu1 %10417, %v7711_v6   ;;  %v7356_v32 = vrot.slane %v16188_v16, %v17998_v60  ;;  %v7612_v6 = vpack.c.bf16 %v7530_v25, %v7529_v53  ;;  %v18042_v53 = vld [vmem:[#allocation74_spill] sm:$0xff]  ;;  %v18043_v25 = vld [vmem:[#allocation67_spill] sm:$0xff] }
 0x95c   : > { %11026 = vrcp.f32 %v7356_v32  ;;  %v7791_v4 = vunpack.c.l.b16 %v7612_v6  ;;  %v7792_v19 = vunpack.c.h.b16 %v7612_v6  ;;  %v18044_v6 = vld [vmem:[#allocation62_spill] sm:$0xff] }
 0x95e   : > { %7887 = vperm.xlu0 %10416, %v7712_v11   ;;  %7893 = vperm.xlu1 %10417, %v7714_v34   ;;  %v7610_v11 = vpack.c.bf16 %v7525_v61, %v7524_v2  ;;  %v18035_v34 = vld [vmem:[#allocation101_spill] sm:$0xff]  ;;  %v7368_v61 = vrot.slane %v16188_v16, %v18011_v46 }
 0x95f   : > { %v7533_v29 = vmul.f32 %v11023_v28, %v18035_v34 }
 0x960   : > { %v7787_v10 = vunpack.c.l.b16 %v7610_v11  ;;  %v7788_v21 = vunpack.c.h.b16 %v7610_v11  ;;  %v18046_v11 = vld [vmem:[#allocation55_spill] sm:$0xff] }
 0x962   : > { %7902 = vperm.xlu0 %10416, %v7717_v26   ;;  %7896 = vperm.xlu1 %10417, %v7715_v62   ;;  %v7613_v26 = vpack.c.bf16 %v7533_v29, %v7532_v33  ;;  %v7360_v62 = vrot.slane %v16188_v16, %v18003_v9  ;;  %v18045_v33 = vld [vmem:[#allocation50_spill] sm:$0xff]  ;;  %v18047_v29 = vld [vmem:[#allocation128_spill] sm:$0xff] }
 0x964   : > { %v7794_v58 = vunpack.c.h.b16 %v7613_v26  ;;  %v7793_v14 = vunpack.c.l.b16 %v7613_v26  ;;  %11028 = vrcp.f32 %v7360_v62 }
 0x965   : > { %11030 = vrcp.f32 %v7364_v63 }
 0x966   : > { %7899 = vperm.xlu0 %10416, %v7716_v15   ;;  %7905 = vperm.xlu1 %10417, %v7718_v3   ;;  %v7537_v15 = vmul.f32 %v11025_v7, %v18038_v57  ;;  %v18039_v3 = vld [vmem:[#allocation105_spill] sm:$0xff]  ;;  %v11027_v41 = vpop.eup %11026  ;;  %11032 = vrcp.f32 %v7368_v61 }
 0x967   : > { %v7538_v55 = vmul.f32 %v11025_v7, %v18039_v3  ;;  %v7542_v31 = vmul.f32 %v11027_v41, %v18042_v53  ;;  %v7543_v28 = vmul.f32 %v11027_v41, %v18043_v25  ;;  %v7544_v5 = vmul.f32 %v11027_v41, %v18044_v6  ;;  %v18050_v3 = vld [vmem:[#allocation87_spill] sm:$0xff] }
 0x968   : > { %v18054_v25 = vld [vmem:[#allocation111_spill] sm:$0xff] }
 0x969   : > { %v7615_v37 = vpack.c.bf16 %v7538_v55, %v7537_v15  ;;  %v7617_v50 = vpack.c.bf16 %v7543_v28, %v7542_v31 }
 0x96a   : > { %7911 = vperm.xlu0 %10416, %v7720_v18   ;;  %7908 = vperm.xlu1 %10417, %v7719_v24   ;;  %v18040_v24 = vld [vmem:[#allocation39_spill] sm:$0xff] }
 0x96b   : > { %v7797_v18 = vunpack.c.l.b16 %v7615_v37  ;;  %v7539_v40 = vmul.f32 %v11025_v7, %v18040_v24  ;;  %v16238_v7 = vpop.xlane.xlu1 %7229 }
 0x96c   : > { %v7276_v39 = vrot.slane %v16238_v7, %v17986_v59 }
 0x96d   : > { %v7616_v13 = vpack.c.bf16 %v7540_v27, %v7539_v40  ;;  %v18052_v40 = vld [vmem:[#allocation136_spill] sm:$0xff] }
 0x96e   : > { %8109 = vperm.xlu1 %10417, %v7786_v22   ;;  %8106 = vperm.xlu0 %10416, %v7785_v38   ;;  %v7798_v22 = vunpack.c.h.b16 %v7615_v37  ;;  %v7796_v38 = vunpack.c.h.b16 %v7614_v42  ;;  %v11029_v2 = vpop.eup %11028  ;;  %v7280_v42 = vrot.slane %v16238_v7, %v17987_v54  ;;  %11034 = vrcp.f32 %v7276_v39  ;;  %v18053_v27 = vld [vmem:[#allocation40_spill] sm:$0xff] }
 0x96f   : > { %v7799_v32 = vunpack.c.l.b16 %v7616_v13  ;;  %v7547_v34 = vmul.f32 %v11029_v2, %v18046_v11  ;;  %v7800_v62 = vunpack.c.h.b16 %v7616_v13  ;;  %v11031_v16 = vpop.eup %11030  ;;  %v7284_v13 = vrot.slane %v16238_v7, %v17988_v30 }
 0x970   : > { %v7552_v55 = vmul.f32 %v11031_v16, %v18050_v3  ;;  %11036 = vrcp.f32 %v7280_v42  ;;  %v7554_v44 = vmul.f32 %v11031_v16, %v18052_v40  ;;  %v7555_v53 = vmul.f32 %v11031_v16, %v18053_v27  ;;  %v18062_v42 = vld [vmem:[#allocation42_spill] sm:$0xff]  ;;  %v18064_v40 = vld [vmem:[#allocation69_spill] sm:$0xff] }
 0x971   : > { %11038 = vrcp.f32 %v7284_v13  ;;  %v18065_v27 = vld [vmem:[#allocation65_spill] sm:$0xff] }
 0x972   : > { %8121 = vperm.xlu1 %10417, %v7790_v17   ;;  %8118 = vperm.xlu0 %10416, %v7789_v0   ;;  %v7545_v17 = vmul.f32 %v11027_v41, %v18045_v33  ;;  %v7801_v0 = vunpack.c.l.b16 %v7617_v50  ;;  %v18056_v33 = vld [vmem:[#allocation99_spill] sm:$0xff] }
 0x974   : > { %v7618_v26 = vpack.c.bf16 %v7545_v17, %v7544_v5 }
 0x976   : > { %8124 = vperm.xlu1 %10417, %v7791_v4   ;;  %8112 = vperm.xlu0 %10416, %v7787_v10   ;;  %v7548_v4 = vmul.f32 %v11029_v2, %v18047_v29  ;;  %v7802_v10 = vunpack.c.h.b16 %v7617_v50  ;;  %v7803_v36 = vunpack.c.l.b16 %v7618_v26  ;;  %v7804_v63 = vunpack.c.h.b16 %v7618_v26  ;;  %v18058_v29 = vld [vmem:[#allocation98_spill] sm:$0xff] }
 0x977   : > { %v7622_v50 = vpack.c.bf16 %v7555_v53, %v7554_v44 }
 0x978   : > { %v7619_v8 = vpack.c.bf16 %v7548_v4, %v7547_v34 }
 0x979   : > { %v7811_v5 = vunpack.c.l.b16 %v7622_v50 }
 0x97a   : > { %8133 = vperm.xlu1 %10417, %v7794_v58   ;;  %8130 = vperm.xlu0 %10416, %v7793_v14   ;;  %v7549_v58 = vmul.f32 %v11029_v2, %v18048_v23  ;;  %v18049_v14 = vld [vmem:[#allocation94_spill] sm:$0xff]  ;;  %v7805_v15 = vunpack.c.l.b16 %v7619_v8  ;;  %v7806_v37 = vunpack.c.h.b16 %v7619_v8  ;;  %v7288_v8 = vrot.slane %v16238_v7, %v17989_v51 }
 0x97b   : > { %v7550_v57 = vmul.f32 %v11029_v2, %v18049_v14 }
 0x97c   : > { %11040 = vrcp.f32 %v7288_v8  ;;  %v18069_v8 = vld [vmem:[#allocation49_spill] sm:$0xff] }
 0x97d   : > { %v7620_v41 = vpack.c.bf16 %v7550_v57, %v7549_v58  ;;  %v18060_v58 = vld [vmem:[#allocation102_spill] sm:$0xff]  ;;  %v18061_v57 = vld [vmem:[#allocation109_spill] sm:$0xff] }
 0x97e   : > { %8115 = vperm.xlu1 %10417, %v7788_v21   ;;  %8127 = vperm.xlu0 %10416, %v7792_v19   ;;  %v18051_v21 = vld [vmem:[#allocation52_spill] sm:$0xff] }
 0x97f   : > { %v7553_v19 = vmul.f32 %v11031_v16, %v18051_v21  ;;  %v7807_v24 = vunpack.c.l.b16 %v7620_v41  ;;  %v7808_v61 = vunpack.c.h.b16 %v7620_v41  ;;  %v18063_v41 = vld [vmem:[#allocation143_spill] sm:$0xff] }
 0x982   : > { %8136 = vperm.xlu1 %10417, %v7795_v56   ;;  %8142 = vperm.xlu0 %10416, %v7797_v18   ;;  %v7621_v56 = vpack.c.bf16 %v7553_v19, %v7552_v55  ;;  %v11033_v18 = vpop.eup %11032 }
 0x983   : > { %v7557_v28 = vmul.f32 %v11033_v18, %v18054_v25  ;;  %v11035_v6 = vpop.eup %11034  ;;  %v7559_v17 = vmul.f32 %v11033_v18, %v18056_v33 }
 0x984   : > { %v7809_v31 = vunpack.c.l.b16 %v7621_v56  ;;  %v7810_v2 = vunpack.c.h.b16 %v7621_v56  ;;  %v7442_v4 = vmul.f32 %v11035_v6, %v18058_v29 }
 0x986   : > { %8145 = vperm.xlu1 %10417, %v7798_v22   ;;  %8139 = vperm.xlu0 %10416, %v7796_v38   ;;  %v18055_v22 = vld [vmem:[#allocation92_spill] sm:$0xff] }
 0x987   : > { %v7558_v38 = vmul.f32 %v11033_v18, %v18055_v22 }
 0x988   : > { %v16265_v55 = vpop.xlane.xlu0 %7232 }
 0x98a   : > { %8148 = vperm.xlu1 %10417, %v7799_v32   ;;  %8154 = vperm.xlu0 %10416, %v7801_v0   ;;  %v7623_v32 = vpack.c.bf16 %v7558_v38, %v7557_v28  ;;  %v18057_v0 = vld [vmem:[#allocation134_spill] sm:$0xff]  ;;  %v18066_v38 = vld [vmem:[#allocation108_spill] sm:$0xff] }
 0x98b   : > { %v7560_v11 = vmul.f32 %v11033_v18, %v18057_v0  ;;  %v7292_v18 = vrot.slane %v16238_v7, %v17998_v60 }
 0x98c   : > { %v7813_v34 = vunpack.c.l.b16 %v7623_v32  ;;  %v7814_v16 = vunpack.c.h.b16 %v7623_v32 }
 0x98d   : > { %v16260_v39 = vpack.c.bf16 %v7560_v11, %v7559_v17  ;;  %11042 = vrcp.f32 %v7292_v18  ;;  %v7296_v11 = vrot.slane %v16238_v7, %v18003_v9 }
 0x98e   : > { %8157 = vperm.xlu1 %10417, %v7802_v10   ;;  %8151 = vperm.xlu0 %10416, %v7800_v62   ;;  %v18059_v10 = vld [vmem:[#allocation103_spill] sm:$0xff]  ;;  %v11037_v62 = vpop.eup %11036 }
 0x98f   : > { %v7443_v26 = vmul.f32 %v11035_v6, %v18059_v10  ;;  %v7447_v14 = vmul.f32 %v11037_v62, %v18060_v58  ;;  %v7815_v3 = vunpack.c.l.b16 %v16260_v39  ;;  %v11039_v56 = vpop.eup %11038  ;;  %v7449_v44 = vmul.f32 %v11037_v62, %v18064_v40 }
 0x990   : > { %v7450_v53 = vmul.f32 %v11037_v62, %v18065_v27  ;;  %v7452_v13 = vmul.f32 %v11039_v56, %v18066_v38  ;;  %v11041_v0 = vpop.eup %11040  ;;  %11044 = vrcp.f32 %v7296_v11  ;;  %v18073_v27 = vld [vmem:[#allocation110_spill] sm:$0xff]  ;;  %v18074_v38 = vld [vmem:[#allocation112_spill] sm:$0xff]  ;;  %v7304_v11 = vrot.slane %v16238_v7, %v18011_v46 }
 0x991   : > { %v7577_v23 = vpack.c.bf16 %v7443_v26, %v7442_v4  ;;  %v18068_v26 = vld [vmem:[#allocation113_spill] sm:$0xff] }
 0x992   : > { %8160 = vperm.xlu1 %10417, %v7803_v36   ;;  %8166 = vperm.xlu0 %10416, %v7805_v15   ;;  %v7812_v36 = vunpack.c.h.b16 %v7622_v50  ;;  %v7448_v15 = vmul.f32 %v11037_v62, %v18061_v57  ;;  %v7580_v32 = vpack.c.bf16 %v7450_v53, %v7449_v44  ;;  %v7457_v62 = vmul.f32 %v11041_v0, %v18068_v26 }
 0x993   : > { %v7721_v21 = vunpack.c.l.b16 %v7577_v23 }
 0x994   : > { %v7579_v19 = vpack.c.bf16 %v7448_v15, %v7447_v14  ;;  %v18071_v14 = vld [vmem:[#allocation71_spill] sm:$0xff] }
 0x995   : > { %v7455_v57 = vmul.f32 %v11039_v56, %v18071_v14  ;;  %v18078_v14 = vld [vmem:[#allocation116_spill] sm:$0xff] }
 0x996   : > { %8169 = vperm.xlu1 %10417, %v7806_v37   ;;  %8163 = vperm.xlu0 %10416, %v7804_v63   ;;  %v7444_v37 = vmul.f32 %v11035_v6, %v18062_v42  ;;  %v7445_v63 = vmul.f32 %v11035_v6, %v18063_v41  ;;  %v7725_v28 = vunpack.c.l.b16 %v7579_v19 }
 0x997   : > { %v11043_v42 = vpop.eup %11042 }
 0x998   : > { %v7578_v22 = vpack.c.bf16 %v7445_v63, %v7444_v37  ;;  %v7300_v37 = vrot.slane %v16238_v7, %v18006_v35  ;;  %v7463_v53 = vmul.f32 %v11043_v42, %v18073_v27 }
 0x99a   : > { %8172 = vperm.xlu1 %10417, %v7807_v24   ;;  %8178 = vperm.xlu0 %10416, %v7809_v31   ;;  %v7722_v24 = vunpack.c.h.b16 %v7577_v23  ;;  %v7723_v33 = vunpack.c.l.b16 %v7578_v22  ;;  %v18070_v23 = vld [vmem:[#allocation77_spill] sm:$0xff]  ;;  %v7724_v41 = vunpack.c.h.b16 %v7578_v22  ;;  %11046 = vrcp.f32 %v7300_v37 }
 0x99b   : > { %v7454_v58 = vmul.f32 %v11039_v56, %v18070_v23  ;;  %11048 = vrcp.f32 %v7304_v11 }
 0x99d   : > { %v7582_v63 = vpack.c.bf16 %v7455_v57, %v7454_v58  ;;  %v7464_v57 = vmul.f32 %v11043_v42, %v18078_v14 }
 0x99e   : > { %8181 = vperm.xlu1 %10417, %v7810_v2   ;;  %8175 = vperm.xlu0 %10416, %v7808_v61   ;;  %v18067_v2 = vld [vmem:[#allocation114_spill] sm:$0xff]  ;;  %v7726_v61 = vunpack.c.h.b16 %v7579_v19 }
 0x99f   : > { %v7453_v50 = vmul.f32 %v11039_v56, %v18067_v2  ;;  %v18072_v56 = vld [vmem:[#allocation51_spill] sm:$0xff]  ;;  %v18075_v2 = vld [vmem:[#allocation46_spill] sm:$0xff] }
 0x9a0   : > { %v7462_v44 = vmul.f32 %v11043_v42, %v18072_v56  ;;  %v7308_v56 = vrot.slane %v16265_v55, %v17986_v59 }
 0x9a1   : > { %v7581_v17 = vpack.c.bf16 %v7453_v50, %v7452_v13  ;;  %v7459_v13 = vmul.f32 %v11041_v0, %v18074_v38  ;;  %v7460_v50 = vmul.f32 %v11041_v0, %v18075_v2  ;;  %v18081_v2 = vld [vmem:[#allocation117_spill] sm:$0xff] }
 0x9a2   : > { %8184 = vperm.xlu1 %10417, %v7811_v5   ;;  %8190 = vperm.xlu0 %10416, %v7813_v34   ;;  %v7727_v34 = vunpack.c.l.b16 %v7580_v32  ;;  %11050 = vrcp.f32 %v7308_v56 }
 0x9a3   : > { %v7729_v10 = vunpack.c.l.b16 %v7581_v17 }
 0x9a6   : > { %8193 = vperm.xlu1 %10417, %v7814_v16   ;;  %8187 = vperm.xlu0 %10416, %v7812_v36   ;;  %v7458_v16 = vmul.f32 %v11041_v0, %v18069_v8  ;;  %v7730_v36 = vunpack.c.h.b16 %v7581_v17  ;;  %v11045_v17 = vpop.eup %11044  ;;  %v18076_v0 = vld [vmem:[#allocation68_spill] sm:$0xff] }
 0x9a8   : > { %v7583_v19 = vpack.c.bf16 %v7458_v16, %v7457_v62  ;;  %v7467_v16 = vmul.f32 %v11045_v17, %v18076_v0 }
 0x9aa   : > { %8196 = vperm.xlu1 %10417, %v7815_v3   ;;  %7914 = vperm.xlu0 %10416, %v7721_v21   ;;  %v7728_v21 = vunpack.c.h.b16 %v7580_v32  ;;  %v7733_v40 = vunpack.c.l.b16 %v7583_v19  ;;  %v7732_v32 = vunpack.c.h.b16 %v7582_v63 }
 0x9ad   : > { %v16273_v31 = vpop.permute.xlu1 %7818  ;;  %v16275_v25 = vpop.permute.xlu0 %7821 }
 0x9ae   : > { %7917 = vperm.xlu1 %10417, %v7722_v24   ;;  %7926 = vperm.xlu0 %10416, %v7725_v28   ;;  %v7731_v28 = vunpack.c.l.b16 %v7582_v63 }
 0x9b1   : > { %v16279_v6 = vpop.permute.xlu1 %7830  ;;  %v16281_v5 = vpop.permute.xlu0 %7824 }
 0x9b2   : > { %7929 = vperm.xlu1 %10417, %v7726_v61   ;;  %7920 = vperm.xlu0 %10416, %v7723_v33   ;;  %v7585_v33 = vpack.c.bf16 %v7463_v53, %v7462_v44 }
 0x9b4   : > { %v7737_v8 = vunpack.c.l.b16 %v7585_v33  ;;  %v7738_v44 = vunpack.c.h.b16 %v7585_v33  ;;  %v18083_v33 = vld [vmem:[#allocation120_spill] sm:$0xff] }
 0x9b5   : > { %v16285_v29 = vpop.permute.xlu1 %7833  ;;  %v16287_v4 = vpop.permute.xlu0 %7842 }
 0x9b6   : > { %7932 = vperm.xlu1 %10417, %v7727_v34   ;;  %7938 = vperm.xlu0 %10416, %v7729_v10   ;;  %v7734_v34 = vunpack.c.h.b16 %v7583_v19  ;;  %v7584_v10 = vpack.c.bf16 %v7460_v50, %v7459_v13 }
 0x9b8   : > { %v7735_v58 = vunpack.c.l.b16 %v7584_v10 }
 0x9b9   : > { %v16293_v15 = vpop.permute.xlu1 %7836  ;;  %v16295_v3 = vpop.permute.xlu0 %7827 }
 0x9ba   : > { %7941 = vperm.xlu1 %10417, %v7730_v36   ;;  %7935 = vperm.xlu0 %10416, %v7728_v21   ;;  %v18077_v36 = vld [vmem:[#allocation115_spill] sm:$0xff]  ;;  %v18079_v21 = vld [vmem:[#allocation48_spill] sm:$0xff] }
 0x9bb   : > { %v7468_v23 = vmul.f32 %v11045_v17, %v18077_v36  ;;  %v7465_v37 = vmul.f32 %v11043_v42, %v18079_v21  ;;  %v18080_v42 = vld [vmem:[#allocation72_spill] sm:$0xff] }
 0x9bd   : > { %v16299_v18 = vpop.permute.xlu1 %7845  ;;  %v16301_v24 = vpop.permute.xlu0 %7848  ;;  %v7587_v63 = vpack.c.bf16 %v7468_v23, %v7467_v16  ;;  %v7586_v27 = vpack.c.bf16 %v7465_v37, %v7464_v57 }
 0x9be   : > { %7923 = vperm.xlu1 %10417, %v7724_v41   ;;  %7950 = vperm.xlu0 %10416, %v7733_v40   ;;  %v7736_v41 = vunpack.c.h.b16 %v7584_v10  ;;  %v11047_v40 = vpop.eup %11046 }
 0x9bf   : > { %v7741_v38 = vunpack.c.l.b16 %v7587_v63  ;;  %v7472_v13 = vmul.f32 %v11047_v40, %v18080_v42  ;;  %v7473_v50 = vmul.f32 %v11047_v40, %v18081_v2  ;;  %v7739_v10 = vunpack.c.l.b16 %v7586_v27  ;;  %v18087_v42 = vld [vmem:[#allocation86_spill] sm:$0xff]  ;;  %v18088_v2 = vld [vmem:[#allocation123_spill] sm:$0xff] }
 0x9c0   : > { %v7740_v36 = vunpack.c.h.b16 %v7586_v27  ;;  %v7742_v14 = vunpack.c.h.b16 %v7587_v63  ;;  %v7316_v27 = vrot.slane %v16265_v55, %v17988_v30  ;;  %v7475_v63 = vmul.f32 %v11047_v40, %v18088_v2 }
 0x9c1   : > { %v16307_v61 = vpop.permute.xlu1 %7839  ;;  %v16309_v22 = vpop.permute.xlu0 %7857  ;;  %v7589_v23 = vpack.c.bf16 %v7473_v50, %v7472_v13  ;;  %v7474_v13 = vmul.f32 %v11047_v40, %v18087_v42  ;;  %v18093_v40 = vld [vmem:[#allocation161_spill] sm:$0xff] }
 0x9c2   : > { %7944 = vperm.xlu1 %10417, %v7731_v28   ;;  %7947 = vperm.xlu0 %10416, %v7732_v32   ;;  %v18082_v32 = vld [vmem:[#allocation118_spill] sm:$0xff] }
 0x9c3   : > { %v7469_v11 = vmul.f32 %v11045_v17, %v18082_v32 }
 0x9c5   : > { %v16313_v26 = vpop.permute.xlu1 %7854  ;;  %v16315_v62 = vpop.permute.xlu0 %7851 }
 0x9c6   : > { %7953 = vperm.xlu1 %10417, %v7734_v34   ;;  %7962 = vperm.xlu0 %10416, %v7737_v8   ;;  %v7312_v34 = vrot.slane %v16265_v55, %v17987_v54  ;;  %v7470_v8 = vmul.f32 %v11045_v17, %v18083_v33  ;;  %v7745_v54 = vunpack.c.l.b16 %v7589_v23  ;;  %v18086_v17 = vld [vmem:[#allocation119_spill] sm:$0xff]  ;;  %v7746_v33 = vunpack.c.h.b16 %v7589_v23 }
 0x9c8   : > { %11052 = vrcp.f32 %v7312_v34  ;;  %v7588_v57 = vpack.c.bf16 %v7470_v8, %v7469_v11  ;;  %v7590_v8 = vpack.c.bf16 %v7475_v63, %v7474_v13 }
 0x9c9   : > { %v16321_v7 = vpop.permute.xlu1 %7860  ;;  %v16323_v19 = vpop.permute.xlu0 %7866  ;;  %11054 = vrcp.f32 %v7316_v27 }
 0x9ca   : > { %7956 = vperm.xlu1 %10417, %v7735_v58   ;;  %7959 = vperm.xlu0 %10416, %v7736_v41   ;;  %v11049_v58 = vpop.eup %11048  ;;  %v18085_v41 = vld [vmem:[#allocation76_spill] sm:$0xff]  ;;  %v7744_v11 = vunpack.c.h.b16 %v7588_v57  ;;  %v7748_v13 = vunpack.c.h.b16 %v7590_v8 }
 0x9cb   : > { %v7477_v56 = vmul.f32 %v11049_v58, %v18085_v41 }
 0x9cd   : > { %v16327_v53 = vpop.permute.xlu1 %7869  ;;  %v16329_v28 = vpop.permute.xlu0 %7863 }
 0x9ce   : > { %7965 = vperm.xlu1 %10417, %v7738_v44   ;;  %7974 = vperm.xlu0 %10416, %v7741_v38   ;;  %v7478_v44 = vmul.f32 %v11049_v58, %v18086_v17  ;;  %v7743_v38 = vunpack.c.l.b16 %v7588_v57  ;;  %v7747_v57 = vunpack.c.l.b16 %v7590_v8 }
 0x9d0   : > { %v7591_v34 = vpack.c.bf16 %v7478_v44, %v7477_v56  ;;  %v18094_v56 = vld [vmem:[#allocation89_spill] sm:$0xff] }
 0x9d1   : > { %v16337_v0 = vpop.permute.xlu1 %7872  ;;  %v16339_v16 = vpop.permute.xlu0 %7878  ;;  %v7479_v44 = vmul.f32 %v11049_v58, %v18094_v56 }
 0x9d2   : > { %18084 = vst [vmem:[#allocation160_spill] sm:$0xff] %v16339_v16  ;;  %7968 = vperm.xlu1 %10417, %v7739_v10   ;;  %7971 = vperm.xlu0 %10416, %v7740_v36   ;;  %v11051_v10 = vpop.eup %11050  ;;  %v18113_v16 = vld [vmem:[#allocation145_spill] sm:$0xff] }
 0x9d3   : > { %v7483_v17 = vmul.f32 %v11051_v10, %v18093_v40  ;;  %v11053_v42 = vpop.eup %11052 }
 0x9d5   : > { %v16341_v21 = vpop.permute.xlu1 %7881  ;;  %v16343_v37 = vpop.permute.xlu0 %7875 }
 0x9d6   : > { %7977 = vperm.xlu1 %10417, %v7742_v14   ;;  %7986 = vperm.xlu0 %10416, %v7745_v54   ;;  %v7749_v14 = vunpack.c.l.b16 %v7591_v34  ;;  %v18092_v54 = vld [vmem:[#allocation121_spill] sm:$0xff] }
 0x9d7   : > { %v7482_v41 = vmul.f32 %v11051_v10, %v18092_v54 }
 0x9d9   : > { %v16351_v50 = vpop.permute.xlu1 %7884  ;;  %v16353_v32 = vpop.permute.xlu0 %7890  ;;  %v7593_v63 = vpack.c.bf16 %v7483_v17, %v7482_v41  ;;  %v18103_v41 = vld [vmem:[#allocation168_spill] sm:$0xff] }
 0x9da   : > { %18089 = vst [vmem:[#allocation56_spill] sm:$0xff] %v16353_v32  ;;  %7980 = vperm.xlu1 %10417, %v7743_v38   ;;  %7983 = vperm.xlu0 %10416, %v7744_v11   ;;  %v18095_v38 = vld [vmem:[#allocation91_spill] sm:$0xff]  ;;  %v18098_v11 = vld [vmem:[#allocation124_spill] sm:$0xff]  ;;  %v18099_v32 = vld [vmem:[#allocation90_spill] sm:$0xff]  ;;  %v7485_v17 = vmul.f32 %v11051_v10, %v18103_v41 }
 0x9db   : > { %v7480_v2 = vmul.f32 %v11049_v58, %v18095_v38  ;;  %v7487_v59 = vmul.f32 %v11053_v42, %v18098_v11  ;;  %v7488_v54 = vmul.f32 %v11053_v42, %v18099_v32  ;;  %v7753_v38 = vunpack.c.l.b16 %v7593_v63  ;;  %v11055_v11 = vpop.eup %11054  ;;  %v18108_v41 = vld [vmem:[#allocation129_spill] sm:$0xff] }
 0x9dd   : > { %v16355_v36 = vpop.permute.xlu1 %7893  ;;  %v16357_v30 = vpop.permute.xlu0 %7887  ;;  %v7592_v40 = vpack.c.bf16 %v7480_v2, %v7479_v44  ;;  %v18106_v2 = vld [vmem:[#allocation162_spill] sm:$0xff] }
 0x9de   : > { %18090 = vst [vmem:[#allocation61_spill] sm:$0xff] %v16355_v36  ;;  %18091 = vst [vmem:[#allocation41_spill] sm:$0xff] %v16357_v30  ;;  %7989 = vperm.xlu1 %10417, %v7746_v33   ;;  %7998 = vperm.xlu0 %10416, %v7749_v14   ;;  %v7320_v33 = vrot.slane %v16265_v55, %v17989_v51  ;;  %v7750_v14 = vunpack.c.h.b16 %v7591_v34  ;;  %v18111_v30 = vld [vmem:[#allocation144_spill] sm:$0xff] }
 0x9df   : > { %v7751_v32 = vunpack.c.l.b16 %v7592_v40 }
 0x9e0   : > { %11056 = vrcp.f32 %v7320_v33 }
 0x9e1   : > { %v16363_v27 = vpop.permute.xlu1 %7896  ;;  %v16365_v23 = vpop.permute.xlu0 %7902 }
 0x9e2   : > { %18096 = vst [vmem:[#allocation70_spill] sm:$0xff] %v16363_v27  ;;  %18097 = vst [vmem:[#allocation88_spill] sm:$0xff] %v16365_v23  ;;  %7992 = vperm.xlu1 %10417, %v7747_v57   ;;  %7995 = vperm.xlu0 %10416, %v7748_v13   ;;  %v7595_v27 = vpack.c.bf16 %v7488_v54, %v7487_v59  ;;  %v18102_v23 = vld [vmem:[#allocation131_spill] sm:$0xff]  ;;  %v7492_v13 = vmul.f32 %v11055_v11, %v18106_v2 }
 0x9e3   : > { %v7484_v8 = vmul.f32 %v11051_v10, %v18102_v23  ;;  %v7324_v59 = vrot.slane %v16265_v55, %v17998_v60  ;;  %v7752_v10 = vunpack.c.h.b16 %v7592_v40  ;;  %v7495_v60 = vmul.f32 %v11055_v11, %v18111_v30 }
 0x9e4   : > { %v7757_v34 = vunpack.c.l.b16 %v7595_v27  ;;  %v7332_v30 = vrot.slane %v16265_v55, %v18006_v35 }
 0x9e5   : > { %v16371_v56 = vpop.permute.xlu1 %7905  ;;  %v16373_v58 = vpop.permute.xlu0 %7899  ;;  %v7594_v44 = vpack.c.bf16 %v7485_v17, %v7484_v8  ;;  %11058 = vrcp.f32 %v7324_v59  ;;  %v7489_v8 = vmul.f32 %v11053_v42, %v18108_v41  ;;  %v18109_v17 = vld [vmem:[#allocation53_spill] sm:$0xff] }
 0x9e6   : > { %18100 = vst [vmem:[#allocation126_spill] sm:$0xff] %v16371_v56  ;;  %18101 = vst [vmem:[#allocation133_spill] sm:$0xff] %v16373_v58  ;;  %8001 = vperm.xlu1 %10417, %v7750_v14   ;;  %8010 = vperm.xlu0 %10416, %v7753_v38   ;;  %v18107_v58 = vld [vmem:[#allocation164_spill] sm:$0xff]  ;;  %v7754_v38 = vunpack.c.h.b16 %v7593_v63  ;;  %v7490_v2 = vmul.f32 %v11053_v42, %v18109_v17  ;;  %v18112_v42 = vld [vmem:[#allocation142_spill] sm:$0xff] }
 0x9e7   : > { %v7493_v56 = vmul.f32 %v11055_v11, %v18107_v58  ;;  %v7755_v33 = vunpack.c.l.b16 %v7594_v44 }
 0x9e8   : > { %v7596_v59 = vpack.c.bf16 %v7490_v2, %v7489_v8 }
 0x9e9   : > { %v16377_v57 = vpop.permute.xlu1 %7908  ;;  %v16379_v51 = vpop.permute.xlu0 %7911  ;;  %v7597_v14 = vpack.c.bf16 %v7493_v56, %v7492_v13  ;;  %v7328_v56 = vrot.slane %v16265_v55, %v18003_v9  ;;  %v7758_v13 = vunpack.c.h.b16 %v7595_v27 }
 0x9ea   : > { %18104 = vst [vmem:[#allocation137_spill] sm:$0xff] %v16377_v57  ;;  %18105 = vst [vmem:[#allocation140_spill] sm:$0xff] %v16379_v51  ;;  %8004 = vperm.xlu1 %10417, %v7751_v32   ;;  %8022 = vperm.xlu0 %10416, %v7757_v34   ;;  %v18110_v34 = vld [vmem:[#allocation135_spill] sm:$0xff]  ;;  %v11057_v40 = vpop.eup %11056 }
 0x9eb   : > { %v7761_v32 = vunpack.c.l.b16 %v7597_v14  ;;  %v7494_v57 = vmul.f32 %v11055_v11, %v18110_v34  ;;  %v7497_v17 = vmul.f32 %v11057_v40, %v18112_v42  ;;  %v7498_v36 = vmul.f32 %v11057_v40, %v18113_v16  ;;  %v18114_v42 = vld [vmem:[#allocation148_spill] sm:$0xff] }
 0x9ec   : > { %11060 = vrcp.f32 %v7328_v56  ;;  %v7759_v11 = vunpack.c.l.b16 %v7596_v59 }
 0x9ed   : > { %v8110_v23 = vpop.permute.xlu1 %8109  ;;  %v8107_v54 = vpop.permute.xlu0 %8106  ;;  %v7598_v41 = vpack.c.bf16 %v7495_v60, %v7494_v57  ;;  %v7599_v27 = vpack.c.bf16 %v7498_v36, %v7497_v17  ;;  %11062 = vrcp.f32 %v7332_v30  ;;  %v7762_v60 = vunpack.c.h.b16 %v7597_v14  ;;  %v18115_v17 = vld [vmem:[#allocation170_spill] sm:$0xff] }
 0x9ee   : > { %8007 = vperm.xlu1 %10417, %v7752_v10   ;;  %8016 = vperm.xlu0 %10416, %v7755_v33   ;;  %v7756_v33 = vunpack.c.h.b16 %v7594_v44  ;;  %v8664_v2 = vrot.slane %v8110_v23, %v14554_v43  ;;  %v8660_v57 = vrot.slane %v8107_v54, %v14551_v1 }
 0x9ef   : > { %v7763_v9 = vunpack.c.l.b16 %v7598_v41  ;;  %v11059_v8 = vpop.eup %11058  ;;  %v7766_v36 = vunpack.c.h.b16 %v7599_v27 }
 0x9f0   : > { %v7502_v23 = vmul.f32 %v11059_v8, %v18114_v42  ;;  %v7503_v54 = vmul.f32 %v11059_v8, %v18115_v17 }
 0x9f1   : > { %v8122_v51 = vpop.permute.xlu1 %8121  ;;  %v8119_v58 = vpop.permute.xlu0 %8118 }
 0x9f2   : > { %8013 = vperm.xlu1 %10417, %v7754_v38   ;;  %8034 = vperm.xlu0 %10416, %v7761_v32   ;;  %v8683_v44 = vrot.slane %v8122_v51, %v14554_v43  ;;  %v8679_v16 = vrot.slane %v8119_v58, %v14551_v1  ;;  %v8665_v51 = vsel %vm4868_vm1, %v8664_v2, %v8660_v57  ;;  %v18116_v57 = vld [vmem:[#allocation172_spill] sm:$0xff] }
 0x9f3   : > { %v7601_v17 = vpack.c.bf16 %v7503_v54, %v7502_v23  ;;  %v18118_v23 = vld [vmem:[#allocation179_spill] sm:$0xff] }
 0x9f4   : > { %v8684_v58 = vsel %vm4868_vm1, %v8683_v44, %v8679_v16  ;;  %v7499_v44 = vmul.f32 %v11057_v40, %v18116_v57  ;;  %v18117_v16 = vld [vmem:[#allocation150_spill] sm:$0xff] }
 0x9f5   : > { %v8125_v63 = vpop.permute.xlu1 %8124  ;;  %v8113_v10 = vpop.permute.xlu0 %8112 }
 0x9f6   : > { %8025 = vperm.xlu1 %10417, %v7758_v13   ;;  %8019 = vperm.xlu0 %10416, %v7756_v33   ;;  %v8688_v34 = vrot.slane %v8125_v63, %v14565_v45  ;;  %v8669_v35 = vrot.slane %v8113_v10, %v14565_v45  ;;  %v7760_v33 = vunpack.c.h.b16 %v7596_v59 }
 0x9f8   : > { %v8689_v10 = vsel %vm4875_vm2, %v8688_v34, %v8684_v58  ;;  %v8670_v14 = vsel %vm4875_vm2, %v8669_v35, %v8665_v51  ;;  %v7764_v34 = vunpack.c.h.b16 %v7598_v41  ;;  %v11061_v35 = vpop.eup %11060  ;;  %v7765_v58 = vunpack.c.l.b16 %v7599_v27  ;;  %v18119_v27 = vld [vmem:[#allocation166_spill] sm:$0xff] }
 0x9f9   : > { %v8134_v38 = vpop.permute.xlu1 %8133  ;;  %v8131_v32 = vpop.permute.xlu0 %8130  ;;  %v7507_v41 = vmul.f32 %v11061_v35, %v15743_v12  ;;  %v7508_v54 = vmul.f32 %v11061_v35, %v18118_v23 }
 0x9fa   : > { %8028 = vperm.xlu1 %10417, %v7759_v11   ;;  %8040 = vperm.xlu0 %10416, %v7763_v9   ;;  %v8702_v30 = vrot.slane %v8134_v38, %v14554_v43  ;;  %v8698_v59 = vrot.slane %v8131_v32, %v14551_v1  ;;  %v7336_v32 = vrot.slane %v16265_v55, %v18011_v46 }
 0x9fc   : > { %11064 = vrcp.f32 %v7336_v32  ;;  %v7770_v32 = vunpack.c.h.b16 %v7601_v17 }
 0x9fd   : > { %v8116_v56 = vpop.permute.xlu1 %8115  ;;  %v8128_v13 = vpop.permute.xlu0 %8127 }
 0x9fe   : > { %v8674_v11 = vrot.slane %v8116_v56, %v14581_v52  ;;  %v8693_v63 = vrot.slane %v8128_v13, %v14581_v52  ;;  %8037 = vperm.xlu1 %10417, %v7762_v60   ;;  %8049 = vperm.xlu0 %10416, %v7766_v36   ;;  %v7500_v56 = vmul.f32 %v11057_v40, %v18117_v16 }
 0x9ff   : > { %v8703_v36 = vsel %vm4868_vm1, %v8702_v30, %v8698_v59  ;;  %v7504_v30 = vmul.f32 %v11059_v8, %v18119_v27 }
 0xa00   : > { %v8675_v9 = vsel %vm4882_vm3, %v8674_v11, %v8670_v14  ;;  %v8694_v2 = vsel %vm4882_vm3, %v8693_v63, %v8689_v10  ;;  %v7600_v40 = vpack.c.bf16 %v7500_v56, %v7499_v44  ;;  %v7769_v10 = vunpack.c.l.b16 %v7601_v17  ;;  %v16423_v14 = vpop.eup %11062 }
 0xa01   : > { %v8830_v13 = vsel %vm5473_vm4, %v8694_v2, %v8675_v9  ;;  %v8137_v60 = vpop.permute.xlu1 %8136  ;;  %v8143_v42 = vpop.permute.xlu0 %8142  ;;  %v18120_v2 = vld [vmem:[#allocation153_spill] sm:$0xff] }
 0xa02   : > { %v8707_v38 = vrot.slane %v8137_v60, %v14565_v45  ;;  %8031 = vperm.xlu1 %10417, %v7760_v33   ;;  %8043 = vperm.xlu0 %10416, %v7764_v34   ;;  %v8717_v33 = vrot.slane %v8143_v42, %v14551_v1  ;;  %v7767_v12 = vunpack.c.l.b16 %v7600_v40  ;;  %v7505_v57 = vmul.f32 %v11059_v8, %v18120_v2  ;;  %v18122_v8 = vld [vmem:[#allocation152_spill] sm:$0xff] }
 0xa03   : > { %v7768_v56 = vunpack.c.h.b16 %v7600_v40  ;;  %v7603_v60 = vpack.c.bf16 %v7508_v54, %v7507_v41 }
 0xa04   : > { %v8708_v51 = vsel %vm4875_vm2, %v8707_v38, %v8703_v36  ;;  %v7602_v36 = vpack.c.bf16 %v7505_v57, %v7504_v30 }
 0xa05   : > { %v8146_v11 = vpop.permute.xlu1 %8145  ;;  %v8140_v63 = vpop.permute.xlu0 %8139 }
 0xa06   : > { %v8721_v46 = vrot.slane %v8146_v11, %v14554_v43  ;;  %v8712_v55 = vrot.slane %v8140_v63, %v14581_v52  ;;  %8046 = vperm.xlu1 %10417, %v7765_v58   ;;  %8058 = vperm.xlu0 %10416, %v7769_v10   ;;  %v7773_v11 = vunpack.c.l.b16 %v7603_v60  ;;  %v7771_v54 = vunpack.c.l.b16 %v7602_v36  ;;  %v11065_v27 = vpop.eup %11064 }
 0xa08   : > { %v8722_v59 = vsel %vm4868_vm1, %v8721_v46, %v8717_v33  ;;  %v8713_v9 = vsel %vm4882_vm3, %v8712_v55, %v8708_v51  ;;  %v18121_v51 = vld [vmem:[#allocation180_spill] sm:$0xff]  ;;  %v18123_v33 = vld [vmem:[#allocation173_spill] sm:$0xff]  ;;  %v7510_v55 = vmul.f32 %v11061_v35, %v15790_v47  ;;  %v7517_v47 = vmul.f32 %v11065_v27, %v15828_v20 }
 0xa09   : > { %v8831_v44 = vsel %vm5475_vm5, %v8713_v9, %v8830_v13  ;;  %v8149_v16 = vpop.permute.xlu1 %8148  ;;  %v8155_v34 = vpop.permute.xlu0 %8154  ;;  %v7512_v63 = vmul.f32 %v16423_v14, %v18121_v51  ;;  %v7513_v13 = vmul.f32 %v16423_v14, %v18122_v8  ;;  %v7509_v46 = vmul.f32 %v11061_v35, %v18123_v33  ;;  %v18124_v35 = vld [vmem:[#allocation154_spill] sm:$0xff] }
 0xa0a   : > { %v8726_v42 = vrot.slane %v8149_v16, %v14565_v45  ;;  %8052 = vperm.xlu1 %10417, %v7767_v12   ;;  %8055 = vperm.xlu0 %10416, %v7768_v56   ;;  %v8736_v40 = vrot.slane %v8155_v34, %v14551_v1  ;;  %v7772_v9 = vunpack.c.h.b16 %v7602_v36 }
 0xa0b   : > { %v7605_v12 = vpack.c.bf16 %v7513_v13, %v7512_v63  ;;  %v7604_v34 = vpack.c.bf16 %v7510_v55, %v7509_v46 }
 0xa0c   : > { %v8727_v38 = vsel %vm4875_vm2, %v8726_v42, %v8722_v59  ;;  %v7774_v42 = vunpack.c.h.b16 %v7603_v60  ;;  %v18125_v60 = vld [vmem:[#allocation178_spill] sm:$0xff] }
 0xa0d   : > { %v8158_v58 = vpop.permute.xlu1 %8157  ;;  %v8152_v41 = vpop.permute.xlu0 %8151  ;;  %v7775_v8 = vunpack.c.l.b16 %v7604_v34  ;;  %v7514_v13 = vmul.f32 %v16423_v14, %v18125_v60 }
 0xa0e   : > { %v8740_v10 = vrot.slane %v8158_v58, %v14554_v43  ;;  %8061 = vperm.xlu1 %10417, %v7770_v32   ;;  %v8731_v23 = vrot.slane %v8152_v41, %v14581_v52  ;;  %8070 = vperm.xlu0 %10416, %v7773_v11   ;;  %v7777_v58 = vunpack.c.l.b16 %v7605_v12 }
 0xa10   : > { %v8741_v17 = vsel %vm4868_vm1, %v8740_v10, %v8736_v40  ;;  %v8732_v30 = vsel %vm4882_vm3, %v8731_v23, %v8727_v38  ;;  %v7518_v38 = vmul.f32 %v11065_v27, %v18124_v35  ;;  %v18126_v40 = vld [vmem:[#allocation82_spill] sm:$0xff]  ;;  %v7776_v23 = vunpack.c.h.b16 %v7604_v34 }
 0xa11   : > { %v8161_v59 = vpop.permute.xlu1 %8160  ;;  %v8832_v2 = vsel %vm5477_vm6, %v8732_v30, %v8831_v44  ;;  %v8167_v16 = vpop.permute.xlu0 %8166  ;;  %v7515_v20 = vmul.f32 %v16423_v14, %v18126_v40  ;;  %v7778_v30 = vunpack.c.h.b16 %v7605_v12  ;;  %v7519_v14 = vmul.f32 %v11065_v27, %v15855_v48 }
 0xa12   : > { %v8745_v57 = vrot.slane %v8161_v59, %v14565_v45  ;;  %8064 = vperm.xlu1 %10417, %v7771_v54   ;;  %8067 = vperm.xlu0 %10416, %v7772_v9   ;;  %v8755_v36 = vrot.slane %v8167_v16, %v14551_v1  ;;  %v7520_v16 = vmul.f32 %v11065_v27, %v15802_v49 }
 0xa13   : > { %v7606_v59 = vpack.c.bf16 %v7515_v20, %v7514_v13 }
 0xa14   : > { %v8746_v56 = vsel %vm4875_vm2, %v8745_v57, %v8741_v17  ;;  %v7607_v17 = vpack.c.bf16 %v7518_v38, %v7517_v47  ;;  %v7608_v38 = vpack.c.bf16 %v7520_v16, %v7519_v14 }
 0xa15   : > { %v8170_v32 = vpop.permute.xlu1 %8169  ;;  %v8164_v44 = vpop.permute.xlu0 %8163  ;;  %v7780_v35 = vunpack.c.h.b16 %v7606_v59 }
 0xa16   : > { %v8759_v11 = vrot.slane %v8170_v32, %v14554_v43  ;;  %8073 = vperm.xlu1 %10417, %v7774_v42   ;;  %v8750_v51 = vrot.slane %v8164_v44, %v14581_v52  ;;  %8082 = vperm.xlu0 %10416, %v7777_v58   ;;  %v7781_v57 = vunpack.c.l.b16 %v7607_v17  ;;  %v7779_v58 = vunpack.c.l.b16 %v7606_v59 }
 0xa17   : > { %v7783_v20 = vunpack.c.l.b16 %v7608_v38 }
 0xa18   : > { %v8760_v63 = vsel %vm4868_vm1, %v8759_v11, %v8755_v36  ;;  %v8751_v10 = vsel %vm4882_vm3, %v8750_v51, %v8746_v56  ;;  %v7782_v11 = vunpack.c.h.b16 %v7607_v17  ;;  %v7784_v51 = vunpack.c.h.b16 %v7608_v38 }
 0xa19   : > { %v8173_v41 = vpop.permute.xlu1 %8172  ;;  %v8833_v54 = vsel %vm5479_vm7, %v8751_v10, %v8832_v2  ;;  %v8179_v46 = vpop.permute.xlu0 %8178 }
 0xa1a   : > { %v8764_v33 = vrot.slane %v8173_v41, %v14565_v45  ;;  %8076 = vperm.xlu1 %10417, %v7775_v8   ;;  %8079 = vperm.xlu0 %10416, %v7776_v23   ;;  %v8774_v56 = vrot.slane %v8179_v46, %v14551_v1  ;;  %v7816_v46 = vunpack.c.h.b16 %v16260_v39 }
 0xa1c   : > { %v8765_v55 = vsel %vm4875_vm2, %v8764_v33, %v8760_v63 }
 0xa1d   : > { %v8182_v9 = vpop.permute.xlu1 %8181  ;;  %v8176_v2 = vpop.permute.xlu0 %8175 }
 0xa1e   : > { %v8778_v42 = vrot.slane %v8182_v9, %v14554_v43  ;;  %8085 = vperm.xlu1 %10417, %v7778_v30   ;;  %v8769_v34 = vrot.slane %v8176_v2, %v14581_v52  ;;  %8094 = vperm.xlu0 %10416, %v7781_v57   ;;  %v16499_v57 = vld [vmem:[%s17001_s9] sm:$0xff]  }
 0xa1f   : > { %10233 = vmatprep.subr.bf16.mxu1 %v16499_v57 }
 0xa20   : > { %v8779_v32 = vsel %vm4868_vm1, %v8778_v42, %v8774_v56  ;;  %v8770_v12 = vsel %vm4882_vm3, %v8769_v34, %v8765_v55 }
 0xa21   : > { %v8185_v47 = vpop.permute.xlu1 %8184  ;;  %v8834_v48 = vsel %vm5481_vm8, %v8770_v12, %v8833_v54  ;;  %v8191_v27 = vpop.permute.xlu0 %8190 }
 0xa22   : > { %v8783_v49 = vrot.slane %v8185_v47, %v14565_v45  ;;  %8088 = vperm.xlu1 %10417, %v7779_v58   ;;  %8091 = vperm.xlu0 %10416, %v7780_v35   ;;  %v8793_v63 = vrot.slane %v8191_v27, %v14551_v1  ;;  %v8204_v27 = vrot.slane %v16273_v31, %v14551_v1 }
 0xa23   : > { %v8232_v31 = vrot.slane %v16293_v15, %v14565_v45  ;;  %v8270_v15 = vrot.slane %v16321_v7, %v14565_v45  ;;  %v8284_v7 = vrot.slane %v16327_v53, %v14554_v43  ;;  %v8294_v53 = vrot.slane %v16343_v37, %v14581_v52  ;;  %v18129_v37 = vld [vmem:[#allocation41_spill] sm:$0xff] }
 0xa24   : > { %v8784_v36 = vsel %vm4875_vm2, %v8783_v49, %v8779_v32  ;;  %v8246_v49 = vrot.slane %v16299_v18, %v14554_v43  ;;  %v8213_v18 = vrot.slane %v16281_v5, %v14565_v45 }
 0xa25   : > { %v8194_v44 = vpop.permute.xlu1 %8193  ;;  %v8188_v60 = vpop.permute.xlu0 %8187 }
 0xa26   : > { %v8797_v8 = vrot.slane %v8194_v44, %v14554_v43  ;;  %8097 = vperm.xlu1 %10417, %v7782_v11   ;;  %v8788_v13 = vrot.slane %v8188_v60, %v14581_v52  ;;  %8103 = vperm.xlu0 %10416, %v7784_v51   ;;  %v8227_v11 = vrot.slane %v16285_v29, %v14554_v43 }
 0xa27   : > { %v8242_v44 = vrot.slane %v16287_v4, %v14551_v1  ;;  %v8237_v4 = vrot.slane %v16307_v61, %v14581_v52  ;;  %v8261_v60 = vrot.slane %v16313_v26, %v14551_v1  ;;  %v8275_v61 = vrot.slane %v16329_v28, %v14581_v52 }
 0xa28   : > { %v8798_v40 = vsel %vm4868_vm1, %v8797_v8, %v8793_v63  ;;  %v8789_v10 = vsel %vm4882_vm3, %v8788_v13, %v8784_v36  ;;  %v8208_v36 = vrot.slane %v16275_v25, %v14554_v43  ;;  %v8223_v63 = vrot.slane %v16279_v6, %v14551_v1 }
 0xa29   : > { %v8197_v41 = vpop.permute.xlu1 %8196  ;;  %v16479_v23 = vsel %vm5483_vm9, %v8789_v10, %v8834_v48  ;;  %v16482_v54 = vpop.permute.xlu0 %7914  ;;  %v8251_v25 = vrot.slane %v16301_v24, %v14565_v45  ;;  %v8247_v29 = vsel %vm4868_vm1, %v8246_v49, %v8242_v44  ;;  %v8256_v6 = vrot.slane %v16315_v62, %v14581_v52 }
 0xa2a   : > { %v8802_v17 = vrot.slane %v8197_v41, %v14565_v45  ;;  %8100 = vperm.xlu1 %10417, %v7783_v20   ;;  %v8209_v5 = vsel %vm4868_vm1, %v8208_v36, %v8204_v27  ;;  %v8228_v24 = vsel %vm4868_vm1, %v8227_v11, %v8223_v63  ;;  %v8218_v13 = vrot.slane %v16295_v3, %v14581_v52 }
 0xa2b   : > { %v8214_v62 = vsel %vm4875_vm2, %v8213_v18, %v8209_v5  ;;  %v8233_v20 = vsel %vm4875_vm2, %v8232_v31, %v8228_v24  ;;  %v8252_v10 = vsel %vm4875_vm2, %v8251_v25, %v8247_v29  ;;  %v8289_v28 = vrot.slane %v16337_v0, %v14565_v45  ;;  %v18127_v0 = vld [vmem:[#allocation61_spill] sm:$0xff] }
 0xa2c   : > { %v16485_v33 = vsel %vm4875_vm2, %v8802_v17, %v8798_v40  ;;  %v8265_v40 = vrot.slane %v16309_v22, %v14554_v43  ;;  %v8238_v3 = vsel %vm4882_vm3, %v8237_v4, %v8233_v20  ;;  %v8257_v17 = vsel %vm4882_vm3, %v8256_v6, %v8252_v10  ;;  %v18130_v6 = vld [vmem:[#allocation56_spill] sm:$0xff] }
 0xa2d   : > { %v16488_v55 = vpop.permute.xlu1 %7917  ;;  %v16490_v30 = vpop.permute.xlu0 %7926  ;;  %v8280_v49 = vrot.slane %v16323_v19, %v14551_v1  ;;  %v8303_v27 = vrot.slane %v16341_v21, %v14554_v43  ;;  %v8219_v36 = vsel %vm4882_vm3, %v8218_v13, %v8214_v62  ;;  %v8308_v44 = vrot.slane %v16351_v50, %v14565_v45  ;;  %v18128_v21 = vld [vmem:[#allocation160_spill] sm:$0xff] }
 0xa2e   : > { %8199 = vperm.xlu1 %10417, %v7816_v46   ;;  %v8266_v22 = vsel %vm4868_vm1, %v8265_v40, %v8261_v60  ;;  %v8322_v63 = vrot.slane %v18127_v0, %v14554_v43  ;;  %v8809_v19 = vsel %vm5473_vm4, %v8238_v3, %v8219_v36  ;;  %v8299_v25 = vrot.slane %v18128_v21, %v14551_v1  ;;  %v18131_v40 = vld [vmem:[#allocation126_spill] sm:$0xff] }
 0xa2f   : > { %v8271_v46 = vsel %vm4875_vm2, %v8270_v15, %v8266_v22  ;;  %v8285_v31 = vsel %vm4868_vm1, %v8284_v7, %v8280_v49  ;;  %v8313_v29 = vrot.slane %v18129_v37, %v14581_v52  ;;  %v8810_v60 = vsel %vm5475_vm5, %v8257_v17, %v8809_v19  ;;  %v18132_v17 = vld [vmem:[#allocation88_spill] sm:$0xff] }
 0xa30   : > { %v8276_v11 = vsel %vm4882_vm3, %v8275_v61, %v8271_v46  ;;  %v8290_v50 = vsel %vm4875_vm2, %v8289_v28, %v8285_v31  ;;  %v8318_v5 = vrot.slane %v18130_v6, %v14551_v1  ;;  %v8304_v24 = vsel %vm4868_vm1, %v8303_v27, %v8299_v25  ;;  %v18136_v19 = vld [vmem:[#allocation140_spill] sm:$0xff] }
 0xa31   : > { %v16492_v59 = vpop.permute.xlu1 %7929  ;;  %v16494_v9 = vpop.permute.xlu0 %7920  ;;  %v16611_v15 = vsel %vm5477_vm6, %v8276_v11, %v8810_v60  ;;  %v16615_v13 = vsel %vm4882_vm3, %v8294_v53, %v8290_v50  ;;  %v8341_v61 = vrot.slane %v18131_v40, %v14554_v43  ;;  %v8309_v62 = vsel %vm4875_vm2, %v8308_v44, %v8304_v24 }
 0xa32   : > { %v16621_v20 = vsel %vm4868_vm1, %v8322_v63, %v8318_v5  ;;  %v8360_v10 = vrot.slane %v16488_v55, %v14554_v43  ;;  %v8379_v7 = vrot.slane %v16492_v59, %v14554_v43  ;;  %v16628_v22 = vsel %vm4882_vm3, %v8313_v29, %v8309_v62  ;;  %v18133_v55 = vld [vmem:[#allocation70_spill] sm:$0xff] }
 0xa33   : > { %v8337_v28 = vrot.slane %v18132_v17, %v14551_v1  ;;  %v8365_v46 = vrot.slane %v16494_v9, %v14565_v45  ;;  %v8327_v53 = vrot.slane %v18133_v55, %v14565_v45  ;;  %v8356_v59 = vrot.slane %v16482_v54, %v14551_v1  ;;  %v18134_v9 = vld [vmem:[#allocation133_spill] sm:$0xff] }
 0xa34   : > { %v8375_v36 = vrot.slane %v16490_v30, %v14551_v1  ;;  %v8332_v0 = vrot.slane %v18134_v9, %v14581_v52  ;;  %v8351_v31 = vrot.slane %v18136_v19, %v14581_v52 }
 0xa35   : > { %v16502_v14 = vpop.permute.xlu1 %7932  ;;  %v16504_v16 = vpop.permute.xlu0 %7938  ;;  %v8342_v44 = vsel %vm4868_vm1, %v8341_v61, %v8337_v28  ;;  %v8361_v21 = vsel %vm4868_vm1, %v8360_v10, %v8356_v59 }
 0xa36   : > { %v8384_v49 = vrot.slane %v16502_v14, %v14565_v45  ;;  %v18135_v14 = vld [vmem:[#allocation137_spill] sm:$0xff]  ;;  %v8380_v54 = vsel %vm4868_vm1, %v8379_v7, %v8375_v36  ;;  %v8394_v30 = vrot.slane %v16504_v16, %v14551_v1  ;;  %v8366_v37 = vsel %vm4875_vm2, %v8365_v46, %v8361_v21 }
 0xa37   : > { %v8346_v63 = vrot.slane %v18135_v14, %v14565_v45 }
 0xa38   : > { %v8385_v29 = vsel %vm4875_vm2, %v8384_v49, %v8380_v54 }
 0xa39   : > { %v16506_v39 = vpop.permute.xlu1 %7941  ;;  %v16508_v56 = vpop.permute.xlu0 %7935 }
 0xa3a   : > { %v8398_v11 = vrot.slane %v16506_v39, %v14554_v43  ;;  %v8389_v60 = vrot.slane %v16508_v56, %v14581_v52 }
 0xa3c   : > { %v8399_v5 = vsel %vm4868_vm1, %v8398_v11, %v8394_v30 }
 0xa3d   : > { %v16510_v42 = vpop.permute.xlu1 %7923  ;;  %v16512_v2 = vpop.permute.xlu0 %7950 }
 0xa3e   : > { %v8370_v16 = vrot.slane %v16510_v42, %v14581_v52  ;;  %v8413_v40 = vrot.slane %v16512_v2, %v14551_v1 }
 0xa40   : > { %v8371_v28 = vsel %vm4882_vm3, %v8370_v16, %v8366_v37 }
 0xa41   : > { %v16514_v34 = vpop.permute.xlu1 %7944  ;;  %v16516_v32 = vpop.permute.xlu0 %7947 }
 0xa42   : > { %v8403_v39 = vrot.slane %v16514_v34, %v14565_v45  ;;  %v8408_v56 = vrot.slane %v16516_v32, %v14581_v52 }
 0xa44   : > { %v8404_v42 = vsel %vm4875_vm2, %v8403_v39, %v8399_v5  ;;  %v8328_v39 = vsel %vm4875_vm2, %v8327_v53, %v16621_v20 }
 0xa45   : > { %v16518_v58 = vpop.permute.xlu1 %7953  ;;  %v16520_v12 = vpop.permute.xlu0 %7962  ;;  %v8409_v49 = vsel %vm4882_vm3, %v8408_v56, %v8404_v42 }
 0xa46   : > { %v8417_v50 = vrot.slane %v16518_v58, %v14554_v43 }
 0xa48   : > { %v8418_v10 = vsel %vm4868_vm1, %v8417_v50, %v8413_v40 }
 0xa49   : > { %v16522_v47 = vpop.permute.xlu1 %7956  ;;  %v16524_v35 = vpop.permute.xlu0 %7959 }
 0xa4a   : > { %v8422_v34 = vrot.slane %v16522_v47, %v14565_v45  ;;  %v8432_v47 = vrot.slane %v16520_v12, %v14551_v1  ;;  %v8427_v32 = vrot.slane %v16524_v35, %v14581_v52 }
 0xa4c   : > { %v8423_v12 = vsel %vm4875_vm2, %v8422_v34, %v8418_v10 }
 0xa4d   : > { %v16526_v38 = vpop.permute.xlu1 %7965  ;;  %v16528_v48 = vpop.permute.xlu0 %7974  ;;  %v8428_v11 = vsel %vm4882_vm3, %v8427_v32, %v8423_v12 }
 0xa4e   : > { %v8436_v24 = vrot.slane %v16526_v38, %v14554_v43 }
 0xa50   : > { %v8437_v17 = vsel %vm4868_vm1, %v8436_v24, %v8432_v47 }
 0xa51   : > { %v16540_v51 = vpop.permute.xlu1 %7968  ;;  %v16550_v8 = vpop.permute.xlu0 %7971 }
 0xa52   : > { %v8441_v58 = vrot.slane %v16540_v51, %v14565_v45  ;;  %v8451_v51 = vrot.slane %v16528_v48, %v14551_v1 }
 0xa54   : > { %v8442_v35 = vsel %vm4875_vm2, %v8441_v58, %v8437_v17 }
 0xa55   : > { %v16569_v26 = vpop.permute.xlu1 %7977  ;;  %v16576_v41 = vpop.permute.xlu0 %7986 }
 0xa56   : > { %v8455_v61 = vrot.slane %v16569_v26, %v14554_v43 }
 0xa58   : > { %v8456_v48 = vsel %vm4868_vm1, %v8455_v61, %v8451_v51 }
 0xa59   : > { %v16596_v18 = vpop.permute.xlu1 %7980  ;;  %v16604_v4 = vpop.permute.xlu0 %7983 }
 0xa5a   : > { %v8460_v38 = vrot.slane %v16596_v18, %v14565_v45  ;;  %v8446_v18 = vrot.slane %v16550_v8, %v14581_v52  ;;  %v8465_v46 = vrot.slane %v16604_v4, %v14581_v52  ;;  %v8347_v4 = vsel %vm4875_vm2, %v8346_v63, %v8342_v44 }
 0xa5b   : > { %v8812_v44 = vsel %vm5479_vm7, %v16615_v13, %v16611_v15  ;;  %v8333_v63 = vsel %vm4882_vm3, %v8332_v0, %v8328_v39  ;;  %v8352_v20 = vsel %vm4882_vm3, %v8351_v31, %v8347_v4 }
 0xa5c   : > { %v8461_v55 = vsel %vm4875_vm2, %v8460_v38, %v8456_v48  ;;  %v8447_v54 = vsel %vm4882_vm3, %v8446_v18, %v8442_v35  ;;  %v8813_v34 = vsel %vm5481_vm8, %v16628_v22, %v8812_v44 }
 0xa5d   : > { %v7990_v3 = vpop.permute.xlu1 %7989  ;;  %v16636_v27 = vpop.permute.xlu0 %7998  ;;  %v8466_v37 = vsel %vm4882_vm3, %v8465_v46, %v8461_v55  ;;  %v8814_v0 = vsel %vm5483_vm9, %v8333_v63, %v8813_v34 }
 0xa5e   : > { %v8474_v62 = vrot.slane %v7990_v3, %v14554_v43  ;;  %v8470_v3 = vrot.slane %v16576_v41, %v14551_v1  ;;  %v8390_v41 = vsel %vm4882_vm3, %v8389_v60, %v8385_v29  ;;  %v8489_v29 = vrot.slane %v16636_v27, %v14551_v1 }
 0xa5f   : > { %v8816_v21 = vsel %vm5473_vm4, %v8390_v41, %v8371_v28  ;;  %v8815_v58 = vsel %vm5485_vm10, %v8352_v20, %v8814_v0 }
 0xa60   : > { %v8475_v59 = vsel %vm4868_vm1, %v8474_v62, %v8470_v3 }
 0xa61   : > { %v7993_v25 = vpop.permute.xlu1 %7992  ;;  %v7996_v6 = vpop.permute.xlu0 %7995 }
 0xa62   : > { %v8479_v26 = vrot.slane %v7993_v25, %v14565_v45  ;;  %v8484_v8 = vrot.slane %v7996_v6, %v14581_v52  ;;  %v8817_v25 = vsel %vm5475_vm5, %v8409_v49, %v8816_v21 }
 0xa63   : > { %v8818_v60 = vsel %vm5477_vm6, %v8428_v11, %v8817_v25 }
 0xa64   : > { %v8480_v9 = vsel %vm4875_vm2, %v8479_v26, %v8475_v59  ;;  %v8819_v53 = vsel %vm5479_vm7, %v8447_v54, %v8818_v60 }
 0xa65   : > { %v8002_v2 = vpop.permute.xlu1 %8001  ;;  %v16692_v7 = vpop.permute.xlu0 %8010  ;;  %v8485_v50 = vsel %vm4882_vm3, %v8484_v8, %v8480_v9  ;;  %v8820_v15 = vsel %vm5481_vm8, %v8466_v37, %v8819_v53 }
 0xa66   : > { %v8493_v14 = vrot.slane %v8002_v2, %v14554_v43  ;;  %v8821_v24 = vsel %vm5483_vm9, %v8485_v50, %v8820_v15  ;;  %v8508_v9 = vrot.slane %v16692_v7, %v14551_v1 }
 0xa68   : > { %v8494_v5 = vsel %vm4868_vm1, %v8493_v14, %v8489_v29 }
 0xa69   : > { %v8005_v36 = vpop.permute.xlu1 %8004  ;;  %v16713_v19 = vpop.permute.xlu0 %8022 }
 0xa6a   : > { %v8498_v30 = vrot.slane %v8005_v36, %v14565_v45  ;;  %v8527_v14 = vrot.slane %v16713_v19, %v14551_v1 }
 0xa6c   : > { %v8499_v13 = vsel %vm4875_vm2, %v8498_v30, %v8494_v5 }
 0xa6d   : > { %v8008_v6 = vpop.permute.xlu1 %8007  ;;  %v8017_v27 = vpop.permute.xlu0 %8016 }
 0xa6e   : > { %v8503_v16 = vrot.slane %v8008_v6, %v14581_v52  ;;  %v8517_v29 = vrot.slane %v8017_v27, %v14565_v45 }
 0xa70   : > { %v8504_v31 = vsel %vm4882_vm3, %v8503_v16, %v8499_v13 }
 0xa71   : > { %v8822_v40 = vsel %vm5485_vm10, %v8504_v31, %v8821_v24  ;;  %v8014_v56 = vpop.permute.xlu1 %8013  ;;  %v8035_v61 = vpop.permute.xlu0 %8034 }
 0xa72   : > { %v8837_v42 = vpack.c.b16 %v8822_v40, %v8815_v58  ;;  %v8512_v8 = vrot.slane %v8014_v56, %v14554_v43  ;;  %v8546_v54 = vrot.slane %v8035_v61, %v14551_v1 }
 0xa74   : > { %10229 = vmatprep.mubr.msk.bf16.mxu1 %vm5512_vm11, %v8837_v42  ;;  %v8513_v39 = vsel %vm4868_vm1, %v8512_v8, %v8508_v9  ;;  %v16812_v8 = vld [vmem:[%s928_s5] sm:$0x1] }
 0xa75   : > { %v8026_v22 = vpop.permute.xlu1 %8025  ;;  %v8020_v47 = vpop.permute.xlu0 %8019  ;;  %v8518_v6 = vsel %vm4875_vm2, %v8517_v29, %v8513_v39  ;;  %v18139_v29 = vld [vmem:[#allocation34_spill] sm:$0xff] }
 0xa76   : > { %v8531_v36 = vrot.slane %v8026_v22, %v14554_v43  ;;  %v8522_v37 = vrot.slane %v8020_v47, %v14581_v52 }
 0xa78   : > { %v8532_v25 = vsel %vm4868_vm1, %v8531_v36, %v8527_v14  ;;  %v8523_v53 = vsel %vm4882_vm3, %v8522_v37, %v8518_v6 }
 0xa79   : > { %v8029_v38 = vpop.permute.xlu1 %8028  ;;  %v8041_v62 = vpop.permute.xlu0 %8040 }
 0xa7a   : > { %v8536_v41 = vrot.slane %v8029_v38, %v14565_v45  ;;  %v8555_v19 = vrot.slane %v8041_v62, %v14565_v45 }
 0xa7c   : > { %v8537_v7 = vsel %vm4875_vm2, %v8536_v41, %v8532_v25 }
 0xa7d   : > { %v8038_v2 = vpop.permute.xlu1 %8037  ;;  %v8050_v10 = vpop.permute.xlu0 %8049 }
 0xa7e   : > { %v8550_v11 = vrot.slane %v8038_v2, %v14554_v43  ;;  %v8569_v5 = vrot.slane %v8050_v10, %v14554_v43 }
 0xa80   : > { %v8551_v44 = vsel %vm4868_vm1, %v8550_v11, %v8546_v54 }
 0xa81   : > { %v8032_v32 = vpop.permute.xlu1 %8031  ;;  %v8044_v51 = vpop.permute.xlu0 %8043  ;;  %v8556_v16 = vsel %vm4875_vm2, %v8555_v19, %v8551_v44 }
 0xa82   : > { %v8541_v4 = vrot.slane %v8032_v32, %v14581_v52  ;;  %v8560_v13 = vrot.slane %v8044_v51, %v14581_v52 }
 0xa84   : > { %v8542_v63 = vsel %vm4882_vm3, %v8541_v4, %v8537_v7  ;;  %v8561_v51 = vsel %vm4882_vm3, %v8560_v13, %v8556_v16  ;;  %v10456_v16 = vld [vmem:[%s17001_s9 + $0x30] sm:$0xff]  }
 0xa85   : > { %v8047_v26 = vpop.permute.xlu1 %8046  ;;  %v8059_v12 = vpop.permute.xlu0 %8058  ;;  %v8823_v15 = vsel %vm5473_vm4, %v8542_v63, %v8523_v53  ;;  %v18142_v13 = vld [vmem:[#allocation35_spill] sm:$0xff] }
 0xa86   : > { %v8565_v60 = vrot.slane %v8047_v26, %v14551_v1  ;;  %v8584_v40 = vrot.slane %v8059_v12, %v14551_v1  ;;  %v8824_v41 = vsel %vm5475_vm5, %v8561_v51, %v8823_v15  ;;  %v10470_v51 = vld [vmem:[%s17010_s18 + $0x70] sm:$0xff]  }
 0xa88   : > { %v8570_v31 = vsel %vm4868_vm1, %v8569_v5, %v8565_v60  ;;  %v10454_v5 = vld [vmem:[%s17001_s9 + $0x20] sm:$0xff]  }
 0xa89   : > { %v8053_v17 = vpop.permute.xlu1 %8052  ;;  %v16745_v18 = vpop.permute.xlu0 %8055 }
 0xa8a   : > { %v8574_v20 = vrot.slane %v8053_v17, %v14565_v45  ;;  %v8579_v22 = vrot.slane %v16745_v18, %v14581_v52 }
 0xa8c   : > { %v8575_v42 = vsel %vm4875_vm2, %v8574_v20, %v8570_v31  ;;  %v10459_v31 = vld [vmem:[%s17010_s18] sm:$0xff]  }
 0xa8d   : > { %v8062_v3 = vpop.permute.xlu1 %8061  ;;  %v8071_v28 = vpop.permute.xlu0 %8070 }
 0xa8e   : > { %v8588_v27 = vrot.slane %v8062_v3, %v14554_v43  ;;  %v8603_v47 = vrot.slane %v8071_v28, %v14551_v1 }
 0xa90   : > { %v8589_v62 = vsel %vm4868_vm1, %v8588_v27, %v8584_v40  ;;  %v10457_v27 = vld [vmem:[%s17001_s9 + $0x38] sm:$0xff]  }
 0xa91   : > { %v8065_v35 = vpop.permute.xlu1 %8064  ;;  %v16747_v48 = vpop.permute.xlu0 %8067 }
 0xa92   : > { %v8593_v0 = vrot.slane %v8065_v35, %v14565_v45  ;;  %v8598_v2 = vrot.slane %v16747_v48, %v14581_v52 }
 0xa94   : > { %v8594_v26 = vsel %vm4875_vm2, %v8593_v0, %v8589_v62  ;;  %v10466_v62 = vld [vmem:[%s17010_s18 + $0x60] sm:$0xff]  }
 0xa95   : > { %v8074_v46 = vpop.permute.xlu1 %8073  ;;  %v8083_v49 = vpop.permute.xlu0 %8082 }
 0xa96   : > { %v8607_v24 = vrot.slane %v8074_v46, %v14554_v43  ;;  %v8622_v10 = vrot.slane %v8083_v49, %v14551_v1  ;;  %v8580_v46 = vsel %vm4882_vm3, %v8579_v22, %v8575_v42  ;;  %v10462_v42 = vld [vmem:[%s17010_s18 + $0x50] sm:$0xff]  }
 0xa97   : > { %v8825_v14 = vsel %vm5477_vm6, %v8580_v46, %v8824_v41  ;;  %v10463_v22 = vld [vmem:[%s17010_s18 + $0x10] sm:$0xff]   ;;  %v18144_v46 = vld [vmem:[#allocation37_spill] sm:$0xff] }
 0xa98   : > { %v8608_v12 = vsel %vm4868_vm1, %v8607_v24, %v8603_v47  ;;  %v10458_v24 = vld [vmem:[%s17010_s18 + $0x40] sm:$0xff]   ;;  %v10464_v47 = vld [vmem:[%s17010_s18 + $0x58] sm:$0xff]  }
 0xa99   : > { %v8077_v55 = vpop.permute.xlu1 %8076  ;;  %v16749_v59 = vpop.permute.xlu0 %8079 }
 0xa9a   : > { %v8612_v56 = vrot.slane %v8077_v55, %v14565_v45  ;;  %v8617_v17 = vrot.slane %v16749_v59, %v14581_v52  ;;  %v8599_v59 = vsel %vm4882_vm3, %v8598_v2, %v8594_v26  ;;  %v10467_v2 = vld [vmem:[%s17010_s18 + $0x20] sm:$0xff]   ;;  %v10471_v26 = vld [vmem:[%s17010_s18 + $0x30] sm:$0xff]  }
 0xa9c   : > { %v8613_v18 = vsel %vm4875_vm2, %v8612_v56, %v8608_v12  ;;  %v10460_v56 = vld [vmem:[%s17010_s18 + $0x48] sm:$0xff]   ;;  %v10472_v12 = vld [vmem:[%s17010_s18 + $0x78] sm:$0xff]  }
 0xa9d   : > { %v8086_v21 = vpop.permute.xlu1 %8085  ;;  %v8095_v30 = vpop.permute.xlu0 %8094 }
 0xa9e   : > { %v8626_v58 = vrot.slane %v8086_v21, %v14554_v43 }
 0xaa0   : > { %v8627_v3 = vsel %vm4868_vm1, %v8626_v58, %v8622_v10  ;;  %v18143_v58 = vld [vmem:[#allocation36_spill] sm:$0xff]  ;;  %v10468_v10 = vld [vmem:[%s17010_s18 + $0x68] sm:$0xff]  }
 0xaa1   : > { %v8089_v50 = vpop.permute.xlu1 %8088  ;;  %v8092_v34 = vpop.permute.xlu0 %8091 }
 0xaa2   : > { %v8631_v38 = vrot.slane %v8089_v50, %v14565_v45  ;;  %v8636_v28 = vrot.slane %v8092_v34, %v14581_v52  ;;  %v18140_v50 = vld [vmem:[#allocation32_spill] sm:$0xff]  ;;  %v18141_v34 = vld [vmem:[#allocation33_spill] sm:$0xff] }
 0xaa4   : > { %v8632_v49 = vsel %vm4875_vm2, %v8631_v38, %v8627_v3  ;;  %v10465_v38 = vld [vmem:[%s17010_s18 + $0x18] sm:$0xff]  }
 0xaa5   : > { %v8098_v61 = vpop.permute.xlu1 %8097  ;;  %v8104_v35 = vpop.permute.xlu0 %8103  ;;  %v8637_v4 = vsel %vm4882_vm3, %v8636_v28, %v8632_v49  ;;  %v9835_v49 = vld [vmem:[#allocation12] ss:$0 sm:$0xff] }
 0xaa6   : > { %v8645_v32 = vrot.slane %v8098_v61, %v14554_v43  ;;  %v8641_v43 = vrot.slane %v8095_v30, %v14551_v1  ;;  %v8618_v1 = vsel %vm4882_vm3, %v8617_v17, %v8613_v18  ;;  %v8655_v11 = vrot.slane %v8104_v35, %v14581_v52  ;;  %v10461_v61 = vld [vmem:[%s17010_s18 + $0x8] sm:$0xff]   ;;  %v10473_v17 = vld [vmem:[%s17010_s18 + $0x38] sm:$0xff]  }
 0xaa7   : > { %v8826_v30 = vsel %vm5479_vm7, %v8599_v59, %v8825_v14 }
 0xaa8   : > { %v8646_v36 = vsel %vm4868_vm1, %v8645_v32, %v8641_v43  ;;  %v8827_v37 = vsel %vm5481_vm8, %v8618_v1, %v8826_v30  ;;  %v10469_v32 = vld [vmem:[%s17010_s18 + $0x28] sm:$0xff]  }
 0xaa9   : > { %v8101_v48 = vpop.permute.xlu1 %8100  ;;  %v8828_v44 = vsel %vm5483_vm9, %v8637_v4, %v8827_v37  ;;  %v9844_v4 = vld [vmem:[#allocation16] ss:$0 sm:$0xff] }
 0xaaa   : > { %v8650_v55 = vrot.slane %v8101_v48, %v14565_v45  ;;  %v18138_v45 = vld [vmem:[#allocation31_spill] sm:$0xff] }
 0xaab   : > { %v8897_v54 = vrot.slane %v16812_v8, %v18138_v45 }
 0xaac   : > { %v8651_v9 = vsel %vm4875_vm2, %v8650_v55, %v8646_v36 }
 0xaad   : > { %v8200_v21 = vpop.permute.xlu1 %8199  ;;  %v8656_v39 = vsel %vm4882_vm3, %v8655_v11, %v8651_v9  ;;  %v8899_v7 = vmul.f32 %v8897_v54, %v18139_v29  ;;  %v8898_v6 = vmul.f32 %v8897_v54, %v18140_v50  ;;  %v8900_v15 = vmul.f32 %v8897_v54, %v18141_v34 }
 0xaae   : > { %v8807_v25 = vrot.slane %v8200_v21, %v14581_v52  ;;  %v8829_v63 = vsel %vm5485_vm10, %v8656_v39, %v8828_v44  ;;  %v10451_v52 = vld [vmem:[%s17001_s9 + $0x8] sm:$0xff]   ;;  %v8901_v0 = vmul.f32 %v8897_v54, %v18142_v13 }
 0xaaf   : > { %v8902_v53 = vpack.c.bf16 %v8899_v7, %v8898_v6  ;;  %v10477_v6 = vld [vmem:[%s17012_s20 + $0x8] sm:$0xff]  }
 0xab0   : > { %v8808_v19 = vsel %vm4882_vm3, %v8807_v25, %v16485_v33  ;;  %v10452_v33 = vld [vmem:[%s17001_s9 + $0x10] sm:$0xff]   ;;  %v8903_v40 = vpack.c.bf16 %v8901_v0, %v8900_v15 }
 0xab1   : > { %v8836_v60 = vsel %vm5485_vm10, %v8808_v19, %v16479_v23  ;;  %v10453_v23 = vld [vmem:[%s17001_s9 + $0x18] sm:$0xff]   ;;  %v10474_v19 = vld [vmem:[%s17012_s20 + $0x40] sm:$0xff]  }
 0xab2   : > { %v8838_v20 = vpack.c.b16 %v8836_v60, %v8829_v63  ;;  %v10475_v63 = vld [vmem:[%s17012_s20] sm:$0xff]   ;;  %v10476_v60 = vld [vmem:[%s17012_s20 + $0x48] sm:$0xff]  }
 0xab4   : > { %10230 = vmatmul.mubr.msk.bf16.vlgmr.msra.gmra.mrb[40].mxu1 %vm5512_vm11, %v8838_v20 }
 0xab5   : > { %10234 = vmatpush3.bf16.msra.mxu1 %v16499_v57  ;;  %10249 = vmatprep.mubr.bf16.mxu1 %v8902_v53  ;;  %v10455_v57 = vld [vmem:[%s17001_s9 + $0x28] sm:$0xff]  }
 0xab6   : > { %10235 = vmatprep.subr.bf16.mxu1 %v10451_v52 }
 0xab9   : > { %10236 = vmatpush3.bf16.msra.mxu1 %v10451_v52  ;;  %v9048_v52 = vld [vmem:[#allocation21 + $0x8] sm:$0xff] }
 0xaba   : > { %10237 = vmatprep.subr.bf16.mxu1 %v10452_v33 }
 0xabd   : > { %10238 = vmatpush3.bf16.msra.mxu1 %v10452_v33  ;;  %v9047_v33 = vld [vmem:[#allocation21] sm:$0xff] }
 0xabe   : > { %10239 = vmatprep.subr.bf16.mxu1 %v10453_v23 }
 0xac1   : > { %10240 = vmatpush3.bf16.msra.mxu1 %v10453_v23  ;;  %v9049_v23 = vld [vmem:[#allocation21 + $0x10] sm:$0xff] }
 0xac2   : > { %10241 = vmatprep.subr.bf16.mxu1 %v10454_v5 }
 0xac5   : > { %10242 = vmatpush3.bf16.msra.mxu1 %v10454_v5 }
 0xac6   : > { %10243 = vmatprep.subr.bf16.mxu1 %v10455_v57 }
 0xac9   : > { %10244 = vmatpush3.bf16.msra.mxu1 %v10455_v57 }
 0xaca   : > { %10245 = vmatprep.subr.bf16.mxu1 %v10456_v16 }
 0xacd   : > { %10246 = vmatpush3.bf16.msra.mxu1 %v10456_v16  ;;  %v9050_v16 = vld [vmem:[#allocation21 + $0x18] sm:$0xff] }
 0xace   : > { %10247 = vmatprep.subr.bf16.mxu1 %v10457_v27 }
 0xad1   : > { %10248 = vmatpush3.bf16.msra.mxu1 %v10457_v27 }
 0xad2   : > { %9991 = vmatprep.subr.bf16.mxu1 %v10458_v24 }
 0xad4   : > { %10250 = vmatmul.mubr.bf16.vlgmr.msra.gmra.mrb[44].mxu1 %v8903_v40 }
 0xad5   : > { %9301 = vmatprep.mubr.bf16.mxu1 %v18143_v58  ;;  %9992 = vmatpush3.bf16.msra.mxu1 %v10459_v31 }
 0xad6   : > { %9993 = vmatprep.subr.bf16.mxu1 %v10460_v56 }
 0xad9   : > { %9994 = vmatpush3.bf16.msra.mxu1 %v10461_v61 }
 0xada   : > { %9995 = vmatprep.subr.bf16.mxu1 %v10462_v42 }
 0xadd   : > { %9996 = vmatpush3.bf16.msra.mxu1 %v10463_v22 }
 0xade   : > { %9997 = vmatprep.subr.bf16.mxu1 %v10464_v47 }
 0xae1   : > { %9998 = vmatpush3.bf16.msra.mxu1 %v10465_v38 }
 0xae2   : > { %9999 = vmatprep.subr.bf16.mxu1 %v10466_v62 }
 0xae5   : > { %10000 = vmatpush3.bf16.msra.mxu1 %v10467_v2 }
 0xae6   : > { %10001 = vmatprep.subr.bf16.mxu1 %v10468_v10 }
 0xae9   : > { %10002 = vmatpush3.bf16.msra.mxu1 %v10469_v32 }
 0xaea   : > { %10003 = vmatprep.subr.bf16.mxu1 %v10470_v51 }
 0xaed   : > { %10004 = vmatpush3.bf16.msra.mxu1 %v10471_v26 }
 0xaee   : > { %10005 = vmatprep.subr.bf16.mxu1 %v10472_v12 }
 0xaf1   : > { %10006 = vmatpush3.bf16.msra.mxu1 %v10473_v17 }
 0xaf2   : > { %10019 = vmatprep.subr.bf16.mxu1 %v10474_v19 }
 0xb87   : > { %v10231_v18 = vpop.f32.mrb[40].mxu1 }
 0xb88   : > { %v8879_v3 = vpop.f32.mrb[41].mxu1 }
 0xb89   : > { %v10232_v43 = vpop.f32.mrb[42].mxu1 }
 0xb8a   : > { %v9133_v28 = vpack.c.bf16 %v10232_v43, %v10231_v18  ;;  %v8882_v35 = vpop.f32.mrb[43].mxu1 }
 0xb8b   : > { %v9132_v48 = vpack.c.bf16 %v8882_v35, %v8879_v3  ;;  %v9845_v3 = vld [vmem:[%s18145_s8] ss:$0 sm:$0xff]  ;;  %s18147_s8 = sld [smem:[#allocation191_spill]] }
 0xb8d   : > { %9302 = vmatmul.mubr.bf16.vlgmr.msra.gmra.mrb[48].mxu1 %v9132_v48 }
 0xb8e   : > { %9309 = vmatprep.mubr.bf16.mxu1 %v18144_v46  ;;  %10020 = vmatpush3.bf16.msra.mxu1 %v10475_v63 }
 0xb8f   : > { %10021 = vmatprep.subr.bf16.mxu1 %v10476_v60 }
 0xb92   : > { %10022 = vmatpush3.bf16.msra.mxu1 %v10477_v6 }
 0xb95   : > { %9310 = vmatmul.mubr.bf16.gmra.mrb[52].mxu1 %v9133_v28 }
 0xba7   : > { %v10251_v55 = vpop.f32.mrb[44].mxu1 }
 0xba8   : > { %v9018_v59 = vadd.f32 %v10251_v55, %v9835_v49  ;;  %v9009_v36 = vpop.f32.mrb[45].mxu1 }
 0xba9   : > { %v9010_v41 = vadd.f32 %v9835_v49, %v9009_v36  ;;  %v10252_v1 = vpop.f32.mrb[46].mxu1 }
 0xbaa   : > { %v9012_v11 = vpop.f32.mrb[47].mxu1  ;;  %v9021_v14 = vadd.f32 %v10252_v1, %v9835_v49 }
 0xbab   : > { %11066 = vtanh.f32 %v9010_v41  ;;  %v9013_v9 = vadd.f32 %v9835_v49, %v9012_v11 }
 0xbac   : > { %11068 = vtanh.f32 %v9018_v59 }
 0xbad   : > { %11070 = vtanh.f32 %v9013_v9 }
 0xbae   : > { %11072 = vtanh.f32 %v9021_v14 }
 0xbb5   : > { %v11067_v21 = vpop.eup %11066 }
 0xbb6   : > { %v11069_v54 = vpop.eup %11068  ;;  %v9035_v30 = vmul.f32 %v11067_v21, %v9844_v4 }
 0xbb7   : > { %v11071_v39 = vpop.eup %11070  ;;  %v9037_v37 = vmul.f32 %v11069_v54, %v9844_v4 }
 0xbb8   : > { %9039 = vadd.xlane.f32.xlu0 %v9035_v30  ;;  %v9036_v25 = vmul.f32 %v11071_v39, %v9844_v4  ;;  %v11073_v7 = vpop.eup %11072 }
 0xbb9   : > { %v9038_v44 = vmul.f32 %v11073_v7, %v9844_v4 }
 0xbba   : > { %9041 = vadd.xlane.f32.xlu1 %v9036_v25 }
 0xbbc   : > { %9043 = vadd.xlane.f32.xlu0 %v9037_v37 }
 0xbc0   : > { %9045 = vadd.xlane.f32.xlu0 %v9038_v44 }
 0xc45   : > { %v9040_v20 = vpop.xlane.xlu0 %9039 }
 0xc46   : > { %v9051_v27 = vadd.f32 %v9047_v33, %v9040_v20 }
 0xc47   : > { %v9042_v53 = vpop.xlane.xlu1 %9041 }
 0xc48   : > { %v9052_v57 = vadd.f32 %v9048_v52, %v9042_v53  ;;  %v9056_v40 = vsel %vm9055_vm12, %v9051_v27, -inf }
 0xc49   : > { %v9044_v5 = vpop.xlane.xlu0 %9043 }
 0xc4a   : > { %v9053_v15 = vadd.f32 %v9049_v23, %v9044_v5  ;;  %v9057_v24 = vsel %vm9055_vm12, %v9052_v57, -inf }
 0xc4b   : > { %v9060_v61 = vmax.f32 %v9056_v40, %v9057_v24 }
 0xc4c   : > { %v9058_v56 = vsel %vm9055_vm12, %v9053_v15, -inf }
 0xc4d   : > { %v9046_v0 = vpop.xlane.xlu0 %9045 }
 0xc4e   : > { %v9054_v31 = vadd.f32 %v9050_v16, %v9046_v0 }
 0xc50   : > { %v9059_v58 = vsel %vm9055_vm12, %v9054_v31, -inf }
 0xc51   : > { %v9061_v42 = vmax.f32 %v9058_v56, %v9059_v58 }
 0xc53   : > { %v9062_v22 = vmax.f32 %v9060_v61, %v9061_v42 }
 0xc55   : > { %v9063_v47 = vrot.slane %v9062_v22, 4 }
 0xc57   : > { %v9064_v38 = vmax.f32 %v9062_v22, %v9063_v47 }
 0xc59   : > { %v9065_v62 = vrot.slane %v9064_v38, 2 }
 0xc5b   : > { %v9066_v2 = vmax.f32 %v9064_v38, %v9065_v62 }
 0xc5d   : > { %v9067_v10 = vrot.slane %v9066_v2, 1 }
 0xc5f   : > { %v9068_v32 = vmax.f32 %v9066_v2, %v9067_v10 }
 0xc60   : > { %v10007_v51 = vpop.f32.mrb[48].mxu1 }
 0xc61   : > { %v9069_v26 = vsub.f32 %v9051_v27, %v9068_v32  ;;  %v9070_v12 = vsub.f32 %v9052_v57, %v9068_v32  ;;  %v9071_v17 = vsub.f32 %v9053_v15, %v9068_v32  ;;  %v9072_v18 = vsub.f32 %v9054_v31, %v9068_v32  ;;  %v10008_v43 = vpop.f32.mrb[49].mxu1 }
 0xc62   : > { %v10009_v28 = vadd.f32 %v10008_v43, %v10007_v51  ;;  %v10010_v35 = vpop.f32.mrb[50].mxu1 }
 0xc63   : > { %v9073_v48 = vmul.f32 1.442695, %v9069_v26  ;;  %v9075_v46 = vmul.f32 1.442695, %v9070_v12  ;;  %v9077_v49 = vmul.f32 1.442695, %v9071_v17 }
 0xc64   : > { %v9079_v55 = vmul.f32 1.442695, %v9072_v18  ;;  %v9304_v59 = vadd.f32 %v10009_v28, %v9845_v3  ;;  %v10011_v36 = vpop.f32.mrb[51].mxu1 }
 0xc65   : > { %11074 = vpow2.f32 %v9073_v48  ;;  %v10012_v41 = vadd.f32 %v10011_v36, %v10010_v35 }
 0xc66   : > { %11076 = vpow2.f32 %v9075_v46  ;;  %v9322_v1 = vmin.f32 %v9304_v59, 0.0  ;;  %vm9318_vm13 = vcmp.gt.f32.partialorder %v9304_v59, 0.0 }
 0xc67   : > { %11078 = vpow2.f32 %v9077_v49  ;;  %v9307_v11 = vadd.f32 %v10012_v41, %v9845_v3 }
 0xc68   : > { %11080 = vpow2.f32 %v9079_v55  ;;  %v9326_v9 = vmul.f32 1.442695, %v9322_v1  ;;  %v10013_v14 = vpop.f32.mrb[52].mxu1  ;;  %v10478_v1 = vld [vmem:[%s17012_s20 + $0x50] sm:$0xff]  }
 0xc69   : > { %v9323_v4 = vmin.f32 %v9307_v11, 0.0  ;;  %v10014_v21 = vpop.f32.mrb[53].mxu1  ;;  %vm9319_vm14 = vcmp.gt.f32.partialorder %v9307_v11, 0.0  ;;  %10023 = vmatprep.subr.bf16.mxu1 %v10478_v1 }
 0xc6a   : > { %11082 = vpow2.f32 %v9326_v9  ;;  %v10015_v54 = vadd.f32 %v10014_v21, %v10013_v14  ;;  %v10016_v30 = vpop.f32.mrb[54].mxu1  ;;  %v10480_v14 = vld [vmem:[%s17012_s20 + $0x58] sm:$0xff]   ;;  %v10482_v21 = vld [vmem:[%s17012_s20 + $0x60] sm:$0xff]  }
 0xc6b   : > { %v9328_v39 = vmul.f32 1.442695, %v9323_v4  ;;  %v10017_v25 = vpop.f32.mrb[55].mxu1  ;;  %v10481_v4 = vld [vmem:[%s17012_s20 + $0x18] sm:$0xff]  }
 0xc6c   : > { %v9312_v37 = vadd.f32 %v10015_v54, %v9845_v3  ;;  %v10018_v7 = vadd.f32 %v10017_v25, %v10016_v30  ;;  %v10483_v54 = vld [vmem:[%s17012_s20 + $0x20] sm:$0xff]   ;;  %v10484_v30 = vld [vmem:[%s17012_s20 + $0x68] sm:$0xff]  }
 0xc6d   : > { %11084 = vpow2.f32 %v9328_v39  ;;  %v9355_v39 = vpack.c.bf16 %v16812_v8, %v16812_v8  ;;  %v10485_v25 = vld [vmem:[%s17012_s20 + $0x28] sm:$0xff]   ;;  %v10488_v8 = vld [vmem:[%s17012_s20 + $0x78] sm:$0xff]  }
 0xc6e   : > { %v9324_v44 = vmin.f32 %v9312_v37, 0.0  ;;  %v9315_v19 = vadd.f32 %v10018_v7, %v9845_v3  ;;  %vm9320_vm15 = vcmp.gt.f32.partialorder %v9312_v37, 0.0  ;;  %v10487_v7 = vld [vmem:[%s17012_s20 + $0x30] sm:$0xff]  }
 0xc6f   : > { %v11075_v63 = vpop.eup %11074  ;;  %9517 = vmatprep.mubr.bf16.mxu1 %v9355_v39 }
 0xc70   : > { %v11077_v60 = vpop.eup %11076  ;;  %v9081_v6 = vsel %vm9055_vm12, %v11075_v63, 0.0  ;;  %v9330_v20 = vmul.f32 1.442695, %v9324_v44  ;;  %v9325_v52 = vmin.f32 %v9315_v19, 0.0  ;;  %vm9321_vm0 = vcmp.gt.f32.partialorder %v9315_v19, 0.0  ;;  %v10489_v44 = vld [vmem:[%s17012_s20 + $0x38] sm:$0xff]  }
 0xc71   : > { %v11079_v53 = vpop.eup %11078  ;;  %v9082_v33 = vsel %vm9055_vm12, %v11077_v60, 0.0 }
 0xc72   : > { %v11081_v23 = vpop.eup %11080  ;;  %v9083_v5 = vadd.f32 %v9082_v33, %v9081_v6  ;;  %11086 = vpow2.f32 %v9330_v20  ;;  %v9332_v57 = vmul.f32 1.442695, %v9325_v52  ;;  %v9084_v16 = vsel %vm9055_vm12, %v11079_v53, 0.0 }
 0xc73   : > { %v9086_v0 = vsel %vm9055_vm12, %v11081_v23, 0.0 }
 0xc74   : > { %v11083_v27 = vpop.eup %11082  ;;  %v9085_v15 = vadd.f32 %v9084_v16, %v9083_v5  ;;  %11088 = vpow2.f32 %v9332_v57 }
 0xc75   : > { %v9862_v24 = vadd.f32 -1.0, %v11083_v27 }
 0xc76   : > { %v9087_v31 = vadd.f32 %v9086_v0, %v9085_v15 }
 0xc77   : > { %v11085_v40 = vpop.eup %11084  ;;  %v9338_v56 = vmul.f32 1.6732632, %v9862_v24 }
 0xc78   : > { %v9088_v58 = vrot.slane %v9087_v31, 4  ;;  %v9863_v61 = vadd.f32 -1.0, %v11085_v40 }
 0xc79   : > { %v9342_v42 = vsel %vm9318_vm13, %v9304_v59, %v9338_v56 }
 0xc7a   : > { %v9089_v22 = vadd.f32 %v9088_v58, %v9087_v31  ;;  %v9346_v47 = vmul.f32 1.050701, %v9342_v42  ;;  %v9339_v38 = vmul.f32 1.6732632, %v9863_v61 }
 0xc7c   : > { %v11087_v62 = vpop.eup %11086  ;;  %v9090_v2 = vrot.slane %v9089_v22, 2  ;;  %9350 = vst [vmem:[%s933_s26] sm:$0xff] %v9346_v47  ;;  %v9343_v10 = vsel %vm9319_vm14, %v9307_v11, %v9339_v38  ;;  %v10479_v11 = vld [vmem:[%s17012_s20 + $0x10] sm:$0xff]  }
 0xc7d   : > { %v9347_v32 = vmul.f32 1.050701, %v9343_v10  ;;  %v9864_v51 = vadd.f32 -1.0, %v11087_v62  ;;  %10024 = vmatpush3.bf16.msra.mxu1 %v10479_v11 }
 0xc7e   : > { %v11089_v26 = vpop.eup %11088  ;;  %v9091_v12 = vadd.f32 %v9090_v2, %v9089_v22  ;;  %10025 = vmatprep.subr.bf16.mxu1 %v10480_v14 }
 0xc7f   : > { %9351 = vst [vmem:[%s933_s26 + $0x8] sm:$0xff] %v9347_v32  ;;  %v9340_v17 = vmul.f32 1.6732632, %v9864_v51  ;;  %v9865_v18 = vadd.f32 -1.0, %v11089_v26 }
 0xc80   : > { %v9092_v3 = vrot.slane %v9091_v12, 1 }
 0xc81   : > { %v9344_v43 = vsel %vm9320_vm15, %v9312_v37, %v9340_v17  ;;  %v9341_v28 = vmul.f32 1.6732632, %v9865_v18  ;;  %10026 = vmatpush3.bf16.msra.mxu1 %v10481_v4  ;;  %v10486_v37 = vld [vmem:[%s17012_s20 + $0x70] sm:$0xff]  }
 0xc82   : > { %v9093_v35 = vadd.f32 %v9092_v3, %v9091_v12  ;;  %v9348_v48 = vmul.f32 1.050701, %v9344_v43  ;;  %10027 = vmatprep.subr.bf16.mxu1 %v10482_v21 }
 0xc83   : > { %v9345_v46 = vsel %vm9321_vm0, %v9315_v19, %v9341_v28 }
 0xc84   : > { %11090 = vrcp.f32 %v9093_v35  ;;  %9352 = vst [vmem:[%s933_s26 + $0x10] sm:$0xff] %v9348_v48  ;;  %v9349_v49 = vmul.f32 1.050701, %v9345_v46 }
 0xc85   : > { %10028 = vmatpush3.bf16.msra.mxu1 %v10483_v54 }
 0xc86   : > { %9353 = vst [vmem:[%s933_s26 + $0x18] sm:$0xff] %v9349_v49  ;;  %10029 = vmatprep.subr.bf16.mxu1 %v10484_v30 }
 0xc89   : > { %10030 = vmatpush3.bf16.msra.mxu1 %v10485_v25 }
 0xc8a   : > { %10031 = vmatprep.subr.bf16.mxu1 %v10486_v37 }
 0xc8d   : > { %10032 = vmatpush3.bf16.msra.mxu1 %v10487_v7 }
 0xc8e   : > { %v11091_v55 = vpop.eup %11090  ;;  %10033 = vmatprep.subr.bf16.mxu1 %v10488_v8 }
 0xc8f   : > { %v9096_v59 = vmul.f32 %v11091_v55, %v11077_v60  ;;  %v9095_v36 = vmul.f32 %v11091_v55, %v11075_v63  ;;  %v9097_v41 = vmul.f32 %v11091_v55, %v11079_v53  ;;  %v9098_v9 = vmul.f32 %v11091_v55, %v11081_v23 }
 0xc91   : > { %9106 = vperm.xlu0 %10416, %v9096_v59   ;;  %9101 = vperm.xlu1 %10417, %v9095_v36  }
 0xc92   : > { %10034 = vmatpush3.bf16.msra.mxu1 %v10489_v44 }
 0xc95   : > { %9111 = vperm.xlu1 %10417, %v9097_v41  }
 0xc99   : > { %9116 = vperm.xlu1 %10417, %v9098_v9  }
 0xd10   : > { %v9107_v19 = vpop.permute.xlu0 %9106  ;;  %v9102_v63 = vpop.permute.xlu1 %9101 }
 0xd11   : > { %v9120_v60 = vmul.f32 %v9107_v19, %v18139_v29  ;;  %v9119_v6 = vmul.f32 %v9102_v63, %v18140_v50  ;;  %v9388_v50 = vld [vmem:[%s18147_s8] sm:$0x1] }
 0xd13   : > { %v9123_v53 = vadd.f32 %v9120_v60, %v9119_v6 }
 0xd14   : > { %v9112_v20 = vpop.permute.xlu1 %9111 }
 0xd15   : > { %v9121_v52 = vmul.f32 %v9112_v20, %v18141_v34 }
 0xd17   : > { %v9124_v23 = vadd.f32 %v9123_v53, %v9121_v52 }
 0xd18   : > { %v9117_v33 = vpop.permute.xlu1 %9116 }
 0xd19   : > { %v9122_v5 = vmul.f32 %v9117_v33, %v18142_v13 }
 0xd1b   : > { %v9125_v57 = vadd.f32 %v9124_v23, %v9122_v5 }
 0xd1d   : > { %v9126_v16 = vrot.slane %v9125_v57, 4 }
 0xd1f   : > { %v9127_v27 = vadd.f32 %v9126_v16, %v9125_v57 }
 0xd21   : > { %v9128_v15 = vrot.slane %v9127_v27, 2 }
 0xd23   : > { %v9129_v0 = vadd.f32 %v9128_v15, %v9127_v27 }
 0xd25   : > { %v9130_v24 = vrot.slane %v9129_v0, 1 }
 0xd27   : > { %v9131_v31 = vadd.f32 %v9130_v24, %v9129_v0 }
 0xd29   : > { %v9354_v40 = vpack.c.bf16 %v9131_v31, %v9131_v31 }
 0xd2b   : > { %9518 = vmatmul.mubr.bf16.vlgmr.msra.gmra.mrb[56].mxu1 %v9354_v40 }
 0xdfe   : > { %v10035_v29 = vpop.f32.mrb[56].mxu1 }
 0xdff   : > { %v10036_v34 = vpop.f32.mrb[57].mxu1 }
 0xe00   : > { %v10037_v56 = vadd.f32 %v10036_v34, %v10035_v29  ;;  %v10038_v58 = vpop.f32.mrb[58].mxu1 }
 0xe01   : > { %v10039_v61 = vpop.f32.mrb[59].mxu1 }
 0xe02   : > { %v9520_v13 = vadd.f32 %v10037_v56, %v9388_v50 }
 0xe04   : > { %v9528_v42 = vrot.slane %v9520_v13, %v18138_v45 }
 0xe06   : > { %9529 = vst [vmem:[%s937_s23] sm:$0xff] %v9528_v42 }
 0xe07 PF: > { %s18149_s26 = sld [smem:[#allocation29_spill]] }
 0xe0d   : > { %s41_s4 = sadd.s32 1, %s18149_s26  }
 0xe0e   : > { %p38_p4 = scmp.ge.s32.totalorder %s41_s4, 4  }
 0xe10   :  { %40 = sbr.rel (!%p38_p4) target bundleno = 21 (0x15), region = 209 }
 0xe17   :  { %9565 = vsyncpa [#allocation3], 1 }
 0xe18   :  { %9567 = vsyncpa [#allocation3 + $0x1], 1 }
 0xe19   :  { %9568 = vsyncpa [#allocation5], 1 }
 0xe1a   :  { %9569 = vsyncpa [#allocation8], 1 }
 0xe1b   :  { %9570 = vsyncpa [#allocation11], 1 }
 0xe1c   :  { %9571 = vsyncpa [#allocation14], 1 }
 0xe1d   :  { %9572 = vsyncpa [#allocation17], 1 }
 0xe1e   :  { %9573 = vsyncpa [#allocation20], 1 }

</bundles_post_ra>
